<compile_context>
chip_gen: v7x
topology: tpu7x:2x2x1
jax: 0.10.0
libtpu: 0.0.40
codegen_flags: <defaults>
</compile_context>

<pallas_src>
import functools

import jax
import jax.numpy as jnp
from jax import lax
from jax.experimental import pallas as pl
from jax.experimental.pallas import tpu as pltpu

EMBED_DIM = 64
FF_DIM = 256
NUM_HEADS = 4
NUM_LAYERS = 3
CNN_IN_CH = 1
CNN_OUT_CH = 128


def _full_spec(a):
    """Full-array BlockSpec (weight identical for the single grid step)."""
    nd = a.ndim
    return pl.BlockSpec(a.shape, lambda i, nd=nd: (0,) * nd)


# ----------------------------------------------------------------------------
# Single fused kernel: CNN -> embedding -> 3 encoder layers -> pool/fc/normalize
# ----------------------------------------------------------------------------
def _song2vec_kernel(x_ref, w1_ref, b1_ref, w2_ref, b2_ref, w3_ref, b3_ref,
                     w4_ref, b4_ref, we_ref, be_ref,
                     wqkv_ref, bqkv_ref, wo_ref, bo_ref, ln1g_ref, ln1b_ref,
                     f1w_ref, f1b_ref, f2w_ref, f2b_ref, ln2g_ref, ln2b_ref,
                     fcw_ref, fcb_ref, o_ref, xpad, ypool, *,
                     raw_len, num_heads, num_layers):
    # x_ref : (2*L, 3)  im2col'd raw signal of both batch items (taps l-1, l, l+1)
    # wN_ref (N>=2): (3, Cin, Cout);  bN_ref: (1, Cout)
    # transformer weights are stacked with a leading num_layers axis
    # o_ref : (2, EMBED_DIM)
    # xpad  : (L+24, 128) scratch: zero-gap-padded conv input slab (both items)
    # ypool : (2L, 128)   scratch: staging for stride-2 max pooling
    L = raw_len

    def relu(v):
        return jnp.maximum(v, 0.0)

    # ---- stage 1: Conv1d(1 -> 32) on both items at once: (2L,3)@(3,32) --------
    y1 = relu(jnp.dot(x_ref[...], w1_ref[...],
                      preferred_element_type=jnp.float32) + b1_ref[...])
    # MaxPool1d(2,2): store once, read back even/odd rows with stride-2 pl.ds.
    ypool[0:2 * L, 0:32] = y1
    h = jnp.maximum(ypool[pl.ds(0, L, 2), 0:32], ypool[pl.ds(1, L, 2), 0:32])
    Lc = L // 2                      # h: (2*Lc, 32); item0 rows [0:Lc], item1 [Lc:2Lc]

    # ---- stages 2-4: 3-tap conv on both items packed with an 8-row zero gap ---
    def conv_stage(h, Lc, w_ref, b_ref):
        Cin = h.shape[1]
        Cout = w_ref.shape[2]
        # xpad layout: [0:8]=0 | [8:8+Lc]=item0 | [8+Lc:16+Lc]=0 |
        #              [16+Lc:16+2Lc]=item1 | [16+2Lc:24+2Lc]=0   (all stores 8-aligned)
        xpad[0:8, 0:Cin] = jnp.zeros((8, Cin), jnp.float32)
        xpad[8 + Lc:16 + Lc, 0:Cin] = jnp.zeros((8, Cin), jnp.float32)
        xpad[16 + 2 * Lc:24 + 2 * Lc, 0:Cin] = jnp.zeros((8, Cin), jnp.float32)
        xpad[8:8 + Lc, 0:Cin] = h[0:Lc]
        xpad[16 + Lc:16 + 2 * Lc, 0:Cin] = h[Lc:2 * Lc]
        T = 2 * Lc + 8               # output rows [0:Lc]=item0, [8+Lc:8+2Lc]=item1
        acc = jnp.dot(xpad[7:7 + T, 0:Cin], w_ref[0],
                      preferred_element_type=jnp.float32)
        for k in (1, 2):             # static taps
            acc = acc + jnp.dot(xpad[7 + k:7 + k + T, 0:Cin], w_ref[k],
                                preferred_element_type=jnp.float32)
        y = relu(acc + b_ref[...])
        # drop the 8 gap rows, then MaxPool(2) via stride-2 reads.
        ypool[0:Lc, 0:Cout] = y[0:Lc]
        ypool[Lc:2 * Lc, 0:Cout] = y[8 + Lc:8 + 2 * Lc]
        return jnp.maximum(ypool[pl.ds(0, Lc, 2), 0:Cout],
                           ypool[pl.ds(1, Lc, 2), 0:Cout])

    h = conv_stage(h, Lc, w2_ref, b2_ref); Lc //= 2     # (2*L/4,  64)
    h = conv_stage(h, Lc, w3_ref, b3_ref); Lc //= 2     # (2*L/8, 128)
    h = conv_stage(h, Lc, w4_ref, b4_ref); Lc //= 2     # (2*L/16,128)
    S = Lc                                              # per-item sequence length

    # ---- embedding Linear(128 -> 64), both items in one matmul ----------------
    e = jnp.dot(h, we_ref[...], preferred_element_type=jnp.float32) + be_ref[...]
    x0 = e[0:S]                      # (S, E) attention position 0 (= batch item 0)
    x1 = e[S:2 * S]                  # (S, E) attention position 1 (= batch item 1)

    E = x0.shape[1]
    Dh = E // num_heads
    scale = 1.0 / float(Dh) ** 0.5

    # Per-head segment-sum / broadcast matrices (built once, reused by all layers):
    #   seg  (E, H): 1 where lane e belongs to head h   (per-head reduce)
    #   seg_t(H, E): transpose                          (per-head broadcast)
    e_idx = lax.broadcasted_iota(jnp.int32, (E, num_heads), 0)
    h_idx = lax.broadcasted_iota(jnp.int32, (E, num_heads), 1)
    seg = ((e_idx >= h_idx * Dh) & (e_idx < (h_idx + 1) * Dh)).astype(jnp.float32)
    h_idx_t = lax.broadcasted_iota(jnp.int32, (num_heads, E), 0)
    e_idx_t = lax.broadcasted_iota(jnp.int32, (num_heads, E), 1)
    seg_t = ((e_idx_t >= h_idx_t * Dh)
             & (e_idx_t < (h_idx_t + 1) * Dh)).astype(jnp.float32)

    def layer_norm(hh, g, b):        # biased var, eps=1e-5 (PyTorch)
        mu = jnp.mean(hh, axis=-1, keepdims=True)
        var = jnp.mean(jnp.square(hh - mu), axis=-1, keepdims=True)
        return (hh - mu) * lax.rsqrt(var + 1e-5) * g + b

    # ---- 3 fused post-norm encoder layers (static in-kernel loop) -------------
    for l in range(num_layers):
        wqkv, bqkv = wqkv_ref[l], bqkv_ref[l]
        qkv0 = jnp.dot(x0, wqkv, preferred_element_type=jnp.float32) + bqkv
        qkv1 = jnp.dot(x1, wqkv, preferred_element_type=jnp.float32) + bqkv
        q0, k0, v0 = qkv0[:, 0:E], qkv0[:, E:2 * E], qkv0[:, 2 * E:3 * E]
        q1, k1, v1 = qkv1[:, 0:E], qkv1[:, E:2 * E], qkv1[:, 2 * E:3 * E]

        def head_scores(q, k):       # per-head dot products -> (S, H)
            return jnp.dot(q * k, seg, preferred_element_type=jnp.float32) * scale

        s00 = head_scores(q0, k0)
        s01 = head_scores(q0, k1)
        s10 = head_scores(q1, k0)
        s11 = head_scores(q1, k1)

        def softmax_pair(sa, sb):    # softmax over the 2 keys (closed form)
            m = jnp.maximum(sa, sb)
            pa = jnp.exp(sa - m)
            pb = jnp.exp(sb - m)
            r = pl.reciprocal(pa + pb, approx=True)   # EUP slot; VALU stays free
            return pa * r, pb * r

        a00, a01 = softmax_pair(s00, s01)
        a10, a11 = softmax_pair(s10, s11)

        def expand(a):               # (S, H) -> (S, E)
            return jnp.dot(a, seg_t, preferred_element_type=jnp.float32)

        attn0 = expand(a00) * v0 + expand(a01) * v1
        attn1 = expand(a10) * v0 + expand(a11) * v1

        wo, bo = wo_ref[l], bo_ref[l]
        ln1g, ln1b = ln1g_ref[l], ln1b_ref[l]
        h1_0 = layer_norm(x0 + jnp.dot(attn0, wo,
                                       preferred_element_type=jnp.float32) + bo,
                          ln1g, ln1b)
        h1_1 = layer_norm(x1 + jnp.dot(attn1, wo,
                                       preferred_element_type=jnp.float32) + bo,
                          ln1g, ln1b)

        w1f, b1f, w2f, b2f = f1w_ref[l], f1b_ref[l], f2w_ref[l], f2b_ref[l]

        def ffn(hh):
            f = jnp.maximum(
                jnp.dot(hh, w1f, preferred_element_type=jnp.float32) + b1f, 0.0)
            return jnp.dot(f, w2f, preferred_element_type=jnp.float32) + b2f

        ln2g, ln2b = ln2g_ref[l], ln2b_ref[l]
        x0 = layer_norm(h1_0 + ffn(h1_0), ln2g, ln2b)
        x1 = layer_norm(h1_1 + ffn(h1_1), ln2g, ln2b)

    # TODO(synk): dropout layers omitted (eval-mode identity; randomness not reproduced).

    # ---- mean over S + final Linear + L2 normalize (F.normalize, eps=1e-12) ---
    def pooled_out(xx):
        mm = jnp.mean(xx, axis=0, keepdims=True)                       # (1, E)
        yy = jnp.dot(mm, fcw_ref[...],
                     preferred_element_type=jnp.float32) + fcb_ref[...]
        nn = jnp.sqrt(jnp.sum(yy * yy, axis=-1, keepdims=True))
        return yy / jnp.maximum(nn, 1e-12)

    o_ref[0:1, :] = pooled_out(x0).astype(o_ref.dtype)
    o_ref[1:2, :] = pooled_out(x1).astype(o_ref.dtype)


# ----------------------------------------------------------------------------
# Full forward pass (only the tiny input im2col happens in XLA)
# ----------------------------------------------------------------------------
def song2vec_forward(params, x):
    # x: (B, Cin=1, L)  -- PyTorch NCL input.
    B, _, L = x.shape
    # The closed-form 2-key softmax specializes the length-2 attention axis that the
    # reference's batch_first=False usage produces with batch == 2.
    assert B == 2, "fused kernel requires batch == 2"
    assert L % 16 == 0

    xs = x[:, 0, :]                                             # (B, L)
    zero = jnp.zeros((B, 1), x.dtype)
    # im2col the k=3 / pad=1 taps once at the graph level (a few KB) so the first
    # conv (Cin=1) is one lane-dense (2L, 3) @ (3, 32) MXU matmul in-kernel.
    x_taps = jnp.stack(
        [jnp.concatenate([zero, xs[:, :-1]], axis=1),           # x[l-1]
         xs,                                                    # x[l]
         jnp.concatenate([xs[:, 1:], zero], axis=1)],           # x[l+1]
        axis=-1).reshape(B * L, 3).astype(jnp.float32)

    args = (x_taps,
            params["conv1_w"], params["conv1_b"],
            params["conv2_w"], params["conv2_b"],
            params["conv3_w"], params["conv3_b"],
            params["conv4_w"], params["conv4_b"],
            params["emb_w"], params["emb_b"],
            params["wqkv"], params["bqkv"],
            params["wo"], params["bo"],
            params["ln1_g"], params["ln1_b"],
            params["w1"], params["b1"],
            params["w2"], params["b2"],
            params["ln2_g"], params["ln2_b"],
            params["fc_w"], params["fc_b"])

    kernel = functools.partial(_song2vec_kernel, raw_len=L,
                               num_heads=NUM_HEADS, num_layers=NUM_LAYERS)
    return pl.pallas_call(
        kernel,
        out_shape=jax.ShapeDtypeStruct((B, EMBED_DIM), jnp.float32),
        grid=(1,),
        in_specs=[_full_spec(a) for a in args],
        out_specs=pl.BlockSpec((B, EMBED_DIM), lambda i: (0, 0)),
        scratch_shapes=[pltpu.VMEM((L + 24, CNN_OUT_CH), jnp.float32),   # xpad
                        pltpu.VMEM((2 * L, CNN_OUT_CH), jnp.float32)],   # ypool
        compiler_params=pltpu.CompilerParams(dimension_semantics=("arbitrary",)),
    )(*args)


# ----------------------------------------------------------------------------
# Deterministic synthetic parameter initialization (fused / stacked layouts)
# ----------------------------------------------------------------------------
def init_params(key):
    keys = iter(jax.random.split(key, 64))

    def w(shape, scale=0.05):
        return (scale * jax.random.normal(next(keys), shape)).astype(jnp.float32)

    E, F, NL = EMBED_DIM, FF_DIM, NUM_LAYERS
    return {
        # CNN (weights as (K, Cin, Cout); first conv has Cin=1 folded into K axis)
        "conv1_w": w((3, 32)), "conv1_b": w((1, 32)),
        "conv2_w": w((3, 32, 64)), "conv2_b": w((1, 64)),
        "conv3_w": w((3, 64, 128)), "conv3_b": w((1, 128)),
        "conv4_w": w((3, 128, CNN_OUT_CH)), "conv4_b": w((1, CNN_OUT_CH)),
        "emb_w": w((CNN_OUT_CH, E)), "emb_b": w((1, E)),
        # Transformer encoder layers, stacked on a leading num_layers axis.
        "wqkv": w((NL, E, 3 * E)), "bqkv": w((NL, 1, 3 * E)),   # fused [Wq|Wk|Wv]
        "wo": w((NL, E, E)), "bo": w((NL, 1, E)),
        "ln1_g": jnp.ones((NL, 1, E), jnp.float32),
        "ln1_b": jnp.zeros((NL, 1, E), jnp.float32),
        "w1": w((NL, E, F)), "b1": w((NL, 1, F)),
        "w2": w((NL, F, E)), "b2": w((NL, 1, E)),
        "ln2_g": jnp.ones((NL, 1, E), jnp.float32),
        "ln2_b": jnp.zeros((NL, 1, E), jnp.float32),
        # Final projection
        "fc_w": w((E, E)), "fc_b": w((1, E)),
    }


if __name__ == "__main__":
    key = jax.random.PRNGKey(0)
    pkey, xkey = jax.random.split(key)
    params = init_params(pkey)

    # Small input consistent with the module: (batch=2, channels=1, length=128)
    # -> CNN pools /16 -> sequence length 8, feature dim 128 -> embed dim 64.
    x = jax.random.normal(xkey, (2, CNN_IN_CH, 128), jnp.float32)

    out = jax.jit(song2vec_forward)(params, x)
    out = jax.block_until_ready(out)

    assert out.shape == (2, EMBED_DIM)
    assert bool(jnp.all(jnp.isfinite(out)))
    # Output rows are L2-normalized.
    assert bool(jnp.allclose(jnp.linalg.norm(out, axis=1), 1.0, atol=1e-4))
    print("KERNEL_OK")
</pallas_src>

<mosaic_0001>
module attributes {stable_mosaic.version = 11 : i64} {
  func.func @_song2vec_kernel(%arg0: i32, %arg1: memref<256x3xf32, #tpu.memory_space<vmem>>, %arg2: memref<3x32xf32, #tpu.memory_space<vmem>>, %arg3: memref<1x32xf32, #tpu.memory_space<vmem>>, %arg4: memref<3x32x64xf32, #tpu.memory_space<vmem>>, %arg5: memref<1x64xf32, #tpu.memory_space<vmem>>, %arg6: memref<3x64x128xf32, #tpu.memory_space<vmem>>, %arg7: memref<1x128xf32, #tpu.memory_space<vmem>>, %arg8: memref<3x128x128xf32, #tpu.memory_space<vmem>>, %arg9: memref<1x128xf32, #tpu.memory_space<vmem>>, %arg10: memref<128x64xf32, #tpu.memory_space<vmem>>, %arg11: memref<1x64xf32, #tpu.memory_space<vmem>>, %arg12: memref<3x64x192xf32, #tpu.memory_space<vmem>>, %arg13: memref<3x1x192xf32, #tpu.memory_space<vmem>>, %arg14: memref<3x64x64xf32, #tpu.memory_space<vmem>>, %arg15: memref<3x1x64xf32, #tpu.memory_space<vmem>>, %arg16: memref<3x1x64xf32, #tpu.memory_space<vmem>>, %arg17: memref<3x1x64xf32, #tpu.memory_space<vmem>>, %arg18: memref<3x64x256xf32, #tpu.memory_space<vmem>>, %arg19: memref<3x1x256xf32, #tpu.memory_space<vmem>>, %arg20: memref<3x256x64xf32, #tpu.memory_space<vmem>>, %arg21: memref<3x1x64xf32, #tpu.memory_space<vmem>>, %arg22: memref<3x1x64xf32, #tpu.memory_space<vmem>>, %arg23: memref<3x1x64xf32, #tpu.memory_space<vmem>>, %arg24: memref<64x64xf32, #tpu.memory_space<vmem>>, %arg25: memref<1x64xf32, #tpu.memory_space<vmem>>, %arg26: memref<2x64xf32, #tpu.memory_space<vmem>>, %arg27: memref<152x128xf32, #tpu.memory_space<vmem>>, %arg28: memref<256x128xf32, #tpu.memory_space<vmem>>) attributes {dimension_semantics = [#tpu.dimension_semantics<arbitrary>], iteration_bounds = array<i64: 1>, scalar_prefetch = 0 : i64, scratch_operands = 2 : i64, tpu.core_type = #tpu.core_type<tc>, window_params = [{pipeline_mode = #tpu.pipeline_mode<synchronous>, transform_indices = @transform_0, window_bounds = array<i64: 256, 3>}, {pipeline_mode = #tpu.pipeline_mode<synchronous>, transform_indices = @transform_1, window_bounds = array<i64: 3, 32>}, {pipeline_mode = #tpu.pipeline_mode<synchronous>, transform_indices = @transform_2, window_bounds = array<i64: 1, 32>}, {pipeline_mode = #tpu.pipeline_mode<synchronous>, transform_indices = @transform_3, window_bounds = array<i64: 3, 32, 64>}, {pipeline_mode = #tpu.pipeline_mode<synchronous>, transform_indices = @transform_4, window_bounds = array<i64: 1, 64>}, {pipeline_mode = #tpu.pipeline_mode<synchronous>, transform_indices = @transform_5, window_bounds = array<i64: 3, 64, 128>}, {pipeline_mode = #tpu.pipeline_mode<synchronous>, transform_indices = @transform_6, window_bounds = array<i64: 1, 128>}, {pipeline_mode = #tpu.pipeline_mode<synchronous>, transform_indices = @transform_7, window_bounds = array<i64: 3, 128, 128>}, {pipeline_mode = #tpu.pipeline_mode<synchronous>, transform_indices = @transform_8, window_bounds = array<i64: 1, 128>}, {pipeline_mode = #tpu.pipeline_mode<synchronous>, transform_indices = @transform_9, window_bounds = array<i64: 128, 64>}, {pipeline_mode = #tpu.pipeline_mode<synchronous>, transform_indices = @transform_10, window_bounds = array<i64: 1, 64>}, {pipeline_mode = #tpu.pipeline_mode<synchronous>, transform_indices = @transform_11, window_bounds = array<i64: 3, 64, 192>}, {pipeline_mode = #tpu.pipeline_mode<synchronous>, transform_indices = @transform_12, window_bounds = array<i64: 3, 1, 192>}, {pipeline_mode = #tpu.pipeline_mode<synchronous>, transform_indices = @transform_13, window_bounds = array<i64: 3, 64, 64>}, {pipeline_mode = #tpu.pipeline_mode<synchronous>, transform_indices = @transform_14, window_bounds = array<i64: 3, 1, 64>}, {pipeline_mode = #tpu.pipeline_mode<synchronous>, transform_indices = @transform_15, window_bounds = array<i64: 3, 1, 64>}, {pipeline_mode = #tpu.pipeline_mode<synchronous>, transform_indices = @transform_16, window_bounds = array<i64: 3, 1, 64>}, {pipeline_mode = #tpu.pipeline_mode<synchronous>, transform_indices = @transform_17, window_bounds = array<i64: 3, 64, 256>}, {pipeline_mode = #tpu.pipeline_mode<synchronous>, transform_indices = @transform_18, window_bounds = array<i64: 3, 1, 256>}, {pipeline_mode = #tpu.pipeline_mode<synchronous>, transform_indices = @transform_19, window_bounds = array<i64: 3, 256, 64>}, {pipeline_mode = #tpu.pipeline_mode<synchronous>, transform_indices = @transform_20, window_bounds = array<i64: 3, 1, 64>}, {pipeline_mode = #tpu.pipeline_mode<synchronous>, transform_indices = @transform_21, window_bounds = array<i64: 3, 1, 64>}, {pipeline_mode = #tpu.pipeline_mode<synchronous>, transform_indices = @transform_22, window_bounds = array<i64: 3, 1, 64>}, {pipeline_mode = #tpu.pipeline_mode<synchronous>, transform_indices = @transform_23, window_bounds = array<i64: 64, 64>}, {pipeline_mode = #tpu.pipeline_mode<synchronous>, transform_indices = @transform_24, window_bounds = array<i64: 1, 64>}, {pipeline_mode = #tpu.pipeline_mode<synchronous>, transform_indices = @transform_25, window_bounds = array<i64: 2, 64>}]} {
    %c0 = arith.constant 0 : index
    %c0_0 = arith.constant 0 : index
    %0 = vector.load %arg1[%c0, %c0_0] : memref<256x3xf32, #tpu.memory_space<vmem>>, vector<256x3xf32>
    %c0_1 = arith.constant 0 : index
    %c0_2 = arith.constant 0 : index
    %1 = vector.load %arg2[%c0_1, %c0_2] : memref<3x32xf32, #tpu.memory_space<vmem>>, vector<3x32xf32>
    %cst = arith.constant dense<0.000000e+00> : vector<256x32xf32>
    %2 = tpu.matmul %0, %1, %cst {dimension_numbers = #tpu.dot_dimension_numbers<[1], [0], [0], [1], [0, 0, 1, 1], [], []>} : vector<256x3xf32>, vector<3x32xf32>, vector<256x32xf32> -> vector<256x32xf32>
    %c0_3 = arith.constant 0 : index
    %c0_4 = arith.constant 0 : index
    %3 = vector.load %arg3[%c0_3, %c0_4] : memref<1x32xf32, #tpu.memory_space<vmem>>, vector<1x32xf32>
    %4 = vector.broadcast %3 : vector<1x32xf32> to vector<256x32xf32>
    %5 = arith.addf %2, %4 : vector<256x32xf32>
    %cst_5 = arith.constant 0.000000e+00 : f32
    %6 = vector.broadcast %cst_5 : f32 to vector<256x32xf32>
    %7 = arith.maximumf %5, %6 : vector<256x32xf32>
    %c0_6 = arith.constant 0 : index
    %c0_7 = arith.constant 0 : index
    %8 = vector.load %arg28[%c0_6, %c0_7] : memref<256x128xf32, #tpu.memory_space<vmem>>, vector<256x32xf32>
    tpu.vector_store %arg28[%c0_6, %c0_7], %7 {strides = array<i32>} : memref<256x128xf32, #tpu.memory_space<vmem>>, vector<256x32xf32>,
    %c0_8 = arith.constant 0 : index
    %c0_9 = arith.constant 0 : index
    %9 = tpu.strided_load %arg28[%c0_8, %c0_9] {strides = array<i32: 2, 1>} : memref<256x128xf32, #tpu.memory_space<vmem>>, vector<128x32xf32>
    %c1 = arith.constant 1 : index
    %c0_10 = arith.constant 0 : index
    %10 = tpu.strided_load %arg28[%c1, %c0_10] {strides = array<i32: 2, 1>} : memref<256x128xf32, #tpu.memory_space<vmem>>, vector<128x32xf32>
    %11 = arith.maximumf %9, %10 : vector<128x32xf32>
    %cst_11 = arith.constant 0.000000e+00 : f32
    %12 = vector.broadcast %cst_11 : f32 to vector<8x32xf32>
    %c0_12 = arith.constant 0 : index
    %c0_13 = arith.constant 0 : index
    %13 = vector.load %arg27[%c0_12, %c0_13] : memref<152x128xf32, #tpu.memory_space<vmem>>, vector<8x32xf32>
    tpu.vector_store %arg27[%c0_12, %c0_13], %12 {strides = array<i32>} : memref<152x128xf32, #tpu.memory_space<vmem>>, vector<8x32xf32>,
    %cst_14 = arith.constant 0.000000e+00 : f32
    %14 = vector.broadcast %cst_14 : f32 to vector<8x32xf32>
    %c72 = arith.constant 72 : index
    %c0_15 = arith.constant 0 : index
    %15 = vector.load %arg27[%c72, %c0_15] : memref<152x128xf32, #tpu.memory_space<vmem>>, vector<8x32xf32>
    tpu.vector_store %arg27[%c72, %c0_15], %14 {strides = array<i32>} : memref<152x128xf32, #tpu.memory_space<vmem>>, vector<8x32xf32>,
    %cst_16 = arith.constant 0.000000e+00 : f32
    %16 = vector.broadcast %cst_16 : f32 to vector<8x32xf32>
    %c144 = arith.constant 144 : index
    %c0_17 = arith.constant 0 : index
    %17 = vector.load %arg27[%c144, %c0_17] : memref<152x128xf32, #tpu.memory_space<vmem>>, vector<8x32xf32>
    tpu.vector_store %arg27[%c144, %c0_17], %16 {strides = array<i32>} : memref<152x128xf32, #tpu.memory_space<vmem>>, vector<8x32xf32>,
    %18 = vector.extract_strided_slice %11 {offsets = [0, 0], sizes = [64, 32], strides = [1, 1]} : vector<128x32xf32> to vector<64x32xf32>
    %c8 = arith.constant 8 : index
    %c0_18 = arith.constant 0 : index
    %19 = vector.load %arg27[%c8, %c0_18] : memref<152x128xf32, #tpu.memory_space<vmem>>, vector<64x32xf32>
    tpu.vector_store %arg27[%c8, %c0_18], %18 {strides = array<i32>} : memref<152x128xf32, #tpu.memory_space<vmem>>, vector<64x32xf32>,
    %20 = vector.extract_strided_slice %11 {offsets = [64, 0], sizes = [64, 32], strides = [1, 1]} : vector<128x32xf32> to vector<64x32xf32>
    %c80 = arith.constant 80 : index
    %c0_19 = arith.constant 0 : index
    %21 = vector.load %arg27[%c80, %c0_19] : memref<152x128xf32, #tpu.memory_space<vmem>>, vector<64x32xf32>
    tpu.vector_store %arg27[%c80, %c0_19], %20 {strides = array<i32>} : memref<152x128xf32, #tpu.memory_space<vmem>>, vector<64x32xf32>,
    %c7 = arith.constant 7 : index
    %c0_20 = arith.constant 0 : index
    %22 = vector.load %arg27[%c7, %c0_20] : memref<152x128xf32, #tpu.memory_space<vmem>>, vector<136x32xf32>
    %c0_21 = arith.constant 0 : index
    %c0_22 = arith.constant 0 : index
    %c0_23 = arith.constant 0 : index
    %23 = vector.load %arg4[%c0_21, %c0_22, %c0_23] : memref<3x32x64xf32, #tpu.memory_space<vmem>>, vector<1x32x64xf32>
    %24 = vector.shape_cast %23 : vector<1x32x64xf32> to vector<32x64xf32>
    %cst_24 = arith.constant dense<0.000000e+00> : vector<136x64xf32>
    %25 = tpu.matmul %22, %24, %cst_24 {dimension_numbers = #tpu.dot_dimension_numbers<[1], [0], [0], [1], [0, 0, 1, 1], [], []>} : vector<136x32xf32>, vector<32x64xf32>, vector<136x64xf32> -> vector<136x64xf32>
    %c8_25 = arith.constant 8 : index
    %c0_26 = arith.constant 0 : index
    %26 = vector.load %arg27[%c8_25, %c0_26] : memref<152x128xf32, #tpu.memory_space<vmem>>, vector<136x32xf32>
    %c1_27 = arith.constant 1 : index
    %c0_28 = arith.constant 0 : index
    %c0_29 = arith.constant 0 : index
    %27 = vector.load %arg4[%c1_27, %c0_28, %c0_29] : memref<3x32x64xf32, #tpu.memory_space<vmem>>, vector<1x32x64xf32>
    %28 = vector.shape_cast %27 : vector<1x32x64xf32> to vector<32x64xf32>
    %cst_30 = arith.constant dense<0.000000e+00> : vector<136x64xf32>
    %29 = tpu.matmul %26, %28, %cst_30 {dimension_numbers = #tpu.dot_dimension_numbers<[1], [0], [0], [1], [0, 0, 1, 1], [], []>} : vector<136x32xf32>, vector<32x64xf32>, vector<136x64xf32> -> vector<136x64xf32>
    %30 = arith.addf %25, %29 : vector<136x64xf32>
    %c9 = arith.constant 9 : index
    %c0_31 = arith.constant 0 : index
    %31 = vector.load %arg27[%c9, %c0_31] : memref<152x128xf32, #tpu.memory_space<vmem>>, vector<136x32xf32>
    %c2 = arith.constant 2 : index
    %c0_32 = arith.constant 0 : index
    %c0_33 = arith.constant 0 : index
    %32 = vector.load %arg4[%c2, %c0_32, %c0_33] : memref<3x32x64xf32, #tpu.memory_space<vmem>>, vector<1x32x64xf32>
    %33 = vector.shape_cast %32 : vector<1x32x64xf32> to vector<32x64xf32>
    %cst_34 = arith.constant dense<0.000000e+00> : vector<136x64xf32>
    %34 = tpu.matmul %31, %33, %cst_34 {dimension_numbers = #tpu.dot_dimension_numbers<[1], [0], [0], [1], [0, 0, 1, 1], [], []>} : vector<136x32xf32>, vector<32x64xf32>, vector<136x64xf32> -> vector<136x64xf32>
    %35 = arith.addf %30, %34 : vector<136x64xf32>
    %c0_35 = arith.constant 0 : index
    %c0_36 = arith.constant 0 : index
    %36 = vector.load %arg5[%c0_35, %c0_36] : memref<1x64xf32, #tpu.memory_space<vmem>>, vector<1x64xf32>
    %37 = vector.broadcast %36 : vector<1x64xf32> to vector<136x64xf32>
    %38 = arith.addf %35, %37 : vector<136x64xf32>
    %cst_37 = arith.constant 0.000000e+00 : f32
    %39 = vector.broadcast %cst_37 : f32 to vector<136x64xf32>
    %40 = arith.maximumf %38, %39 : vector<136x64xf32>
    %41 = vector.extract_strided_slice %40 {offsets = [0, 0], sizes = [64, 64], strides = [1, 1]} : vector<136x64xf32> to vector<64x64xf32>
    %c0_38 = arith.constant 0 : index
    %c0_39 = arith.constant 0 : index
    %42 = vector.load %arg28[%c0_38, %c0_39] : memref<256x128xf32, #tpu.memory_space<vmem>>, vector<64x64xf32>
    tpu.vector_store %arg28[%c0_38, %c0_39], %41 {strides = array<i32>} : memref<256x128xf32, #tpu.memory_space<vmem>>, vector<64x64xf32>,
    %43 = vector.extract_strided_slice %40 {offsets = [72, 0], sizes = [64, 64], strides = [1, 1]} : vector<136x64xf32> to vector<64x64xf32>
    %c64 = arith.constant 64 : index
    %c0_40 = arith.constant 0 : index
    %44 = vector.load %arg28[%c64, %c0_40] : memref<256x128xf32, #tpu.memory_space<vmem>>, vector<64x64xf32>
    tpu.vector_store %arg28[%c64, %c0_40], %43 {strides = array<i32>} : memref<256x128xf32, #tpu.memory_space<vmem>>, vector<64x64xf32>,
    %c0_41 = arith.constant 0 : index
    %c0_42 = arith.constant 0 : index
    %45 = tpu.strided_load %arg28[%c0_41, %c0_42] {strides = array<i32: 2, 1>} : memref<256x128xf32, #tpu.memory_space<vmem>>, vector<64x64xf32>
    %c1_43 = arith.constant 1 : index
    %c0_44 = arith.constant 0 : index
    %46 = tpu.strided_load %arg28[%c1_43, %c0_44] {strides = array<i32: 2, 1>} : memref<256x128xf32, #tpu.memory_space<vmem>>, vector<64x64xf32>
    %47 = arith.maximumf %45, %46 : vector<64x64xf32>
    %cst_45 = arith.constant 0.000000e+00 : f32
    %48 = vector.broadcast %cst_45 : f32 to vector<8x64xf32>
    %c0_46 = arith.constant 0 : index
    %c0_47 = arith.constant 0 : index
    %49 = vector.load %arg27[%c0_46, %c0_47] : memref<152x128xf32, #tpu.memory_space<vmem>>, vector<8x64xf32>
    tpu.vector_store %arg27[%c0_46, %c0_47], %48 {strides = array<i32>} : memref<152x128xf32, #tpu.memory_space<vmem>>, vector<8x64xf32>,
    %cst_48 = arith.constant 0.000000e+00 : f32
    %50 = vector.broadcast %cst_48 : f32 to vector<8x64xf32>
    %c40 = arith.constant 40 : index
    %c0_49 = arith.constant 0 : index
    %51 = vector.load %arg27[%c40, %c0_49] : memref<152x128xf32, #tpu.memory_space<vmem>>, vector<8x64xf32>
    tpu.vector_store %arg27[%c40, %c0_49], %50 {strides = array<i32>} : memref<152x128xf32, #tpu.memory_space<vmem>>, vector<8x64xf32>,
    %cst_50 = arith.constant 0.000000e+00 : f32
    %52 = vector.broadcast %cst_50 : f32 to vector<8x64xf32>
    %c80_51 = arith.constant 80 : index
    %c0_52 = arith.constant 0 : index
    %53 = vector.load %arg27[%c80_51, %c0_52] : memref<152x128xf32, #tpu.memory_space<vmem>>, vector<8x64xf32>
    tpu.vector_store %arg27[%c80_51, %c0_52], %52 {strides = array<i32>} : memref<152x128xf32, #tpu.memory_space<vmem>>, vector<8x64xf32>,
    %54 = vector.extract_strided_slice %47 {offsets = [0, 0], sizes = [32, 64], strides = [1, 1]} : vector<64x64xf32> to vector<32x64xf32>
    %c8_53 = arith.constant 8 : index
    %c0_54 = arith.constant 0 : index
    %55 = vector.load %arg27[%c8_53, %c0_54] : memref<152x128xf32, #tpu.memory_space<vmem>>, vector<32x64xf32>
    tpu.vector_store %arg27[%c8_53, %c0_54], %54 {strides = array<i32>} : memref<152x128xf32, #tpu.memory_space<vmem>>, vector<32x64xf32>,
    %56 = vector.extract_strided_slice %47 {offsets = [32, 0], sizes = [32, 64], strides = [1, 1]} : vector<64x64xf32> to vector<32x64xf32>
    %c48 = arith.constant 48 : index
    %c0_55 = arith.constant 0 : index
    %57 = vector.load %arg27[%c48, %c0_55] : memref<152x128xf32, #tpu.memory_space<vmem>>, vector<32x64xf32>
    tpu.vector_store %arg27[%c48, %c0_55], %56 {strides = array<i32>} : memref<152x128xf32, #tpu.memory_space<vmem>>, vector<32x64xf32>,
    %c7_56 = arith.constant 7 : index
    %c0_57 = arith.constant 0 : index
    %58 = vector.load %arg27[%c7_56, %c0_57] : memref<152x128xf32, #tpu.memory_space<vmem>>, vector<72x64xf32>
    %c0_58 = arith.constant 0 : index
    %c0_59 = arith.constant 0 : index
    %c0_60 = arith.constant 0 : index
    %59 = vector.load %arg6[%c0_58, %c0_59, %c0_60] : memref<3x64x128xf32, #tpu.memory_space<vmem>>, vector<1x64x128xf32>
    %60 = vector.shape_cast %59 : vector<1x64x128xf32> to vector<64x128xf32>
    %cst_61 = arith.constant dense<0.000000e+00> : vector<72x128xf32>
    %61 = tpu.matmul %58, %60, %cst_61 {dimension_numbers = #tpu.dot_dimension_numbers<[1], [0], [0], [1], [0, 0, 1, 1], [], []>} : vector<72x64xf32>, vector<64x128xf32>, vector<72x128xf32> -> vector<72x128xf32>
    %c8_62 = arith.constant 8 : index
    %c0_63 = arith.constant 0 : index
    %62 = vector.load %arg27[%c8_62, %c0_63] : memref<152x128xf32, #tpu.memory_space<vmem>>, vector<72x64xf32>
    %c1_64 = arith.constant 1 : index
    %c0_65 = arith.constant 0 : index
    %c0_66 = arith.constant 0 : index
    %63 = vector.load %arg6[%c1_64, %c0_65, %c0_66] : memref<3x64x128xf32, #tpu.memory_space<vmem>>, vector<1x64x128xf32>
    %64 = vector.shape_cast %63 : vector<1x64x128xf32> to vector<64x128xf32>
    %cst_67 = arith.constant dense<0.000000e+00> : vector<72x128xf32>
    %65 = tpu.matmul %62, %64, %cst_67 {dimension_numbers = #tpu.dot_dimension_numbers<[1], [0], [0], [1], [0, 0, 1, 1], [], []>} : vector<72x64xf32>, vector<64x128xf32>, vector<72x128xf32> -> vector<72x128xf32>
    %66 = arith.addf %61, %65 : vector<72x128xf32>
    %c9_68 = arith.constant 9 : index
    %c0_69 = arith.constant 0 : index
    %67 = vector.load %arg27[%c9_68, %c0_69] : memref<152x128xf32, #tpu.memory_space<vmem>>, vector<72x64xf32>
    %c2_70 = arith.constant 2 : index
    %c0_71 = arith.constant 0 : index
    %c0_72 = arith.constant 0 : index
    %68 = vector.load %arg6[%c2_70, %c0_71, %c0_72] : memref<3x64x128xf32, #tpu.memory_space<vmem>>, vector<1x64x128xf32>
    %69 = vector.shape_cast %68 : vector<1x64x128xf32> to vector<64x128xf32>
    %cst_73 = arith.constant dense<0.000000e+00> : vector<72x128xf32>
    %70 = tpu.matmul %67, %69, %cst_73 {dimension_numbers = #tpu.dot_dimension_numbers<[1], [0], [0], [1], [0, 0, 1, 1], [], []>} : vector<72x64xf32>, vector<64x128xf32>, vector<72x128xf32> -> vector<72x128xf32>
    %71 = arith.addf %66, %70 : vector<72x128xf32>
    %c0_74 = arith.constant 0 : index
    %c0_75 = arith.constant 0 : index
    %72 = vector.load %arg7[%c0_74, %c0_75] : memref<1x128xf32, #tpu.memory_space<vmem>>, vector<1x128xf32>
    %73 = vector.broadcast %72 : vector<1x128xf32> to vector<72x128xf32>
    %74 = arith.addf %71, %73 : vector<72x128xf32>
    %cst_76 = arith.constant 0.000000e+00 : f32
    %75 = vector.broadcast %cst_76 : f32 to vector<72x128xf32>
    %76 = arith.maximumf %74, %75 : vector<72x128xf32>
    %77 = vector.extract_strided_slice %76 {offsets = [0, 0], sizes = [32, 128], strides = [1, 1]} : vector<72x128xf32> to vector<32x128xf32>
    %c0_77 = arith.constant 0 : index
    %c0_78 = arith.constant 0 : index
    %78 = vector.load %arg28[%c0_77, %c0_78] : memref<256x128xf32, #tpu.memory_space<vmem>>, vector<32x128xf32>
    tpu.vector_store %arg28[%c0_77, %c0_78], %77 {strides = array<i32>} : memref<256x128xf32, #tpu.memory_space<vmem>>, vector<32x128xf32>,
    %79 = vector.extract_strided_slice %76 {offsets = [40, 0], sizes = [32, 128], strides = [1, 1]} : vector<72x128xf32> to vector<32x128xf32>
    %c32 = arith.constant 32 : index
    %c0_79 = arith.constant 0 : index
    %80 = vector.load %arg28[%c32, %c0_79] : memref<256x128xf32, #tpu.memory_space<vmem>>, vector<32x128xf32>
    tpu.vector_store %arg28[%c32, %c0_79], %79 {strides = array<i32>} : memref<256x128xf32, #tpu.memory_space<vmem>>, vector<32x128xf32>,
    %c0_80 = arith.constant 0 : index
    %c0_81 = arith.constant 0 : index
    %81 = tpu.strided_load %arg28[%c0_80, %c0_81] {strides = array<i32: 2, 1>} : memref<256x128xf32, #tpu.memory_space<vmem>>, vector<32x128xf32>
    %c1_82 = arith.constant 1 : index
    %c0_83 = arith.constant 0 : index
    %82 = tpu.strided_load %arg28[%c1_82, %c0_83] {strides = array<i32: 2, 1>} : memref<256x128xf32, #tpu.memory_space<vmem>>, vector<32x128xf32>
    %83 = arith.maximumf %81, %82 : vector<32x128xf32>
    %cst_84 = arith.constant 0.000000e+00 : f32
    %84 = vector.broadcast %cst_84 : f32 to vector<8x128xf32>
    %c0_85 = arith.constant 0 : index
    %c0_86 = arith.constant 0 : index
    %85 = vector.load %arg27[%c0_85, %c0_86] : memref<152x128xf32, #tpu.memory_space<vmem>>, vector<8x128xf32>
    tpu.vector_store %arg27[%c0_85, %c0_86], %84 {strides = array<i32>} : memref<152x128xf32, #tpu.memory_space<vmem>>, vector<8x128xf32>,
    %cst_87 = arith.constant 0.000000e+00 : f32
    %86 = vector.broadcast %cst_87 : f32 to vector<8x128xf32>
    %c24 = arith.constant 24 : index
    %c0_88 = arith.constant 0 : index
    %87 = vector.load %arg27[%c24, %c0_88] : memref<152x128xf32, #tpu.memory_space<vmem>>, vector<8x128xf32>
    tpu.vector_store %arg27[%c24, %c0_88], %86 {strides = array<i32>} : memref<152x128xf32, #tpu.memory_space<vmem>>, vector<8x128xf32>,
    %cst_89 = arith.constant 0.000000e+00 : f32
    %88 = vector.broadcast %cst_89 : f32 to vector<8x128xf32>
    %c48_90 = arith.constant 48 : index
    %c0_91 = arith.constant 0 : index
    %89 = vector.load %arg27[%c48_90, %c0_91] : memref<152x128xf32, #tpu.memory_space<vmem>>, vector<8x128xf32>
    tpu.vector_store %arg27[%c48_90, %c0_91], %88 {strides = array<i32>} : memref<152x128xf32, #tpu.memory_space<vmem>>, vector<8x128xf32>,
    %90 = vector.extract_strided_slice %83 {offsets = [0, 0], sizes = [16, 128], strides = [1, 1]} : vector<32x128xf32> to vector<16x128xf32>
    %c8_92 = arith.constant 8 : index
    %c0_93 = arith.constant 0 : index
    %91 = vector.load %arg27[%c8_92, %c0_93] : memref<152x128xf32, #tpu.memory_space<vmem>>, vector<16x128xf32>
    tpu.vector_store %arg27[%c8_92, %c0_93], %90 {strides = array<i32>} : memref<152x128xf32, #tpu.memory_space<vmem>>, vector<16x128xf32>,
    %92 = vector.extract_strided_slice %83 {offsets = [16, 0], sizes = [16, 128], strides = [1, 1]} : vector<32x128xf32> to vector<16x128xf32>
    %c32_94 = arith.constant 32 : index
    %c0_95 = arith.constant 0 : index
    %93 = vector.load %arg27[%c32_94, %c0_95] : memref<152x128xf32, #tpu.memory_space<vmem>>, vector<16x128xf32>
    tpu.vector_store %arg27[%c32_94, %c0_95], %92 {strides = array<i32>} : memref<152x128xf32, #tpu.memory_space<vmem>>, vector<16x128xf32>,
    %c7_96 = arith.constant 7 : index
    %c0_97 = arith.constant 0 : index
    %94 = vector.load %arg27[%c7_96, %c0_97] : memref<152x128xf32, #tpu.memory_space<vmem>>, vector<40x128xf32>
    %c0_98 = arith.constant 0 : index
    %c0_99 = arith.constant 0 : index
    %c0_100 = arith.constant 0 : index
    %95 = vector.load %arg8[%c0_98, %c0_99, %c0_100] : memref<3x128x128xf32, #tpu.memory_space<vmem>>, vector<1x128x128xf32>
    %96 = vector.shape_cast %95 : vector<1x128x128xf32> to vector<128x128xf32>
    %cst_101 = arith.constant dense<0.000000e+00> : vector<40x128xf32>
    %97 = tpu.matmul %94, %96, %cst_101 {dimension_numbers = #tpu.dot_dimension_numbers<[1], [0], [0], [1], [0, 0, 1, 1], [], []>} : vector<40x128xf32>, vector<128x128xf32>, vector<40x128xf32> -> vector<40x128xf32>
    %c8_102 = arith.constant 8 : index
    %c0_103 = arith.constant 0 : index
    %98 = vector.load %arg27[%c8_102, %c0_103] : memref<152x128xf32, #tpu.memory_space<vmem>>, vector<40x128xf32>
    %c1_104 = arith.constant 1 : index
    %c0_105 = arith.constant 0 : index
    %c0_106 = arith.constant 0 : index
    %99 = vector.load %arg8[%c1_104, %c0_105, %c0_106] : memref<3x128x128xf32, #tpu.memory_space<vmem>>, vector<1x128x128xf32>
    %100 = vector.shape_cast %99 : vector<1x128x128xf32> to vector<128x128xf32>
    %cst_107 = arith.constant dense<0.000000e+00> : vector<40x128xf32>
    %101 = tpu.matmul %98, %100, %cst_107 {dimension_numbers = #tpu.dot_dimension_numbers<[1], [0], [0], [1], [0, 0, 1, 1], [], []>} : vector<40x128xf32>, vector<128x128xf32>, vector<40x128xf32> -> vector<40x128xf32>
    %102 = arith.addf %97, %101 : vector<40x128xf32>
    %c9_108 = arith.constant 9 : index
    %c0_109 = arith.constant 0 : index
    %103 = vector.load %arg27[%c9_108, %c0_109] : memref<152x128xf32, #tpu.memory_space<vmem>>, vector<40x128xf32>
    %c2_110 = arith.constant 2 : index
    %c0_111 = arith.constant 0 : index
    %c0_112 = arith.constant 0 : index
    %104 = vector.load %arg8[%c2_110, %c0_111, %c0_112] : memref<3x128x128xf32, #tpu.memory_space<vmem>>, vector<1x128x128xf32>
    %105 = vector.shape_cast %104 : vector<1x128x128xf32> to vector<128x128xf32>
    %cst_113 = arith.constant dense<0.000000e+00> : vector<40x128xf32>
    %106 = tpu.matmul %103, %105, %cst_113 {dimension_numbers = #tpu.dot_dimension_numbers<[1], [0], [0], [1], [0, 0, 1, 1], [], []>} : vector<40x128xf32>, vector<128x128xf32>, vector<40x128xf32> -> vector<40x128xf32>
    %107 = arith.addf %102, %106 : vector<40x128xf32>
    %c0_114 = arith.constant 0 : index
    %c0_115 = arith.constant 0 : index
    %108 = vector.load %arg9[%c0_114, %c0_115] : memref<1x128xf32, #tpu.memory_space<vmem>>, vector<1x128xf32>
    %109 = vector.broadcast %108 : vector<1x128xf32> to vector<40x128xf32>
    %110 = arith.addf %107, %109 : vector<40x128xf32>
    %cst_116 = arith.constant 0.000000e+00 : f32
    %111 = vector.broadcast %cst_116 : f32 to vector<40x128xf32>
    %112 = arith.maximumf %110, %111 : vector<40x128xf32>
    %113 = vector.extract_strided_slice %112 {offsets = [0, 0], sizes = [16, 128], strides = [1, 1]} : vector<40x128xf32> to vector<16x128xf32>
    %c0_117 = arith.constant 0 : index
    %c0_118 = arith.constant 0 : index
    %114 = vector.load %arg28[%c0_117, %c0_118] : memref<256x128xf32, #tpu.memory_space<vmem>>, vector<16x128xf32>
    tpu.vector_store %arg28[%c0_117, %c0_118], %113 {strides = array<i32>} : memref<256x128xf32, #tpu.memory_space<vmem>>, vector<16x128xf32>,
    %115 = vector.extract_strided_slice %112 {offsets = [24, 0], sizes = [16, 128], strides = [1, 1]} : vector<40x128xf32> to vector<16x128xf32>
    %c16 = arith.constant 16 : index
    %c0_119 = arith.constant 0 : index
    %116 = vector.load %arg28[%c16, %c0_119] : memref<256x128xf32, #tpu.memory_space<vmem>>, vector<16x128xf32>
    tpu.vector_store %arg28[%c16, %c0_119], %115 {strides = array<i32>} : memref<256x128xf32, #tpu.memory_space<vmem>>, vector<16x128xf32>,
    %c0_120 = arith.constant 0 : index
    %c0_121 = arith.constant 0 : index
    %117 = tpu.strided_load %arg28[%c0_120, %c0_121] {strides = array<i32: 2, 1>} : memref<256x128xf32, #tpu.memory_space<vmem>>, vector<16x128xf32>
    %c1_122 = arith.constant 1 : index
    %c0_123 = arith.constant 0 : index
    %118 = tpu.strided_load %arg28[%c1_122, %c0_123] {strides = array<i32: 2, 1>} : memref<256x128xf32, #tpu.memory_space<vmem>>, vector<16x128xf32>
    %119 = arith.maximumf %117, %118 : vector<16x128xf32>
    %c0_124 = arith.constant 0 : index
    %c0_125 = arith.constant 0 : index
    %120 = vector.load %arg10[%c0_124, %c0_125] : memref<128x64xf32, #tpu.memory_space<vmem>>, vector<128x64xf32>
    %cst_126 = arith.constant dense<0.000000e+00> : vector<16x64xf32>
    %121 = tpu.matmul %119, %120, %cst_126 {dimension_numbers = #tpu.dot_dimension_numbers<[1], [0], [0], [1], [0, 0, 1, 1], [], []>} : vector<16x128xf32>, vector<128x64xf32>, vector<16x64xf32> -> vector<16x64xf32>
    %c0_127 = arith.constant 0 : index
    %c0_128 = arith.constant 0 : index
    %122 = vector.load %arg11[%c0_127, %c0_128] : memref<1x64xf32, #tpu.memory_space<vmem>>, vector<1x64xf32>
    %123 = vector.broadcast %122 : vector<1x64xf32> to vector<16x64xf32>
    %124 = arith.addf %121, %123 : vector<16x64xf32>
    %125 = vector.extract_strided_slice %124 {offsets = [0, 0], sizes = [8, 64], strides = [1, 1]} : vector<16x64xf32> to vector<8x64xf32>
    %126 = vector.extract_strided_slice %124 {offsets = [8, 0], sizes = [8, 64], strides = [1, 1]} : vector<16x64xf32> to vector<8x64xf32>
    %127 = tpu.iota {dimensions = array<i32: 0>} : vector<64x4xi32>
    %128 = tpu.iota {dimensions = array<i32: 1>} : vector<64x4xi32>
    %c16_i32 = arith.constant 16 : i32
    %129 = vector.broadcast %c16_i32 : i32 to vector<64x4xi32>
    %130 = arith.muli %128, %129 : vector<64x4xi32>
    %131 = arith.cmpi sge, %127, %130 : vector<64x4xi32>
    %c1_i32 = arith.constant 1 : i32
    %132 = vector.broadcast %c1_i32 : i32 to vector<64x4xi32>
    %133 = arith.addi %128, %132 : vector<64x4xi32>
    %c16_i32_129 = arith.constant 16 : i32
    %134 = vector.broadcast %c16_i32_129 : i32 to vector<64x4xi32>
    %135 = arith.muli %133, %134 : vector<64x4xi32>
    %136 = arith.cmpi slt, %127, %135 : vector<64x4xi32>
    %137 = arith.andi %131, %136 : vector<64x4xi1>
    %138 = arith.extui %137 : vector<64x4xi1> to vector<64x4xi32>
    %139 = arith.sitofp %138 : vector<64x4xi32> to vector<64x4xf32>
    %140 = tpu.iota {dimensions = array<i32: 0>} : vector<4x64xi32>
    %141 = tpu.iota {dimensions = array<i32: 1>} : vector<4x64xi32>
    %c16_i32_130 = arith.constant 16 : i32
    %142 = vector.broadcast %c16_i32_130 : i32 to vector<4x64xi32>
    %143 = arith.muli %140, %142 : vector<4x64xi32>
    %144 = arith.cmpi sge, %141, %143 : vector<4x64xi32>
    %c1_i32_131 = arith.constant 1 : i32
    %145 = vector.broadcast %c1_i32_131 : i32 to vector<4x64xi32>
    %146 = arith.addi %140, %145 : vector<4x64xi32>
    %c16_i32_132 = arith.constant 16 : i32
    %147 = vector.broadcast %c16_i32_132 : i32 to vector<4x64xi32>
    %148 = arith.muli %146, %147 : vector<4x64xi32>
    %149 = arith.cmpi slt, %141, %148 : vector<4x64xi32>
    %150 = arith.andi %144, %149 : vector<4x64xi1>
    %151 = arith.extui %150 : vector<4x64xi1> to vector<4x64xi32>
    %152 = arith.sitofp %151 : vector<4x64xi32> to vector<4x64xf32>
    %c0_133 = arith.constant 0 : index
    %c0_134 = arith.constant 0 : index
    %c0_135 = arith.constant 0 : index
    %153 = vector.load %arg12[%c0_133, %c0_134, %c0_135] : memref<3x64x192xf32, #tpu.memory_space<vmem>>, vector<1x64x192xf32>
    %154 = vector.shape_cast %153 : vector<1x64x192xf32> to vector<64x192xf32>
    %c0_136 = arith.constant 0 : index
    %c0_137 = arith.constant 0 : index
    %c0_138 = arith.constant 0 : index
    %155 = vector.load %arg13[%c0_136, %c0_137, %c0_138] : memref<3x1x192xf32, #tpu.memory_space<vmem>>, vector<1x1x192xf32>
    %156 = vector.shape_cast %155 : vector<1x1x192xf32> to vector<1x192xf32>
    %cst_139 = arith.constant dense<0.000000e+00> : vector<8x192xf32>
    %157 = tpu.matmul %125, %154, %cst_139 {dimension_numbers = #tpu.dot_dimension_numbers<[1], [0], [0], [1], [0, 0, 1, 1], [], []>} : vector<8x64xf32>, vector<64x192xf32>, vector<8x192xf32> -> vector<8x192xf32>
    %158 = vector.broadcast %156 : vector<1x192xf32> to vector<8x192xf32>
    %159 = arith.addf %157, %158 : vector<8x192xf32>
    %cst_140 = arith.constant dense<0.000000e+00> : vector<8x192xf32>
    %160 = tpu.matmul %126, %154, %cst_140 {dimension_numbers = #tpu.dot_dimension_numbers<[1], [0], [0], [1], [0, 0, 1, 1], [], []>} : vector<8x64xf32>, vector<64x192xf32>, vector<8x192xf32> -> vector<8x192xf32>
    %161 = vector.broadcast %156 : vector<1x192xf32> to vector<8x192xf32>
    %162 = arith.addf %160, %161 : vector<8x192xf32>
    %163 = vector.extract_strided_slice %159 {offsets = [0, 0], sizes = [8, 64], strides = [1, 1]} : vector<8x192xf32> to vector<8x64xf32>
    %164 = vector.extract_strided_slice %159 {offsets = [0, 64], sizes = [8, 64], strides = [1, 1]} : vector<8x192xf32> to vector<8x64xf32>
    %165 = vector.extract_strided_slice %159 {offsets = [0, 128], sizes = [8, 64], strides = [1, 1]} : vector<8x192xf32> to vector<8x64xf32>
    %166 = vector.extract_strided_slice %162 {offsets = [0, 0], sizes = [8, 64], strides = [1, 1]} : vector<8x192xf32> to vector<8x64xf32>
    %167 = vector.extract_strided_slice %162 {offsets = [0, 64], sizes = [8, 64], strides = [1, 1]} : vector<8x192xf32> to vector<8x64xf32>
    %168 = vector.extract_strided_slice %162 {offsets = [0, 128], sizes = [8, 64], strides = [1, 1]} : vector<8x192xf32> to vector<8x64xf32>
    %169 = arith.mulf %163, %164 : vector<8x64xf32>
    %cst_141 = arith.constant dense<0.000000e+00> : vector<8x4xf32>
    %170 = tpu.matmul %169, %139, %cst_141 {dimension_numbers = #tpu.dot_dimension_numbers<[1], [0], [0], [1], [0, 0, 1, 1], [], []>} : vector<8x64xf32>, vector<64x4xf32>, vector<8x4xf32> -> vector<8x4xf32>
    %cst_142 = arith.constant 2.500000e-01 : f32
    %171 = vector.broadcast %cst_142 : f32 to vector<8x4xf32>
    %172 = arith.mulf %170, %171 : vector<8x4xf32>
    %173 = arith.mulf %163, %167 : vector<8x64xf32>
    %cst_143 = arith.constant dense<0.000000e+00> : vector<8x4xf32>
    %174 = tpu.matmul %173, %139, %cst_143 {dimension_numbers = #tpu.dot_dimension_numbers<[1], [0], [0], [1], [0, 0, 1, 1], [], []>} : vector<8x64xf32>, vector<64x4xf32>, vector<8x4xf32> -> vector<8x4xf32>
    %cst_144 = arith.constant 2.500000e-01 : f32
    %175 = vector.broadcast %cst_144 : f32 to vector<8x4xf32>
    %176 = arith.mulf %174, %175 : vector<8x4xf32>
    %177 = arith.mulf %166, %164 : vector<8x64xf32>
    %cst_145 = arith.constant dense<0.000000e+00> : vector<8x4xf32>
    %178 = tpu.matmul %177, %139, %cst_145 {dimension_numbers = #tpu.dot_dimension_numbers<[1], [0], [0], [1], [0, 0, 1, 1], [], []>} : vector<8x64xf32>, vector<64x4xf32>, vector<8x4xf32> -> vector<8x4xf32>
    %cst_146 = arith.constant 2.500000e-01 : f32
    %179 = vector.broadcast %cst_146 : f32 to vector<8x4xf32>
    %180 = arith.mulf %178, %179 : vector<8x4xf32>
    %181 = arith.mulf %166, %167 : vector<8x64xf32>
    %cst_147 = arith.constant dense<0.000000e+00> : vector<8x4xf32>
    %182 = tpu.matmul %181, %139, %cst_147 {dimension_numbers = #tpu.dot_dimension_numbers<[1], [0], [0], [1], [0, 0, 1, 1], [], []>} : vector<8x64xf32>, vector<64x4xf32>, vector<8x4xf32> -> vector<8x4xf32>
    %cst_148 = arith.constant 2.500000e-01 : f32
    %183 = vector.broadcast %cst_148 : f32 to vector<8x4xf32>
    %184 = arith.mulf %182, %183 : vector<8x4xf32>
    %185 = arith.maximumf %172, %176 : vector<8x4xf32>
    %186 = arith.subf %172, %185 : vector<8x4xf32>
    %187 = math.exp %186 : vector<8x4xf32>
    %188 = arith.subf %176, %185 : vector<8x4xf32>
    %189 = math.exp %188 : vector<8x4xf32>
    %190 = arith.addf %187, %189 : vector<8x4xf32>
    %191 = tpu.reciprocal %190 {approx = true} : vector<8x4xf32> -> vector<8x4xf32>
    %192 = arith.mulf %187, %191 : vector<8x4xf32>
    %193 = arith.mulf %189, %191 : vector<8x4xf32>
    %194 = arith.maximumf %180, %184 : vector<8x4xf32>
    %195 = arith.subf %180, %194 : vector<8x4xf32>
    %196 = math.exp %195 : vector<8x4xf32>
    %197 = arith.subf %184, %194 : vector<8x4xf32>
    %198 = math.exp %197 : vector<8x4xf32>
    %199 = arith.addf %196, %198 : vector<8x4xf32>
    %200 = tpu.reciprocal %199 {approx = true} : vector<8x4xf32> -> vector<8x4xf32>
    %201 = arith.mulf %196, %200 : vector<8x4xf32>
    %202 = arith.mulf %198, %200 : vector<8x4xf32>
    %cst_149 = arith.constant dense<0.000000e+00> : vector<8x64xf32>
    %203 = tpu.matmul %192, %152, %cst_149 {dimension_numbers = #tpu.dot_dimension_numbers<[1], [0], [0], [1], [0, 0, 1, 1], [], []>} : vector<8x4xf32>, vector<4x64xf32>, vector<8x64xf32> -> vector<8x64xf32>
    %204 = arith.mulf %203, %165 : vector<8x64xf32>
    %cst_150 = arith.constant dense<0.000000e+00> : vector<8x64xf32>
    %205 = tpu.matmul %193, %152, %cst_150 {dimension_numbers = #tpu.dot_dimension_numbers<[1], [0], [0], [1], [0, 0, 1, 1], [], []>} : vector<8x4xf32>, vector<4x64xf32>, vector<8x64xf32> -> vector<8x64xf32>
    %206 = arith.mulf %205, %168 : vector<8x64xf32>
    %207 = arith.addf %204, %206 : vector<8x64xf32>
    %cst_151 = arith.constant dense<0.000000e+00> : vector<8x64xf32>
    %208 = tpu.matmul %201, %152, %cst_151 {dimension_numbers = #tpu.dot_dimension_numbers<[1], [0], [0], [1], [0, 0, 1, 1], [], []>} : vector<8x4xf32>, vector<4x64xf32>, vector<8x64xf32> -> vector<8x64xf32>
    %209 = arith.mulf %208, %165 : vector<8x64xf32>
    %cst_152 = arith.constant dense<0.000000e+00> : vector<8x64xf32>
    %210 = tpu.matmul %202, %152, %cst_152 {dimension_numbers = #tpu.dot_dimension_numbers<[1], [0], [0], [1], [0, 0, 1, 1], [], []>} : vector<8x4xf32>, vector<4x64xf32>, vector<8x64xf32> -> vector<8x64xf32>
    %211 = arith.mulf %210, %168 : vector<8x64xf32>
    %212 = arith.addf %209, %211 : vector<8x64xf32>
    %c0_153 = arith.constant 0 : index
    %c0_154 = arith.constant 0 : index
    %c0_155 = arith.constant 0 : index
    %213 = vector.load %arg14[%c0_153, %c0_154, %c0_155] : memref<3x64x64xf32, #tpu.memory_space<vmem>>, vector<1x64x64xf32>
    %214 = vector.shape_cast %213 : vector<1x64x64xf32> to vector<64x64xf32>
    %c0_156 = arith.constant 0 : index
    %c0_157 = arith.constant 0 : index
    %c0_158 = arith.constant 0 : index
    %215 = vector.load %arg15[%c0_156, %c0_157, %c0_158] : memref<3x1x64xf32, #tpu.memory_space<vmem>>, vector<1x1x64xf32>
    %216 = vector.shape_cast %215 : vector<1x1x64xf32> to vector<1x64xf32>
    %c0_159 = arith.constant 0 : index
    %c0_160 = arith.constant 0 : index
    %c0_161 = arith.constant 0 : index
    %217 = vector.load %arg16[%c0_159, %c0_160, %c0_161] : memref<3x1x64xf32, #tpu.memory_space<vmem>>, vector<1x1x64xf32>
    %218 = vector.shape_cast %217 : vector<1x1x64xf32> to vector<1x64xf32>
    %c0_162 = arith.constant 0 : index
    %c0_163 = arith.constant 0 : index
    %c0_164 = arith.constant 0 : index
    %219 = vector.load %arg17[%c0_162, %c0_163, %c0_164] : memref<3x1x64xf32, #tpu.memory_space<vmem>>, vector<1x1x64xf32>
    %220 = vector.shape_cast %219 : vector<1x1x64xf32> to vector<1x64xf32>
    %cst_165 = arith.constant dense<0.000000e+00> : vector<8x64xf32>
    %221 = tpu.matmul %207, %214, %cst_165 {dimension_numbers = #tpu.dot_dimension_numbers<[1], [0], [0], [1], [0, 0, 1, 1], [], []>} : vector<8x64xf32>, vector<64x64xf32>, vector<8x64xf32> -> vector<8x64xf32>
    %222 = arith.addf %125, %221 : vector<8x64xf32>
    %223 = vector.broadcast %216 : vector<1x64xf32> to vector<8x64xf32>
    %224 = arith.addf %222, %223 : vector<8x64xf32>
    %cst_166 = arith.constant dense<0.000000e+00> : vector<8xf32>
    %225 = vector.multi_reduction <add>, %224, %cst_166 [1] : vector<8x64xf32> to vector<8xf32>
    %226 = vector.shape_cast %225 : vector<8xf32> to vector<8x1xf32>
    %cst_167 = arith.constant 6.400000e+01 : f32
    %227 = vector.broadcast %cst_167 : f32 to vector<8x1xf32>
    %228 = arith.divf %226, %227 : vector<8x1xf32>
    %229 = vector.broadcast %228 : vector<8x1xf32> to vector<8x64xf32>
    %230 = arith.subf %224, %229 : vector<8x64xf32>
    %231 = arith.mulf %230, %230 : vector<8x64xf32>
    %cst_168 = arith.constant dense<0.000000e+00> : vector<8xf32>
    %232 = vector.multi_reduction <add>, %231, %cst_168 [1] : vector<8x64xf32> to vector<8xf32>
    %233 = vector.shape_cast %232 : vector<8xf32> to vector<8x1xf32>
    %cst_169 = arith.constant 6.400000e+01 : f32
    %234 = vector.broadcast %cst_169 : f32 to vector<8x1xf32>
    %235 = arith.divf %233, %234 : vector<8x1xf32>
    %236 = vector.broadcast %228 : vector<8x1xf32> to vector<8x64xf32>
    %237 = arith.subf %224, %236 : vector<8x64xf32>
    %cst_170 = arith.constant 9.99999974E-6 : f32
    %238 = vector.broadcast %cst_170 : f32 to vector<8x1xf32>
    %239 = arith.addf %235, %238 : vector<8x1xf32>
    %240 = math.rsqrt %239 : vector<8x1xf32>
    %241 = vector.broadcast %240 : vector<8x1xf32> to vector<8x64xf32>
    %242 = arith.mulf %237, %241 : vector<8x64xf32>
    %243 = vector.broadcast %218 : vector<1x64xf32> to vector<8x64xf32>
    %244 = arith.mulf %242, %243 : vector<8x64xf32>
    %245 = vector.broadcast %220 : vector<1x64xf32> to vector<8x64xf32>
    %246 = arith.addf %244, %245 : vector<8x64xf32>
    %cst_171 = arith.constant dense<0.000000e+00> : vector<8x64xf32>
    %247 = tpu.matmul %212, %214, %cst_171 {dimension_numbers = #tpu.dot_dimension_numbers<[1], [0], [0], [1], [0, 0, 1, 1], [], []>} : vector<8x64xf32>, vector<64x64xf32>, vector<8x64xf32> -> vector<8x64xf32>
    %248 = arith.addf %126, %247 : vector<8x64xf32>
    %249 = vector.broadcast %216 : vector<1x64xf32> to vector<8x64xf32>
    %250 = arith.addf %248, %249 : vector<8x64xf32>
    %cst_172 = arith.constant dense<0.000000e+00> : vector<8xf32>
    %251 = vector.multi_reduction <add>, %250, %cst_172 [1] : vector<8x64xf32> to vector<8xf32>
    %252 = vector.shape_cast %251 : vector<8xf32> to vector<8x1xf32>
    %cst_173 = arith.constant 6.400000e+01 : f32
    %253 = vector.broadcast %cst_173 : f32 to vector<8x1xf32>
    %254 = arith.divf %252, %253 : vector<8x1xf32>
    %255 = vector.broadcast %254 : vector<8x1xf32> to vector<8x64xf32>
    %256 = arith.subf %250, %255 : vector<8x64xf32>
    %257 = arith.mulf %256, %256 : vector<8x64xf32>
    %cst_174 = arith.constant dense<0.000000e+00> : vector<8xf32>
    %258 = vector.multi_reduction <add>, %257, %cst_174 [1] : vector<8x64xf32> to vector<8xf32>
    %259 = vector.shape_cast %258 : vector<8xf32> to vector<8x1xf32>
    %cst_175 = arith.constant 6.400000e+01 : f32
    %260 = vector.broadcast %cst_175 : f32 to vector<8x1xf32>
    %261 = arith.divf %259, %260 : vector<8x1xf32>
    %262 = vector.broadcast %254 : vector<8x1xf32> to vector<8x64xf32>
    %263 = arith.subf %250, %262 : vector<8x64xf32>
    %cst_176 = arith.constant 9.99999974E-6 : f32
    %264 = vector.broadcast %cst_176 : f32 to vector<8x1xf32>
    %265 = arith.addf %261, %264 : vector<8x1xf32>
    %266 = math.rsqrt %265 : vector<8x1xf32>
    %267 = vector.broadcast %266 : vector<8x1xf32> to vector<8x64xf32>
    %268 = arith.mulf %263, %267 : vector<8x64xf32>
    %269 = vector.broadcast %218 : vector<1x64xf32> to vector<8x64xf32>
    %270 = arith.mulf %268, %269 : vector<8x64xf32>
    %271 = vector.broadcast %220 : vector<1x64xf32> to vector<8x64xf32>
    %272 = arith.addf %270, %271 : vector<8x64xf32>
    %c0_177 = arith.constant 0 : index
    %c0_178 = arith.constant 0 : index
    %c0_179 = arith.constant 0 : index
    %273 = vector.load %arg18[%c0_177, %c0_178, %c0_179] : memref<3x64x256xf32, #tpu.memory_space<vmem>>, vector<1x64x256xf32>
    %274 = vector.shape_cast %273 : vector<1x64x256xf32> to vector<64x256xf32>
    %c0_180 = arith.constant 0 : index
    %c0_181 = arith.constant 0 : index
    %c0_182 = arith.constant 0 : index
    %275 = vector.load %arg19[%c0_180, %c0_181, %c0_182] : memref<3x1x256xf32, #tpu.memory_space<vmem>>, vector<1x1x256xf32>
    %276 = vector.shape_cast %275 : vector<1x1x256xf32> to vector<1x256xf32>
    %c0_183 = arith.constant 0 : index
    %c0_184 = arith.constant 0 : index
    %c0_185 = arith.constant 0 : index
    %277 = vector.load %arg20[%c0_183, %c0_184, %c0_185] : memref<3x256x64xf32, #tpu.memory_space<vmem>>, vector<1x256x64xf32>
    %278 = vector.shape_cast %277 : vector<1x256x64xf32> to vector<256x64xf32>
    %c0_186 = arith.constant 0 : index
    %c0_187 = arith.constant 0 : index
    %c0_188 = arith.constant 0 : index
    %279 = vector.load %arg21[%c0_186, %c0_187, %c0_188] : memref<3x1x64xf32, #tpu.memory_space<vmem>>, vector<1x1x64xf32>
    %280 = vector.shape_cast %279 : vector<1x1x64xf32> to vector<1x64xf32>
    %c0_189 = arith.constant 0 : index
    %c0_190 = arith.constant 0 : index
    %c0_191 = arith.constant 0 : index
    %281 = vector.load %arg22[%c0_189, %c0_190, %c0_191] : memref<3x1x64xf32, #tpu.memory_space<vmem>>, vector<1x1x64xf32>
    %282 = vector.shape_cast %281 : vector<1x1x64xf32> to vector<1x64xf32>
    %c0_192 = arith.constant 0 : index
    %c0_193 = arith.constant 0 : index
    %c0_194 = arith.constant 0 : index
    %283 = vector.load %arg23[%c0_192, %c0_193, %c0_194] : memref<3x1x64xf32, #tpu.memory_space<vmem>>, vector<1x1x64xf32>
    %284 = vector.shape_cast %283 : vector<1x1x64xf32> to vector<1x64xf32>
    %cst_195 = arith.constant dense<0.000000e+00> : vector<8x256xf32>
    %285 = tpu.matmul %246, %274, %cst_195 {dimension_numbers = #tpu.dot_dimension_numbers<[1], [0], [0], [1], [0, 0, 1, 1], [], []>} : vector<8x64xf32>, vector<64x256xf32>, vector<8x256xf32> -> vector<8x256xf32>
    %286 = vector.broadcast %276 : vector<1x256xf32> to vector<8x256xf32>
    %287 = arith.addf %285, %286 : vector<8x256xf32>
    %cst_196 = arith.constant 0.000000e+00 : f32
    %288 = vector.broadcast %cst_196 : f32 to vector<8x256xf32>
    %289 = arith.maximumf %287, %288 : vector<8x256xf32>
    %cst_197 = arith.constant dense<0.000000e+00> : vector<8x64xf32>
    %290 = tpu.matmul %289, %278, %cst_197 {dimension_numbers = #tpu.dot_dimension_numbers<[1], [0], [0], [1], [0, 0, 1, 1], [], []>} : vector<8x256xf32>, vector<256x64xf32>, vector<8x64xf32> -> vector<8x64xf32>
    %291 = vector.broadcast %280 : vector<1x64xf32> to vector<8x64xf32>
    %292 = arith.addf %290, %291 : vector<8x64xf32>
    %293 = arith.addf %246, %292 : vector<8x64xf32>
    %cst_198 = arith.constant dense<0.000000e+00> : vector<8xf32>
    %294 = vector.multi_reduction <add>, %293, %cst_198 [1] : vector<8x64xf32> to vector<8xf32>
    %295 = vector.shape_cast %294 : vector<8xf32> to vector<8x1xf32>
    %cst_199 = arith.constant 6.400000e+01 : f32
    %296 = vector.broadcast %cst_199 : f32 to vector<8x1xf32>
    %297 = arith.divf %295, %296 : vector<8x1xf32>
    %298 = vector.broadcast %297 : vector<8x1xf32> to vector<8x64xf32>
    %299 = arith.subf %293, %298 : vector<8x64xf32>
    %300 = arith.mulf %299, %299 : vector<8x64xf32>
    %cst_200 = arith.constant dense<0.000000e+00> : vector<8xf32>
    %301 = vector.multi_reduction <add>, %300, %cst_200 [1] : vector<8x64xf32> to vector<8xf32>
    %302 = vector.shape_cast %301 : vector<8xf32> to vector<8x1xf32>
    %cst_201 = arith.constant 6.400000e+01 : f32
    %303 = vector.broadcast %cst_201 : f32 to vector<8x1xf32>
    %304 = arith.divf %302, %303 : vector<8x1xf32>
    %305 = vector.broadcast %297 : vector<8x1xf32> to vector<8x64xf32>
    %306 = arith.subf %293, %305 : vector<8x64xf32>
    %cst_202 = arith.constant 9.99999974E-6 : f32
    %307 = vector.broadcast %cst_202 : f32 to vector<8x1xf32>
    %308 = arith.addf %304, %307 : vector<8x1xf32>
    %309 = math.rsqrt %308 : vector<8x1xf32>
    %310 = vector.broadcast %309 : vector<8x1xf32> to vector<8x64xf32>
    %311 = arith.mulf %306, %310 : vector<8x64xf32>
    %312 = vector.broadcast %282 : vector<1x64xf32> to vector<8x64xf32>
    %313 = arith.mulf %311, %312 : vector<8x64xf32>
    %314 = vector.broadcast %284 : vector<1x64xf32> to vector<8x64xf32>
    %315 = arith.addf %313, %314 : vector<8x64xf32>
    %cst_203 = arith.constant dense<0.000000e+00> : vector<8x256xf32>
    %316 = tpu.matmul %272, %274, %cst_203 {dimension_numbers = #tpu.dot_dimension_numbers<[1], [0], [0], [1], [0, 0, 1, 1], [], []>} : vector<8x64xf32>, vector<64x256xf32>, vector<8x256xf32> -> vector<8x256xf32>
    %317 = vector.broadcast %276 : vector<1x256xf32> to vector<8x256xf32>
    %318 = arith.addf %316, %317 : vector<8x256xf32>
    %cst_204 = arith.constant 0.000000e+00 : f32
    %319 = vector.broadcast %cst_204 : f32 to vector<8x256xf32>
    %320 = arith.maximumf %318, %319 : vector<8x256xf32>
    %cst_205 = arith.constant dense<0.000000e+00> : vector<8x64xf32>
    %321 = tpu.matmul %320, %278, %cst_205 {dimension_numbers = #tpu.dot_dimension_numbers<[1], [0], [0], [1], [0, 0, 1, 1], [], []>} : vector<8x256xf32>, vector<256x64xf32>, vector<8x64xf32> -> vector<8x64xf32>
    %322 = vector.broadcast %280 : vector<1x64xf32> to vector<8x64xf32>
    %323 = arith.addf %321, %322 : vector<8x64xf32>
    %324 = arith.addf %272, %323 : vector<8x64xf32>
    %cst_206 = arith.constant dense<0.000000e+00> : vector<8xf32>
    %325 = vector.multi_reduction <add>, %324, %cst_206 [1] : vector<8x64xf32> to vector<8xf32>
    %326 = vector.shape_cast %325 : vector<8xf32> to vector<8x1xf32>
    %cst_207 = arith.constant 6.400000e+01 : f32
    %327 = vector.broadcast %cst_207 : f32 to vector<8x1xf32>
    %328 = arith.divf %326, %327 : vector<8x1xf32>
    %329 = vector.broadcast %328 : vector<8x1xf32> to vector<8x64xf32>
    %330 = arith.subf %324, %329 : vector<8x64xf32>
    %331 = arith.mulf %330, %330 : vector<8x64xf32>
    %cst_208 = arith.constant dense<0.000000e+00> : vector<8xf32>
    %332 = vector.multi_reduction <add>, %331, %cst_208 [1] : vector<8x64xf32> to vector<8xf32>
    %333 = vector.shape_cast %332 : vector<8xf32> to vector<8x1xf32>
    %cst_209 = arith.constant 6.400000e+01 : f32
    %334 = vector.broadcast %cst_209 : f32 to vector<8x1xf32>
    %335 = arith.divf %333, %334 : vector<8x1xf32>
    %336 = vector.broadcast %328 : vector<8x1xf32> to vector<8x64xf32>
    %337 = arith.subf %324, %336 : vector<8x64xf32>
    %cst_210 = arith.constant 9.99999974E-6 : f32
    %338 = vector.broadcast %cst_210 : f32 to vector<8x1xf32>
    %339 = arith.addf %335, %338 : vector<8x1xf32>
    %340 = math.rsqrt %339 : vector<8x1xf32>
    %341 = vector.broadcast %340 : vector<8x1xf32> to vector<8x64xf32>
    %342 = arith.mulf %337, %341 : vector<8x64xf32>
    %343 = vector.broadcast %282 : vector<1x64xf32> to vector<8x64xf32>
    %344 = arith.mulf %342, %343 : vector<8x64xf32>
    %345 = vector.broadcast %284 : vector<1x64xf32> to vector<8x64xf32>
    %346 = arith.addf %344, %345 : vector<8x64xf32>
    %c1_211 = arith.constant 1 : index
    %c0_212 = arith.constant 0 : index
    %c0_213 = arith.constant 0 : index
    %347 = vector.load %arg12[%c1_211, %c0_212, %c0_213] : memref<3x64x192xf32, #tpu.memory_space<vmem>>, vector<1x64x192xf32>
    %348 = vector.shape_cast %347 : vector<1x64x192xf32> to vector<64x192xf32>
    %c1_214 = arith.constant 1 : index
    %c0_215 = arith.constant 0 : index
    %c0_216 = arith.constant 0 : index
    %349 = vector.load %arg13[%c1_214, %c0_215, %c0_216] : memref<3x1x192xf32, #tpu.memory_space<vmem>>, vector<1x1x192xf32>
    %350 = vector.shape_cast %349 : vector<1x1x192xf32> to vector<1x192xf32>
    %cst_217 = arith.constant dense<0.000000e+00> : vector<8x192xf32>
    %351 = tpu.matmul %315, %348, %cst_217 {dimension_numbers = #tpu.dot_dimension_numbers<[1], [0], [0], [1], [0, 0, 1, 1], [], []>} : vector<8x64xf32>, vector<64x192xf32>, vector<8x192xf32> -> vector<8x192xf32>
    %352 = vector.broadcast %350 : vector<1x192xf32> to vector<8x192xf32>
    %353 = arith.addf %351, %352 : vector<8x192xf32>
    %cst_218 = arith.constant dense<0.000000e+00> : vector<8x192xf32>
    %354 = tpu.matmul %346, %348, %cst_218 {dimension_numbers = #tpu.dot_dimension_numbers<[1], [0], [0], [1], [0, 0, 1, 1], [], []>} : vector<8x64xf32>, vector<64x192xf32>, vector<8x192xf32> -> vector<8x192xf32>
    %355 = vector.broadcast %350 : vector<1x192xf32> to vector<8x192xf32>
    %356 = arith.addf %354, %355 : vector<8x192xf32>
    %357 = vector.extract_strided_slice %353 {offsets = [0, 0], sizes = [8, 64], strides = [1, 1]} : vector<8x192xf32> to vector<8x64xf32>
    %358 = vector.extract_strided_slice %353 {offsets = [0, 64], sizes = [8, 64], strides = [1, 1]} : vector<8x192xf32> to vector<8x64xf32>
    %359 = vector.extract_strided_slice %353 {offsets = [0, 128], sizes = [8, 64], strides = [1, 1]} : vector<8x192xf32> to vector<8x64xf32>
    %360 = vector.extract_strided_slice %356 {offsets = [0, 0], sizes = [8, 64], strides = [1, 1]} : vector<8x192xf32> to vector<8x64xf32>
    %361 = vector.extract_strided_slice %356 {offsets = [0, 64], sizes = [8, 64], strides = [1, 1]} : vector<8x192xf32> to vector<8x64xf32>
    %362 = vector.extract_strided_slice %356 {offsets = [0, 128], sizes = [8, 64], strides = [1, 1]} : vector<8x192xf32> to vector<8x64xf32>
    %363 = arith.mulf %357, %358 : vector<8x64xf32>
    %cst_219 = arith.constant dense<0.000000e+00> : vector<8x4xf32>
    %364 = tpu.matmul %363, %139, %cst_219 {dimension_numbers = #tpu.dot_dimension_numbers<[1], [0], [0], [1], [0, 0, 1, 1], [], []>} : vector<8x64xf32>, vector<64x4xf32>, vector<8x4xf32> -> vector<8x4xf32>
    %cst_220 = arith.constant 2.500000e-01 : f32
    %365 = vector.broadcast %cst_220 : f32 to vector<8x4xf32>
    %366 = arith.mulf %364, %365 : vector<8x4xf32>
    %367 = arith.mulf %357, %361 : vector<8x64xf32>
    %cst_221 = arith.constant dense<0.000000e+00> : vector<8x4xf32>
    %368 = tpu.matmul %367, %139, %cst_221 {dimension_numbers = #tpu.dot_dimension_numbers<[1], [0], [0], [1], [0, 0, 1, 1], [], []>} : vector<8x64xf32>, vector<64x4xf32>, vector<8x4xf32> -> vector<8x4xf32>
    %cst_222 = arith.constant 2.500000e-01 : f32
    %369 = vector.broadcast %cst_222 : f32 to vector<8x4xf32>
    %370 = arith.mulf %368, %369 : vector<8x4xf32>
    %371 = arith.mulf %360, %358 : vector<8x64xf32>
    %cst_223 = arith.constant dense<0.000000e+00> : vector<8x4xf32>
    %372 = tpu.matmul %371, %139, %cst_223 {dimension_numbers = #tpu.dot_dimension_numbers<[1], [0], [0], [1], [0, 0, 1, 1], [], []>} : vector<8x64xf32>, vector<64x4xf32>, vector<8x4xf32> -> vector<8x4xf32>
    %cst_224 = arith.constant 2.500000e-01 : f32
    %373 = vector.broadcast %cst_224 : f32 to vector<8x4xf32>
    %374 = arith.mulf %372, %373 : vector<8x4xf32>
    %375 = arith.mulf %360, %361 : vector<8x64xf32>
    %cst_225 = arith.constant dense<0.000000e+00> : vector<8x4xf32>
    %376 = tpu.matmul %375, %139, %cst_225 {dimension_numbers = #tpu.dot_dimension_numbers<[1], [0], [0], [1], [0, 0, 1, 1], [], []>} : vector<8x64xf32>, vector<64x4xf32>, vector<8x4xf32> -> vector<8x4xf32>
    %cst_226 = arith.constant 2.500000e-01 : f32
    %377 = vector.broadcast %cst_226 : f32 to vector<8x4xf32>
    %378 = arith.mulf %376, %377 : vector<8x4xf32>
    %379 = arith.maximumf %366, %370 : vector<8x4xf32>
    %380 = arith.subf %366, %379 : vector<8x4xf32>
    %381 = math.exp %380 : vector<8x4xf32>
    %382 = arith.subf %370, %379 : vector<8x4xf32>
    %383 = math.exp %382 : vector<8x4xf32>
    %384 = arith.addf %381, %383 : vector<8x4xf32>
    %385 = tpu.reciprocal %384 {approx = true} : vector<8x4xf32> -> vector<8x4xf32>
    %386 = arith.mulf %381, %385 : vector<8x4xf32>
    %387 = arith.mulf %383, %385 : vector<8x4xf32>
    %388 = arith.maximumf %374, %378 : vector<8x4xf32>
    %389 = arith.subf %374, %388 : vector<8x4xf32>
    %390 = math.exp %389 : vector<8x4xf32>
    %391 = arith.subf %378, %388 : vector<8x4xf32>
    %392 = math.exp %391 : vector<8x4xf32>
    %393 = arith.addf %390, %392 : vector<8x4xf32>
    %394 = tpu.reciprocal %393 {approx = true} : vector<8x4xf32> -> vector<8x4xf32>
    %395 = arith.mulf %390, %394 : vector<8x4xf32>
    %396 = arith.mulf %392, %394 : vector<8x4xf32>
    %cst_227 = arith.constant dense<0.000000e+00> : vector<8x64xf32>
    %397 = tpu.matmul %386, %152, %cst_227 {dimension_numbers = #tpu.dot_dimension_numbers<[1], [0], [0], [1], [0, 0, 1, 1], [], []>} : vector<8x4xf32>, vector<4x64xf32>, vector<8x64xf32> -> vector<8x64xf32>
    %398 = arith.mulf %397, %359 : vector<8x64xf32>
    %cst_228 = arith.constant dense<0.000000e+00> : vector<8x64xf32>
    %399 = tpu.matmul %387, %152, %cst_228 {dimension_numbers = #tpu.dot_dimension_numbers<[1], [0], [0], [1], [0, 0, 1, 1], [], []>} : vector<8x4xf32>, vector<4x64xf32>, vector<8x64xf32> -> vector<8x64xf32>
    %400 = arith.mulf %399, %362 : vector<8x64xf32>
    %401 = arith.addf %398, %400 : vector<8x64xf32>
    %cst_229 = arith.constant dense<0.000000e+00> : vector<8x64xf32>
    %402 = tpu.matmul %395, %152, %cst_229 {dimension_numbers = #tpu.dot_dimension_numbers<[1], [0], [0], [1], [0, 0, 1, 1], [], []>} : vector<8x4xf32>, vector<4x64xf32>, vector<8x64xf32> -> vector<8x64xf32>
    %403 = arith.mulf %402, %359 : vector<8x64xf32>
    %cst_230 = arith.constant dense<0.000000e+00> : vector<8x64xf32>
    %404 = tpu.matmul %396, %152, %cst_230 {dimension_numbers = #tpu.dot_dimension_numbers<[1], [0], [0], [1], [0, 0, 1, 1], [], []>} : vector<8x4xf32>, vector<4x64xf32>, vector<8x64xf32> -> vector<8x64xf32>
    %405 = arith.mulf %404, %362 : vector<8x64xf32>
    %406 = arith.addf %403, %405 : vector<8x64xf32>
    %c1_231 = arith.constant 1 : index
    %c0_232 = arith.constant 0 : index
    %c0_233 = arith.constant 0 : index
    %407 = vector.load %arg14[%c1_231, %c0_232, %c0_233] : memref<3x64x64xf32, #tpu.memory_space<vmem>>, vector<1x64x64xf32>
    %408 = vector.shape_cast %407 : vector<1x64x64xf32> to vector<64x64xf32>
    %c1_234 = arith.constant 1 : index
    %c0_235 = arith.constant 0 : index
    %c0_236 = arith.constant 0 : index
    %409 = vector.load %arg15[%c1_234, %c0_235, %c0_236] : memref<3x1x64xf32, #tpu.memory_space<vmem>>, vector<1x1x64xf32>
    %410 = vector.shape_cast %409 : vector<1x1x64xf32> to vector<1x64xf32>
    %c1_237 = arith.constant 1 : index
    %c0_238 = arith.constant 0 : index
    %c0_239 = arith.constant 0 : index
    %411 = vector.load %arg16[%c1_237, %c0_238, %c0_239] : memref<3x1x64xf32, #tpu.memory_space<vmem>>, vector<1x1x64xf32>
    %412 = vector.shape_cast %411 : vector<1x1x64xf32> to vector<1x64xf32>
    %c1_240 = arith.constant 1 : index
    %c0_241 = arith.constant 0 : index
    %c0_242 = arith.constant 0 : index
    %413 = vector.load %arg17[%c1_240, %c0_241, %c0_242] : memref<3x1x64xf32, #tpu.memory_space<vmem>>, vector<1x1x64xf32>
    %414 = vector.shape_cast %413 : vector<1x1x64xf32> to vector<1x64xf32>
    %cst_243 = arith.constant dense<0.000000e+00> : vector<8x64xf32>
    %415 = tpu.matmul %401, %408, %cst_243 {dimension_numbers = #tpu.dot_dimension_numbers<[1], [0], [0], [1], [0, 0, 1, 1], [], []>} : vector<8x64xf32>, vector<64x64xf32>, vector<8x64xf32> -> vector<8x64xf32>
    %416 = arith.addf %315, %415 : vector<8x64xf32>
    %417 = vector.broadcast %410 : vector<1x64xf32> to vector<8x64xf32>
    %418 = arith.addf %416, %417 : vector<8x64xf32>
    %cst_244 = arith.constant dense<0.000000e+00> : vector<8xf32>
    %419 = vector.multi_reduction <add>, %418, %cst_244 [1] : vector<8x64xf32> to vector<8xf32>
    %420 = vector.shape_cast %419 : vector<8xf32> to vector<8x1xf32>
    %cst_245 = arith.constant 6.400000e+01 : f32
    %421 = vector.broadcast %cst_245 : f32 to vector<8x1xf32>
    %422 = arith.divf %420, %421 : vector<8x1xf32>
    %423 = vector.broadcast %422 : vector<8x1xf32> to vector<8x64xf32>
    %424 = arith.subf %418, %423 : vector<8x64xf32>
    %425 = arith.mulf %424, %424 : vector<8x64xf32>
    %cst_246 = arith.constant dense<0.000000e+00> : vector<8xf32>
    %426 = vector.multi_reduction <add>, %425, %cst_246 [1] : vector<8x64xf32> to vector<8xf32>
    %427 = vector.shape_cast %426 : vector<8xf32> to vector<8x1xf32>
    %cst_247 = arith.constant 6.400000e+01 : f32
    %428 = vector.broadcast %cst_247 : f32 to vector<8x1xf32>
    %429 = arith.divf %427, %428 : vector<8x1xf32>
    %430 = vector.broadcast %422 : vector<8x1xf32> to vector<8x64xf32>
    %431 = arith.subf %418, %430 : vector<8x64xf32>
    %cst_248 = arith.constant 9.99999974E-6 : f32
    %432 = vector.broadcast %cst_248 : f32 to vector<8x1xf32>
    %433 = arith.addf %429, %432 : vector<8x1xf32>
    %434 = math.rsqrt %433 : vector<8x1xf32>
    %435 = vector.broadcast %434 : vector<8x1xf32> to vector<8x64xf32>
    %436 = arith.mulf %431, %435 : vector<8x64xf32>
    %437 = vector.broadcast %412 : vector<1x64xf32> to vector<8x64xf32>
    %438 = arith.mulf %436, %437 : vector<8x64xf32>
    %439 = vector.broadcast %414 : vector<1x64xf32> to vector<8x64xf32>
    %440 = arith.addf %438, %439 : vector<8x64xf32>
    %cst_249 = arith.constant dense<0.000000e+00> : vector<8x64xf32>
    %441 = tpu.matmul %406, %408, %cst_249 {dimension_numbers = #tpu.dot_dimension_numbers<[1], [0], [0], [1], [0, 0, 1, 1], [], []>} : vector<8x64xf32>, vector<64x64xf32>, vector<8x64xf32> -> vector<8x64xf32>
    %442 = arith.addf %346, %441 : vector<8x64xf32>
    %443 = vector.broadcast %410 : vector<1x64xf32> to vector<8x64xf32>
    %444 = arith.addf %442, %443 : vector<8x64xf32>
    %cst_250 = arith.constant dense<0.000000e+00> : vector<8xf32>
    %445 = vector.multi_reduction <add>, %444, %cst_250 [1] : vector<8x64xf32> to vector<8xf32>
    %446 = vector.shape_cast %445 : vector<8xf32> to vector<8x1xf32>
    %cst_251 = arith.constant 6.400000e+01 : f32
    %447 = vector.broadcast %cst_251 : f32 to vector<8x1xf32>
    %448 = arith.divf %446, %447 : vector<8x1xf32>
    %449 = vector.broadcast %448 : vector<8x1xf32> to vector<8x64xf32>
    %450 = arith.subf %444, %449 : vector<8x64xf32>
    %451 = arith.mulf %450, %450 : vector<8x64xf32>
    %cst_252 = arith.constant dense<0.000000e+00> : vector<8xf32>
    %452 = vector.multi_reduction <add>, %451, %cst_252 [1] : vector<8x64xf32> to vector<8xf32>
    %453 = vector.shape_cast %452 : vector<8xf32> to vector<8x1xf32>
    %cst_253 = arith.constant 6.400000e+01 : f32
    %454 = vector.broadcast %cst_253 : f32 to vector<8x1xf32>
    %455 = arith.divf %453, %454 : vector<8x1xf32>
    %456 = vector.broadcast %448 : vector<8x1xf32> to vector<8x64xf32>
    %457 = arith.subf %444, %456 : vector<8x64xf32>
    %cst_254 = arith.constant 9.99999974E-6 : f32
    %458 = vector.broadcast %cst_254 : f32 to vector<8x1xf32>
    %459 = arith.addf %455, %458 : vector<8x1xf32>
    %460 = math.rsqrt %459 : vector<8x1xf32>
    %461 = vector.broadcast %460 : vector<8x1xf32> to vector<8x64xf32>
    %462 = arith.mulf %457, %461 : vector<8x64xf32>
    %463 = vector.broadcast %412 : vector<1x64xf32> to vector<8x64xf32>
    %464 = arith.mulf %462, %463 : vector<8x64xf32>
    %465 = vector.broadcast %414 : vector<1x64xf32> to vector<8x64xf32>
    %466 = arith.addf %464, %465 : vector<8x64xf32>
    %c1_255 = arith.constant 1 : index
    %c0_256 = arith.constant 0 : index
    %c0_257 = arith.constant 0 : index
    %467 = vector.load %arg18[%c1_255, %c0_256, %c0_257] : memref<3x64x256xf32, #tpu.memory_space<vmem>>, vector<1x64x256xf32>
    %468 = vector.shape_cast %467 : vector<1x64x256xf32> to vector<64x256xf32>
    %c1_258 = arith.constant 1 : index
    %c0_259 = arith.constant 0 : index
    %c0_260 = arith.constant 0 : index
    %469 = vector.load %arg19[%c1_258, %c0_259, %c0_260] : memref<3x1x256xf32, #tpu.memory_space<vmem>>, vector<1x1x256xf32>
    %470 = vector.shape_cast %469 : vector<1x1x256xf32> to vector<1x256xf32>
    %c1_261 = arith.constant 1 : index
    %c0_262 = arith.constant 0 : index
    %c0_263 = arith.constant 0 : index
    %471 = vector.load %arg20[%c1_261, %c0_262, %c0_263] : memref<3x256x64xf32, #tpu.memory_space<vmem>>, vector<1x256x64xf32>
    %472 = vector.shape_cast %471 : vector<1x256x64xf32> to vector<256x64xf32>
    %c1_264 = arith.constant 1 : index
    %c0_265 = arith.constant 0 : index
    %c0_266 = arith.constant 0 : index
    %473 = vector.load %arg21[%c1_264, %c0_265, %c0_266] : memref<3x1x64xf32, #tpu.memory_space<vmem>>, vector<1x1x64xf32>
    %474 = vector.shape_cast %473 : vector<1x1x64xf32> to vector<1x64xf32>
    %c1_267 = arith.constant 1 : index
    %c0_268 = arith.constant 0 : index
    %c0_269 = arith.constant 0 : index
    %475 = vector.load %arg22[%c1_267, %c0_268, %c0_269] : memref<3x1x64xf32, #tpu.memory_space<vmem>>, vector<1x1x64xf32>
    %476 = vector.shape_cast %475 : vector<1x1x64xf32> to vector<1x64xf32>
    %c1_270 = arith.constant 1 : index
    %c0_271 = arith.constant 0 : index
    %c0_272 = arith.constant 0 : index
    %477 = vector.load %arg23[%c1_270, %c0_271, %c0_272] : memref<3x1x64xf32, #tpu.memory_space<vmem>>, vector<1x1x64xf32>
    %478 = vector.shape_cast %477 : vector<1x1x64xf32> to vector<1x64xf32>
    %cst_273 = arith.constant dense<0.000000e+00> : vector<8x256xf32>
    %479 = tpu.matmul %440, %468, %cst_273 {dimension_numbers = #tpu.dot_dimension_numbers<[1], [0], [0], [1], [0, 0, 1, 1], [], []>} : vector<8x64xf32>, vector<64x256xf32>, vector<8x256xf32> -> vector<8x256xf32>
    %480 = vector.broadcast %470 : vector<1x256xf32> to vector<8x256xf32>
    %481 = arith.addf %479, %480 : vector<8x256xf32>
    %cst_274 = arith.constant 0.000000e+00 : f32
    %482 = vector.broadcast %cst_274 : f32 to vector<8x256xf32>
    %483 = arith.maximumf %481, %482 : vector<8x256xf32>
    %cst_275 = arith.constant dense<0.000000e+00> : vector<8x64xf32>
    %484 = tpu.matmul %483, %472, %cst_275 {dimension_numbers = #tpu.dot_dimension_numbers<[1], [0], [0], [1], [0, 0, 1, 1], [], []>} : vector<8x256xf32>, vector<256x64xf32>, vector<8x64xf32> -> vector<8x64xf32>
    %485 = vector.broadcast %474 : vector<1x64xf32> to vector<8x64xf32>
    %486 = arith.addf %484, %485 : vector<8x64xf32>
    %487 = arith.addf %440, %486 : vector<8x64xf32>
    %cst_276 = arith.constant dense<0.000000e+00> : vector<8xf32>
    %488 = vector.multi_reduction <add>, %487, %cst_276 [1] : vector<8x64xf32> to vector<8xf32>
    %489 = vector.shape_cast %488 : vector<8xf32> to vector<8x1xf32>
    %cst_277 = arith.constant 6.400000e+01 : f32
    %490 = vector.broadcast %cst_277 : f32 to vector<8x1xf32>
    %491 = arith.divf %489, %490 : vector<8x1xf32>
    %492 = vector.broadcast %491 : vector<8x1xf32> to vector<8x64xf32>
    %493 = arith.subf %487, %492 : vector<8x64xf32>
    %494 = arith.mulf %493, %493 : vector<8x64xf32>
    %cst_278 = arith.constant dense<0.000000e+00> : vector<8xf32>
    %495 = vector.multi_reduction <add>, %494, %cst_278 [1] : vector<8x64xf32> to vector<8xf32>
    %496 = vector.shape_cast %495 : vector<8xf32> to vector<8x1xf32>
    %cst_279 = arith.constant 6.400000e+01 : f32
    %497 = vector.broadcast %cst_279 : f32 to vector<8x1xf32>
    %498 = arith.divf %496, %497 : vector<8x1xf32>
    %499 = vector.broadcast %491 : vector<8x1xf32> to vector<8x64xf32>
    %500 = arith.subf %487, %499 : vector<8x64xf32>
    %cst_280 = arith.constant 9.99999974E-6 : f32
    %501 = vector.broadcast %cst_280 : f32 to vector<8x1xf32>
    %502 = arith.addf %498, %501 : vector<8x1xf32>
    %503 = math.rsqrt %502 : vector<8x1xf32>
    %504 = vector.broadcast %503 : vector<8x1xf32> to vector<8x64xf32>
    %505 = arith.mulf %500, %504 : vector<8x64xf32>
    %506 = vector.broadcast %476 : vector<1x64xf32> to vector<8x64xf32>
    %507 = arith.mulf %505, %506 : vector<8x64xf32>
    %508 = vector.broadcast %478 : vector<1x64xf32> to vector<8x64xf32>
    %509 = arith.addf %507, %508 : vector<8x64xf32>
    %cst_281 = arith.constant dense<0.000000e+00> : vector<8x256xf32>
    %510 = tpu.matmul %466, %468, %cst_281 {dimension_numbers = #tpu.dot_dimension_numbers<[1], [0], [0], [1], [0, 0, 1, 1], [], []>} : vector<8x64xf32>, vector<64x256xf32>, vector<8x256xf32> -> vector<8x256xf32>
    %511 = vector.broadcast %470 : vector<1x256xf32> to vector<8x256xf32>
    %512 = arith.addf %510, %511 : vector<8x256xf32>
    %cst_282 = arith.constant 0.000000e+00 : f32
    %513 = vector.broadcast %cst_282 : f32 to vector<8x256xf32>
    %514 = arith.maximumf %512, %513 : vector<8x256xf32>
    %cst_283 = arith.constant dense<0.000000e+00> : vector<8x64xf32>
    %515 = tpu.matmul %514, %472, %cst_283 {dimension_numbers = #tpu.dot_dimension_numbers<[1], [0], [0], [1], [0, 0, 1, 1], [], []>} : vector<8x256xf32>, vector<256x64xf32>, vector<8x64xf32> -> vector<8x64xf32>
    %516 = vector.broadcast %474 : vector<1x64xf32> to vector<8x64xf32>
    %517 = arith.addf %515, %516 : vector<8x64xf32>
    %518 = arith.addf %466, %517 : vector<8x64xf32>
    %cst_284 = arith.constant dense<0.000000e+00> : vector<8xf32>
    %519 = vector.multi_reduction <add>, %518, %cst_284 [1] : vector<8x64xf32> to vector<8xf32>
    %520 = vector.shape_cast %519 : vector<8xf32> to vector<8x1xf32>
    %cst_285 = arith.constant 6.400000e+01 : f32
    %521 = vector.broadcast %cst_285 : f32 to vector<8x1xf32>
    %522 = arith.divf %520, %521 : vector<8x1xf32>
    %523 = vector.broadcast %522 : vector<8x1xf32> to vector<8x64xf32>
    %524 = arith.subf %518, %523 : vector<8x64xf32>
    %525 = arith.mulf %524, %524 : vector<8x64xf32>
    %cst_286 = arith.constant dense<0.000000e+00> : vector<8xf32>
    %526 = vector.multi_reduction <add>, %525, %cst_286 [1] : vector<8x64xf32> to vector<8xf32>
    %527 = vector.shape_cast %526 : vector<8xf32> to vector<8x1xf32>
    %cst_287 = arith.constant 6.400000e+01 : f32
    %528 = vector.broadcast %cst_287 : f32 to vector<8x1xf32>
    %529 = arith.divf %527, %528 : vector<8x1xf32>
    %530 = vector.broadcast %522 : vector<8x1xf32> to vector<8x64xf32>
    %531 = arith.subf %518, %530 : vector<8x64xf32>
    %cst_288 = arith.constant 9.99999974E-6 : f32
    %532 = vector.broadcast %cst_288 : f32 to vector<8x1xf32>
    %533 = arith.addf %529, %532 : vector<8x1xf32>
    %534 = math.rsqrt %533 : vector<8x1xf32>
    %535 = vector.broadcast %534 : vector<8x1xf32> to vector<8x64xf32>
    %536 = arith.mulf %531, %535 : vector<8x64xf32>
    %537 = vector.broadcast %476 : vector<1x64xf32> to vector<8x64xf32>
    %538 = arith.mulf %536, %537 : vector<8x64xf32>
    %539 = vector.broadcast %478 : vector<1x64xf32> to vector<8x64xf32>
    %540 = arith.addf %538, %539 : vector<8x64xf32>
    %c2_289 = arith.constant 2 : index
    %c0_290 = arith.constant 0 : index
    %c0_291 = arith.constant 0 : index
    %541 = vector.load %arg12[%c2_289, %c0_290, %c0_291] : memref<3x64x192xf32, #tpu.memory_space<vmem>>, vector<1x64x192xf32>
    %542 = vector.shape_cast %541 : vector<1x64x192xf32> to vector<64x192xf32>
    %c2_292 = arith.constant 2 : index
    %c0_293 = arith.constant 0 : index
    %c0_294 = arith.constant 0 : index
    %543 = vector.load %arg13[%c2_292, %c0_293, %c0_294] : memref<3x1x192xf32, #tpu.memory_space<vmem>>, vector<1x1x192xf32>
    %544 = vector.shape_cast %543 : vector<1x1x192xf32> to vector<1x192xf32>
    %cst_295 = arith.constant dense<0.000000e+00> : vector<8x192xf32>
    %545 = tpu.matmul %509, %542, %cst_295 {dimension_numbers = #tpu.dot_dimension_numbers<[1], [0], [0], [1], [0, 0, 1, 1], [], []>} : vector<8x64xf32>, vector<64x192xf32>, vector<8x192xf32> -> vector<8x192xf32>
    %546 = vector.broadcast %544 : vector<1x192xf32> to vector<8x192xf32>
    %547 = arith.addf %545, %546 : vector<8x192xf32>
    %cst_296 = arith.constant dense<0.000000e+00> : vector<8x192xf32>
    %548 = tpu.matmul %540, %542, %cst_296 {dimension_numbers = #tpu.dot_dimension_numbers<[1], [0], [0], [1], [0, 0, 1, 1], [], []>} : vector<8x64xf32>, vector<64x192xf32>, vector<8x192xf32> -> vector<8x192xf32>
    %549 = vector.broadcast %544 : vector<1x192xf32> to vector<8x192xf32>
    %550 = arith.addf %548, %549 : vector<8x192xf32>
    %551 = vector.extract_strided_slice %547 {offsets = [0, 0], sizes = [8, 64], strides = [1, 1]} : vector<8x192xf32> to vector<8x64xf32>
    %552 = vector.extract_strided_slice %547 {offsets = [0, 64], sizes = [8, 64], strides = [1, 1]} : vector<8x192xf32> to vector<8x64xf32>
    %553 = vector.extract_strided_slice %547 {offsets = [0, 128], sizes = [8, 64], strides = [1, 1]} : vector<8x192xf32> to vector<8x64xf32>
    %554 = vector.extract_strided_slice %550 {offsets = [0, 0], sizes = [8, 64], strides = [1, 1]} : vector<8x192xf32> to vector<8x64xf32>
    %555 = vector.extract_strided_slice %550 {offsets = [0, 64], sizes = [8, 64], strides = [1, 1]} : vector<8x192xf32> to vector<8x64xf32>
    %556 = vector.extract_strided_slice %550 {offsets = [0, 128], sizes = [8, 64], strides = [1, 1]} : vector<8x192xf32> to vector<8x64xf32>
    %557 = arith.mulf %551, %552 : vector<8x64xf32>
    %cst_297 = arith.constant dense<0.000000e+00> : vector<8x4xf32>
    %558 = tpu.matmul %557, %139, %cst_297 {dimension_numbers = #tpu.dot_dimension_numbers<[1], [0], [0], [1], [0, 0, 1, 1], [], []>} : vector<8x64xf32>, vector<64x4xf32>, vector<8x4xf32> -> vector<8x4xf32>
    %cst_298 = arith.constant 2.500000e-01 : f32
    %559 = vector.broadcast %cst_298 : f32 to vector<8x4xf32>
    %560 = arith.mulf %558, %559 : vector<8x4xf32>
    %561 = arith.mulf %551, %555 : vector<8x64xf32>
    %cst_299 = arith.constant dense<0.000000e+00> : vector<8x4xf32>
    %562 = tpu.matmul %561, %139, %cst_299 {dimension_numbers = #tpu.dot_dimension_numbers<[1], [0], [0], [1], [0, 0, 1, 1], [], []>} : vector<8x64xf32>, vector<64x4xf32>, vector<8x4xf32> -> vector<8x4xf32>
    %cst_300 = arith.constant 2.500000e-01 : f32
    %563 = vector.broadcast %cst_300 : f32 to vector<8x4xf32>
    %564 = arith.mulf %562, %563 : vector<8x4xf32>
    %565 = arith.mulf %554, %552 : vector<8x64xf32>
    %cst_301 = arith.constant dense<0.000000e+00> : vector<8x4xf32>
    %566 = tpu.matmul %565, %139, %cst_301 {dimension_numbers = #tpu.dot_dimension_numbers<[1], [0], [0], [1], [0, 0, 1, 1], [], []>} : vector<8x64xf32>, vector<64x4xf32>, vector<8x4xf32> -> vector<8x4xf32>
    %cst_302 = arith.constant 2.500000e-01 : f32
    %567 = vector.broadcast %cst_302 : f32 to vector<8x4xf32>
    %568 = arith.mulf %566, %567 : vector<8x4xf32>
    %569 = arith.mulf %554, %555 : vector<8x64xf32>
    %cst_303 = arith.constant dense<0.000000e+00> : vector<8x4xf32>
    %570 = tpu.matmul %569, %139, %cst_303 {dimension_numbers = #tpu.dot_dimension_numbers<[1], [0], [0], [1], [0, 0, 1, 1], [], []>} : vector<8x64xf32>, vector<64x4xf32>, vector<8x4xf32> -> vector<8x4xf32>
    %cst_304 = arith.constant 2.500000e-01 : f32
    %571 = vector.broadcast %cst_304 : f32 to vector<8x4xf32>
    %572 = arith.mulf %570, %571 : vector<8x4xf32>
    %573 = arith.maximumf %560, %564 : vector<8x4xf32>
    %574 = arith.subf %560, %573 : vector<8x4xf32>
    %575 = math.exp %574 : vector<8x4xf32>
    %576 = arith.subf %564, %573 : vector<8x4xf32>
    %577 = math.exp %576 : vector<8x4xf32>
    %578 = arith.addf %575, %577 : vector<8x4xf32>
    %579 = tpu.reciprocal %578 {approx = true} : vector<8x4xf32> -> vector<8x4xf32>
    %580 = arith.mulf %575, %579 : vector<8x4xf32>
    %581 = arith.mulf %577, %579 : vector<8x4xf32>
    %582 = arith.maximumf %568, %572 : vector<8x4xf32>
    %583 = arith.subf %568, %582 : vector<8x4xf32>
    %584 = math.exp %583 : vector<8x4xf32>
    %585 = arith.subf %572, %582 : vector<8x4xf32>
    %586 = math.exp %585 : vector<8x4xf32>
    %587 = arith.addf %584, %586 : vector<8x4xf32>
    %588 = tpu.reciprocal %587 {approx = true} : vector<8x4xf32> -> vector<8x4xf32>
    %589 = arith.mulf %584, %588 : vector<8x4xf32>
    %590 = arith.mulf %586, %588 : vector<8x4xf32>
    %cst_305 = arith.constant dense<0.000000e+00> : vector<8x64xf32>
    %591 = tpu.matmul %580, %152, %cst_305 {dimension_numbers = #tpu.dot_dimension_numbers<[1], [0], [0], [1], [0, 0, 1, 1], [], []>} : vector<8x4xf32>, vector<4x64xf32>, vector<8x64xf32> -> vector<8x64xf32>
    %592 = arith.mulf %591, %553 : vector<8x64xf32>
    %cst_306 = arith.constant dense<0.000000e+00> : vector<8x64xf32>
    %593 = tpu.matmul %581, %152, %cst_306 {dimension_numbers = #tpu.dot_dimension_numbers<[1], [0], [0], [1], [0, 0, 1, 1], [], []>} : vector<8x4xf32>, vector<4x64xf32>, vector<8x64xf32> -> vector<8x64xf32>
    %594 = arith.mulf %593, %556 : vector<8x64xf32>
    %595 = arith.addf %592, %594 : vector<8x64xf32>
    %cst_307 = arith.constant dense<0.000000e+00> : vector<8x64xf32>
    %596 = tpu.matmul %589, %152, %cst_307 {dimension_numbers = #tpu.dot_dimension_numbers<[1], [0], [0], [1], [0, 0, 1, 1], [], []>} : vector<8x4xf32>, vector<4x64xf32>, vector<8x64xf32> -> vector<8x64xf32>
    %597 = arith.mulf %596, %553 : vector<8x64xf32>
    %cst_308 = arith.constant dense<0.000000e+00> : vector<8x64xf32>
    %598 = tpu.matmul %590, %152, %cst_308 {dimension_numbers = #tpu.dot_dimension_numbers<[1], [0], [0], [1], [0, 0, 1, 1], [], []>} : vector<8x4xf32>, vector<4x64xf32>, vector<8x64xf32> -> vector<8x64xf32>
    %599 = arith.mulf %598, %556 : vector<8x64xf32>
    %600 = arith.addf %597, %599 : vector<8x64xf32>
    %c2_309 = arith.constant 2 : index
    %c0_310 = arith.constant 0 : index
    %c0_311 = arith.constant 0 : index
    %601 = vector.load %arg14[%c2_309, %c0_310, %c0_311] : memref<3x64x64xf32, #tpu.memory_space<vmem>>, vector<1x64x64xf32>
    %602 = vector.shape_cast %601 : vector<1x64x64xf32> to vector<64x64xf32>
    %c2_312 = arith.constant 2 : index
    %c0_313 = arith.constant 0 : index
    %c0_314 = arith.constant 0 : index
    %603 = vector.load %arg15[%c2_312, %c0_313, %c0_314] : memref<3x1x64xf32, #tpu.memory_space<vmem>>, vector<1x1x64xf32>
    %604 = vector.shape_cast %603 : vector<1x1x64xf32> to vector<1x64xf32>
    %c2_315 = arith.constant 2 : index
    %c0_316 = arith.constant 0 : index
    %c0_317 = arith.constant 0 : index
    %605 = vector.load %arg16[%c2_315, %c0_316, %c0_317] : memref<3x1x64xf32, #tpu.memory_space<vmem>>, vector<1x1x64xf32>
    %606 = vector.shape_cast %605 : vector<1x1x64xf32> to vector<1x64xf32>
    %c2_318 = arith.constant 2 : index
    %c0_319 = arith.constant 0 : index
    %c0_320 = arith.constant 0 : index
    %607 = vector.load %arg17[%c2_318, %c0_319, %c0_320] : memref<3x1x64xf32, #tpu.memory_space<vmem>>, vector<1x1x64xf32>
    %608 = vector.shape_cast %607 : vector<1x1x64xf32> to vector<1x64xf32>
    %cst_321 = arith.constant dense<0.000000e+00> : vector<8x64xf32>
    %609 = tpu.matmul %595, %602, %cst_321 {dimension_numbers = #tpu.dot_dimension_numbers<[1], [0], [0], [1], [0, 0, 1, 1], [], []>} : vector<8x64xf32>, vector<64x64xf32>, vector<8x64xf32> -> vector<8x64xf32>
    %610 = arith.addf %509, %609 : vector<8x64xf32>
    %611 = vector.broadcast %604 : vector<1x64xf32> to vector<8x64xf32>
    %612 = arith.addf %610, %611 : vector<8x64xf32>
    %cst_322 = arith.constant dense<0.000000e+00> : vector<8xf32>
    %613 = vector.multi_reduction <add>, %612, %cst_322 [1] : vector<8x64xf32> to vector<8xf32>
    %614 = vector.shape_cast %613 : vector<8xf32> to vector<8x1xf32>
    %cst_323 = arith.constant 6.400000e+01 : f32
    %615 = vector.broadcast %cst_323 : f32 to vector<8x1xf32>
    %616 = arith.divf %614, %615 : vector<8x1xf32>
    %617 = vector.broadcast %616 : vector<8x1xf32> to vector<8x64xf32>
    %618 = arith.subf %612, %617 : vector<8x64xf32>
    %619 = arith.mulf %618, %618 : vector<8x64xf32>
    %cst_324 = arith.constant dense<0.000000e+00> : vector<8xf32>
    %620 = vector.multi_reduction <add>, %619, %cst_324 [1] : vector<8x64xf32> to vector<8xf32>
    %621 = vector.shape_cast %620 : vector<8xf32> to vector<8x1xf32>
    %cst_325 = arith.constant 6.400000e+01 : f32
    %622 = vector.broadcast %cst_325 : f32 to vector<8x1xf32>
    %623 = arith.divf %621, %622 : vector<8x1xf32>
    %624 = vector.broadcast %616 : vector<8x1xf32> to vector<8x64xf32>
    %625 = arith.subf %612, %624 : vector<8x64xf32>
    %cst_326 = arith.constant 9.99999974E-6 : f32
    %626 = vector.broadcast %cst_326 : f32 to vector<8x1xf32>
    %627 = arith.addf %623, %626 : vector<8x1xf32>
    %628 = math.rsqrt %627 : vector<8x1xf32>
    %629 = vector.broadcast %628 : vector<8x1xf32> to vector<8x64xf32>
    %630 = arith.mulf %625, %629 : vector<8x64xf32>
    %631 = vector.broadcast %606 : vector<1x64xf32> to vector<8x64xf32>
    %632 = arith.mulf %630, %631 : vector<8x64xf32>
    %633 = vector.broadcast %608 : vector<1x64xf32> to vector<8x64xf32>
    %634 = arith.addf %632, %633 : vector<8x64xf32>
    %cst_327 = arith.constant dense<0.000000e+00> : vector<8x64xf32>
    %635 = tpu.matmul %600, %602, %cst_327 {dimension_numbers = #tpu.dot_dimension_numbers<[1], [0], [0], [1], [0, 0, 1, 1], [], []>} : vector<8x64xf32>, vector<64x64xf32>, vector<8x64xf32> -> vector<8x64xf32>
    %636 = arith.addf %540, %635 : vector<8x64xf32>
    %637 = vector.broadcast %604 : vector<1x64xf32> to vector<8x64xf32>
    %638 = arith.addf %636, %637 : vector<8x64xf32>
    %cst_328 = arith.constant dense<0.000000e+00> : vector<8xf32>
    %639 = vector.multi_reduction <add>, %638, %cst_328 [1] : vector<8x64xf32> to vector<8xf32>
    %640 = vector.shape_cast %639 : vector<8xf32> to vector<8x1xf32>
    %cst_329 = arith.constant 6.400000e+01 : f32
    %641 = vector.broadcast %cst_329 : f32 to vector<8x1xf32>
    %642 = arith.divf %640, %641 : vector<8x1xf32>
    %643 = vector.broadcast %642 : vector<8x1xf32> to vector<8x64xf32>
    %644 = arith.subf %638, %643 : vector<8x64xf32>
    %645 = arith.mulf %644, %644 : vector<8x64xf32>
    %cst_330 = arith.constant dense<0.000000e+00> : vector<8xf32>
    %646 = vector.multi_reduction <add>, %645, %cst_330 [1] : vector<8x64xf32> to vector<8xf32>
    %647 = vector.shape_cast %646 : vector<8xf32> to vector<8x1xf32>
    %cst_331 = arith.constant 6.400000e+01 : f32
    %648 = vector.broadcast %cst_331 : f32 to vector<8x1xf32>
    %649 = arith.divf %647, %648 : vector<8x1xf32>
    %650 = vector.broadcast %642 : vector<8x1xf32> to vector<8x64xf32>
    %651 = arith.subf %638, %650 : vector<8x64xf32>
    %cst_332 = arith.constant 9.99999974E-6 : f32
    %652 = vector.broadcast %cst_332 : f32 to vector<8x1xf32>
    %653 = arith.addf %649, %652 : vector<8x1xf32>
    %654 = math.rsqrt %653 : vector<8x1xf32>
    %655 = vector.broadcast %654 : vector<8x1xf32> to vector<8x64xf32>
    %656 = arith.mulf %651, %655 : vector<8x64xf32>
    %657 = vector.broadcast %606 : vector<1x64xf32> to vector<8x64xf32>
    %658 = arith.mulf %656, %657 : vector<8x64xf32>
    %659 = vector.broadcast %608 : vector<1x64xf32> to vector<8x64xf32>
    %660 = arith.addf %658, %659 : vector<8x64xf32>
    %c2_333 = arith.constant 2 : index
    %c0_334 = arith.constant 0 : index
    %c0_335 = arith.constant 0 : index
    %661 = vector.load %arg18[%c2_333, %c0_334, %c0_335] : memref<3x64x256xf32, #tpu.memory_space<vmem>>, vector<1x64x256xf32>
    %662 = vector.shape_cast %661 : vector<1x64x256xf32> to vector<64x256xf32>
    %c2_336 = arith.constant 2 : index
    %c0_337 = arith.constant 0 : index
    %c0_338 = arith.constant 0 : index
    %663 = vector.load %arg19[%c2_336, %c0_337, %c0_338] : memref<3x1x256xf32, #tpu.memory_space<vmem>>, vector<1x1x256xf32>
    %664 = vector.shape_cast %663 : vector<1x1x256xf32> to vector<1x256xf32>
    %c2_339 = arith.constant 2 : index
    %c0_340 = arith.constant 0 : index
    %c0_341 = arith.constant 0 : index
    %665 = vector.load %arg20[%c2_339, %c0_340, %c0_341] : memref<3x256x64xf32, #tpu.memory_space<vmem>>, vector<1x256x64xf32>
    %666 = vector.shape_cast %665 : vector<1x256x64xf32> to vector<256x64xf32>
    %c2_342 = arith.constant 2 : index
    %c0_343 = arith.constant 0 : index
    %c0_344 = arith.constant 0 : index
    %667 = vector.load %arg21[%c2_342, %c0_343, %c0_344] : memref<3x1x64xf32, #tpu.memory_space<vmem>>, vector<1x1x64xf32>
    %668 = vector.shape_cast %667 : vector<1x1x64xf32> to vector<1x64xf32>
    %c2_345 = arith.constant 2 : index
    %c0_346 = arith.constant 0 : index
    %c0_347 = arith.constant 0 : index
    %669 = vector.load %arg22[%c2_345, %c0_346, %c0_347] : memref<3x1x64xf32, #tpu.memory_space<vmem>>, vector<1x1x64xf32>
    %670 = vector.shape_cast %669 : vector<1x1x64xf32> to vector<1x64xf32>
    %c2_348 = arith.constant 2 : index
    %c0_349 = arith.constant 0 : index
    %c0_350 = arith.constant 0 : index
    %671 = vector.load %arg23[%c2_348, %c0_349, %c0_350] : memref<3x1x64xf32, #tpu.memory_space<vmem>>, vector<1x1x64xf32>
    %672 = vector.shape_cast %671 : vector<1x1x64xf32> to vector<1x64xf32>
    %cst_351 = arith.constant dense<0.000000e+00> : vector<8x256xf32>
    %673 = tpu.matmul %634, %662, %cst_351 {dimension_numbers = #tpu.dot_dimension_numbers<[1], [0], [0], [1], [0, 0, 1, 1], [], []>} : vector<8x64xf32>, vector<64x256xf32>, vector<8x256xf32> -> vector<8x256xf32>
    %674 = vector.broadcast %664 : vector<1x256xf32> to vector<8x256xf32>
    %675 = arith.addf %673, %674 : vector<8x256xf32>
    %cst_352 = arith.constant 0.000000e+00 : f32
    %676 = vector.broadcast %cst_352 : f32 to vector<8x256xf32>
    %677 = arith.maximumf %675, %676 : vector<8x256xf32>
    %cst_353 = arith.constant dense<0.000000e+00> : vector<8x64xf32>
    %678 = tpu.matmul %677, %666, %cst_353 {dimension_numbers = #tpu.dot_dimension_numbers<[1], [0], [0], [1], [0, 0, 1, 1], [], []>} : vector<8x256xf32>, vector<256x64xf32>, vector<8x64xf32> -> vector<8x64xf32>
    %679 = vector.broadcast %668 : vector<1x64xf32> to vector<8x64xf32>
    %680 = arith.addf %678, %679 : vector<8x64xf32>
    %681 = arith.addf %634, %680 : vector<8x64xf32>
    %cst_354 = arith.constant dense<0.000000e+00> : vector<8xf32>
    %682 = vector.multi_reduction <add>, %681, %cst_354 [1] : vector<8x64xf32> to vector<8xf32>
    %683 = vector.shape_cast %682 : vector<8xf32> to vector<8x1xf32>
    %cst_355 = arith.constant 6.400000e+01 : f32
    %684 = vector.broadcast %cst_355 : f32 to vector<8x1xf32>
    %685 = arith.divf %683, %684 : vector<8x1xf32>
    %686 = vector.broadcast %685 : vector<8x1xf32> to vector<8x64xf32>
    %687 = arith.subf %681, %686 : vector<8x64xf32>
    %688 = arith.mulf %687, %687 : vector<8x64xf32>
    %cst_356 = arith.constant dense<0.000000e+00> : vector<8xf32>
    %689 = vector.multi_reduction <add>, %688, %cst_356 [1] : vector<8x64xf32> to vector<8xf32>
    %690 = vector.shape_cast %689 : vector<8xf32> to vector<8x1xf32>
    %cst_357 = arith.constant 6.400000e+01 : f32
    %691 = vector.broadcast %cst_357 : f32 to vector<8x1xf32>
    %692 = arith.divf %690, %691 : vector<8x1xf32>
    %693 = vector.broadcast %685 : vector<8x1xf32> to vector<8x64xf32>
    %694 = arith.subf %681, %693 : vector<8x64xf32>
    %cst_358 = arith.constant 9.99999974E-6 : f32
    %695 = vector.broadcast %cst_358 : f32 to vector<8x1xf32>
    %696 = arith.addf %692, %695 : vector<8x1xf32>
    %697 = math.rsqrt %696 : vector<8x1xf32>
    %698 = vector.broadcast %697 : vector<8x1xf32> to vector<8x64xf32>
    %699 = arith.mulf %694, %698 : vector<8x64xf32>
    %700 = vector.broadcast %670 : vector<1x64xf32> to vector<8x64xf32>
    %701 = arith.mulf %699, %700 : vector<8x64xf32>
    %702 = vector.broadcast %672 : vector<1x64xf32> to vector<8x64xf32>
    %703 = arith.addf %701, %702 : vector<8x64xf32>
    %cst_359 = arith.constant dense<0.000000e+00> : vector<8x256xf32>
    %704 = tpu.matmul %660, %662, %cst_359 {dimension_numbers = #tpu.dot_dimension_numbers<[1], [0], [0], [1], [0, 0, 1, 1], [], []>} : vector<8x64xf32>, vector<64x256xf32>, vector<8x256xf32> -> vector<8x256xf32>
    %705 = vector.broadcast %664 : vector<1x256xf32> to vector<8x256xf32>
    %706 = arith.addf %704, %705 : vector<8x256xf32>
    %cst_360 = arith.constant 0.000000e+00 : f32
    %707 = vector.broadcast %cst_360 : f32 to vector<8x256xf32>
    %708 = arith.maximumf %706, %707 : vector<8x256xf32>
    %cst_361 = arith.constant dense<0.000000e+00> : vector<8x64xf32>
    %709 = tpu.matmul %708, %666, %cst_361 {dimension_numbers = #tpu.dot_dimension_numbers<[1], [0], [0], [1], [0, 0, 1, 1], [], []>} : vector<8x256xf32>, vector<256x64xf32>, vector<8x64xf32> -> vector<8x64xf32>
    %710 = vector.broadcast %668 : vector<1x64xf32> to vector<8x64xf32>
    %711 = arith.addf %709, %710 : vector<8x64xf32>
    %712 = arith.addf %660, %711 : vector<8x64xf32>
    %cst_362 = arith.constant dense<0.000000e+00> : vector<8xf32>
    %713 = vector.multi_reduction <add>, %712, %cst_362 [1] : vector<8x64xf32> to vector<8xf32>
    %714 = vector.shape_cast %713 : vector<8xf32> to vector<8x1xf32>
    %cst_363 = arith.constant 6.400000e+01 : f32
    %715 = vector.broadcast %cst_363 : f32 to vector<8x1xf32>
    %716 = arith.divf %714, %715 : vector<8x1xf32>
    %717 = vector.broadcast %716 : vector<8x1xf32> to vector<8x64xf32>
    %718 = arith.subf %712, %717 : vector<8x64xf32>
    %719 = arith.mulf %718, %718 : vector<8x64xf32>
    %cst_364 = arith.constant dense<0.000000e+00> : vector<8xf32>
    %720 = vector.multi_reduction <add>, %719, %cst_364 [1] : vector<8x64xf32> to vector<8xf32>
    %721 = vector.shape_cast %720 : vector<8xf32> to vector<8x1xf32>
    %cst_365 = arith.constant 6.400000e+01 : f32
    %722 = vector.broadcast %cst_365 : f32 to vector<8x1xf32>
    %723 = arith.divf %721, %722 : vector<8x1xf32>
    %724 = vector.broadcast %716 : vector<8x1xf32> to vector<8x64xf32>
    %725 = arith.subf %712, %724 : vector<8x64xf32>
    %cst_366 = arith.constant 9.99999974E-6 : f32
    %726 = vector.broadcast %cst_366 : f32 to vector<8x1xf32>
    %727 = arith.addf %723, %726 : vector<8x1xf32>
    %728 = math.rsqrt %727 : vector<8x1xf32>
    %729 = vector.broadcast %728 : vector<8x1xf32> to vector<8x64xf32>
    %730 = arith.mulf %725, %729 : vector<8x64xf32>
    %731 = vector.broadcast %670 : vector<1x64xf32> to vector<8x64xf32>
    %732 = arith.mulf %730, %731 : vector<8x64xf32>
    %733 = vector.broadcast %672 : vector<1x64xf32> to vector<8x64xf32>
    %734 = arith.addf %732, %733 : vector<8x64xf32>
    %cst_367 = arith.constant dense<0.000000e+00> : vector<64xf32>
    %735 = vector.multi_reduction <add>, %703, %cst_367 [0] : vector<8x64xf32> to vector<64xf32>
    %736 = vector.shape_cast %735 : vector<64xf32> to vector<1x64xf32>
    %cst_368 = arith.constant 8.000000e+00 : f32
    %737 = vector.broadcast %cst_368 : f32 to vector<1x64xf32>
    %738 = arith.divf %736, %737 : vector<1x64xf32>
    %c0_369 = arith.constant 0 : index
    %c0_370 = arith.constant 0 : index
    %739 = vector.load %arg24[%c0_369, %c0_370] : memref<64x64xf32, #tpu.memory_space<vmem>>, vector<64x64xf32>
    %cst_371 = arith.constant dense<0.000000e+00> : vector<1x64xf32>
    %740 = tpu.matmul %738, %739, %cst_371 {dimension_numbers = #tpu.dot_dimension_numbers<[1], [0], [0], [1], [0, 0, 1, 1], [], []>} : vector<1x64xf32>, vector<64x64xf32>, vector<1x64xf32> -> vector<1x64xf32>
    %c0_372 = arith.constant 0 : index
    %c0_373 = arith.constant 0 : index
    %741 = vector.load %arg25[%c0_372, %c0_373] : memref<1x64xf32, #tpu.memory_space<vmem>>, vector<1x64xf32>
    %742 = arith.addf %740, %741 : vector<1x64xf32>
    %743 = arith.mulf %742, %742 : vector<1x64xf32>
    %cst_374 = arith.constant dense<0.000000e+00> : vector<1xf32>
    %744 = vector.multi_reduction <add>, %743, %cst_374 [1] : vector<1x64xf32> to vector<1xf32>
    %745 = vector.shape_cast %744 : vector<1xf32> to vector<1x1xf32>
    %746 = math.sqrt %745 : vector<1x1xf32>
    %cst_375 = arith.constant 9.99999996E-13 : f32
    %747 = vector.broadcast %cst_375 : f32 to vector<1x1xf32>
    %748 = arith.maximumf %746, %747 : vector<1x1xf32>
    %749 = vector.broadcast %748 : vector<1x1xf32> to vector<1x64xf32>
    %750 = arith.divf %742, %749 : vector<1x64xf32>
    %c0_376 = arith.constant 0 : index
    %c0_377 = arith.constant 0 : index
    %751 = vector.load %arg26[%c0_376, %c0_377] : memref<2x64xf32, #tpu.memory_space<vmem>>, vector<1x64xf32>
    tpu.vector_store %arg26[%c0_376, %c0_377], %750 {strides = array<i32>} : memref<2x64xf32, #tpu.memory_space<vmem>>, vector<1x64xf32>,
    %cst_378 = arith.constant dense<0.000000e+00> : vector<64xf32>
    %752 = vector.multi_reduction <add>, %734, %cst_378 [0] : vector<8x64xf32> to vector<64xf32>
    %753 = vector.shape_cast %752 : vector<64xf32> to vector<1x64xf32>
    %cst_379 = arith.constant 8.000000e+00 : f32
    %754 = vector.broadcast %cst_379 : f32 to vector<1x64xf32>
    %755 = arith.divf %753, %754 : vector<1x64xf32>
    %c0_380 = arith.constant 0 : index
    %c0_381 = arith.constant 0 : index
    %756 = vector.load %arg24[%c0_380, %c0_381] : memref<64x64xf32, #tpu.memory_space<vmem>>, vector<64x64xf32>
    %cst_382 = arith.constant dense<0.000000e+00> : vector<1x64xf32>
    %757 = tpu.matmul %755, %756, %cst_382 {dimension_numbers = #tpu.dot_dimension_numbers<[1], [0], [0], [1], [0, 0, 1, 1], [], []>} : vector<1x64xf32>, vector<64x64xf32>, vector<1x64xf32> -> vector<1x64xf32>
    %c0_383 = arith.constant 0 : index
    %c0_384 = arith.constant 0 : index
    %758 = vector.load %arg25[%c0_383, %c0_384] : memref<1x64xf32, #tpu.memory_space<vmem>>, vector<1x64xf32>
    %759 = arith.addf %757, %758 : vector<1x64xf32>
    %760 = arith.mulf %759, %759 : vector<1x64xf32>
    %cst_385 = arith.constant dense<0.000000e+00> : vector<1xf32>
    %761 = vector.multi_reduction <add>, %760, %cst_385 [1] : vector<1x64xf32> to vector<1xf32>
    %762 = vector.shape_cast %761 : vector<1xf32> to vector<1x1xf32>
    %763 = math.sqrt %762 : vector<1x1xf32>
    %cst_386 = arith.constant 9.99999996E-13 : f32
    %764 = vector.broadcast %cst_386 : f32 to vector<1x1xf32>
    %765 = arith.maximumf %763, %764 : vector<1x1xf32>
    %766 = vector.broadcast %765 : vector<1x1xf32> to vector<1x64xf32>
    %767 = arith.divf %759, %766 : vector<1x64xf32>
    %c1_387 = arith.constant 1 : index
    %c0_388 = arith.constant 0 : index
    %768 = vector.load %arg26[%c1_387, %c0_388] : memref<2x64xf32, #tpu.memory_space<vmem>>, vector<1x64xf32>
    tpu.vector_store %arg26[%c1_387, %c0_388], %767 {strides = array<i32>} : memref<2x64xf32, #tpu.memory_space<vmem>>, vector<1x64xf32>,
    return
  }
  func.func @transform_0(%arg0: i32) -> (i32, i32) {
    %c0_i32 = arith.constant 0 : i32
    %c0_i32_0 = arith.constant 0 : i32
    %c0_i32_1 = arith.constant 0 : i32
    return %c0_i32, %c0_i32_0 : i32, i32
  }
  func.func @transform_1(%arg0: i32) -> (i32, i32) {
    %c0_i32 = arith.constant 0 : i32
    %c0_i32_0 = arith.constant 0 : i32
    %c0_i32_1 = arith.constant 0 : i32
    return %c0_i32, %c0_i32_0 : i32, i32
  }
  func.func @transform_2(%arg0: i32) -> (i32, i32) {
    %c0_i32 = arith.constant 0 : i32
    %c0_i32_0 = arith.constant 0 : i32
    %c0_i32_1 = arith.constant 0 : i32
    return %c0_i32, %c0_i32_0 : i32, i32
  }
  func.func @transform_3(%arg0: i32) -> (i32, i32, i32) {
    %c0_i32 = arith.constant 0 : i32
    %c0_i32_0 = arith.constant 0 : i32
    %c0_i32_1 = arith.constant 0 : i32
    %c0_i32_2 = arith.constant 0 : i32
    return %c0_i32, %c0_i32_0, %c0_i32_1 : i32, i32, i32
  }
  func.func @transform_4(%arg0: i32) -> (i32, i32) {
    %c0_i32 = arith.constant 0 : i32
    %c0_i32_0 = arith.constant 0 : i32
    %c0_i32_1 = arith.constant 0 : i32
    return %c0_i32, %c0_i32_0 : i32, i32
  }
  func.func @transform_5(%arg0: i32) -> (i32, i32, i32) {
    %c0_i32 = arith.constant 0 : i32
    %c0_i32_0 = arith.constant 0 : i32
    %c0_i32_1 = arith.constant 0 : i32
    %c0_i32_2 = arith.constant 0 : i32
    return %c0_i32, %c0_i32_0, %c0_i32_1 : i32, i32, i32
  }
  func.func @transform_6(%arg0: i32) -> (i32, i32) {
    %c0_i32 = arith.constant 0 : i32
    %c0_i32_0 = arith.constant 0 : i32
    %c0_i32_1 = arith.constant 0 : i32
    return %c0_i32, %c0_i32_0 : i32, i32
  }
  func.func @transform_7(%arg0: i32) -> (i32, i32, i32) {
    %c0_i32 = arith.constant 0 : i32
    %c0_i32_0 = arith.constant 0 : i32
    %c0_i32_1 = arith.constant 0 : i32
    %c0_i32_2 = arith.constant 0 : i32
    return %c0_i32, %c0_i32_0, %c0_i32_1 : i32, i32, i32
  }
  func.func @transform_8(%arg0: i32) -> (i32, i32) {
    %c0_i32 = arith.constant 0 : i32
    %c0_i32_0 = arith.constant 0 : i32
    %c0_i32_1 = arith.constant 0 : i32
    return %c0_i32, %c0_i32_0 : i32, i32
  }
  func.func @transform_9(%arg0: i32) -> (i32, i32) {
    %c0_i32 = arith.constant 0 : i32
    %c0_i32_0 = arith.constant 0 : i32
    %c0_i32_1 = arith.constant 0 : i32
    return %c0_i32, %c0_i32_0 : i32, i32
  }
  func.func @transform_10(%arg0: i32) -> (i32, i32) {
    %c0_i32 = arith.constant 0 : i32
    %c0_i32_0 = arith.constant 0 : i32
    %c0_i32_1 = arith.constant 0 : i32
    return %c0_i32, %c0_i32_0 : i32, i32
  }
  func.func @transform_11(%arg0: i32) -> (i32, i32, i32) {
    %c0_i32 = arith.constant 0 : i32
    %c0_i32_0 = arith.constant 0 : i32
    %c0_i32_1 = arith.constant 0 : i32
    %c0_i32_2 = arith.constant 0 : i32
    return %c0_i32, %c0_i32_0, %c0_i32_1 : i32, i32, i32
  }
  func.func @transform_12(%arg0: i32) -> (i32, i32, i32) {
    %c0_i32 = arith.constant 0 : i32
    %c0_i32_0 = arith.constant 0 : i32
    %c0_i32_1 = arith.constant 0 : i32
    %c0_i32_2 = arith.constant 0 : i32
    return %c0_i32, %c0_i32_0, %c0_i32_1 : i32, i32, i32
  }
  func.func @transform_13(%arg0: i32) -> (i32, i32, i32) {
    %c0_i32 = arith.constant 0 : i32
    %c0_i32_0 = arith.constant 0 : i32
    %c0_i32_1 = arith.constant 0 : i32
    %c0_i32_2 = arith.constant 0 : i32
    return %c0_i32, %c0_i32_0, %c0_i32_1 : i32, i32, i32
  }
  func.func @transform_14(%arg0: i32) -> (i32, i32, i32) {
    %c0_i32 = arith.constant 0 : i32
    %c0_i32_0 = arith.constant 0 : i32
    %c0_i32_1 = arith.constant 0 : i32
    %c0_i32_2 = arith.constant 0 : i32
    return %c0_i32, %c0_i32_0, %c0_i32_1 : i32, i32, i32
  }
  func.func @transform_15(%arg0: i32) -> (i32, i32, i32) {
    %c0_i32 = arith.constant 0 : i32
    %c0_i32_0 = arith.constant 0 : i32
    %c0_i32_1 = arith.constant 0 : i32
    %c0_i32_2 = arith.constant 0 : i32
    return %c0_i32, %c0_i32_0, %c0_i32_1 : i32, i32, i32
  }
  func.func @transform_16(%arg0: i32) -> (i32, i32, i32) {
    %c0_i32 = arith.constant 0 : i32
    %c0_i32_0 = arith.constant 0 : i32
    %c0_i32_1 = arith.constant 0 : i32
    %c0_i32_2 = arith.constant 0 : i32
    return %c0_i32, %c0_i32_0, %c0_i32_1 : i32, i32, i32
  }
  func.func @transform_17(%arg0: i32) -> (i32, i32, i32) {
    %c0_i32 = arith.constant 0 : i32
    %c0_i32_0 = arith.constant 0 : i32
    %c0_i32_1 = arith.constant 0 : i32
    %c0_i32_2 = arith.constant 0 : i32
    return %c0_i32, %c0_i32_0, %c0_i32_1 : i32, i32, i32
  }
  func.func @transform_18(%arg0: i32) -> (i32, i32, i32) {
    %c0_i32 = arith.constant 0 : i32
    %c0_i32_0 = arith.constant 0 : i32
    %c0_i32_1 = arith.constant 0 : i32
    %c0_i32_2 = arith.constant 0 : i32
    return %c0_i32, %c0_i32_0, %c0_i32_1 : i32, i32, i32
  }
  func.func @transform_19(%arg0: i32) -> (i32, i32, i32) {
    %c0_i32 = arith.constant 0 : i32
    %c0_i32_0 = arith.constant 0 : i32
    %c0_i32_1 = arith.constant 0 : i32
    %c0_i32_2 = arith.constant 0 : i32
    return %c0_i32, %c0_i32_0, %c0_i32_1 : i32, i32, i32
  }
  func.func @transform_20(%arg0: i32) -> (i32, i32, i32) {
    %c0_i32 = arith.constant 0 : i32
    %c0_i32_0 = arith.constant 0 : i32
    %c0_i32_1 = arith.constant 0 : i32
    %c0_i32_2 = arith.constant 0 : i32
    return %c0_i32, %c0_i32_0, %c0_i32_1 : i32, i32, i32
  }
  func.func @transform_21(%arg0: i32) -> (i32, i32, i32) {
    %c0_i32 = arith.constant 0 : i32
    %c0_i32_0 = arith.constant 0 : i32
    %c0_i32_1 = arith.constant 0 : i32
    %c0_i32_2 = arith.constant 0 : i32
    return %c0_i32, %c0_i32_0, %c0_i32_1 : i32, i32, i32
  }
  func.func @transform_22(%arg0: i32) -> (i32, i32, i32) {
    %c0_i32 = arith.constant 0 : i32
    %c0_i32_0 = arith.constant 0 : i32
    %c0_i32_1 = arith.constant 0 : i32
    %c0_i32_2 = arith.constant 0 : i32
    return %c0_i32, %c0_i32_0, %c0_i32_1 : i32, i32, i32
  }
  func.func @transform_23(%arg0: i32) -> (i32, i32) {
    %c0_i32 = arith.constant 0 : i32
    %c0_i32_0 = arith.constant 0 : i32
    %c0_i32_1 = arith.constant 0 : i32
    return %c0_i32, %c0_i32_0 : i32, i32
  }
  func.func @transform_24(%arg0: i32) -> (i32, i32) {
    %c0_i32 = arith.constant 0 : i32
    %c0_i32_0 = arith.constant 0 : i32
    %c0_i32_1 = arith.constant 0 : i32
    return %c0_i32, %c0_i32_0 : i32, i32
  }
  func.func @transform_25(%arg0: i32) -> (i32, i32) {
    %c0_i32 = arith.constant 0 : i32
    %c0_i32_0 = arith.constant 0 : i32
    %c0_i32_1 = arith.constant 0 : i32
    return %c0_i32, %c0_i32_0 : i32, i32
  }
}

</mosaic_0001>

<bundles_post_ra>
// kernel: song2vec_forward.1
= control target key start
LH: loop header
LB: loop body
LE: loop exit
PB: predicated region body
PF: predicated region fallthrough
CT: control target
= control target key end

     0   :  { %s13080_s0 = inlined_call_operand.vmem [shape: f32[256,3], index: 0, kind: input, shape index: {}]   ;;  %s13081_s1 = inlined_call_operand.hbm [shape: f32[3,32], index: 1, kind: input, shape index: {}]   ;;  %s13082_s2 = inlined_call_operand.vmem [shape: f32[1,32], index: 2, kind: input, shape index: {}]   ;;  %s13083_s3 = inlined_call_operand.hbm [shape: f32[3,32,64], index: 3, kind: input, shape index: {}]   ;;  %s13084_s4 = inlined_call_operand.vmem [shape: f32[1,64], index: 4, kind: input, shape index: {}]   ;;  %s13085_s5 = inlined_call_operand.vmem [shape: f32[3,64,128], index: 5, kind: input, shape index: {}]   ;;  %s13086_s6 = inlined_call_operand.hbm [shape: f32[1,128], index: 6, kind: input, shape index: {}]   ;;  %s13087_s7 = inlined_call_operand.vmem [shape: f32[3,128,128], index: 7, kind: input, shape index: {}]   ;;  %s13088_s8 = inlined_call_operand.hbm [shape: f32[1,128], index: 8, kind: input, shape index: {}]   ;;  %s13089_s9 = inlined_call_operand.vmem [shape: f32[128,64], index: 9, kind: input, shape index: {}]   ;;  %s13090_s10 = inlined_call_operand.hbm [shape: f32[1,64], index: 10, kind: input, shape index: {}]   ;;  %s13091_s11 = inlined_call_operand.vmem [shape: f32[3,64,192], index: 11, kind: input, shape index: {}]   ;;  %s13092_s12 = inlined_call_operand.vmem [shape: f32[3,1,192], index: 12, kind: input, shape index: {}]   ;;  %s13093_s13 = inlined_call_operand.hbm [shape: f32[3,64,64], index: 13, kind: input, shape index: {}]   ;;  %s13094_s14 = inlined_call_operand.hbm [shape: f32[3,1,64], index: 14, kind: input, shape index: {}]   ;;  %s13095_s15 = inlined_call_operand.hbm [shape: f32[3,1,64], index: 15, kind: input, shape index: {}]   ;;  %s13096_s16 = inlined_call_operand.hbm [shape: f32[3,1,64], index: 16, kind: input, shape index: {}]   ;;  %s13097_s17 = inlined_call_operand.vmem [shape: f32[3,64,256], index: 17, kind: input, shape index: {}]   ;;  %s13098_s18 = inlined_call_operand.vmem [shape: f32[3,1,256], index: 18, kind: input, shape index: {}]   ;;  %s13099_s19 = inlined_call_operand.vmem [shape: f32[3,256,64], index: 19, kind: input, shape index: {}]   ;;  %s13100_s20 = inlined_call_operand.hbm [shape: f32[3,1,64], index: 20, kind: input, shape index: {}]   ;;  %s13101_s21 = inlined_call_operand.hbm [shape: f32[3,1,64], index: 21, kind: input, shape index: {}]   ;;  %s13102_s22 = inlined_call_operand.hbm [shape: f32[3,1,64], index: 22, kind: input, shape index: {}]   ;;  %s13103_s23 = inlined_call_operand.hbm [shape: f32[64,64], index: 23, kind: input, shape index: {}]   ;;  %s13104_s24 = inlined_call_operand.hbm [shape: f32[1,64], index: 24, kind: input, shape index: {}]   ;;  %s13105_s25 = inlined_call_operand.hbm [shape: f32[2,64], index: 25, kind: output, shape index: {}]  }
   0x1   :  { %13120 = sst [smem:[#allocation37_spill]] %s13080_s0 }
   0x2   :  { %13121 = sst [smem:[#allocation38_spill]] %s13081_s1 }
   0x3   :  { %13122 = sst [smem:[#allocation39_spill]] %s13082_s2 }
   0x4   :  { %13123 = sst [smem:[#allocation40_spill]] %s13083_s3 }
   0x5   :  { %13124 = sst [smem:[#allocation41_spill]] %s13084_s4 }
   0x6   :  { %13125 = sst [smem:[#allocation42_spill]] %s13085_s5 }
   0x7   :  { %13126 = sst [smem:[#allocation43_spill]] %s13086_s6 }
   0x8   :  { %13127 = sst [smem:[#allocation44_spill]] %s13087_s7 }
   0x9   :  { %13128 = sst [smem:[#allocation45_spill]] %s13088_s8 }
   0xa   :  { %13129 = sst [smem:[#allocation46_spill]] %s13089_s9 }
   0xb   :  { %13130 = sst [smem:[#allocation47_spill]] %s13098_s18 }
   0xc   :  { %13131 = sst [smem:[#allocation48_spill]] %s13099_s19 }
   0xd   :  { %13132 = sst [smem:[#allocation49_spill]] %s13105_s25 }
   0xe   :  { %30 = vsyncpa [#allocation5], 0 }
   0xf   :  { %31 = vsyncpa [#allocation8], 0 }
  0x10   :  { %32 = vsyncpa [#allocation11], 0 }
  0x11   :  { %33 = vsyncpa [#allocation14], 0 }
  0x12   :  { %34 = vsyncpa [#allocation17], 0 }
  0x13   :  { %35 = vsyncpa [#allocation20], 0 }
  0x14   :  { %36 = vsyncpa [#allocation23], 0 }
  0x15   :  { %37 = vsyncpa [#allocation26], 0 }
  0x16   :  { %38 = vsyncpa [#allocation6], 0  ;;  %s10441_s29 = smov [#allocation7]   ;;  %s13133_s7 = sld [smem:[#allocation40_spill]] }
  0x17   :  { %s58_s2 = sshll.u32 %s10441_s29, 4  ;;  %s59_s2 = int_to_ptr.vmem [resolvable:$true] %s58_s2 }
  0x1c   :  { %s10093_s3 = scalar_lea.hbm %s13133_s7, 1536 }
  0x1d   :  { %p10094_p0 = scmp.ne.s32.totalorder %s13133_s7, %s10093_s3  ;;  %p10097_p1 = scmp.lt.u32.totalorder %s10093_s3, %s13133_s7 }
  0x1f   :  { %p10099_p2 = pnand %p10097_p1, %p10094_p0 }
  0x21   :  { %10102 = shalt.err (!%p10099_p2)
}
  0x22   :  { %s10103_s4 = scalar_lea.vmem %s59_s2, 1536  ;;  %p10108_p4 = scmp.lt.s32.totalorder %s59_s2, %s59_s2 }
  0x23   :  { %p10104_p3 = scmp.ne.s32.totalorder %s59_s2, %s10103_s4  ;;  %p10109_p5 = scmp.lt.s32.totalorder %s10103_s4, %s10103_s4 }
  0x25   :  { %p10110_p6 = por %p10109_p5, %p10108_p4 }
  0x27   :  { %p10111_p7 = pnand %p10110_p6, %p10104_p3 }
  0x29   :  { %10114 = shalt.err (!%p10111_p7)
}
  0x2a   :  { %s10442_s28 = smov 128   ;;  %s10443_s9 = smov 8  }
  0x2b   :  { %64 = dma.hbm_to_vmem [thread:$0]  %s13133_s7, 1536, %s59_s2, [#allocation8], %s10442_s28, %s10442_s28, %s10443_s9  }
  0x2c   :  { %s10444_s29 = smov [#allocation10]   ;;  %s10445_s30 = smov [#allocation13]  }
  0x2d   :  { %s87_s6 = sshll.u32 %s10444_s29, 4  ;;  %s112_s3 = sshll.u32 %s10445_s30, 4  ;;  %s88_s6 = int_to_ptr.vmem [resolvable:$true] %s87_s6  ;;  %s113_s3 = int_to_ptr.vmem [resolvable:$true] %s112_s3 }
  0x2e   :  { %s13134_s8 = sld [smem:[#allocation45_spill]] }
  0x34   :  { %s10115_s27 = scalar_lea.hbm %s13134_s8, 16 }
  0x35   :  { %p10116_p8 = scmp.ne.s32.totalorder %s13134_s8, %s10115_s27  ;;  %p10119_p9 = scmp.lt.u32.totalorder %s10115_s27, %s13134_s8 }
  0x37   :  { %p10121_p10 = pnand %p10119_p9, %p10116_p8 }
  0x39   :  { %10124 = shalt.err (!%p10121_p10)
}
  0x3a   :  { %s10125_s2 = scalar_lea.vmem %s88_s6, 16  ;;  %s10129_s7 = scalar_lea.vmem %s88_s6, 32 }
  0x3b   :  { %p10126_p11 = scmp.ne.s32.totalorder %s88_s6, %s10125_s2  ;;  %p10130_p12 = scmp.lt.s32.totalorder %s88_s6, %s88_s6 }
  0x3c   :  { %p10131_p13 = scmp.lt.s32.totalorder %s10129_s7, %s10125_s2 }
  0x3e   :  { %p10132_p0 = por %p10131_p13, %p10130_p12 }
  0x40   :  { %p10133_p1 = pnand %p10132_p0, %p10126_p11 }
  0x42   :  { %10136 = shalt.err (!%p10133_p1)
}
  0x43   :  { %90 = dma.hbm_to_vmem [thread:$0]  %s13134_s8, 16, %s88_s6, [#allocation11]  }
  0x44   :  { %s10137_s18 = scalar_lea.hbm %s13093_s13, 3072 }
  0x45   :  { %p10138_p2 = scmp.ne.s32.totalorder %s13093_s13, %s10137_s18  ;;  %p10141_p3 = scmp.lt.u32.totalorder %s10137_s18, %s13093_s13 }
  0x47   :  { %p10143_p4 = pnand %p10141_p3, %p10138_p2 }
  0x49   :  { %10146 = shalt.err (!%p10143_p4)
}
  0x4a   :  { %s10147_s27 = scalar_lea.vmem %s113_s3, 3072  ;;  %p10152_p6 = scmp.lt.s32.totalorder %s113_s3, %s113_s3 }
  0x4b   :  { %p10148_p5 = scmp.ne.s32.totalorder %s113_s3, %s10147_s27  ;;  %p10153_p7 = scmp.lt.s32.totalorder %s10147_s27, %s10147_s27 }
  0x4d   :  { %p10154_p8 = por %p10153_p7, %p10152_p6 }
  0x4f   :  { %p10155_p9 = pnand %p10154_p8, %p10148_p5 }
  0x51   :  { %10158 = shalt.err (!%p10155_p9)
}
  0x52   :  { %118 = dma.hbm_to_vmem [thread:$0]  %s13093_s13, 3072, %s113_s3, [#allocation14], %s10442_s28, %s10442_s28, %s10443_s9  }
  0x53   :  { %s10446_s4 = smov [#allocation16]   ;;  %s10447_s7 = smov [#allocation19]  }
  0x54   :  { %s136_s2 = sshll.u32 %s10446_s4, 4  ;;  %s166_s5 = sshll.u32 %s10447_s7, 4  ;;  %s137_s2 = int_to_ptr.vmem [resolvable:$true] %s136_s2  ;;  %s167_s5 = int_to_ptr.vmem [resolvable:$true] %s166_s5 }
  0x55   :  { %s10159_s29 = scalar_lea.hbm %s13095_s15, 48 }
  0x56   :  { %p10160_p10 = scmp.ne.s32.totalorder %s13095_s15, %s10159_s29  ;;  %p10163_p11 = scmp.lt.u32.totalorder %s10159_s29, %s13095_s15 }
  0x58   :  { %p10165_p12 = pnand %p10163_p11, %p10160_p10 }
  0x5a   :  { %10168 = shalt.err (!%p10165_p12)
}
  0x5b   :  { %s10169_s13 = scalar_lea.vmem %s137_s2, 48  ;;  %s10173_s3 = scalar_lea.vmem %s137_s2, 64 }
  0x5c   :  { %p10170_p13 = scmp.ne.s32.totalorder %s137_s2, %s10169_s13  ;;  %p10174_p0 = scmp.lt.s32.totalorder %s137_s2, %s137_s2 }
  0x5d   :  { %p10175_p1 = scmp.lt.s32.totalorder %s10173_s3, %s10169_s13 }
  0x5f   :  { %p10176_p2 = por %p10175_p1, %p10174_p0 }
  0x61   :  { %p10177_p3 = pnand %p10176_p2, %p10170_p13 }
  0x63   :  { %10180 = shalt.err (!%p10177_p3)
}
  0x64   :  { %s10448_s1 = smov 16   ;;  %s10449_s27 = smov 1  }
  0x65   :  { %142 = dma.hbm_to_vmem [thread:$0]  %s13095_s15, 48, %s137_s2, [#allocation17], %s10448_s1, %s10448_s1, %s10449_s27  }
  0x66   :  { %s10181_s0 = scalar_lea.hbm %s13100_s20, 48 }
  0x67   :  { %p10182_p4 = scmp.ne.s32.totalorder %s13100_s20, %s10181_s0  ;;  %p10185_p5 = scmp.lt.u32.totalorder %s10181_s0, %s13100_s20 }
  0x69   :  { %p10187_p6 = pnand %p10185_p5, %p10182_p4 }
  0x6b   :  { %10190 = shalt.err (!%p10187_p6)
}
  0x6c   :  { %s10191_s30 = scalar_lea.vmem %s167_s5, 48  ;;  %s10195_s26 = scalar_lea.vmem %s167_s5, 64 }
  0x6d   :  { %p10192_p7 = scmp.ne.s32.totalorder %s167_s5, %s10191_s30  ;;  %p10196_p8 = scmp.lt.s32.totalorder %s167_s5, %s167_s5 }
  0x6e   :  { %p10197_p9 = scmp.lt.s32.totalorder %s10195_s26, %s10191_s30 }
  0x70   :  { %p10198_p10 = por %p10197_p9, %p10196_p8 }
  0x72   :  { %p10199_p11 = pnand %p10198_p10, %p10192_p7 }
  0x74   :  { %10202 = shalt.err (!%p10199_p11)
}
  0x75   :  { %172 = dma.hbm_to_vmem [thread:$0]  %s13100_s20, 48, %s167_s5, [#allocation20], %s10448_s1, %s10448_s1, %s10449_s27  }
  0x76   :  { %s10450_s13 = smov [#allocation22]   ;;  %s10451_s6 = smov [#allocation4]  }
  0x77   :  { %s190_s3 = sshll.u32 %s10450_s13, 4  ;;  %s47_s8 = sshll.u32 %s10451_s6, 4  ;;  %s191_s3 = int_to_ptr.vmem [resolvable:$true] %s190_s3  ;;  %s48_s8 = int_to_ptr.vmem [resolvable:$true] %s47_s8 }
  0x78   :  { %s10203_s0 = scalar_lea.hbm %s13102_s22, 48 }
  0x79   :  { %p10204_p12 = scmp.ne.s32.totalorder %s13102_s22, %s10203_s0  ;;  %p10207_p13 = scmp.lt.u32.totalorder %s10203_s0, %s13102_s22 }
  0x7b   :  { %p10209_p0 = pnand %p10207_p13, %p10204_p12 }
  0x7d   :  { %10212 = shalt.err (!%p10209_p0)
}
  0x7e   :  { %s10213_s20 = scalar_lea.vmem %s191_s3, 48  ;;  %s10217_s5 = scalar_lea.vmem %s191_s3, 64 }
  0x7f   :  { %p10214_p1 = scmp.ne.s32.totalorder %s191_s3, %s10213_s20  ;;  %p10218_p2 = scmp.lt.s32.totalorder %s191_s3, %s191_s3 }
  0x80   :  { %p10219_p3 = scmp.lt.s32.totalorder %s10217_s5, %s10213_s20 }
  0x82   :  { %p10220_p4 = por %p10219_p3, %p10218_p2 }
  0x84   :  { %p10221_p5 = pnand %p10220_p4, %p10214_p1 }
  0x86   :  { %10224 = shalt.err (!%p10221_p5)
}
  0x87   :  { %196 = dma.hbm_to_vmem [thread:$0]  %s13102_s22, 48, %s191_s3, [#allocation23], %s10448_s1, %s10448_s1, %s10449_s27  }
  0x88   :  { %s13135_s13 = sld [smem:[#allocation38_spill]] }
  0x8e   :  { %s10225_s6 = scalar_lea.hbm %s13135_s13, 64 }
  0x8f   :  { %p10226_p6 = scmp.ne.s32.totalorder %s13135_s13, %s10225_s6  ;;  %p10229_p7 = scmp.lt.u32.totalorder %s10225_s6, %s13135_s13 }
  0x91   :  { %p10231_p8 = pnand %p10229_p7, %p10226_p6 }
  0x93   :  { %10234 = shalt.err (!%p10231_p8)
}
  0x94   :  { %s10235_s29 = scalar_lea.vmem %s48_s8, 64  ;;  %p10240_p10 = scmp.lt.s32.totalorder %s48_s8, %s48_s8 }
  0x95   :  { %p10236_p9 = scmp.ne.s32.totalorder %s48_s8, %s10235_s29  ;;  %p10241_p11 = scmp.lt.s32.totalorder %s10235_s29, %s10235_s29 }
  0x97   :  { %p10242_p12 = por %p10241_p11, %p10240_p10 }
  0x99   :  { %p10243_p13 = pnand %p10242_p12, %p10236_p9 }
  0x9b   :  { %10246 = shalt.err (!%p10243_p13)
}
  0x9c   :  { %50 = dma.hbm_to_vmem [thread:$0]  %s13135_s13, 64, %s48_s8, [#allocation5]  }
  0x9d   :  { %s10452_s18 = smov [#allocation9]   ;;  %s10453_s20 = smov [#allocation12]  }
  0x9e   :  { %s75_s19 = sshll.u32 %s10452_s18, 4  ;;  %s99_s5 = sshll.u32 %s10453_s20, 4  ;;  %s76_s19 = int_to_ptr.vmem [resolvable:$true] %s75_s19  ;;  %s100_s5 = int_to_ptr.vmem [resolvable:$true] %s99_s5 }
  0x9f   :  { %s13136_s15 = sld [smem:[#allocation43_spill]] }
  0xa5   :  { %s10247_s2 = scalar_lea.hbm %s13136_s15, 16 }
  0xa6   :  { %p10248_p0 = scmp.ne.s32.totalorder %s13136_s15, %s10247_s2  ;;  %p10251_p1 = scmp.lt.u32.totalorder %s10247_s2, %s13136_s15 }
  0xa8   :  { %p10253_p2 = pnand %p10251_p1, %p10248_p0 }
  0xaa   :  { %10256 = shalt.err (!%p10253_p2)
}
  0xab   :  { %s10257_s8 = scalar_lea.vmem %s76_s19, 16  ;;  %s10261_s13 = scalar_lea.vmem %s76_s19, 32 }
  0xac   :  { %p10258_p3 = scmp.ne.s32.totalorder %s76_s19, %s10257_s8  ;;  %p10262_p4 = scmp.lt.s32.totalorder %s76_s19, %s76_s19 }
  0xad   :  { %p10263_p5 = scmp.lt.s32.totalorder %s10261_s13, %s10257_s8 }
  0xaf   :  { %p10264_p6 = por %p10263_p5, %p10262_p4 }
  0xb1   :  { %p10265_p7 = pnand %p10264_p6, %p10258_p3 }
  0xb3   :  { %10268 = shalt.err (!%p10265_p7)
}
  0xb4   :  { %78 = dma.hbm_to_vmem [thread:$0]  %s13136_s15, 16, %s76_s19, [#allocation8]  }
  0xb5   :  { %s10269_s18 = scalar_lea.hbm %s13090_s10, 16 }
  0xb6   :  { %p10270_p8 = scmp.ne.s32.totalorder %s13090_s10, %s10269_s18  ;;  %p10273_p9 = scmp.lt.u32.totalorder %s10269_s18, %s13090_s10 }
  0xb8   :  { %p10275_p10 = pnand %p10273_p9, %p10270_p8 }
  0xba   :  { %10278 = shalt.err (!%p10275_p10)
}
  0xbb   :  { %s10279_s6 = scalar_lea.vmem %s100_s5, 16  ;;  %s10283_s4 = scalar_lea.vmem %s100_s5, 32 }
  0xbc   :  { %p10280_p11 = scmp.ne.s32.totalorder %s100_s5, %s10279_s6  ;;  %p10284_p12 = scmp.lt.s32.totalorder %s100_s5, %s100_s5 }
  0xbd   :  { %p10285_p13 = scmp.lt.s32.totalorder %s10283_s4, %s10279_s6 }
  0xbf   :  { %p10286_p0 = por %p10285_p13, %p10284_p12 }
  0xc1   :  { %p10287_p1 = pnand %p10286_p0, %p10280_p11 }
  0xc3   :  { %10290 = shalt.err (!%p10287_p1)
}
  0xc4   :  { %102 = dma.hbm_to_vmem [thread:$0]  %s13090_s10, 16, %s100_s5, [#allocation11]  }
  0xc5   :  { %s10454_s7 = smov [#allocation15]   ;;  %s10455_s8 = smov [#allocation18]  }
  0xc6   :  { %s124_s0 = sshll.u32 %s10454_s7, 4  ;;  %s148_s13 = sshll.u32 %s10455_s8, 4  ;;  %s125_s0 = int_to_ptr.vmem [resolvable:$true] %s124_s0  ;;  %s149_s13 = int_to_ptr.vmem [resolvable:$true] %s148_s13 }
  0xc7   :  { %s10291_s22 = scalar_lea.hbm %s13094_s14, 48 }
  0xc8   :  { %p10292_p2 = scmp.ne.s32.totalorder %s13094_s14, %s10291_s22  ;;  %p10295_p3 = scmp.lt.u32.totalorder %s10291_s22, %s13094_s14 }
  0xca   :  { %p10297_p4 = pnand %p10295_p3, %p10292_p2 }
  0xcc   :  { %10300 = shalt.err (!%p10297_p4)
}
  0xcd   :  { %s10301_s10 = scalar_lea.vmem %s125_s0, 48  ;;  %s10305_s5 = scalar_lea.vmem %s125_s0, 64 }
  0xce   :  { %p10302_p5 = scmp.ne.s32.totalorder %s125_s0, %s10301_s10  ;;  %p10306_p6 = scmp.lt.s32.totalorder %s125_s0, %s125_s0 }
  0xcf   :  { %p10307_p7 = scmp.lt.s32.totalorder %s10305_s5, %s10301_s10 }
  0xd1   :  { %p10308_p8 = por %p10307_p7, %p10306_p6 }
  0xd3   :  { %p10309_p9 = pnand %p10308_p8, %p10302_p5 }
  0xd5   :  { %10312 = shalt.err (!%p10309_p9)
}
  0xd6   :  { %130 = dma.hbm_to_vmem [thread:$0]  %s13094_s14, 48, %s125_s0, [#allocation14], %s10448_s1, %s10448_s1, %s10449_s27  }
  0xd7   :  { %s10313_s19 = scalar_lea.hbm %s13096_s16, 48 }
  0xd8   :  { %p10314_p10 = scmp.ne.s32.totalorder %s13096_s16, %s10313_s19  ;;  %p10317_p11 = scmp.lt.u32.totalorder %s10313_s19, %s13096_s16 }
  0xda   :  { %p10319_p12 = pnand %p10317_p11, %p10314_p10 }
  0xdc   :  { %10322 = shalt.err (!%p10319_p12)
}
  0xdd   :  { %s10323_s29 = scalar_lea.vmem %s149_s13, 48  ;;  %s10327_s22 = scalar_lea.vmem %s149_s13, 64 }
  0xde   :  { %p10324_p13 = scmp.ne.s32.totalorder %s149_s13, %s10323_s29  ;;  %p10328_p0 = scmp.lt.s32.totalorder %s149_s13, %s149_s13 }
  0xdf   :  { %p10329_p1 = scmp.lt.s32.totalorder %s10327_s22, %s10323_s29 }
  0xe1   :  { %p10330_p2 = por %p10329_p1, %p10328_p0 }
  0xe3   :  { %p10331_p3 = pnand %p10330_p2, %p10324_p13 }
  0xe5   :  { %10334 = shalt.err (!%p10331_p3)
}
  0xe6   :  { %154 = dma.hbm_to_vmem [thread:$0]  %s13096_s16, 48, %s149_s13, [#allocation17], %s10448_s1, %s10448_s1, %s10449_s27  }
  0xe7   :  { %s10456_s3 = smov [#allocation21]   ;;  %s10457_s20 = smov [#allocation24]  }
  0xe8   :  { %s178_s18 = sshll.u32 %s10456_s3, 4  ;;  %s202_s30 = sshll.u32 %s10457_s20, 4  ;;  %s179_s18 = int_to_ptr.vmem [resolvable:$true] %s178_s18  ;;  %s203_s30 = int_to_ptr.vmem [resolvable:$true] %s202_s30 }
  0xe9   :  { %s10335_s26 = scalar_lea.hbm %s13101_s21, 48 }
  0xea   :  { %p10336_p4 = scmp.ne.s32.totalorder %s13101_s21, %s10335_s26  ;;  %p10339_p5 = scmp.lt.u32.totalorder %s10335_s26, %s13101_s21 }
  0xec   :  { %p10341_p6 = pnand %p10339_p5, %p10336_p4 }
  0xee   :  { %10344 = shalt.err (!%p10341_p6)
}
  0xef   :  { %s10345_s16 = scalar_lea.vmem %s179_s18, 48  ;;  %s10349_s13 = scalar_lea.vmem %s179_s18, 64 }
  0xf0   :  { %p10346_p7 = scmp.ne.s32.totalorder %s179_s18, %s10345_s16  ;;  %p10350_p8 = scmp.lt.s32.totalorder %s179_s18, %s179_s18 }
  0xf1   :  { %p10351_p9 = scmp.lt.s32.totalorder %s10349_s13, %s10345_s16 }
  0xf3   :  { %p10352_p10 = por %p10351_p9, %p10350_p8 }
  0xf5   :  { %p10353_p11 = pnand %p10352_p10, %p10346_p7 }
  0xf7   :  { %10356 = shalt.err (!%p10353_p11)
}
  0xf8   :  { %184 = dma.hbm_to_vmem [thread:$0]  %s13101_s21, 48, %s179_s18, [#allocation20], %s10448_s1, %s10448_s1, %s10449_s27  }
  0xf9   :  { %s10357_s29 = scalar_lea.hbm %s13103_s23, 1024 }
  0xfa   :  { %p10358_p12 = scmp.ne.s32.totalorder %s13103_s23, %s10357_s29  ;;  %p10361_p13 = scmp.lt.u32.totalorder %s10357_s29, %s13103_s23 }
  0xfc   :  { %p10363_p0 = pnand %p10361_p13, %p10358_p12 }
  0xfe   :  { %10366 = shalt.err (!%p10363_p0)
}
  0xff   :  { %s10367_s20 = scalar_lea.vmem %s203_s30, 1024  ;;  %p10372_p2 = scmp.lt.s32.totalorder %s203_s30, %s203_s30 }
 0x100   :  { %p10368_p1 = scmp.ne.s32.totalorder %s203_s30, %s10367_s20  ;;  %p10373_p3 = scmp.lt.s32.totalorder %s10367_s20, %s10367_s20 }
 0x102   :  { %p10374_p4 = por %p10373_p3, %p10372_p2 }
 0x104   :  { %p10375_p5 = pnand %p10374_p4, %p10368_p1 }
 0x106   :  { %10378 = shalt.err (!%p10375_p5)
}
 0x107   :  { %208 = dma.hbm_to_vmem [thread:$0]  %s13103_s23, 1024, %s203_s30, [#allocation23], %s10442_s28, %s10442_s28, %s10443_s9  }
 0x108   :  { %s10458_s27 = smov [#allocation25]   ;;  %s10379_s26 = scalar_lea.hbm %s13104_s24, 16 }
 0x109   :  { %s215_s18 = sshll.u32 %s10458_s27, 4  ;;  %p10380_p6 = scmp.ne.s32.totalorder %s13104_s24, %s10379_s26  ;;  %s216_s18 = int_to_ptr.vmem [resolvable:$true] %s215_s18 }
 0x10a   :  { %p10383_p7 = scmp.lt.u32.totalorder %s10379_s26, %s13104_s24 }
 0x10c   :  { %p10385_p8 = pnand %p10383_p7, %p10380_p6 }
 0x10e   :  { %10388 = shalt.err (!%p10385_p8)
}
 0x10f   :  { %s10389_s16 = scalar_lea.vmem %s216_s18, 16  ;;  %s10393_s23 = scalar_lea.vmem %s216_s18, 32 }
 0x110   :  { %p10390_p9 = scmp.ne.s32.totalorder %s216_s18, %s10389_s16  ;;  %p10394_p10 = scmp.lt.s32.totalorder %s216_s18, %s216_s18 }
 0x111   :  { %p10395_p11 = scmp.lt.s32.totalorder %s10393_s23, %s10389_s16 }
 0x113   :  { %p10396_p12 = por %p10395_p11, %p10394_p10 }
 0x115   :  { %p10397_p13 = pnand %p10396_p12, %p10390_p9 }
 0x117   :  { %10400 = shalt.err (!%p10397_p13)
}
 0x118   :  { %218 = dma.hbm_to_vmem [thread:$0]  %s13104_s24, 16, %s216_s18, [#allocation26]  }
 0x119   :  { %10423 = dma.done.wait [#allocation5], 64  }
 0x11a   :  { %10424 = vsyncadd [#allocation5], 4294967232 }
 0x11b   :  { %10425 = dma.done.wait [#allocation8], 1552  }
 0x11c   :  { %10426 = vsyncadd [#allocation8], 4294965744 }
 0x11d   :  { %10427 = dma.done.wait [#allocation11], 32  }
 0x11e   :  { %10428 = vsyncadd [#allocation11], 4294967264 }
 0x11f   :  { %10429 = dma.done.wait [#allocation14], 3120  }
 0x120   :  { %10430 = vsyncadd [#allocation14], 4294964176 }
 0x121   :  { %10431 = dma.done.wait [#allocation17], 96  }
 0x122   :  { %10432 = vsyncadd [#allocation17], 4294967200 }
 0x123   :  { %10433 = dma.done.wait [#allocation20], 96  }
 0x124   :  { %10434 = vsyncadd [#allocation20], 4294967200 }
 0x125   :  { %10435 = dma.done.wait [#allocation23], 1072  }
 0x126   :  { %10436 = vsyncadd [#allocation23], 4294966224 }
 0x127   :  { %10437 = dma.done.wait [#allocation26], 16  }
 0x128   :  { %10438 = vsyncadd [#allocation26], 4294967280  ;;  %vm398_vm0 = vcmask 1042432   ;;  %vm301_vm1 = vcmask 23552   ;;  %v293_v0 = vld [vmem:[#allocation4] sm:$0x7] }
 0x129   :  { %s13137_s13 = sld [smem:[#allocation37_spill]]  ;;  %8244 = vmatprep.subr.msk.mxu0 %vm398_vm0, %v293_v0  ;;  %v829_v33 = vld [vmem:[#allocation7 + $0x20] sm:$0xff]  ;;  %v830_v34 = vld [vmem:[#allocation7 + $0x28] sm:$0xff]  ;;  %vm659_vm2 = vcmask 261120   ;;  %v10459_v38 = vmov 0.0|0.0   ;;  %v10460_v40 = vmov 0.0  }
 0x12a   :  { %8245 = vmatpush3.msk.msra.mxu0 %vm398_vm0, %v293_v0  ;;  %v807_v35 = vld [vmem:[#allocation7] sm:$0xff]  ;;  %v9217_v36 = vpack.c.bf16 %v830_v34, %v829_v33  ;;  %v808_v37 = vld [vmem:[#allocation7 + $0x8] sm:$0xff]  ;;  %9216 = vmatprep.subr.bf16.mxu1 %v10459_v38  ;;  %771 = vst.msk [vmem:[#allocation2] sm:$0xff] %vm659_vm2, %v10460_v40  ;;  %772 = vst.msk [vmem:[#allocation2 + $0x48] sm:$0xff] %vm659_vm2, %v10460_v40  ;;  %vm13117_vm3 = vmmov 0   ;;  %s13138_s20 = sld [smem:[#allocation39_spill]] }
 0x12b   :  { %9222 = vmatprep.subr.bf16.mxu0 %v10459_v38  ;;  %v9223_v39 = vpack.c.bf16 %v808_v37, %v807_v35  ;;  %773 = vst.msk [vmem:[#allocation2 + $0x90] sm:$0xff] %vm659_vm2, %v10460_v40  ;;  %v831_v41 = vld [vmem:[#allocation7 + $0x30] sm:$0xff]  ;;  %v832_v42 = vld [vmem:[#allocation7 + $0x38] sm:$0xff]  ;;  %8302 = vmatprep.mubr.msk.f32.mxu1 %vm13117_vm3, %v10460_v40  ;;  %vm13119_vm4 = vcmask 523264   ;;  %s13139_s27 = sld [smem:[#allocation42_spill]]  ;;  %s13140_s6 = sld [smem:[#allocation41_spill]] }
 0x12c   :  { %9218 = vmatpush3.bf16.msra.mxu1 %v9217_v36  ;;  %v809_v43 = vld [vmem:[#allocation7 + $0x10] sm:$0xff]  ;;  %v9220_v44 = vpack.c.bf16 %v832_v42, %v831_v41  ;;  %v810_v45 = vld [vmem:[#allocation7 + $0x18] sm:$0xff]  ;;  %s13141_s3 = sld [smem:[#allocation44_spill]]  ;;  %s13142_s9 = sld [smem:[#allocation46_spill]] }
 0x12d   :  { %9219 = vmatprep.subr.bf16.mxu1 %v10459_v38  ;;  %v9226_v46 = vpack.c.bf16 %v810_v45, %v809_v43  ;;  %v1254_v34 = vld [vmem:[#allocation7 + $0x58] sm:$0xff]  ;;  %s13162_s10 = sld [smem:[#allocation48_spill]]  ;;  %s13165_s15 = sld [smem:[#allocation47_spill]] }
 0x12f   :  { %v261_v1 = vld [vmem:[%s13137_s13] sm:$0xff]  ;;  %v262_v2 = vld [vmem:[%s13137_s13 + $0x8] sm:$0xff]  ;;  %v263_v3 = vld [vmem:[%s13137_s13 + $0x10] sm:$0xff] }
 0x130   :  { %8246 = vmatprep.mubr.msk.f32.mxu0 %vm301_vm1, %v261_v1  ;;  %v264_v4 = vld [vmem:[%s13137_s13 + $0x18] sm:$0xff]  ;;  %v265_v5 = vld [vmem:[%s13137_s13 + $0x20] sm:$0xff]  ;;  %v266_v6 = vld [vmem:[%s13137_s13 + $0x28] sm:$0xff]  ;;  %9221 = vmatpush3.bf16.msra.mxu1 %v9220_v44 }
 0x131   :  { %8247 = vmatmul.mubr.msk.f32.vlgmr.msra.gmra.mrb[0].mxu0 %vm301_vm1, %v262_v2  ;;  %v267_v7 = vld [vmem:[%s13137_s13 + $0x30] sm:$0xff]  ;;  %v268_v8 = vld [vmem:[%s13137_s13 + $0x38] sm:$0xff]  ;;  %v269_v9 = vld [vmem:[%s13137_s13 + $0x40] sm:$0xff]  ;;  %9228 = vmatprep.subr.bf16.mxu1 %v10459_v38 }
 0x132   :  { %8249 = vmatprep.mubr.msk.f32.mxu0 %vm301_vm1, %v263_v3  ;;  %v270_v10 = vld [vmem:[%s13137_s13 + $0x48] sm:$0xff]  ;;  %v271_v11 = vld [vmem:[%s13137_s13 + $0x50] sm:$0xff]  ;;  %v272_v12 = vld [vmem:[%s13137_s13 + $0x58] sm:$0xff]  ;;  %9224 = vmatpush3.bf16.msra.mxu0 %v9223_v39 }
 0x133   :  { %v273_v13 = vld [vmem:[%s13137_s13 + $0x60] sm:$0xff]  ;;  %v274_v14 = vld [vmem:[%s13137_s13 + $0x68] sm:$0xff]  ;;  %v275_v15 = vld [vmem:[%s13137_s13 + $0x70] sm:$0xff]  ;;  %9225 = vmatprep.subr.bf16.mxu0 %v10459_v38 }
 0x134   :  { %v276_v16 = vld [vmem:[%s13137_s13 + $0x78] sm:$0xff]  ;;  %v277_v17 = vld [vmem:[%s13137_s13 + $0x80] sm:$0xff]  ;;  %v278_v18 = vld [vmem:[%s13137_s13 + $0x88] sm:$0xff] }
 0x135   :  { %8250 = vmatmul.mubr.msk.f32.gmra.mrb[2].mxu0 %vm301_vm1, %v264_v4  ;;  %v279_v19 = vld [vmem:[%s13137_s13 + $0x90] sm:$0xff]  ;;  %v280_v20 = vld [vmem:[%s13137_s13 + $0x98] sm:$0xff]  ;;  %v281_v21 = vld [vmem:[%s13137_s13 + $0xa0] sm:$0xff] }
 0x136   :  { %8252 = vmatprep.mubr.msk.f32.mxu0 %vm301_vm1, %v265_v5  ;;  %v282_v22 = vld [vmem:[%s13137_s13 + $0xa8] sm:$0xff]  ;;  %v283_v23 = vld [vmem:[%s13137_s13 + $0xb0] sm:$0xff]  ;;  %v284_v24 = vld [vmem:[%s13137_s13 + $0xb8] sm:$0xff]  ;;  %9227 = vmatpush3.bf16.msra.mxu0 %v9226_v46 }
 0x137   :  { %v285_v25 = vld [vmem:[%s13137_s13 + $0xc0] sm:$0xff]  ;;  %v286_v26 = vld [vmem:[%s13137_s13 + $0xc8] sm:$0xff]  ;;  %v287_v27 = vld [vmem:[%s13137_s13 + $0xd0] sm:$0xff]  ;;  %9234 = vmatprep.subr.bf16.mxu0 %v10459_v38 }
 0x138   :  { %v288_v28 = vld [vmem:[%s13137_s13 + $0xd8] sm:$0xff]  ;;  %v289_v29 = vld [vmem:[%s13137_s13 + $0xe0] sm:$0xff]  ;;  %v290_v30 = vld [vmem:[%s13137_s13 + $0xe8] sm:$0xff] }
 0x139   :  { %8253 = vmatmul.mubr.msk.f32.gmra.mrb[4].mxu0 %vm301_vm1, %v266_v6  ;;  %v291_v31 = vld [vmem:[%s13137_s13 + $0xf0] sm:$0xff]  ;;  %v292_v32 = vld [vmem:[%s13137_s13 + $0xf8] sm:$0xff]  ;;  %v10937_v47 = vld [vmem:[%s13138_s20] ss:$0 sm:$0xff] }
 0x13a   :  { %8255 = vmatprep.mubr.msk.f32.mxu0 %vm301_vm1, %v267_v7 }
 0x13d   :  { %8256 = vmatmul.mubr.msk.f32.gmra.mrb[6].mxu0 %vm301_vm1, %v268_v8 }
 0x13e   :  { %8258 = vmatprep.mubr.msk.f32.mxu0 %vm301_vm1, %v269_v9 }
 0x141   :  { %8259 = vmatmul.mubr.msk.f32.gmra.mrb[8].mxu0 %vm301_vm1, %v270_v10 }
 0x142   :  { %8261 = vmatprep.mubr.msk.f32.mxu0 %vm301_vm1, %v271_v11 }
 0x145   :  { %8262 = vmatmul.mubr.msk.f32.gmra.mrb[10].mxu0 %vm301_vm1, %v272_v12 }
 0x146   :  { %8264 = vmatprep.mubr.msk.f32.mxu0 %vm301_vm1, %v273_v13 }
 0x149   :  { %8265 = vmatmul.mubr.msk.f32.gmra.mrb[12].mxu0 %vm301_vm1, %v274_v14 }
 0x14a   :  { %8267 = vmatprep.mubr.msk.f32.mxu0 %vm301_vm1, %v275_v15 }
 0x14d   :  { %8268 = vmatmul.mubr.msk.f32.gmra.mrb[14].mxu0 %vm301_vm1, %v276_v16 }
 0x14e   :  { %8270 = vmatprep.mubr.msk.f32.mxu0 %vm301_vm1, %v277_v17  ;;  %v1251_v17 = vld [vmem:[#allocation7 + $0x40] sm:$0xff] }
 0x151   :  { %8271 = vmatmul.mubr.msk.f32.gmra.mrb[16].mxu0 %vm301_vm1, %v278_v18  ;;  %v1252_v18 = vld [vmem:[#allocation7 + $0x48] sm:$0xff] }
 0x152   :  { %8273 = vmatprep.mubr.msk.f32.mxu0 %vm301_vm1, %v279_v19 }
 0x155   :  { %8274 = vmatmul.mubr.msk.f32.gmra.mrb[18].mxu0 %vm301_vm1, %v280_v20 }
 0x156   :  { %8276 = vmatprep.mubr.msk.f32.mxu0 %vm301_vm1, %v281_v21 }
 0x159   :  { %8277 = vmatmul.mubr.msk.f32.gmra.mrb[20].mxu0 %vm301_vm1, %v282_v22 }
 0x15a   :  { %8279 = vmatprep.mubr.msk.f32.mxu0 %vm301_vm1, %v283_v23 }
 0x15d   :  { %8280 = vmatmul.mubr.msk.f32.gmra.mrb[22].mxu0 %vm301_vm1, %v284_v24 }
 0x15e   :  { %8282 = vmatprep.mubr.msk.f32.mxu0 %vm301_vm1, %v285_v25 }
 0x161   :  { %8283 = vmatmul.mubr.msk.f32.gmra.mrb[24].mxu0 %vm301_vm1, %v286_v26 }
 0x162   :  { %8285 = vmatprep.mubr.msk.f32.mxu0 %vm301_vm1, %v287_v27  ;;  %v9229_v27 = vpack.c.bf16 %v1252_v18, %v1251_v17 }
 0x165   :  { %8286 = vmatmul.mubr.msk.f32.gmra.mrb[26].mxu0 %vm301_vm1, %v288_v28 }
 0x166   :  { %8288 = vmatprep.mubr.msk.f32.mxu0 %vm301_vm1, %v289_v29 }
 0x169   :  { %8289 = vmatmul.mubr.msk.f32.gmra.mrb[28].mxu0 %vm301_vm1, %v290_v30  ;;  %v1253_v30 = vld [vmem:[#allocation7 + $0x50] sm:$0xff] }
 0x16a   :  { %8291 = vmatprep.mubr.msk.f32.mxu0 %vm301_vm1, %v291_v31  ;;  %v9232_v45 = vpack.c.bf16 %v1254_v34, %v1253_v30 }
 0x16d   :  { %8292 = vmatmul.mubr.msk.f32.gmra.mrb[30].mxu0 %vm301_vm1, %v292_v32 }
 0x16e   :  { %8361 = vmatprep.mubr.msk.f32.mxu0 %vm13117_vm3, %v10460_v40 }
 0x204   :  { %v8248_v48 = vpop.f32.mrb[0].mxu0 }
 0x205   :  { %v474_v49 = vadd.f32 %v8248_v48, %v10937_v47  ;;  %v468_v50 = vpop.f32.mrb[1].mxu0 }
 0x206   :  { %v469_v51 = vadd.f32 %v10937_v47, %v468_v50 }
 0x207   :  { %v628_v52 = vmax.f32 %v474_v49, 0.0 }
 0x208   :  { %v627_v53 = vmax.f32 %v469_v51, 0.0  ;;  %v8251_v54 = vpop.f32.mrb[2].mxu0 }
 0x209   :  { %661 = vst.msk [vmem:[#allocation3 + $0x8] sm:$0xff] %vm659_vm2, %v628_v52  ;;  %v484_v55 = vadd.f32 %v8251_v54, %v10937_v47  ;;  %v478_v56 = vpop.f32.mrb[3].mxu0 }
 0x20a   :  { %660 = vst.msk [vmem:[#allocation3] sm:$0xff] %vm659_vm2, %v627_v53  ;;  %v479_v57 = vadd.f32 %v10937_v47, %v478_v56 }
 0x20b   :  { %v630_v58 = vmax.f32 %v484_v55, 0.0 }
 0x20c   :  { %v629_v59 = vmax.f32 %v479_v57, 0.0  ;;  %v8254_v60 = vpop.f32.mrb[4].mxu0 }
 0x20d   :  { %663 = vst.msk [vmem:[#allocation3 + $0x18] sm:$0xff] %vm659_vm2, %v630_v58  ;;  %v494_v61 = vadd.f32 %v8254_v60, %v10937_v47  ;;  %v488_v62 = vpop.f32.mrb[5].mxu0 }
 0x20e   :  { %662 = vst.msk [vmem:[#allocation3 + $0x10] sm:$0xff] %vm659_vm2, %v629_v59  ;;  %v489_v63 = vadd.f32 %v10937_v47, %v488_v62 }
 0x20f   :  { %v632_v0 = vmax.f32 %v494_v61, 0.0 }
 0x210   :  { %v631_v1 = vmax.f32 %v489_v63, 0.0  ;;  %v8257_v2 = vpop.f32.mrb[6].mxu0 }
 0x211   :  { %v692_v3 = vld [vmem:[#allocation3] ss:$2 sm:$0xff]  ;;  %v724_v4 = vld [vmem:[#allocation3 + $0x1] ss:$2 sm:$0xff]  ;;  %665 = vst.msk [vmem:[#allocation3 + $0x28] sm:$0xff] %vm659_vm2, %v632_v0  ;;  %v504_v5 = vadd.f32 %v8257_v2, %v10937_v47  ;;  %v498_v6 = vpop.f32.mrb[7].mxu0 }
 0x212   :  { %664 = vst.msk [vmem:[#allocation3 + $0x20] sm:$0xff] %vm659_vm2, %v631_v1  ;;  %v499_v7 = vadd.f32 %v10937_v47, %v498_v6  ;;  %v755_v8 = vmax.f32 %v692_v3, %v724_v4 }
 0x213   :  { %v634_v9 = vmax.f32 %v504_v5, 0.0 }
 0x214   :  { %v633_v10 = vmax.f32 %v499_v7, 0.0  ;;  %v8260_v11 = vpop.f32.mrb[8].mxu0  ;;  %774 = vst.msk [vmem:[#allocation2 + $0x8] sm:$0xff] %vm659_vm2, %v755_v8 }
 0x215   :  { %v694_v12 = vld [vmem:[#allocation3 + $0x10] ss:$2 sm:$0xff]  ;;  %v726_v13 = vld [vmem:[#allocation3 + $0x11] ss:$2 sm:$0xff]  ;;  %667 = vst.msk [vmem:[#allocation3 + $0x38] sm:$0xff] %vm659_vm2, %v634_v9  ;;  %v514_v14 = vadd.f32 %v8260_v11, %v10937_v47  ;;  %v508_v15 = vpop.f32.mrb[9].mxu0 }
 0x216   :  { %666 = vst.msk [vmem:[#allocation3 + $0x30] sm:$0xff] %vm659_vm2, %v633_v10  ;;  %v509_v16 = vadd.f32 %v10937_v47, %v508_v15  ;;  %v756_v19 = vmax.f32 %v694_v12, %v726_v13 }
 0x217   :  { %v636_v20 = vmax.f32 %v514_v14, 0.0 }
 0x218   :  { %v635_v21 = vmax.f32 %v509_v16, 0.0  ;;  %v8263_v22 = vpop.f32.mrb[10].mxu0  ;;  %775 = vst.msk [vmem:[#allocation2 + $0x10] sm:$0xff] %vm659_vm2, %v756_v19 }
 0x219   :  { %v696_v23 = vld [vmem:[#allocation3 + $0x20] ss:$2 sm:$0xff]  ;;  %v728_v24 = vld [vmem:[#allocation3 + $0x21] ss:$2 sm:$0xff]  ;;  %669 = vst.msk [vmem:[#allocation3 + $0x48] sm:$0xff] %vm659_vm2, %v636_v20  ;;  %v524_v25 = vadd.f32 %v8263_v22, %v10937_v47  ;;  %v518_v26 = vpop.f32.mrb[11].mxu0 }
 0x21a   :  { %668 = vst.msk [vmem:[#allocation3 + $0x40] sm:$0xff] %vm659_vm2, %v635_v21  ;;  %v519_v28 = vadd.f32 %v10937_v47, %v518_v26  ;;  %v757_v29 = vmax.f32 %v696_v23, %v728_v24 }
 0x21b   :  { %v638_v31 = vmax.f32 %v524_v25, 0.0  ;;  %v811_v32 = vld [vmem:[#allocation2 + $0x8] sm:$0xff] }
 0x21c   :  { %v790_v33 = vld [vmem:[#allocation2 + $0x7] sm:$0xff]  ;;  %v637_v35 = vmax.f32 %v519_v28, 0.0  ;;  %v8266_v36 = vpop.f32.mrb[12].mxu0  ;;  %8303 = vmatmul.mubr.msk.f32.vlgmr.msra.gmra.mrb[0].mxu1 %vm659_vm2, %v811_v32  ;;  %776 = vst.msk [vmem:[#allocation2 + $0x18] sm:$0xff] %vm659_vm2, %v757_v29 }
 0x21d   :  { %8362 = vmatmul.mubr.msk.f32.vlgmr.msra.gmra.mrb[32].mxu0 %vm659_vm2, %v790_v33  ;;  %1558 = vst.msk [vmem:[#allocation2] sm:$0xff] %vm13119_vm4, %v10460_v40  ;;  %v698_v37 = vld [vmem:[#allocation3 + $0x30] ss:$2 sm:$0xff]  ;;  %v730_v39 = vld [vmem:[#allocation3 + $0x31] ss:$2 sm:$0xff]  ;;  %v534_v41 = vadd.f32 %v8266_v36, %v10937_v47  ;;  %9230 = vmatpush3.bf16.msra.mxu1 %v9229_v27  ;;  %v528_v42 = vpop.f32.mrb[13].mxu0 }
 0x21e   :  { %671 = vst.msk [vmem:[#allocation3 + $0x58] sm:$0xff] %vm659_vm2, %v638_v31  ;;  %8305 = vmatprep.mubr.msk.f32.mxu1 %vm13117_vm3, %v10460_v40  ;;  %670 = vst.msk [vmem:[#allocation3 + $0x50] sm:$0xff] %vm659_vm2, %v637_v35  ;;  %v529_v43 = vadd.f32 %v10937_v47, %v528_v42  ;;  %8364 = vmatprep.mubr.msk.f32.mxu0 %vm13117_vm3, %v10460_v40  ;;  %v758_v44 = vmax.f32 %v698_v37, %v730_v39 }
 0x21f   :  { %9231 = vmatprep.subr.bf16.mxu1 %v10459_v38  ;;  %v640_v46 = vmax.f32 %v534_v41, 0.0  ;;  %v812_v48 = vld [vmem:[#allocation2 + $0x10] sm:$0xff] }
 0x220   :  { %v791_v49 = vld [vmem:[#allocation2 + $0xf] sm:$0xff]  ;;  %v639_v50 = vmax.f32 %v529_v43, 0.0  ;;  %v8269_v51 = vpop.f32.mrb[14].mxu0  ;;  %8306 = vmatmul.mubr.msk.f32.gmra.mrb[2].mxu1 %vm659_vm2, %v812_v48  ;;  %777 = vst.msk [vmem:[#allocation2 + $0x20] sm:$0xff] %vm659_vm2, %v758_v44 }
 0x221   :  { %8365 = vmatmul.mubr.msk.f32.gmra.mrb[34].mxu0 %vm659_vm2, %v791_v49  ;;  %v700_v52 = vld [vmem:[#allocation3 + $0x40] ss:$2 sm:$0xff]  ;;  %v732_v53 = vld [vmem:[#allocation3 + $0x41] ss:$2 sm:$0xff]  ;;  %673 = vst.msk [vmem:[#allocation3 + $0x68] sm:$0xff] %vm659_vm2, %v640_v46  ;;  %v544_v54 = vadd.f32 %v8269_v51, %v10937_v47  ;;  %v538_v55 = vpop.f32.mrb[15].mxu0  ;;  %8308 = vmatprep.mubr.msk.f32.mxu1 %vm13117_vm3, %v10460_v40 }
 0x222   :  { %8367 = vmatprep.mubr.msk.f32.mxu0 %vm13117_vm3, %v10460_v40  ;;  %v759_v56 = vmax.f32 %v700_v52, %v732_v53  ;;  %672 = vst.msk [vmem:[#allocation3 + $0x60] sm:$0xff] %vm659_vm2, %v639_v50  ;;  %v539_v57 = vadd.f32 %v10937_v47, %v538_v55  ;;  %9233 = vmatpush3.bf16.msra.mxu1 %v9232_v45 }
 0x223   :  { %v642_v58 = vmax.f32 %v544_v54, 0.0  ;;  %v813_v59 = vld [vmem:[#allocation2 + $0x18] sm:$0xff]  ;;  %9246 = vmatprep.subr.bf16.mxu1 %v10459_v38 }
 0x224   :  { %v792_v60 = vld [vmem:[#allocation2 + $0x17] sm:$0xff]  ;;  %778 = vst.msk [vmem:[#allocation2 + $0x28] sm:$0xff] %vm659_vm2, %v759_v56  ;;  %v641_v61 = vmax.f32 %v539_v57, 0.0  ;;  %8309 = vmatmul.mubr.msk.f32.gmra.mrb[4].mxu1 %vm659_vm2, %v813_v59  ;;  %v8272_v62 = vpop.f32.mrb[16].mxu0 }
 0x225   :  { %8368 = vmatmul.mubr.msk.f32.gmra.mrb[36].mxu0 %vm659_vm2, %v792_v60  ;;  %v702_v63 = vld [vmem:[#allocation3 + $0x50] ss:$2 sm:$0xff]  ;;  %v734_v0 = vld [vmem:[#allocation3 + $0x51] ss:$2 sm:$0xff]  ;;  %675 = vst.msk [vmem:[#allocation3 + $0x78] sm:$0xff] %vm659_vm2, %v642_v58  ;;  %v554_v1 = vadd.f32 %v8272_v62, %v10937_v47  ;;  %v548_v2 = vpop.f32.mrb[17].mxu0  ;;  %8311 = vmatprep.mubr.msk.f32.mxu1 %vm13117_vm3, %v10460_v40 }
 0x226   :  { %8370 = vmatprep.mubr.msk.f32.mxu0 %vm13117_vm3, %v10460_v40  ;;  %v760_v3 = vmax.f32 %v702_v63, %v734_v0  ;;  %674 = vst.msk [vmem:[#allocation3 + $0x70] sm:$0xff] %vm659_vm2, %v641_v61  ;;  %v549_v4 = vadd.f32 %v10937_v47, %v548_v2  ;;  %v819_v63 = vld [vmem:[#allocation2 + $0x48] sm:$0xff] }
 0x227   :  { %v644_v5 = vmax.f32 %v554_v1, 0.0  ;;  %v814_v6 = vld [vmem:[#allocation2 + $0x20] sm:$0xff] }
 0x228   :  { %v793_v7 = vld [vmem:[#allocation2 + $0x1f] sm:$0xff]  ;;  %779 = vst.msk [vmem:[#allocation2 + $0x30] sm:$0xff] %vm659_vm2, %v760_v3  ;;  %v643_v8 = vmax.f32 %v549_v4, 0.0  ;;  %v8275_v9 = vpop.f32.mrb[18].mxu0  ;;  %8312 = vmatmul.mubr.msk.f32.gmra.mrb[6].mxu1 %vm659_vm2, %v814_v6 }
 0x229   :  { %8371 = vmatmul.mubr.msk.f32.gmra.mrb[38].mxu0 %vm659_vm2, %v793_v7  ;;  %v704_v10 = vld [vmem:[#allocation3 + $0x60] ss:$2 sm:$0xff]  ;;  %v736_v11 = vld [vmem:[#allocation3 + $0x61] ss:$2 sm:$0xff]  ;;  %677 = vst.msk [vmem:[#allocation3 + $0x88] sm:$0xff] %vm659_vm2, %v644_v5  ;;  %v564_v12 = vadd.f32 %v8275_v9, %v10937_v47  ;;  %v558_v13 = vpop.f32.mrb[19].mxu0  ;;  %8314 = vmatprep.mubr.msk.f32.mxu1 %vm13117_vm3, %v10460_v40 }
 0x22a   :  { %8373 = vmatprep.mubr.msk.f32.mxu0 %vm13117_vm3, %v10460_v40  ;;  %v761_v14 = vmax.f32 %v704_v10, %v736_v11  ;;  %676 = vst.msk [vmem:[#allocation3 + $0x80] sm:$0xff] %vm659_vm2, %v643_v8  ;;  %v559_v15 = vadd.f32 %v10937_v47, %v558_v13 }
 0x22b   :  { %v646_v16 = vmax.f32 %v564_v12, 0.0  ;;  %v815_v17 = vld [vmem:[#allocation2 + $0x28] sm:$0xff] }
 0x22c   :  { %v794_v18 = vld [vmem:[#allocation2 + $0x27] sm:$0xff]  ;;  %780 = vst.msk [vmem:[#allocation2 + $0x38] sm:$0xff] %vm659_vm2, %v761_v14  ;;  %v645_v19 = vmax.f32 %v559_v15, 0.0  ;;  %v8278_v20 = vpop.f32.mrb[20].mxu0  ;;  %8315 = vmatmul.mubr.msk.f32.gmra.mrb[8].mxu1 %vm659_vm2, %v815_v17 }
 0x22d   :  { %8374 = vmatmul.mubr.msk.f32.gmra.mrb[40].mxu0 %vm659_vm2, %v794_v18  ;;  %v706_v21 = vld [vmem:[#allocation3 + $0x70] ss:$2 sm:$0xff]  ;;  %v738_v22 = vld [vmem:[#allocation3 + $0x71] ss:$2 sm:$0xff]  ;;  %679 = vst.msk [vmem:[#allocation3 + $0x98] sm:$0xff] %vm659_vm2, %v646_v16  ;;  %v574_v23 = vadd.f32 %v8278_v20, %v10937_v47  ;;  %v568_v24 = vpop.f32.mrb[21].mxu0  ;;  %8317 = vmatprep.mubr.msk.f32.mxu1 %vm13117_vm3, %v10460_v40 }
 0x22e   :  { %8376 = vmatprep.mubr.msk.f32.mxu0 %vm13117_vm3, %v10460_v40  ;;  %v762_v25 = vmax.f32 %v706_v21, %v738_v22  ;;  %678 = vst.msk [vmem:[#allocation3 + $0x90] sm:$0xff] %vm659_vm2, %v645_v19  ;;  %v569_v26 = vadd.f32 %v10937_v47, %v568_v24  ;;  %v11022_v27 = vld [vmem:[#allocation2 + $0x21] sm:$0xff] }
 0x22f   :  { %v648_v28 = vmax.f32 %v574_v23, 0.0  ;;  %v816_v29 = vld [vmem:[#allocation2 + $0x30] sm:$0xff] }
 0x230   :  { %v795_v30 = vld [vmem:[#allocation2 + $0x2f] sm:$0xff]  ;;  %781 = vst.msk [vmem:[#allocation2 + $0x40] sm:$0xff] %vm659_vm2, %v762_v25  ;;  %v647_v32 = vmax.f32 %v569_v26, 0.0  ;;  %v8281_v33 = vpop.f32.mrb[22].mxu0  ;;  %8318 = vmatmul.mubr.msk.f32.gmra.mrb[10].mxu1 %vm659_vm2, %v816_v29 }
 0x231   :  { %v11024_v31 = vld [vmem:[#allocation2 + $0x29] sm:$0xff]  ;;  %8377 = vmatmul.mubr.msk.f32.gmra.mrb[42].mxu0 %vm659_vm2, %v795_v30  ;;  %v708_v34 = vld [vmem:[#allocation3 + $0x80] ss:$2 sm:$0xff]  ;;  %v740_v35 = vld [vmem:[#allocation3 + $0x81] ss:$2 sm:$0xff]  ;;  %681 = vst.msk [vmem:[#allocation3 + $0xa8] sm:$0xff] %vm659_vm2, %v648_v28  ;;  %v584_v36 = vadd.f32 %v8281_v33, %v10937_v47  ;;  %8320 = vmatprep.mubr.msk.f32.mxu1 %vm13117_vm3, %v10460_v40 }
 0x232   :  { %1559 = vst.msk [vmem:[#allocation2 + $0x28] sm:$0xff] %vm13119_vm4, %v10460_v40  ;;  %v578_v37 = vpop.f32.mrb[23].mxu0  ;;  %8379 = vmatprep.mubr.msk.f32.mxu0 %vm13117_vm3, %v10460_v40  ;;  %v763_v39 = vmax.f32 %v708_v34, %v740_v35 }
 0x233   :  { %680 = vst.msk [vmem:[#allocation3 + $0xa0] sm:$0xff] %vm659_vm2, %v647_v32  ;;  %v579_v41 = vadd.f32 %v10937_v47, %v578_v37  ;;  %v650_v42 = vmax.f32 %v584_v36, 0.0  ;;  %v817_v43 = vld [vmem:[#allocation2 + $0x38] sm:$0xff] }
 0x234   :  { %v796_v44 = vld [vmem:[#allocation2 + $0x37] sm:$0xff]  ;;  %782 = vst.msk [vmem:[#allocation2 + $0x50] sm:$0xff] %vm659_vm2, %v763_v39  ;;  %v8284_v46 = vpop.f32.mrb[24].mxu0  ;;  %8321 = vmatmul.mubr.msk.f32.gmra.mrb[12].mxu1 %vm659_vm2, %v817_v43 }
 0x235   :  { %v649_v45 = vmax.f32 %v579_v41, 0.0  ;;  %8380 = vmatmul.mubr.msk.f32.gmra.mrb[44].mxu0 %vm659_vm2, %v796_v44  ;;  %v710_v48 = vld [vmem:[#allocation3 + $0x90] ss:$2 sm:$0xff]  ;;  %v742_v49 = vld [vmem:[#allocation3 + $0x91] ss:$2 sm:$0xff]  ;;  %683 = vst.msk [vmem:[#allocation3 + $0xb8] sm:$0xff] %vm659_vm2, %v650_v42  ;;  %v594_v50 = vadd.f32 %v8284_v46, %v10937_v47  ;;  %8323 = vmatprep.mubr.msk.f32.mxu1 %vm13117_vm3, %v10460_v40 }
 0x236   :  { %v588_v51 = vpop.f32.mrb[25].mxu0  ;;  %8382 = vmatprep.mubr.msk.f32.mxu0 %vm13117_vm3, %v10460_v40  ;;  %v764_v52 = vmax.f32 %v710_v48, %v742_v49 }
 0x237   :  { %682 = vst.msk [vmem:[#allocation3 + $0xb0] sm:$0xff] %vm659_vm2, %v649_v45  ;;  %v589_v53 = vadd.f32 %v10937_v47, %v588_v51  ;;  %v652_v54 = vmax.f32 %v594_v50, 0.0  ;;  %v818_v55 = vld [vmem:[#allocation2 + $0x40] sm:$0xff] }
 0x238   :  { %v797_v56 = vld [vmem:[#allocation2 + $0x3f] sm:$0xff]  ;;  %783 = vst.msk [vmem:[#allocation2 + $0x58] sm:$0xff] %vm659_vm2, %v764_v52  ;;  %v8287_v58 = vpop.f32.mrb[26].mxu0  ;;  %8324 = vmatmul.mubr.msk.f32.gmra.mrb[14].mxu1 %vm659_vm2, %v818_v55  ;;  %v798_v3 = vld [vmem:[#allocation2 + $0x47] sm:$0xff]  ;;  %v1234_v55 = vld [vmem:[#allocation2 + $0x11] sm:$0xff] }
 0x239   :  { %v651_v57 = vmax.f32 %v589_v53, 0.0  ;;  %8383 = vmatmul.mubr.msk.f32.gmra.mrb[46].mxu0 %vm659_vm2, %v797_v56  ;;  %685 = vst.msk [vmem:[#allocation3 + $0xc8] sm:$0xff] %vm659_vm2, %v652_v54  ;;  %v604_v61 = vadd.f32 %v8287_v58, %v10937_v47  ;;  %v598_v62 = vpop.f32.mrb[27].mxu0  ;;  %8326 = vmatprep.mubr.msk.f32.mxu1 %vm13117_vm3, %v10460_v40  ;;  %v1233_v54 = vld [vmem:[#allocation2 + $0x9] sm:$0xff]  ;;  %v1235_v56 = vld [vmem:[#allocation2 + $0x19] sm:$0xff] }
 0x23a   :  { %v712_v59 = vld [vmem:[#allocation3 + $0xa0] ss:$2 sm:$0xff]  ;;  %v744_v60 = vld [vmem:[#allocation3 + $0xa1] ss:$2 sm:$0xff]  ;;  %8385 = vmatprep.mubr.msk.f32.mxu0 %vm13117_vm3, %v10460_v40  ;;  %v599_v1 = vadd.f32 %v10937_v47, %v598_v62 }
 0x23b   :  { %v765_v0 = vmax.f32 %v712_v59, %v744_v60  ;;  %684 = vst.msk [vmem:[#allocation3 + $0xc0] sm:$0xff] %vm659_vm2, %v651_v57  ;;  %v654_v2 = vmax.f32 %v604_v61, 0.0  ;;  %v820_v6 = vld [vmem:[#allocation2 + $0x50] sm:$0xff]  ;;  %v1239_v58 = vld [vmem:[#allocation2 + $0x39] sm:$0xff] }
 0x23c   :  { %v653_v4 = vmax.f32 %v599_v1, 0.0  ;;  %v8290_v5 = vpop.f32.mrb[28].mxu0  ;;  %8327 = vmatmul.mubr.msk.f32.gmra.mrb[16].mxu1 %vm659_vm2, %v819_v63  ;;  %v799_v11 = vld [vmem:[#allocation2 + $0x4f] sm:$0xff]  ;;  %v7213_v1 = vld [vmem:[%s13139_s27 + $0x40] sm:$0xff] }
 0x23d   :  { %784 = vst.msk [vmem:[#allocation2 + $0x60] sm:$0xff] %vm659_vm2, %v765_v0  ;;  %8386 = vmatmul.mubr.msk.f32.gmra.mrb[48].mxu0 %vm659_vm2, %v798_v3  ;;  %687 = vst.msk [vmem:[#allocation3 + $0xd8] sm:$0xff] %vm659_vm2, %v654_v2  ;;  %v614_v9 = vadd.f32 %v8290_v5, %v10937_v47  ;;  %v608_v10 = vpop.f32.mrb[29].mxu0  ;;  %8329 = vmatprep.mubr.msk.f32.mxu1 %vm13117_vm3, %v10460_v40  ;;  %v11072_v16 = vld [vmem:[#allocation2 + $0x49] sm:$0xff]  ;;  %v1238_v57 = vld [vmem:[#allocation2 + $0x31] sm:$0xff] }
 0x23e   :  { %v714_v7 = vld [vmem:[#allocation3 + $0xb0] ss:$2 sm:$0xff]  ;;  %v746_v8 = vld [vmem:[#allocation3 + $0xb1] ss:$2 sm:$0xff]  ;;  %8388 = vmatprep.mubr.msk.f32.mxu0 %vm13117_vm3, %v10460_v40  ;;  %686 = vst.msk [vmem:[#allocation3 + $0xd0] sm:$0xff] %vm659_vm2, %v653_v4  ;;  %v609_v13 = vadd.f32 %v10937_v47, %v608_v10  ;;  %v1578_v4 = vld [vmem:[%s13139_s27] sm:$0xff] }
 0x23f   :  { %v766_v12 = vmax.f32 %v714_v7, %v746_v8  ;;  %v656_v14 = vmax.f32 %v614_v9, 0.0  ;;  %v800_v15 = vld [vmem:[#allocation2 + $0x57] sm:$0xff]  ;;  %v7214_v2 = vld [vmem:[%s13139_s27 + $0x48] sm:$0xff] }
 0x240   :  { %v11074_v17 = vld [vmem:[#allocation2 + $0x51] sm:$0xff]  ;;  %v655_v18 = vmax.f32 %v609_v13, 0.0  ;;  %v8293_v19 = vpop.f32.mrb[30].mxu0  ;;  %8330 = vmatmul.mubr.msk.f32.gmra.mrb[18].mxu1 %vm659_vm2, %v820_v6  ;;  %v9235_v3 = vpack.c.bf16 %v7214_v2, %v7213_v1  ;;  %v1579_v5 = vld [vmem:[%s13139_s27 + $0x8] sm:$0xff]  ;;  %v7217_v13 = vld [vmem:[%s13139_s27 + $0x60] sm:$0xff] }
 0x241   :  { %785 = vst.msk [vmem:[#allocation2 + $0x68] sm:$0xff] %vm659_vm2, %v766_v12  ;;  %8389 = vmatmul.mubr.msk.f32.gmra.mrb[50].mxu0 %vm659_vm2, %v799_v11  ;;  %689 = vst.msk [vmem:[#allocation3 + $0xe8] sm:$0xff] %vm659_vm2, %v656_v14  ;;  %v624_v22 = vadd.f32 %v8293_v19, %v10937_v47  ;;  %v618_v23 = vpop.f32.mrb[31].mxu0  ;;  %8332 = vmatprep.mubr.msk.f32.mxu1 %vm13117_vm3, %v10460_v40  ;;  %v821_v24 = vld [vmem:[#allocation2 + $0x58] sm:$0xff]  ;;  %v9247_v6 = vpack.c.bf16 %v1579_v5, %v1578_v4  ;;  %v7215_v7 = vld [vmem:[%s13139_s27 + $0x50] sm:$0xff] }
 0x242   :  { %1560 = vst.msk [vmem:[#allocation2 + $0x50] sm:$0xff] %vm13119_vm4, %v10460_v40  ;;  %v716_v20 = vld [vmem:[#allocation3 + $0xc0] ss:$2 sm:$0xff]  ;;  %v748_v21 = vld [vmem:[#allocation3 + $0xc1] ss:$2 sm:$0xff]  ;;  %8391 = vmatprep.mubr.msk.f32.mxu0 %vm13117_vm3, %v10460_v40  ;;  %v619_v26 = vadd.f32 %v10937_v47, %v618_v23  ;;  %9236 = vmatpush3.bf16.msra.mxu0 %v9235_v3  ;;  %v1580_v9 = vld [vmem:[%s13139_s27 + $0x10] sm:$0xff] }
 0x243   :  { %v767_v25 = vmax.f32 %v716_v20, %v748_v21  ;;  %688 = vst.msk [vmem:[#allocation3 + $0xe0] sm:$0xff] %vm659_vm2, %v655_v18  ;;  %v658_v28 = vmax.f32 %v624_v22, 0.0  ;;  %9237 = vmatprep.subr.bf16.mxu0 %v10459_v38  ;;  %v7216_v8 = vld [vmem:[%s13139_s27 + $0x58] sm:$0xff]  ;;  %v7218_v14 = vld [vmem:[%s13139_s27 + $0x68] sm:$0xff]  ;;  %v7219_v19 = vld [vmem:[%s13139_s27 + $0x70] sm:$0xff] }
 0x244   :  { %v657_v29 = vmax.f32 %v619_v26, 0.0  ;;  %8333 = vmatmul.mubr.msk.f32.gmra.mrb[20].mxu1 %vm659_vm2, %v821_v24  ;;  %v822_v33 = vld [vmem:[#allocation2 + $0x60] sm:$0xff]  ;;  %v9238_v10 = vpack.c.bf16 %v7216_v8, %v7215_v7  ;;  %v1581_v11 = vld [vmem:[%s13139_s27 + $0x18] sm:$0xff]  ;;  %v1584_v21 = vld [vmem:[%s13139_s27 + $0x30] sm:$0xff] }
 0x245   :  { %786 = vst.msk [vmem:[#allocation2 + $0x70] sm:$0xff] %vm659_vm2, %v767_v25  ;;  %8392 = vmatmul.mubr.msk.f32.gmra.mrb[52].mxu0 %vm659_vm2, %v800_v15  ;;  %v718_v30 = vld [vmem:[#allocation3 + $0xd0] ss:$2 sm:$0xff]  ;;  %v750_v32 = vld [vmem:[#allocation3 + $0xd1] ss:$2 sm:$0xff]  ;;  %691 = vst.msk [vmem:[#allocation3 + $0xf8] sm:$0xff] %vm659_vm2, %v658_v28  ;;  %8335 = vmatprep.mubr.msk.f32.mxu1 %vm13117_vm3, %v10460_v40  ;;  %v9250_v12 = vpack.c.bf16 %v1581_v11, %v1580_v9 }
 0x246   :  { %8394 = vmatprep.mubr.msk.f32.mxu0 %vm13117_vm3, %v10460_v40  ;;  %v768_v47 = vmax.f32 %v718_v30, %v750_v32  ;;  %690 = vst.msk [vmem:[#allocation3 + $0xf0] sm:$0xff] %vm659_vm2, %v657_v29  ;;  %v801_v34 = vld [vmem:[#allocation2 + $0x5f] sm:$0xff]  ;;  %9239 = vmatpush3.bf16.msra.mxu0 %v9238_v10 }
 0x247   :  { %9240 = vmatprep.subr.bf16.mxu0 %v10459_v38  ;;  %v1582_v15 = vld [vmem:[%s13139_s27 + $0x20] sm:$0xff]  ;;  %v7220_v20 = vld [vmem:[%s13139_s27 + $0x78] sm:$0xff] }
 0x248   :  { %787 = vst.msk [vmem:[#allocation2 + $0x78] sm:$0xff] %vm659_vm2, %v768_v47  ;;  %8336 = vmatmul.mubr.msk.f32.gmra.mrb[22].mxu1 %vm659_vm2, %v822_v33  ;;  %v823_v37 = vld [vmem:[#allocation2 + $0x68] sm:$0xff]  ;;  %v9244_v22 = vpack.c.bf16 %v7220_v20, %v7219_v19  ;;  %v1585_v23 = vld [vmem:[%s13139_s27 + $0x38] sm:$0xff] }
 0x249   :  { %8395 = vmatmul.mubr.msk.f32.gmra.mrb[54].mxu0 %vm659_vm2, %v801_v34  ;;  %8338 = vmatprep.mubr.msk.f32.mxu1 %vm13117_vm3, %v10460_v40  ;;  %v802_v41 = vld [vmem:[#allocation2 + $0x67] sm:$0xff]  ;;  %v9256_v24 = vpack.c.bf16 %v1585_v23, %v1584_v21 }
 0x24a   :  { %v720_v35 = vld [vmem:[#allocation3 + $0xe0] ss:$2 sm:$0xff]  ;;  %v752_v36 = vld [vmem:[#allocation3 + $0xe1] ss:$2 sm:$0xff]  ;;  %8397 = vmatprep.mubr.msk.f32.mxu0 %vm13117_vm3, %v10460_v40 }
 0x24b   :  { %v769_v39 = vmax.f32 %v720_v35, %v752_v36  ;;  %v1244_v59 = vld [vmem:[#allocation2 + $0x61] sm:$0xff] }
 0x24c   :  { %8339 = vmatmul.mubr.msk.f32.gmra.mrb[24].mxu1 %vm659_vm2, %v823_v37  ;;  %v824_v44 = vld [vmem:[#allocation2 + $0x70] sm:$0xff] }
 0x24d   :  { %788 = vst.msk [vmem:[#allocation2 + $0x80] sm:$0xff] %vm659_vm2, %v769_v39  ;;  %8398 = vmatmul.mubr.msk.f32.gmra.mrb[56].mxu0 %vm659_vm2, %v802_v41  ;;  %v722_v42 = vld [vmem:[#allocation3 + $0xf0] ss:$2 sm:$0xff]  ;;  %v754_v43 = vld [vmem:[#allocation3 + $0xf1] ss:$2 sm:$0xff]  ;;  %8341 = vmatprep.mubr.msk.f32.mxu1 %vm13117_vm3, %v10460_v40 }
 0x24e   :  { %8400 = vmatprep.mubr.msk.f32.mxu0 %vm13117_vm3, %v10460_v40  ;;  %v770_v45 = vmax.f32 %v722_v42, %v754_v43  ;;  %v803_v46 = vld [vmem:[#allocation2 + $0x6f] sm:$0xff] }
 0x24f   :  { %v825_v48 = vld [vmem:[#allocation2 + $0x78] sm:$0xff]  ;;  %v1245_v60 = vld [vmem:[#allocation2 + $0x69] sm:$0xff] }
 0x250   :  { %789 = vst.msk [vmem:[#allocation2 + $0x88] sm:$0xff] %vm659_vm2, %v770_v45  ;;  %8342 = vmatmul.mubr.msk.f32.gmra.mrb[26].mxu1 %vm659_vm2, %v824_v44  ;;  %v804_v49 = vld [vmem:[#allocation2 + $0x77] sm:$0xff] }
 0x251   :  { %8401 = vmatmul.mubr.msk.f32.gmra.mrb[58].mxu0 %vm659_vm2, %v803_v46  ;;  %8344 = vmatprep.mubr.msk.f32.mxu1 %vm13117_vm3, %v10460_v40  ;;  %v1246_v61 = vld [vmem:[#allocation2 + $0x71] sm:$0xff] }
 0x252   :  { %8403 = vmatprep.mubr.msk.f32.mxu0 %vm13117_vm3, %v10460_v40 }
 0x254   :  { %8345 = vmatmul.mubr.msk.f32.gmra.mrb[28].mxu1 %vm659_vm2, %v825_v48  ;;  %v826_v50 = vld [vmem:[#allocation2 + $0x80] sm:$0xff] }
 0x255   :  { %8404 = vmatmul.mubr.msk.f32.gmra.mrb[60].mxu0 %vm659_vm2, %v804_v49  ;;  %8347 = vmatprep.mubr.msk.f32.mxu1 %vm13117_vm3, %v10460_v40  ;;  %v805_v51 = vld [vmem:[#allocation2 + $0x7f] sm:$0xff] }
 0x256   :  { %8406 = vmatprep.mubr.msk.f32.mxu0 %vm13117_vm3, %v10460_v40  ;;  %v1247_v62 = vld [vmem:[#allocation2 + $0x79] sm:$0xff] }
 0x257   :  { %v827_v52 = vld [vmem:[#allocation2 + $0x88] sm:$0xff] }
 0x258   :  { %8348 = vmatmul.mubr.msk.f32.gmra.mrb[30].mxu1 %vm659_vm2, %v826_v50  ;;  %v806_v53 = vld [vmem:[#allocation2 + $0x87] sm:$0xff] }
 0x259   :  { %8407 = vmatmul.mubr.msk.f32.gmra.mrb[62].mxu0 %vm659_vm2, %v805_v51  ;;  %8350 = vmatprep.mubr.msk.f32.mxu1 %vm13117_vm3, %v10460_v40  ;;  %v1248_v63 = vld [vmem:[#allocation2 + $0x81] sm:$0xff]  ;;  %v1249_v0 = vld [vmem:[#allocation2 + $0x89] sm:$0xff] }
 0x25a   :  { %8409 = vmatprep.mubr.msk.f32.mxu0 %vm13117_vm3, %v10460_v40 }
 0x25c   :  { %8351 = vmatmul.mubr.msk.f32.gmra.mrb[32].mxu1 %vm659_vm2, %v827_v52 }
 0x25d   :  { %8410 = vmatmul.mubr.msk.f32.gmra.mrb[64].mxu0 %vm659_vm2, %v806_v53  ;;  %8420 = vmatprep.mubr.msk.f32.mxu1 %vm13117_vm3, %v10460_v40 }
 0x25e   :  { %8487 = vmatprep.mubr.msk.f32.mxu0 %vm13117_vm3, %v10460_v40 }
 0x260   :  { %8421 = vmatmul.mubr.msk.f32.vlgmr.msra.gmra.mrb[34].mxu1 %vm659_vm2, %v1233_v54 }
 0x261   :  { %8423 = vmatprep.mubr.msk.f32.mxu1 %vm13117_vm3, %v10460_v40  ;;  %9248 = vmatpush3.bf16.msra.mxu1 %v9247_v6 }
 0x262   :  { %9249 = vmatprep.subr.bf16.mxu1 %v10459_v38 }
 0x264   :  { %8424 = vmatmul.mubr.msk.f32.gmra.mrb[36].mxu1 %vm659_vm2, %v1234_v55 }
 0x265   :  { %8426 = vmatprep.mubr.msk.f32.mxu1 %vm13117_vm3, %v10460_v40  ;;  %9251 = vmatpush3.bf16.msra.mxu1 %v9250_v12 }
 0x266   :  { %9252 = vmatprep.subr.bf16.mxu1 %v10459_v38 }
 0x268   :  { %8427 = vmatmul.mubr.msk.f32.gmra.mrb[38].mxu1 %vm659_vm2, %v1235_v56 }
 0x269   :  { %8429 = vmatprep.mubr.msk.f32.mxu1 %vm13117_vm3, %v10460_v40 }
 0x26c   :  { %8430 = vmatmul.mubr.msk.f32.gmra.mrb[40].mxu1 %vm659_vm2, %v11022_v27  ;;  %v1240_v27 = vld [vmem:[#allocation2 + $0x41] sm:$0xff] }
 0x26d   :  { %8432 = vmatprep.mubr.msk.f32.mxu1 %vm13117_vm3, %v10460_v40 }
 0x270   :  { %8433 = vmatmul.mubr.msk.f32.gmra.mrb[42].mxu1 %vm659_vm2, %v11024_v31  ;;  %v1243_v31 = vld [vmem:[#allocation2 + $0x59] sm:$0xff] }
 0x271   :  { %8435 = vmatprep.mubr.msk.f32.mxu1 %vm13117_vm3, %v10460_v40 }
 0x274   :  { %8436 = vmatmul.mubr.msk.f32.gmra.mrb[44].mxu1 %vm659_vm2, %v1238_v57 }
 0x275   :  { %8438 = vmatprep.mubr.msk.f32.mxu1 %vm13117_vm3, %v10460_v40 }
 0x278   :  { %8439 = vmatmul.mubr.msk.f32.gmra.mrb[46].mxu1 %vm659_vm2, %v1239_v58 }
 0x279   :  { %8441 = vmatprep.mubr.msk.f32.mxu1 %vm13117_vm3, %v10460_v40 }
 0x27c   :  { %8442 = vmatmul.mubr.msk.f32.gmra.mrb[48].mxu1 %vm659_vm2, %v1240_v27 }
 0x27d   :  { %8444 = vmatprep.mubr.msk.f32.mxu1 %vm13117_vm3, %v10460_v40 }
 0x280   :  { %8445 = vmatmul.mubr.msk.f32.gmra.mrb[50].mxu1 %vm659_vm2, %v11072_v16  ;;  %v9241_v16 = vpack.c.bf16 %v7218_v14, %v7217_v13 }
 0x281   :  { %8447 = vmatprep.mubr.msk.f32.mxu1 %vm13117_vm3, %v10460_v40 }
 0x282   :  { %9242 = vmatpush3.bf16.msra.mxu0 %v9241_v16 }
 0x283   :  { %9243 = vmatprep.subr.bf16.mxu0 %v10459_v38 }
 0x284   :  { %8448 = vmatmul.mubr.msk.f32.gmra.mrb[52].mxu1 %vm659_vm2, %v11074_v17  ;;  %v1583_v17 = vld [vmem:[%s13139_s27 + $0x28] sm:$0xff] }
 0x285   :  { %8450 = vmatprep.mubr.msk.f32.mxu1 %vm13117_vm3, %v10460_v40  ;;  %v9253_v18 = vpack.c.bf16 %v1583_v17, %v1582_v15 }
 0x286   :  { %9245 = vmatpush3.bf16.msra.mxu0 %v9244_v22 }
 0x287   :  { %9254 = vmatpush3.bf16.msra.mxu1 %v9253_v18  ;;  %9258 = vmatprep.subr.bf16.mxu0 %v10459_v38 }
 0x288   :  { %8451 = vmatmul.mubr.msk.f32.gmra.mrb[54].mxu1 %vm659_vm2, %v1243_v31  ;;  %9255 = vmatprep.subr.bf16.mxu1 %v10459_v38 }
 0x289   :  { %8453 = vmatprep.mubr.msk.f32.mxu1 %vm13117_vm3, %v10460_v40 }
 0x28b   :  { %9257 = vmatpush3.bf16.msra.mxu1 %v9256_v24 }
 0x28c   :  { %8454 = vmatmul.mubr.msk.f32.gmra.mrb[56].mxu1 %vm659_vm2, %v1244_v59  ;;  %9270 = vmatprep.subr.bf16.mxu1 %v10459_v38 }
 0x28d   :  { %8456 = vmatprep.mubr.msk.f32.mxu1 %vm13117_vm3, %v10460_v40 }
 0x290   :  { %8457 = vmatmul.mubr.msk.f32.gmra.mrb[58].mxu1 %vm659_vm2, %v1245_v60 }
 0x291   :  { %8459 = vmatprep.mubr.msk.f32.mxu1 %vm13117_vm3, %v10460_v40 }
 0x294   :  { %8460 = vmatmul.mubr.msk.f32.gmra.mrb[60].mxu1 %vm659_vm2, %v1246_v61 }
 0x295   :  { %8462 = vmatprep.mubr.msk.f32.mxu1 %vm13117_vm3, %v10460_v40 }
 0x298   :  { %8463 = vmatmul.mubr.msk.f32.gmra.mrb[62].mxu1 %vm659_vm2, %v1247_v62 }
 0x299   :  { %8465 = vmatprep.mubr.msk.f32.mxu1 %vm13117_vm3, %v10460_v40 }
 0x29c   :  { %8466 = vmatmul.mubr.msk.f32.gmra.mrb[64].mxu1 %vm659_vm2, %v1248_v63 }
 0x29d   :  { %8468 = vmatprep.mubr.msk.f32.mxu1 %vm13117_vm3, %v10460_v40 }
 0x2a0   :  { %8469 = vmatmul.mubr.msk.f32.gmra.mrb[66].mxu1 %vm659_vm2, %v1249_v0 }
 0x2a1   :  { %8530 = vmatprep.mubr.msk.f32.mxu1 %vm13117_vm3, %v10460_v40 }
 0x2ef   :  { %v950_v25 = vpop.f32.mrb[0].mxu1 }
 0x2f0   :  { %v1150_v26 = vpop.f32.mrb[32].mxu0  ;;  %v8304_v29 = vpop.f32.mrb[1].mxu1 }
 0x2f1   :  { %v11248_v28 = vadd.f32 %v1150_v26, %v950_v25  ;;  %v8363_v30 = vpop.f32.mrb[33].mxu0 }
 0x2f3   :  { %v955_v32 = vpop.f32.mrb[2].mxu1 }
 0x2f4   :  { %v1155_v33 = vpop.f32.mrb[34].mxu0  ;;  %v8307_v34 = vpop.f32.mrb[3].mxu1 }
 0x2f5   :  { %v11250_v47 = vadd.f32 %v1155_v33, %v955_v32  ;;  %v8366_v35 = vpop.f32.mrb[35].mxu0 }
 0x2f7   :  { %v960_v36 = vpop.f32.mrb[4].mxu1 }
 0x2f8   :  { %v1160_v37 = vpop.f32.mrb[36].mxu0  ;;  %v8310_v41 = vpop.f32.mrb[5].mxu1 }
 0x2f9   :  { %v11252_v39 = vadd.f32 %v1160_v37, %v960_v36  ;;  %v8369_v42 = vpop.f32.mrb[37].mxu0 }
 0x2fb   :  { %v965_v43 = vpop.f32.mrb[6].mxu1 }
 0x2fc   :  { %v1165_v44 = vpop.f32.mrb[38].mxu0  ;;  %v8313_v46 = vpop.f32.mrb[7].mxu1 }
 0x2fd   :  { %v11254_v45 = vadd.f32 %v1165_v44, %v965_v43  ;;  %v8372_v48 = vpop.f32.mrb[39].mxu0 }
 0x2ff   :  { %v970_v49 = vpop.f32.mrb[8].mxu1 }
 0x300   :  { %v1170_v50 = vpop.f32.mrb[40].mxu0  ;;  %v8316_v52 = vpop.f32.mrb[9].mxu1 }
 0x301   :  { %v11256_v51 = vadd.f32 %v1170_v50, %v970_v49  ;;  %v8375_v53 = vpop.f32.mrb[41].mxu0 }
 0x303   :  { %v975_v54 = vpop.f32.mrb[10].mxu1 }
 0x304   :  { %v1175_v55 = vpop.f32.mrb[42].mxu0  ;;  %v8319_v57 = vpop.f32.mrb[11].mxu1 }
 0x305   :  { %v11258_v56 = vadd.f32 %v1175_v55, %v975_v54  ;;  %v8378_v58 = vpop.f32.mrb[43].mxu0 }
 0x306   :  { %v11283_v58 = vld [vmem:[%s13140_s6] ss:$0 sm:$0xff] }
 0x307   :  { %v980_v27 = vpop.f32.mrb[12].mxu1 }
 0x308   :  { %v1180_v31 = vpop.f32.mrb[44].mxu0  ;;  %v8322_v60 = vpop.f32.mrb[13].mxu1 }
 0x309   :  { %v11260_v59 = vadd.f32 %v1180_v31, %v980_v27  ;;  %v8381_v61 = vpop.f32.mrb[45].mxu0 }
 0x30b   :  { %v985_v62 = vpop.f32.mrb[14].mxu1 }
 0x30c   :  { %v1185_v63 = vpop.f32.mrb[46].mxu0  ;;  %v8325_v1 = vpop.f32.mrb[15].mxu1 }
 0x30d   :  { %v11262_v0 = vadd.f32 %v1185_v63, %v985_v62  ;;  %v8384_v2 = vpop.f32.mrb[47].mxu0 }
 0x30f   :  { %v990_v3 = vpop.f32.mrb[16].mxu1 }
 0x310   :  { %v1190_v4 = vpop.f32.mrb[48].mxu0  ;;  %v8328_v5 = vpop.f32.mrb[17].mxu1 }
 0x311   :  { %v8387_v6 = vpop.f32.mrb[49].mxu0 }
 0x313   :  { %v994_v7 = vpop.f32.mrb[18].mxu1 }
 0x314   :  { %v1194_v8 = vpop.f32.mrb[50].mxu0  ;;  %v8331_v10 = vpop.f32.mrb[19].mxu1 }
 0x315   :  { %v11264_v9 = vadd.f32 %v1194_v8, %v994_v7  ;;  %v8390_v11 = vpop.f32.mrb[51].mxu0 }
 0x317   :  { %v999_v12 = vpop.f32.mrb[20].mxu1 }
 0x318   :  { %v1199_v13 = vpop.f32.mrb[52].mxu0  ;;  %v8334_v15 = vpop.f32.mrb[21].mxu1 }
 0x319   :  { %v11266_v14 = vadd.f32 %v1199_v13, %v999_v12  ;;  %v8393_v16 = vpop.f32.mrb[53].mxu0 }
 0x31b   :  { %v1004_v17 = vpop.f32.mrb[22].mxu1 }
 0x31c   :  { %v1204_v18 = vpop.f32.mrb[54].mxu0  ;;  %v8337_v20 = vpop.f32.mrb[23].mxu1 }
 0x31d   :  { %v11268_v19 = vadd.f32 %v1204_v18, %v1004_v17  ;;  %v8396_v21 = vpop.f32.mrb[55].mxu0 }
 0x31f   :  { %v1009_v22 = vpop.f32.mrb[24].mxu1 }
 0x320   :  { %v1209_v23 = vpop.f32.mrb[56].mxu0  ;;  %v8340_v25 = vpop.f32.mrb[25].mxu1 }
 0x321   :  { %v11270_v24 = vadd.f32 %v1209_v23, %v1009_v22  ;;  %v8399_v26 = vpop.f32.mrb[57].mxu0 }
 0x322   :  { %v7239_v26 = vld [vmem:[%s13139_s27 + $0x80] sm:$0xff] }
 0x323   :  { %v1014_v29 = vpop.f32.mrb[26].mxu1 }
 0x324   :  { %v1214_v30 = vpop.f32.mrb[58].mxu0  ;;  %v8343_v33 = vpop.f32.mrb[27].mxu1 }
 0x325   :  { %v11272_v32 = vadd.f32 %v1214_v30, %v1014_v29  ;;  %v8402_v34 = vpop.f32.mrb[59].mxu0  ;;  %v7240_v29 = vld [vmem:[%s13139_s27 + $0x88] sm:$0xff] }
 0x327   :  { %v1019_v35 = vpop.f32.mrb[28].mxu1 }
 0x328   :  { %v1219_v36 = vpop.f32.mrb[60].mxu0  ;;  %v8346_v41 = vpop.f32.mrb[29].mxu1 }
 0x329   :  { %v11274_v37 = vadd.f32 %v1219_v36, %v1019_v35  ;;  %v8405_v42 = vpop.f32.mrb[61].mxu0 }
 0x32a   :  { %v9259_v42 = vpack.c.bf16 %v7240_v29, %v7239_v26 }
 0x32b   :  { %v1024_v43 = vpop.f32.mrb[30].mxu1 }
 0x32c   :  { %v1224_v44 = vpop.f32.mrb[62].mxu0  ;;  %v8349_v48 = vpop.f32.mrb[31].mxu1 }
 0x32d   :  { %v11276_v46 = vadd.f32 %v1224_v44, %v1024_v43  ;;  %v8408_v49 = vpop.f32.mrb[63].mxu0  ;;  %v7241_v43 = vld [vmem:[%s13139_s27 + $0x90] sm:$0xff] }
 0x32f   :  { %v1029_v50 = vpop.f32.mrb[32].mxu1 }
 0x330   :  { %v1229_v52 = vpop.f32.mrb[64].mxu0  ;;  %v8352_v54 = vpop.f32.mrb[33].mxu1 }
 0x331   :  { %v11278_v53 = vadd.f32 %v1229_v52, %v1029_v50  ;;  %v8411_v55 = vpop.f32.mrb[65].mxu0 }
 0x333   :  { %v1372_v57 = vpop.f32.mrb[34].mxu1 }
 0x334   :  { %v1455_v27 = vadd.f32 %v1372_v57, %v11248_v28  ;;  %v8422_v31 = vpop.f32.mrb[35].mxu1 }
 0x335   :  { %v7244_v31 = vld [vmem:[%s13139_s27 + $0xa8] sm:$0xff] }
 0x336   :  { %v1478_v60 = vadd.f32 %v11283_v58, %v1455_v27  ;;  %v7243_v27 = vld [vmem:[%s13139_s27 + $0xa0] sm:$0xff] }
 0x337   :  { %v1377_v61 = vpop.f32.mrb[36].mxu1 }
 0x338   :  { %v1494_v62 = vmax.f32 %v1478_v60, 0.0  ;;  %v1456_v63 = vadd.f32 %v1377_v61, %v11250_v47  ;;  %v8425_v1 = vpop.f32.mrb[37].mxu1 }
 0x33a   :  { %1511 = vst.msk [vmem:[#allocation3] sm:$0xff] %vm13119_vm4, %v1494_v62  ;;  %v1479_v2 = vadd.f32 %v11283_v58, %v1456_v63 }
 0x33b   :  { %v1382_v3 = vpop.f32.mrb[38].mxu1 }
 0x33c   :  { %v1495_v4 = vmax.f32 %v1479_v2, 0.0  ;;  %v1457_v5 = vadd.f32 %v1382_v3, %v11252_v39  ;;  %v8428_v6 = vpop.f32.mrb[39].mxu1  ;;  %v9265_v2 = vpack.c.bf16 %v7244_v31, %v7243_v27  ;;  %v7245_v3 = vld [vmem:[%s13139_s27 + $0xb0] sm:$0xff] }
 0x33e   :  { %1512 = vst.msk [vmem:[#allocation3 + $0x8] sm:$0xff] %vm13119_vm4, %v1495_v4  ;;  %v1480_v28 = vadd.f32 %v11283_v58, %v1457_v5 }
 0x33f   :  { %v1387_v7 = vpop.f32.mrb[40].mxu1 }
 0x340   :  { %v1496_v8 = vmax.f32 %v1480_v28, 0.0  ;;  %v1458_v10 = vadd.f32 %v1387_v7, %v11254_v45  ;;  %v8431_v11 = vpop.f32.mrb[41].mxu1  ;;  %v7246_v28 = vld [vmem:[%s13139_s27 + $0xb8] sm:$0xff] }
 0x341   :  { %v9268_v11 = vpack.c.bf16 %v7246_v28, %v7245_v3 }
 0x342   :  { %1513 = vst.msk [vmem:[#allocation3 + $0x10] sm:$0xff] %vm13119_vm4, %v1496_v8  ;;  %v1481_v47 = vadd.f32 %v11283_v58, %v1458_v10 }
 0x343   :  { %v1392_v12 = vpop.f32.mrb[42].mxu1 }
 0x344   :  { %v1497_v13 = vmax.f32 %v1481_v47, 0.0  ;;  %v1459_v15 = vadd.f32 %v1392_v12, %v11256_v51  ;;  %v8434_v16 = vpop.f32.mrb[43].mxu1 }
 0x345   :  { %v1527_v39 = vld [vmem:[#allocation3] ss:$2 sm:$0xff]  ;;  %v1542_v17 = vld [vmem:[#allocation3 + $0x1] ss:$2 sm:$0xff] }
 0x346   :  { %v1550_v18 = vmax.f32 %v1527_v39, %v1542_v17  ;;  %1514 = vst.msk [vmem:[#allocation3 + $0x18] sm:$0xff] %vm13119_vm4, %v1497_v13  ;;  %v1482_v20 = vadd.f32 %v11283_v58, %v1459_v15 }
 0x347   :  { %v1397_v21 = vpop.f32.mrb[44].mxu1 }
 0x348   :  { %1561 = vst.msk [vmem:[#allocation2 + $0x8] sm:$0xff] %vm13119_vm4, %v1550_v18  ;;  %v1498_v45 = vmax.f32 %v1482_v20, 0.0  ;;  %v1460_v22 = vadd.f32 %v1397_v21, %v11258_v56  ;;  %v8437_v23 = vpop.f32.mrb[45].mxu1 }
 0x34a   :  { %1515 = vst.msk [vmem:[#allocation3 + $0x20] sm:$0xff] %vm13119_vm4, %v1498_v45  ;;  %v1483_v25 = vadd.f32 %v11283_v58, %v1460_v22 }
 0x34b   :  { %v1402_v51 = vpop.f32.mrb[46].mxu1 }
 0x34c   :  { %v1499_v30 = vmax.f32 %v1483_v25, 0.0  ;;  %v1461_v33 = vadd.f32 %v1402_v51, %v11260_v59  ;;  %v8440_v34 = vpop.f32.mrb[47].mxu1  ;;  %v7242_v59 = vld [vmem:[%s13139_s27 + $0x98] sm:$0xff] }
 0x34d   :  { %v1529_v35 = vld [vmem:[#allocation3 + $0x10] ss:$2 sm:$0xff]  ;;  %v1543_v56 = vld [vmem:[#allocation3 + $0x11] ss:$2 sm:$0xff]  ;;  %v9262_v57 = vpack.c.bf16 %v7242_v59, %v7241_v43 }
 0x34e   :  { %v1551_v36 = vmax.f32 %v1529_v35, %v1543_v56  ;;  %1516 = vst.msk [vmem:[#allocation3 + $0x28] sm:$0xff] %vm13119_vm4, %v1499_v30  ;;  %v1484_v41 = vadd.f32 %v11283_v58, %v1461_v33 }
 0x34f   :  { %v1407_v44 = vpop.f32.mrb[48].mxu1  ;;  %v1586_v48 = vld [vmem:[#allocation2 + $0x8] sm:$0xff] }
 0x350   :  { %v1569_v49 = vld [vmem:[#allocation2 + $0x7] sm:$0xff]  ;;  %1562 = vst.msk [vmem:[#allocation2 + $0x10] sm:$0xff] %vm13119_vm4, %v1551_v36  ;;  %v1500_v50 = vmax.f32 %v1484_v41, 0.0  ;;  %v1462_v52 = vadd.f32 %v1407_v44, %v11262_v0  ;;  %v8443_v54 = vpop.f32.mrb[49].mxu1  ;;  %8488 = vmatmul.mubr.msk.f32.vlgmr.msra.gmra.mrb[66].mxu0 %vm13119_vm4, %v1586_v48 }
 0x351   :  { %8531 = vmatmul.mubr.msk.f32.vlgmr.msra.gmra.mrb[68].mxu1 %vm13119_vm4, %v1569_v49  ;;  %2081 = vst [vmem:[#allocation2] sm:$0xff] %v10460_v40  ;;  %8490 = vmatprep.mubr.msk.f32.mxu0 %vm13117_vm3, %v10460_v40  ;;  %v1590_v44 = vld [vmem:[#allocation2 + $0x28] sm:$0xff] }
 0x352   :  { %8533 = vmatprep.mubr.msk.f32.mxu1 %vm13117_vm3, %v10460_v40  ;;  %1517 = vst.msk [vmem:[#allocation3 + $0x30] sm:$0xff] %vm13119_vm4, %v1500_v50  ;;  %v1485_v55 = vadd.f32 %v11283_v58, %v1462_v52  ;;  %9260 = vmatpush3.bf16.msra.mxu0 %v9259_v42 }
 0x353   :  { %v1412_v0 = vpop.f32.mrb[50].mxu1  ;;  %9261 = vmatprep.subr.bf16.mxu0 %v10459_v38 }
 0x354   :  { %v1501_v60 = vmax.f32 %v1485_v55, 0.0  ;;  %v8446_v61 = vpop.f32.mrb[51].mxu1 }
 0x355   :  { %v1531_v62 = vld [vmem:[#allocation3 + $0x20] ss:$2 sm:$0xff]  ;;  %v1544_v63 = vld [vmem:[#allocation3 + $0x21] ss:$2 sm:$0xff] }
 0x356   :  { %v1552_v1 = vmax.f32 %v1531_v62, %v1544_v63  ;;  %1518 = vst.msk [vmem:[#allocation3 + $0x38] sm:$0xff] %vm13119_vm4, %v1501_v60  ;;  %9263 = vmatpush3.bf16.msra.mxu0 %v9262_v57 }
 0x357   :  { %v1416_v4 = vpop.f32.mrb[52].mxu1  ;;  %v1587_v5 = vld [vmem:[#allocation2 + $0x10] sm:$0xff]  ;;  %9264 = vmatprep.subr.bf16.mxu0 %v10459_v38 }
 0x358   :  { %v1570_v6 = vld [vmem:[#allocation2 + $0xf] sm:$0xff]  ;;  %1563 = vst.msk [vmem:[#allocation2 + $0x18] sm:$0xff] %vm13119_vm4, %v1552_v1  ;;  %v1463_v7 = vadd.f32 %v1416_v4, %v11264_v9  ;;  %v8449_v8 = vpop.f32.mrb[53].mxu1  ;;  %8491 = vmatmul.mubr.msk.f32.gmra.mrb[68].mxu0 %vm13119_vm4, %v1587_v5 }
 0x359   :  { %8534 = vmatmul.mubr.msk.f32.gmra.mrb[70].mxu1 %vm13119_vm4, %v1570_v6  ;;  %8493 = vmatprep.mubr.msk.f32.mxu0 %vm13117_vm3, %v10460_v40 }
 0x35a   :  { %8536 = vmatprep.mubr.msk.f32.mxu1 %vm13117_vm3, %v10460_v40  ;;  %v1486_v10 = vadd.f32 %v11283_v58, %v1463_v7  ;;  %9266 = vmatpush3.bf16.msra.mxu0 %v9265_v2 }
 0x35b   :  { %v1421_v47 = vpop.f32.mrb[54].mxu1  ;;  %9267 = vmatprep.subr.bf16.mxu0 %v10459_v38 }
 0x35c   :  { %v1502_v12 = vmax.f32 %v1486_v10, 0.0  ;;  %v1464_v9 = vadd.f32 %v1421_v47, %v11266_v14  ;;  %v8452_v13 = vpop.f32.mrb[55].mxu1 }
 0x35d   :  { %v1533_v15 = vld [vmem:[#allocation3 + $0x30] ss:$2 sm:$0xff]  ;;  %v1545_v16 = vld [vmem:[#allocation3 + $0x31] ss:$2 sm:$0xff] }
 0x35e   :  { %v1553_v39 = vmax.f32 %v1533_v15, %v1545_v16  ;;  %1519 = vst.msk [vmem:[#allocation3 + $0x40] sm:$0xff] %vm13119_vm4, %v1502_v12  ;;  %v1487_v17 = vadd.f32 %v11283_v58, %v1464_v9  ;;  %9269 = vmatpush3.bf16.msra.mxu0 %v9268_v11 }
 0x35f   :  { %v1426_v18 = vpop.f32.mrb[56].mxu1  ;;  %v1588_v20 = vld [vmem:[#allocation2 + $0x18] sm:$0xff]  ;;  %9294 = vmatprep.subr.bf16.mxu0 %v10459_v38 }
 0x360   :  { %v1571_v21 = vld [vmem:[#allocation2 + $0x17] sm:$0xff]  ;;  %1564 = vst.msk [vmem:[#allocation2 + $0x20] sm:$0xff] %vm13119_vm4, %v1553_v39  ;;  %v1503_v45 = vmax.f32 %v1487_v17, 0.0  ;;  %v1465_v22 = vadd.f32 %v1426_v18, %v11268_v19  ;;  %v8455_v14 = vpop.f32.mrb[57].mxu1  ;;  %8494 = vmatmul.mubr.msk.f32.gmra.mrb[70].mxu0 %vm13119_vm4, %v1588_v20  ;;  %v1876_v17 = vld [vmem:[#allocation2 + $0x9] sm:$0xff] }
 0x361   :  { %8537 = vmatmul.mubr.msk.f32.gmra.mrb[72].mxu1 %vm13119_vm4, %v1571_v21  ;;  %8496 = vmatprep.mubr.msk.f32.mxu0 %vm13117_vm3, %v10460_v40  ;;  %v11374_v41 = vld [vmem:[#allocation2 + $0x11] sm:$0xff]  ;;  %v7258_v14 = vld [vmem:[%s13141_s3 + $0x88] sm:$0xff] }
 0x362   :  { %8539 = vmatprep.mubr.msk.f32.mxu1 %vm13117_vm3, %v10460_v40  ;;  %1520 = vst.msk [vmem:[#allocation3 + $0x48] sm:$0xff] %vm13119_vm4, %v1503_v45  ;;  %v1488_v23 = vadd.f32 %v11283_v58, %v1465_v22  ;;  %v7257_v22 = vld [vmem:[%s13141_s3 + $0x80] sm:$0xff] }
 0x363   :  { %v1431_v25 = vpop.f32.mrb[58].mxu1 }
 0x364   :  { %v1504_v51 = vmax.f32 %v1488_v23, 0.0  ;;  %v1466_v26 = vadd.f32 %v1431_v25, %v11270_v24  ;;  %v8458_v19 = vpop.f32.mrb[59].mxu1  ;;  %v9271_v23 = vpack.c.bf16 %v7258_v14, %v7257_v22  ;;  %v7259_v25 = vld [vmem:[%s13141_s3 + $0x90] sm:$0xff] }
 0x365   :  { %v2093_v19 = vld [vmem:[%s13141_s3] sm:$0xff] }
 0x366   :  { %1521 = vst.msk [vmem:[#allocation3 + $0x50] sm:$0xff] %vm13119_vm4, %v1504_v51  ;;  %v1489_v29 = vadd.f32 %v11283_v58, %v1466_v26  ;;  %9272 = vmatpush3.bf16.msra.mxu1 %v9271_v23  ;;  %v7260_v51 = vld [vmem:[%s13141_s3 + $0x98] sm:$0xff] }
 0x367   :  { %v1436_v30 = vpop.f32.mrb[60].mxu1  ;;  %v1589_v33 = vld [vmem:[#allocation2 + $0x20] sm:$0xff]  ;;  %9273 = vmatprep.subr.bf16.mxu1 %v10459_v38  ;;  %v9274_v26 = vpack.c.bf16 %v7260_v51, %v7259_v25 }
 0x368   :  { %v1572_v34 = vld [vmem:[#allocation2 + $0x1f] sm:$0xff]  ;;  %v1505_v35 = vmax.f32 %v1489_v29, 0.0  ;;  %v1467_v56 = vadd.f32 %v1436_v30, %v11272_v32  ;;  %v8461_v36 = vpop.f32.mrb[61].mxu1  ;;  %8497 = vmatmul.mubr.msk.f32.gmra.mrb[72].mxu0 %vm13119_vm4, %v1589_v33  ;;  %v1573_v59 = vld [vmem:[#allocation2 + $0x27] sm:$0xff] }
 0x369   :  { %8540 = vmatmul.mubr.msk.f32.gmra.mrb[74].mxu1 %vm13119_vm4, %v1572_v34  ;;  %v11376_v42 = vld [vmem:[#allocation2 + $0x19] sm:$0xff]  ;;  %8499 = vmatprep.mubr.msk.f32.mxu0 %vm13117_vm3, %v10460_v40  ;;  %v1879_v18 = vld [vmem:[#allocation2 + $0x21] sm:$0xff] }
 0x36a   :  { %v1535_v24 = vld [vmem:[#allocation3 + $0x40] ss:$2 sm:$0xff]  ;;  %v1546_v43 = vld [vmem:[#allocation3 + $0x41] ss:$2 sm:$0xff]  ;;  %8542 = vmatprep.mubr.msk.f32.mxu1 %vm13117_vm3, %v10460_v40  ;;  %2082 = vst [vmem:[#allocation2 + $0x18] sm:$0xff] %v10460_v40  ;;  %1522 = vst.msk [vmem:[#allocation3 + $0x58] sm:$0xff] %vm13119_vm4, %v1505_v35  ;;  %v1490_v48 = vadd.f32 %v11283_v58, %v1467_v56  ;;  %9275 = vmatpush3.bf16.msra.mxu1 %v9274_v26 }
 0x36b   :  { %v1554_v32 = vmax.f32 %v1535_v24, %v1546_v43  ;;  %v1441_v49 = vpop.f32.mrb[62].mxu1  ;;  %v2094_v29 = vld [vmem:[%s13141_s3 + $0x8] sm:$0xff]  ;;  %9276 = vmatprep.subr.bf16.mxu1 %v10459_v38  ;;  %v7261_v30 = vld [vmem:[%s13141_s3 + $0xa0] sm:$0xff]  ;;  %v2095_v56 = vld [vmem:[%s13141_s3 + $0x10] sm:$0xff] }
 0x36c   :  { %v1506_v50 = vmax.f32 %v1490_v48, 0.0  ;;  %v1468_v52 = vadd.f32 %v1441_v49, %v11274_v37  ;;  %v8464_v54 = vpop.f32.mrb[63].mxu1  ;;  %8500 = vmatmul.mubr.msk.f32.gmra.mrb[74].mxu0 %vm13119_vm4, %v1590_v44  ;;  %v9295_v33 = vpack.c.bf16 %v2094_v29, %v2093_v19  ;;  %v7262_v34 = vld [vmem:[%s13141_s3 + $0xa8] sm:$0xff]  ;;  %v2096_v36 = vld [vmem:[%s13141_s3 + $0x18] sm:$0xff]  ;;  %v2097_v44 = vld [vmem:[%s13141_s3 + $0x20] sm:$0xff] }
 0x36d   :  { %1565 = vst.msk [vmem:[#allocation2 + $0x30] sm:$0xff] %vm13119_vm4, %v1554_v32  ;;  %8543 = vmatmul.mubr.msk.f32.gmra.mrb[76].mxu1 %vm13119_vm4, %v1573_v59  ;;  %8502 = vmatprep.mubr.msk.f32.mxu0 %vm13117_vm3, %v10460_v40  ;;  %v9277_v35 = vpack.c.bf16 %v7262_v34, %v7261_v30  ;;  %v7264_v24 = vld [vmem:[%s13141_s3 + $0xb8] sm:$0xff]  ;;  %v2098_v32 = vld [vmem:[%s13141_s3 + $0x28] sm:$0xff]  ;;  %v7265_v48 = vld [vmem:[%s13141_s3 + $0xc0] sm:$0xff] }
 0x36e   :  { %8545 = vmatprep.mubr.msk.f32.mxu1 %vm13117_vm3, %v10460_v40  ;;  %1523 = vst.msk [vmem:[#allocation3 + $0x60] sm:$0xff] %vm13119_vm4, %v1506_v50  ;;  %v1491_v55 = vadd.f32 %v11283_v58, %v1468_v52  ;;  %v9301_v49 = vpack.c.bf16 %v2098_v32, %v2097_v44  ;;  %v7266_v59 = vld [vmem:[%s13141_s3 + $0xc8] sm:$0xff]  ;;  %v2099_v52 = vld [vmem:[%s13141_s3 + $0x30] sm:$0xff]  ;;  %v2100_v54 = vld [vmem:[%s13141_s3 + $0x38] sm:$0xff] }
 0x36f   :  { %v1446_v57 = vpop.f32.mrb[64].mxu1  ;;  %9278 = vmatpush3.bf16.msra.mxu1 %v9277_v35  ;;  %v9283_v50 = vpack.c.bf16 %v7266_v59, %v7265_v48 }
 0x370   :  { %v1507_v0 = vmax.f32 %v1491_v55, 0.0  ;;  %v1469_v27 = vadd.f32 %v1446_v57, %v11276_v46  ;;  %v8467_v37 = vpop.f32.mrb[65].mxu1  ;;  %9279 = vmatprep.subr.bf16.mxu1 %v10459_v38  ;;  %v7267_v55 = vld [vmem:[%s13141_s3 + $0xd0] sm:$0xff]  ;;  %v9304_v57 = vpack.c.bf16 %v2100_v54, %v2099_v52 }
 0x371   :  { %v1537_v31 = vld [vmem:[#allocation3 + $0x50] ss:$2 sm:$0xff]  ;;  %v1547_v60 = vld [vmem:[#allocation3 + $0x51] ss:$2 sm:$0xff]  ;;  %v2101_v37 = vld [vmem:[%s13141_s3 + $0x40] sm:$0xff] }
 0x372   :  { %v1555_v61 = vmax.f32 %v1537_v31, %v1547_v60  ;;  %1524 = vst.msk [vmem:[#allocation3 + $0x68] sm:$0xff] %vm13119_vm4, %v1507_v0  ;;  %v1492_v62 = vadd.f32 %v11283_v58, %v1469_v27  ;;  %v7268_v0 = vld [vmem:[%s13141_s3 + $0xd8] sm:$0xff]  ;;  %v2102_v31 = vld [vmem:[%s13141_s3 + $0x48] sm:$0xff]  ;;  %v7269_v60 = vld [vmem:[%s13141_s3 + $0xe0] sm:$0xff] }
 0x373   :  { %v1451_v63 = vpop.f32.mrb[66].mxu1  ;;  %v9286_v27 = vpack.c.bf16 %v7268_v0, %v7267_v55 }
 0x374   :  { %v1591_v1 = vld [vmem:[#allocation2 + $0x30] sm:$0xff]  ;;  %1566 = vst.msk [vmem:[#allocation2 + $0x38] sm:$0xff] %vm13119_vm4, %v1555_v61  ;;  %v1508_v3 = vmax.f32 %v1492_v62, 0.0  ;;  %v1470_v4 = vadd.f32 %v1451_v63, %v11278_v53  ;;  %v8470_v5 = vpop.f32.mrb[67].mxu1  ;;  %v9307_v61 = vpack.c.bf16 %v2102_v31, %v2101_v37  ;;  %v7270_v62 = vld [vmem:[%s13141_s3 + $0xe8] sm:$0xff] }
 0x375   :  { %v1574_v2 = vld [vmem:[#allocation2 + $0x2f] sm:$0xff]  ;;  %8503 = vmatmul.mubr.msk.f32.gmra.mrb[76].mxu0 %vm13119_vm4, %v1591_v1  ;;  %v9289_v63 = vpack.c.bf16 %v7270_v62, %v7269_v60  ;;  %v7272_v5 = vld [vmem:[%s13141_s3 + $0xf8] sm:$0xff] }
 0x376   :  { %8546 = vmatmul.mubr.msk.f32.gmra.mrb[78].mxu1 %vm13119_vm4, %v1574_v2  ;;  %8505 = vmatprep.mubr.msk.f32.mxu0 %vm13117_vm3, %v10460_v40  ;;  %1525 = vst.msk [vmem:[#allocation3 + $0x70] sm:$0xff] %vm13119_vm4, %v1508_v3  ;;  %v1493_v46 = vadd.f32 %v11283_v58, %v1470_v4  ;;  %v1880_v53 = vld [vmem:[#allocation2 + $0x29] sm:$0xff]  ;;  %v2104_v2 = vld [vmem:[%s13141_s3 + $0x58] sm:$0xff] }
 0x377   :  { %8548 = vmatprep.mubr.msk.f32.mxu1 %vm13117_vm3, %v10460_v40  ;;  %v2103_v1 = vld [vmem:[%s13141_s3 + $0x50] sm:$0xff]  ;;  %v11574_v31 = vld [vmem:[#allocation9] ss:$0 sm:$0xff] }
 0x378   :  { %v1509_v6 = vmax.f32 %v1493_v46, 0.0  ;;  %v7271_v3 = vld [vmem:[%s13141_s3 + $0xf0] sm:$0xff]  ;;  %v9310_v4 = vpack.c.bf16 %v2104_v2, %v2103_v1 }
 0x379   :  { %v1539_v28 = vld [vmem:[#allocation3 + $0x60] ss:$2 sm:$0xff]  ;;  %v1548_v7 = vld [vmem:[#allocation3 + $0x61] ss:$2 sm:$0xff]  ;;  %v9292_v46 = vpack.c.bf16 %v7272_v5, %v7271_v3 }
 0x37a   :  { %v1556_v8 = vmax.f32 %v1539_v28, %v1548_v7  ;;  %1526 = vst.msk [vmem:[#allocation3 + $0x78] sm:$0xff] %vm13119_vm4, %v1509_v6  ;;  %v2105_v6 = vld [vmem:[%s13141_s3 + $0x60] sm:$0xff]  ;;  %v2106_v28 = vld [vmem:[%s13141_s3 + $0x68] sm:$0xff] }
 0x37b   :  { %v1592_v10 = vld [vmem:[#allocation2 + $0x38] sm:$0xff]  ;;  %v9313_v7 = vpack.c.bf16 %v2106_v28, %v2105_v6 }
 0x37c   :  { %v1575_v11 = vld [vmem:[#allocation2 + $0x37] sm:$0xff]  ;;  %1567 = vst.msk [vmem:[#allocation2 + $0x40] sm:$0xff] %vm13119_vm4, %v1556_v8  ;;  %8506 = vmatmul.mubr.msk.f32.gmra.mrb[78].mxu0 %vm13119_vm4, %v1592_v10 }
 0x37d   :  { %v1881_v47 = vld [vmem:[#allocation2 + $0x31] sm:$0xff]  ;;  %8549 = vmatmul.mubr.msk.f32.gmra.mrb[80].mxu1 %vm13119_vm4, %v1575_v11  ;;  %8508 = vmatprep.mubr.msk.f32.mxu0 %vm13117_vm3, %v10460_v40 }
 0x37e   :  { %2083 = vst [vmem:[#allocation2 + $0x30] sm:$0xff] %v10460_v40  ;;  %8551 = vmatprep.mubr.msk.f32.mxu1 %vm13117_vm3, %v10460_v40  ;;  %v2107_v8 = vld [vmem:[%s13141_s3 + $0x70] sm:$0xff] }
 0x381   :  { %v1541_v58 = vld [vmem:[#allocation3 + $0x70] ss:$2 sm:$0xff]  ;;  %v1549_v12 = vld [vmem:[#allocation3 + $0x71] ss:$2 sm:$0xff] }
 0x382   :  { %v1557_v9 = vmax.f32 %v1541_v58, %v1549_v12 }
 0x383   :  { %v1593_v13 = vld [vmem:[#allocation2 + $0x40] sm:$0xff] }
 0x384   :  { %v1576_v15 = vld [vmem:[#allocation2 + $0x3f] sm:$0xff]  ;;  %1568 = vst.msk [vmem:[#allocation2 + $0x48] sm:$0xff] %vm13119_vm4, %v1557_v9  ;;  %8509 = vmatmul.mubr.msk.f32.gmra.mrb[80].mxu0 %vm13119_vm4, %v1593_v13 }
 0x385   :  { %8552 = vmatmul.mubr.msk.f32.gmra.mrb[82].mxu1 %vm13119_vm4, %v1576_v15  ;;  %8511 = vmatprep.mubr.msk.f32.mxu0 %vm13117_vm3, %v10460_v40  ;;  %v1882_v20 = vld [vmem:[#allocation2 + $0x39] sm:$0xff] }
 0x386   :  { %8554 = vmatprep.mubr.msk.f32.mxu1 %vm13117_vm3, %v10460_v40 }
 0x38b   :  { %v1594_v16 = vld [vmem:[#allocation2 + $0x48] sm:$0xff] }
 0x38c   :  { %v1577_v39 = vld [vmem:[#allocation2 + $0x47] sm:$0xff]  ;;  %8512 = vmatmul.mubr.msk.f32.gmra.mrb[82].mxu0 %vm13119_vm4, %v1594_v16 }
 0x38d   :  { %8555 = vmatmul.mubr.msk.f32.gmra.mrb[84].mxu1 %vm13119_vm4, %v1577_v39  ;;  %8573 = vmatprep.mubr.msk.f32.mxu0 %vm13117_vm3, %v10460_v40  ;;  %v1883_v21 = vld [vmem:[#allocation2 + $0x41] sm:$0xff]  ;;  %v1884_v45 = vld [vmem:[#allocation2 + $0x49] sm:$0xff] }
 0x38e   :  { %8632 = vmatprep.mubr.msk.f32.mxu1 %vm13117_vm3, %v10460_v40 }
 0x390   :  { %8574 = vmatmul.mubr.msk.f32.vlgmr.msra.gmra.mrb[84].mxu0 %vm13119_vm4, %v1876_v17 }
 0x391   :  { %8576 = vmatprep.mubr.msk.f32.mxu0 %vm13117_vm3, %v10460_v40  ;;  %9296 = vmatpush3.bf16.msra.mxu0 %v9295_v33 }
 0x392   :  { %9297 = vmatprep.subr.bf16.mxu0 %v10459_v38 }
 0x394   :  { %8577 = vmatmul.mubr.msk.f32.gmra.mrb[86].mxu0 %vm13119_vm4, %v11374_v41  ;;  %v7263_v41 = vld [vmem:[%s13141_s3 + $0xb0] sm:$0xff] }
 0x395   :  { %8579 = vmatprep.mubr.msk.f32.mxu0 %vm13117_vm3, %v10460_v40  ;;  %v9280_v43 = vpack.c.bf16 %v7264_v24, %v7263_v41 }
 0x397   :  { %9281 = vmatpush3.bf16.msra.mxu1 %v9280_v43 }
 0x398   :  { %8580 = vmatmul.mubr.msk.f32.gmra.mrb[88].mxu0 %vm13119_vm4, %v11376_v42  ;;  %v9298_v42 = vpack.c.bf16 %v2096_v36, %v2095_v56  ;;  %9282 = vmatprep.subr.bf16.mxu1 %v10459_v38 }
 0x399   :  { %8582 = vmatprep.mubr.msk.f32.mxu0 %vm13117_vm3, %v10460_v40 }
 0x39a   :  { %9299 = vmatpush3.bf16.msra.mxu0 %v9298_v42 }
 0x39b   :  { %9300 = vmatprep.subr.bf16.mxu0 %v10459_v38  ;;  %9284 = vmatpush3.bf16.msra.mxu1 %v9283_v50 }
 0x39c   :  { %8583 = vmatmul.mubr.msk.f32.gmra.mrb[90].mxu0 %vm13119_vm4, %v1879_v18  ;;  %9285 = vmatprep.subr.bf16.mxu1 %v10459_v38 }
 0x39d   :  { %8585 = vmatprep.mubr.msk.f32.mxu0 %vm13117_vm3, %v10460_v40 }
 0x39e   :  { %9302 = vmatpush3.bf16.msra.mxu0 %v9301_v49 }
 0x39f   :  { %9303 = vmatprep.subr.bf16.mxu0 %v10459_v38  ;;  %9287 = vmatpush3.bf16.msra.mxu1 %v9286_v27 }
 0x3a0   :  { %8586 = vmatmul.mubr.msk.f32.gmra.mrb[92].mxu0 %vm13119_vm4, %v1880_v53  ;;  %9288 = vmatprep.subr.bf16.mxu1 %v10459_v38  ;;  %v2108_v53 = vld [vmem:[%s13141_s3 + $0x78] sm:$0xff] }
 0x3a1   :  { %8588 = vmatprep.mubr.msk.f32.mxu0 %vm13117_vm3, %v10460_v40  ;;  %v9316_v10 = vpack.c.bf16 %v2108_v53, %v2107_v8 }
 0x3a2   :  { %9305 = vmatpush3.bf16.msra.mxu0 %v9304_v57 }
 0x3a3   :  { %9306 = vmatprep.subr.bf16.mxu0 %v10459_v38  ;;  %9290 = vmatpush3.bf16.msra.mxu1 %v9289_v63 }
 0x3a4   :  { %8589 = vmatmul.mubr.msk.f32.gmra.mrb[94].mxu0 %vm13119_vm4, %v1881_v47  ;;  %9291 = vmatprep.subr.bf16.mxu1 %v10459_v38 }
 0x3a5   :  { %8591 = vmatprep.mubr.msk.f32.mxu0 %vm13117_vm3, %v10460_v40 }
 0x3a6   :  { %9308 = vmatpush3.bf16.msra.mxu0 %v9307_v61 }
 0x3a7   :  { %9309 = vmatprep.subr.bf16.mxu0 %v10459_v38  ;;  %9293 = vmatpush3.bf16.msra.mxu1 %v9292_v46 }
 0x3a8   :  { %8592 = vmatmul.mubr.msk.f32.gmra.mrb[96].mxu0 %vm13119_vm4, %v1882_v20  ;;  %9318 = vmatprep.subr.bf16.mxu1 %v10459_v38 }
 0x3a9   :  { %8594 = vmatprep.mubr.msk.f32.mxu0 %vm13117_vm3, %v10460_v40 }
 0x3aa   :  { %9311 = vmatpush3.bf16.msra.mxu0 %v9310_v4 }
 0x3ab   :  { %9312 = vmatprep.subr.bf16.mxu0 %v10459_v38 }
 0x3ac   :  { %8595 = vmatmul.mubr.msk.f32.gmra.mrb[98].mxu0 %vm13119_vm4, %v1883_v21 }
 0x3ad   :  { %8597 = vmatprep.mubr.msk.f32.mxu0 %vm13117_vm3, %v10460_v40 }
 0x3ae   :  { %9314 = vmatpush3.bf16.msra.mxu0 %v9313_v7 }
 0x3af   :  { %9315 = vmatprep.subr.bf16.mxu0 %v10459_v38 }
 0x3b0   :  { %8598 = vmatmul.mubr.msk.f32.gmra.mrb[100].mxu0 %vm13119_vm4, %v1884_v45 }
 0x3b1   :  { %8679 = vmatprep.mubr.msk.f32.mxu0 %vm13117_vm3, %v10460_v40 }
 0x3b2   :  { %9317 = vmatpush3.bf16.msra.mxu0 %v9316_v10 }
 0x423   :  { %v1697_v11 = vpop.f32.mrb[66].mxu0 }
 0x424   :  { %v1833_v47 = vpop.f32.mrb[68].mxu1  ;;  %v8489_v12 = vpop.f32.mrb[67].mxu0 }
 0x425   :  { %v1834_v58 = vadd.f32 %v1833_v47, %v1697_v11  ;;  %v8532_v9 = vpop.f32.mrb[69].mxu1  ;;  %v7274_v12 = vld [vmem:[%s13141_s3 + $0x108] sm:$0xff] }
 0x42b   :  { %v1702_v13 = vpop.f32.mrb[68].mxu0 }
 0x42c   :  { %v1838_v15 = vpop.f32.mrb[70].mxu1  ;;  %v8492_v39 = vpop.f32.mrb[69].mxu0 }
 0x42d   :  { %v1839_v16 = vadd.f32 %v1838_v15, %v1702_v13  ;;  %v8535_v17 = vpop.f32.mrb[71].mxu1 }
 0x433   :  { %v1707_v18 = vpop.f32.mrb[70].mxu0 }
 0x434   :  { %v1843_v20 = vpop.f32.mrb[72].mxu1  ;;  %v8495_v45 = vpop.f32.mrb[71].mxu0 }
 0x435   :  { %v1844_v21 = vadd.f32 %v1843_v20, %v1707_v18  ;;  %v8538_v22 = vpop.f32.mrb[73].mxu1  ;;  %v7275_v20 = vld [vmem:[%s13141_s3 + $0x110] sm:$0xff] }
 0x43b   :  { %v1712_v14 = vpop.f32.mrb[72].mxu0 }
 0x43c   :  { %v1848_v23 = vpop.f32.mrb[74].mxu1  ;;  %v8498_v51 = vpop.f32.mrb[73].mxu0 }
 0x43d   :  { %v1849_v25 = vadd.f32 %v1848_v23, %v1712_v14  ;;  %v8541_v26 = vpop.f32.mrb[75].mxu1  ;;  %v7277_v51 = vld [vmem:[%s13141_s3 + $0x120] sm:$0xff] }
 0x43e   :  { %v7278_v26 = vld [vmem:[%s13141_s3 + $0x128] sm:$0xff] }
 0x43f   :  { %v1717_v29 = vpop.f32.mrb[74].mxu0 }
 0x440   :  { %v1853_v19 = vpop.f32.mrb[76].mxu1  ;;  %v8501_v33 = vpop.f32.mrb[75].mxu0 }
 0x441   :  { %v8544_v30 = vpop.f32.mrb[77].mxu1 }
 0x448   :  { %v1721_v34 = vpop.f32.mrb[76].mxu0 }
 0x449   :  { %v1857_v35 = vpop.f32.mrb[78].mxu1  ;;  %v8504_v36 = vpop.f32.mrb[77].mxu0 }
 0x44a   :  { %v1858_v56 = vadd.f32 %v1857_v35, %v1721_v34  ;;  %v8547_v41 = vpop.f32.mrb[79].mxu1 }
 0x44f   :  { %v1726_v42 = vpop.f32.mrb[78].mxu0 }
 0x450   :  { %v1862_v24 = vpop.f32.mrb[80].mxu1  ;;  %v8507_v44 = vpop.f32.mrb[79].mxu0 }
 0x451   :  { %v1863_v43 = vadd.f32 %v1862_v24, %v1726_v42  ;;  %v8550_v32 = vpop.f32.mrb[81].mxu1  ;;  %v7279_v42 = vld [vmem:[%s13141_s3 + $0x130] sm:$0xff]  ;;  %v7280_v24 = vld [vmem:[%s13141_s3 + $0x138] sm:$0xff] }
 0x457   :  { %v1731_v48 = vpop.f32.mrb[80].mxu0 }
 0x458   :  { %v1867_v49 = vpop.f32.mrb[82].mxu1  ;;  %v8510_v50 = vpop.f32.mrb[81].mxu0 }
 0x459   :  { %v11570_v59 = vadd.f32 %v1867_v49, %v1731_v48  ;;  %v8553_v52 = vpop.f32.mrb[83].mxu1  ;;  %v9328_v50 = vpack.c.bf16 %v7280_v24, %v7279_v42  ;;  %v2464_v24 = vld [vmem:[%s13142_s9 + $0x78] sm:$0xff] }
 0x45f   :  { %v1736_v54 = vpop.f32.mrb[82].mxu0 }
 0x460   :  { %v1872_v55 = vpop.f32.mrb[84].mxu1  ;;  %v8513_v0 = vpop.f32.mrb[83].mxu0 }
 0x461   :  { %v11572_v57 = vadd.f32 %v1872_v55, %v1736_v54  ;;  %v8556_v27 = vpop.f32.mrb[85].mxu1  ;;  %v7282_v54 = vld [vmem:[%s13141_s3 + $0x148] sm:$0xff] }
 0x463   :  { %v1987_v37 = vpop.f32.mrb[84].mxu0 }
 0x464   :  { %v2030_v60 = vadd.f32 %v1987_v37, %v1834_v58  ;;  %v8575_v61 = vpop.f32.mrb[85].mxu0  ;;  %v7273_v58 = vld [vmem:[%s13141_s3 + $0x100] sm:$0xff] }
 0x465   :  { %v9319_v17 = vpack.c.bf16 %v7274_v12, %v7273_v58 }
 0x466   :  { %v2045_v62 = vadd.f32 %v11574_v31, %v2030_v60 }
 0x467   :  { %v1992_v63 = vpop.f32.mrb[86].mxu0 }
 0x468   :  { %v2053_v1 = vmax.f32 %v2045_v62, 0.0  ;;  %v2031_v2 = vadd.f32 %v1992_v63, %v1839_v16  ;;  %v8578_v3 = vpop.f32.mrb[87].mxu0  ;;  %v7283_v62 = vld [vmem:[%s13141_s3 + $0x150] sm:$0xff] }
 0x46a   :  { %2061 = vst [vmem:[#allocation3] sm:$0xff] %v2053_v1  ;;  %v2046_v4 = vadd.f32 %v11574_v31, %v2031_v2 }
 0x46b   :  { %v1997_v5 = vpop.f32.mrb[88].mxu0 }
 0x46c   :  { %v2054_v46 = vmax.f32 %v2046_v4, 0.0  ;;  %v2032_v6 = vadd.f32 %v1997_v5, %v1844_v21  ;;  %v8581_v28 = vpop.f32.mrb[89].mxu0  ;;  %v7276_v21 = vld [vmem:[%s13141_s3 + $0x118] sm:$0xff]  ;;  %v7285_v5 = vld [vmem:[%s13141_s3 + $0x160] sm:$0xff] }
 0x46d   :  { %v9322_v23 = vpack.c.bf16 %v7276_v21, %v7275_v20  ;;  %v2451_v21 = vld [vmem:[%s13142_s9 + $0x10] sm:$0xff] }
 0x46e   :  { %2062 = vst [vmem:[#allocation3 + $0x8] sm:$0xff] %v2054_v46  ;;  %v2047_v7 = vadd.f32 %v11574_v31, %v2032_v6  ;;  %v7286_v46 = vld [vmem:[%s13141_s3 + $0x168] sm:$0xff] }
 0x46f   :  { %v2002_v8 = vpop.f32.mrb[90].mxu0  ;;  %v9337_v28 = vpack.c.bf16 %v7286_v46, %v7285_v5  ;;  %v2623_v5 = vld [vmem:[%s13091_s11 + $0x70] sm:$0xff] }
 0x470   :  { %v2055_v53 = vmax.f32 %v2047_v7, 0.0  ;;  %v2033_v10 = vadd.f32 %v2002_v8, %v1849_v25  ;;  %v8584_v11 = vpop.f32.mrb[91].mxu0  ;;  %v7287_v7 = vld [vmem:[%s13141_s3 + $0x170] sm:$0xff]  ;;  %v7288_v8 = vld [vmem:[%s13141_s3 + $0x178] sm:$0xff] }
 0x471   :  { %v9340_v11 = vpack.c.bf16 %v7288_v8, %v7287_v7 }
 0x472   :  { %2063 = vst [vmem:[#allocation3 + $0x10] sm:$0xff] %v2055_v53  ;;  %v2048_v47 = vadd.f32 %v11574_v31, %v2033_v10 }
 0x473   :  { %v2007_v9 = vpop.f32.mrb[92].mxu0 }
 0x474   :  { %v2056_v13 = vmax.f32 %v2048_v47, 0.0  ;;  %v8587_v15 = vpop.f32.mrb[93].mxu0 }
 0x475   :  { %v2069_v16 = vld [vmem:[#allocation3] ss:$2 sm:$0xff]  ;;  %v2073_v39 = vld [vmem:[#allocation3 + $0x1] ss:$2 sm:$0xff] }
 0x476   :  { %v2077_v18 = vmax.f32 %v2069_v16, %v2073_v39  ;;  %2064 = vst [vmem:[#allocation3 + $0x18] sm:$0xff] %v2056_v13 }
 0x477   :  { %v2011_v45 = vpop.f32.mrb[94].mxu0 }
 0x478   :  { %2084 = vst [vmem:[#allocation2 + $0x8] sm:$0xff] %v2077_v18  ;;  %v2034_v22 = vadd.f32 %v2011_v45, %v1858_v56  ;;  %v8590_v14 = vpop.f32.mrb[95].mxu0  ;;  %8633 = vmatmul.mubr.f32.vlgmr.msra.gmra.mrb[86].mxu1 %v2077_v18  ;;  %v9325_v56 = vpack.c.bf16 %v7278_v26, %v7277_v51  ;;  %v2450_v18 = vld [vmem:[%s13142_s9 + $0x8] sm:$0xff]  ;;  %v2452_v45 = vld [vmem:[%s13142_s9 + $0x18] sm:$0xff] }
 0x479   :  { %9320 = vmatpush3.bf16.msra.mxu1 %v9319_v17  ;;  %8635 = vmatprep.mubr.msk.f32.mxu1 %vm13117_vm3, %v10460_v40  ;;  %v2449_v17 = vld [vmem:[%s13142_s9] sm:$0xff]  ;;  %v2454_v14 = vld [vmem:[%s13142_s9 + $0x28] sm:$0xff]  ;;  %v2456_v51 = vld [vmem:[%s13142_s9 + $0x38] sm:$0xff] }
 0x47a   :  { %v2049_v25 = vadd.f32 %v11574_v31, %v2034_v22  ;;  %9321 = vmatprep.subr.bf16.mxu1 %v10459_v38  ;;  %v9342_v20 = vpack.c.bf16 %v2450_v18, %v2449_v17  ;;  %v2453_v22 = vld [vmem:[%s13142_s9 + $0x20] sm:$0xff] }
 0x47b   :  { %v2016_v19 = vpop.f32.mrb[96].mxu0 }
 0x47c   :  { %v2057_v29 = vmax.f32 %v2049_v25, 0.0  ;;  %v2035_v30 = vadd.f32 %v2016_v19, %v1863_v43  ;;  %v8593_v33 = vpop.f32.mrb[97].mxu0  ;;  %9343 = vmatprep.subr.bf16.mxu0 %v9342_v20  ;;  %v2455_v25 = vld [vmem:[%s13142_s9 + $0x30] sm:$0xff]  ;;  %v2457_v19 = vld [vmem:[%s13142_s9 + $0x40] sm:$0xff] }
 0x47d   :  { %v2070_v34 = vld [vmem:[#allocation3 + $0x10] ss:$2 sm:$0xff]  ;;  %v2074_v35 = vld [vmem:[#allocation3 + $0x11] ss:$2 sm:$0xff]  ;;  %9323 = vmatpush3.bf16.msra.mxu1 %v9322_v23  ;;  %v9350_v23 = vpack.c.bf16 %v2454_v14, %v2453_v22  ;;  %v9354_v26 = vpack.c.bf16 %v2456_v51, %v2455_v25  ;;  %v7289_v14 = vld [vmem:[#allocation10] ss:$0 sm:$0xff] }
 0x47e   :  { %v2078_v36 = vmax.f32 %v2070_v34, %v2074_v35  ;;  %2065 = vst [vmem:[#allocation3 + $0x20] sm:$0xff] %v2057_v29  ;;  %v2050_v41 = vadd.f32 %v11574_v31, %v2035_v30  ;;  %9324 = vmatprep.subr.bf16.mxu1 %v10459_v38  ;;  %v2458_v29 = vld [vmem:[%s13142_s9 + $0x48] sm:$0xff]  ;;  %v2459_v33 = vld [vmem:[%s13142_s9 + $0x50] sm:$0xff]  ;;  %v2460_v34 = vld [vmem:[%s13142_s9 + $0x58] sm:$0xff] }
 0x47f   :  { %v2021_v43 = vpop.f32.mrb[98].mxu0  ;;  %v2088_v44 = vld [vmem:[#allocation2 + $0x7] sm:$0xff]  ;;  %v9358_v30 = vpack.c.bf16 %v2458_v29, %v2457_v19  ;;  %v9362_v35 = vpack.c.bf16 %v2460_v34, %v2459_v33 }
 0x480   :  { %2085 = vst [vmem:[#allocation2 + $0x10] sm:$0xff] %v2078_v36  ;;  %v2058_v32 = vmax.f32 %v2050_v41, 0.0  ;;  %v2036_v48 = vadd.f32 %v2021_v43, %v11570_v59  ;;  %v8596_v49 = vpop.f32.mrb[99].mxu0  ;;  %8680 = vmatmul.mubr.f32.vlgmr.msra.gmra.mrb[102].mxu0 %v2088_v44  ;;  %8636 = vmatmul.mubr.f32.gmra.mrb[88].mxu1 %v2078_v36  ;;  %v7281_v59 = vld [vmem:[%s13141_s3 + $0x140] sm:$0xff]  ;;  %v2462_v36 = vld [vmem:[%s13142_s9 + $0x68] sm:$0xff]  ;;  %v2463_v41 = vld [vmem:[%s13142_s9 + $0x70] sm:$0xff] }
 0x481   :  { %8682 = vmatprep.mubr.msk.f32.mxu0 %vm13117_vm3, %v10460_v40  ;;  %9326 = vmatpush3.bf16.msra.mxu1 %v9325_v56  ;;  %v9331_v60 = vpack.c.bf16 %v7282_v54, %v7281_v59  ;;  %v2461_v56 = vld [vmem:[%s13142_s9 + $0x60] sm:$0xff]  ;;  %v9370_v43 = vpack.c.bf16 %v2464_v24, %v2463_v41  ;;  %v2610_v44 = vld [vmem:[%s13091_s11 + $0x8] sm:$0xff]  ;;  %v2616_v59 = vld [vmem:[%s13091_s11 + $0x38] sm:$0xff]  ;;  %s10463_s9 = smov 64  }
 0x482   :  { %2066 = vst [vmem:[#allocation3 + $0x28] sm:$0xff] %v2058_v32  ;;  %v2051_v52 = vadd.f32 %v11574_v31, %v2036_v48  ;;  %9327 = vmatprep.subr.bf16.mxu1 %v10459_v38  ;;  %8638 = vmatprep.mubr.msk.f32.mxu1 %vm13117_vm3, %v10460_v40  ;;  %v9366_v42 = vpack.c.bf16 %v2462_v36, %v2461_v56  ;;  %v2612_v32 = vld [vmem:[%s13091_s11 + $0x18] sm:$0xff]  ;;  %v2609_v48 = vld [vmem:[%s13091_s11] sm:$0xff] }
 0x483   :  { %v2026_v55 = vpop.f32.mrb[100].mxu0  ;;  %9345 = vmatpush3.bf16.msra.mxu0 %v9342_v20  ;;  %v9374_v49 = vpack.c.bf16 %v2612_v32, %v2610_v44 }
 0x484   :  { %v2059_v0 = vmax.f32 %v2051_v52, 0.0  ;;  %v2037_v27 = vadd.f32 %v2026_v55, %v11572_v57  ;;  %v8599_v37 = vpop.f32.mrb[101].mxu0  ;;  %8639 = vmatmul.mubr.f32.gmra.mrb[90].mxu1 %v10460_v40  ;;  %v7284_v57 = vld [vmem:[%s13141_s3 + $0x158] sm:$0xff]  ;;  %v2614_v52 = vld [vmem:[%s13091_s11 + $0x28] sm:$0xff] }
 0x485   :  { %9329 = vmatpush3.bf16.msra.mxu1 %v9328_v50  ;;  %8641 = vmatprep.mubr.msk.f32.mxu1 %vm13117_vm3, %v10460_v40  ;;  %v2611_v50 = vld [vmem:[%s13091_s11 + $0x10] sm:$0xff]  ;;  %v11738_v55 = vpack.c.bf16 %v2616_v59, %v2614_v52  ;;  %v2618_v37 = vld [vmem:[%s13091_s11 + $0x48] sm:$0xff] }
 0x486   :  { %2067 = vst [vmem:[#allocation3 + $0x30] sm:$0xff] %v2059_v0  ;;  %v2052_v61 = vadd.f32 %v11574_v31, %v2037_v27  ;;  %9330 = vmatprep.subr.bf16.mxu1 %v10459_v38  ;;  %v9334_v31 = vpack.c.bf16 %v7284_v57, %v7283_v62  ;;  %v11736_v54 = vpack.c.bf16 %v2611_v50, %v2609_v48  ;;  %v2613_v0 = vld [vmem:[%s13091_s11 + $0x20] sm:$0xff]  ;;  %v2615_v27 = vld [vmem:[%s13091_s11 + $0x30] sm:$0xff] }
 0x487   :  { %v2089_v63 = vld [vmem:[#allocation2 + $0xf] sm:$0xff]  ;;  %v2090_v6 = vld [vmem:[#allocation2 + $0x17] sm:$0xff]  ;;  %v2617_v57 = vld [vmem:[%s13091_s11 + $0x40] sm:$0xff] }
 0x488   :  { %v2060_v1 = vmax.f32 %v2052_v61, 0.0  ;;  %8683 = vmatmul.mubr.f32.gmra.mrb[104].mxu0 %v2089_v63  ;;  %v2309_v12 = vld [vmem:[#allocation2 + $0x9] sm:$0xff]  ;;  %v2310_v13 = vld [vmem:[#allocation2 + $0x11] sm:$0xff]  ;;  %v11753_v61 = vpack.c.bf16 %v2615_v27, %v2613_v0 }
 0x489   :  { %v2071_v2 = vld [vmem:[#allocation3 + $0x20] ss:$2 sm:$0xff]  ;;  %v2075_v3 = vld [vmem:[#allocation3 + $0x21] ss:$2 sm:$0xff]  ;;  %8685 = vmatprep.mubr.msk.f32.mxu0 %vm13117_vm3, %v10460_v40  ;;  %9332 = vmatpush3.bf16.msra.mxu1 %v9331_v60  ;;  %v2619_v63 = vld [vmem:[%s13091_s11 + $0x50] sm:$0xff] }
 0x48a   :  { %v2079_v4 = vmax.f32 %v2071_v2, %v2075_v3  ;;  %2068 = vst [vmem:[#allocation3 + $0x38] sm:$0xff] %v2060_v1  ;;  %9333 = vmatprep.subr.bf16.mxu1 %v10459_v38  ;;  %v2620_v60 = vld [vmem:[%s13091_s11 + $0x58] sm:$0xff]  ;;  %v2622_v1 = vld [vmem:[%s13091_s11 + $0x68] sm:$0xff]  ;;  %v11771_v3 = vpack.c.bf16 %v2619_v63, %v2617_v57 }
 0x48b   :  { %v11756_v62 = vpack.c.bf16 %v2620_v60, %v2618_v37  ;;  %v2624_v2 = vld [vmem:[%s13091_s11 + $0x78] sm:$0xff] }
 0x48c   :  { %2086 = vst [vmem:[#allocation2 + $0x20] sm:$0xff] %v2079_v4  ;;  %8686 = vmatmul.mubr.f32.gmra.mrb[106].mxu0 %v2090_v6  ;;  %8642 = vmatmul.mubr.f32.gmra.mrb[92].mxu1 %v2079_v4  ;;  %v2621_v4 = vld [vmem:[%s13091_s11 + $0x60] sm:$0xff] }
 0x48d   :  { %8688 = vmatprep.mubr.msk.f32.mxu0 %vm13117_vm3, %v10460_v40  ;;  %9335 = vmatpush3.bf16.msra.mxu1 %v9334_v31  ;;  %v11774_v31 = vpack.c.bf16 %v2624_v2, %v2622_v1  ;;  %v11783_v46 = vpack.c.bf16 %v2623_v5, %v2621_v4  ;;  %v11787_v2 = vld [vmem:[#allocation2] sm:$0xff] }
 0x48e   :  { %9336 = vmatprep.subr.bf16.mxu1 %v10459_v38  ;;  %8644 = vmatprep.mubr.msk.f32.mxu1 %vm13117_vm3, %v10460_v40  ;;  %v7290_v4 = vld [vmem:[#allocation12] ss:$0 sm:$0xff] }
 0x491   :  { %v2072_v53 = vld [vmem:[#allocation3 + $0x30] ss:$2 sm:$0xff]  ;;  %v2076_v10 = vld [vmem:[#allocation3 + $0x31] ss:$2 sm:$0xff]  ;;  %9338 = vmatpush3.bf16.msra.mxu1 %v9337_v28 }
 0x492   :  { %v2080_v47 = vmax.f32 %v2072_v53, %v2076_v10  ;;  %9339 = vmatprep.subr.bf16.mxu1 %v10459_v38 }
 0x493   :  { %v2091_v58 = vld [vmem:[#allocation2 + $0x1f] sm:$0xff] }
 0x494   :  { %2087 = vst [vmem:[#allocation2 + $0x28] sm:$0xff] %v2080_v47  ;;  %8689 = vmatmul.mubr.f32.gmra.mrb[108].mxu0 %v2091_v58  ;;  %8645 = vmatmul.mubr.f32.gmra.mrb[94].mxu1 %v2080_v47  ;;  %v2311_v15 = vld [vmem:[#allocation2 + $0x19] sm:$0xff] }
 0x495   :  { %8691 = vmatprep.mubr.msk.f32.mxu0 %vm13117_vm3, %v10460_v40  ;;  %9341 = vmatpush3.bf16.msra.mxu1 %v9340_v11 }
 0x496   :  { %8726 = vmatprep.mubr.msk.f32.mxu1 %vm13117_vm3, %v10460_v40  ;;  %9375 = vmatprep.subr.bf16.mxu1 %v9374_v49 }
 0x498   :  { %8727 = vmatmul.mubr.f32.vlgmr.msra.gmra.mrb[96].mxu1 %v2309_v12 }
 0x499   :  { %8729 = vmatprep.mubr.msk.f32.mxu1 %vm13117_vm3, %v10460_v40  ;;  %9377 = vmatpush1.bf16.msra.mxu1 %v11736_v54 }
 0x49a   :  { %9379 = vmatprep.subr.bf16.mxu1 %v11738_v55 }
 0x49b   :  { %v2092_v9 = vld [vmem:[#allocation2 + $0x27] sm:$0xff] }
 0x49c   :  { %8692 = vmatmul.mubr.f32.gmra.mrb[110].mxu0 %v2092_v9  ;;  %8730 = vmatmul.mubr.f32.gmra.mrb[98].mxu1 %v2310_v13  ;;  %v2312_v16 = vld [vmem:[#allocation2 + $0x21] sm:$0xff]  ;;  %v2313_v39 = vld [vmem:[#allocation2 + $0x29] sm:$0xff] }
 0x49d   :  { %8732 = vmatprep.mubr.msk.f32.mxu1 %vm13117_vm3, %v10460_v40  ;;  %9381 = vmatpush1.bf16.msra.mxu1 %v11753_v61 }
 0x49e   :  { %9383 = vmatprep.subr.bf16.mxu1 %v11756_v62 }
 0x4a0   :  { %8733 = vmatmul.mubr.f32.gmra.mrb[100].mxu1 %v2311_v15 }
 0x4a1   :  { %8735 = vmatprep.mubr.msk.f32.mxu1 %vm13117_vm3, %v10460_v40  ;;  %9385 = vmatpush1.bf16.msra.mxu1 %v11771_v3 }
 0x4a2   :  { %9387 = vmatprep.subr.bf16.mxu1 %v11774_v31 }
 0x4a4   :  { %8736 = vmatmul.mubr.f32.gmra.mrb[102].mxu1 %v2312_v16 }
 0x4a5   :  { %8738 = vmatprep.mubr.msk.f32.mxu1 %vm13117_vm3, %v10460_v40  ;;  %9389 = vmatpush1.bf16.msra.mxu1 %v11783_v46 }
 0x4a6   :  { %9391 = vmatprep.subr.bf16.mxu1 %v9374_v49 }
 0x4a8   :  { %8739 = vmatmul.mubr.f32.gmra.mrb[104].mxu1 %v2313_v39 }
 0x4a9   :  { %2704 = vmatprep.mubr.f32.mxu1 %v10460_v40  ;;  %v9346_v40 = vpack.c.bf16 %v2452_v45, %v2451_v21 }
 0x4ab   :  { %9347 = vmatprep.subr.bf16.mxu0 %v9346_v40 }
 0x4ac   :  { %9349 = vmatpush3.bf16.msra.mxu0 %v9346_v40 }
 0x4ad   :  { %9351 = vmatprep.subr.bf16.mxu0 %v9350_v23 }
 0x4b0   :  { %9353 = vmatpush3.bf16.msra.mxu0 %v9350_v23 }
 0x4b1   :  { %9355 = vmatprep.subr.bf16.mxu0 %v9354_v26 }
 0x4b4   :  { %9357 = vmatpush3.bf16.msra.mxu0 %v9354_v26 }
 0x4b5   :  { %9359 = vmatprep.subr.bf16.mxu0 %v9358_v30 }
 0x4b8   :  { %9361 = vmatpush3.bf16.msra.mxu0 %v9358_v30 }
 0x4b9   :  { %9363 = vmatprep.subr.bf16.mxu0 %v9362_v35 }
 0x4bc   :  { %9365 = vmatpush3.bf16.msra.mxu0 %v9362_v35 }
 0x4bd   :  { %9367 = vmatprep.subr.bf16.mxu0 %v9366_v42 }
 0x4c0   :  { %9369 = vmatpush3.bf16.msra.mxu0 %v9366_v42 }
 0x4c1   :  { %9371 = vmatprep.subr.bf16.mxu0 %v9370_v43 }
 0x4c4   :  { %9373 = vmatpush3.bf16.msra.mxu0 %v9370_v43 }
 0x4c5   :  { %9406 = vmatprep.subr.bf16.mxu0 %v10459_v38 }
 0x54b   :  { %v2197_v6 = vpop.f32.mrb[86].mxu1 }
 0x54c   :  { %v8634_v28 = vpop.f32.mrb[87].mxu1 }
 0x553   :  { %v2286_v7 = vpop.f32.mrb[102].mxu0  ;;  %v2202_v8 = vpop.f32.mrb[88].mxu1 }
 0x554   :  { %v2287_v53 = vadd.f32 %v2286_v7, %v2197_v6  ;;  %v8681_v10 = vpop.f32.mrb[103].mxu0  ;;  %v8637_v11 = vpop.f32.mrb[89].mxu1 }
 0x557   :  { %v2207_v47 = vpop.f32.mrb[90].mxu1 }
 0x558   :  { %v8640_v58 = vpop.f32.mrb[91].mxu1 }
 0x55b   :  { %v2291_v12 = vpop.f32.mrb[104].mxu0 }
 0x55c   :  { %v2292_v9 = vadd.f32 %v2291_v12, %v2202_v8  ;;  %v8684_v13 = vpop.f32.mrb[105].mxu0  ;;  %v10462_v12 = vmov 1.0|1.0  }
 0x55f   :  { %v2296_v15 = vpop.f32.mrb[106].mxu0  ;;  %v2211_v16 = vpop.f32.mrb[92].mxu1 }
 0x560   :  { %v8687_v39 = vpop.f32.mrb[107].mxu0  ;;  %v8643_v17 = vpop.f32.mrb[93].mxu1 }
 0x561   :  { %v11879_v17 = vld [vmem:[%s13092_s12] sm:$0x3] }
 0x567   :  { %v2300_v18 = vpop.f32.mrb[108].mxu0  ;;  %v2216_v20 = vpop.f32.mrb[94].mxu1 }
 0x568   :  { %v2301_v21 = vadd.f32 %v2300_v18, %v2211_v16  ;;  %v8690_v45 = vpop.f32.mrb[109].mxu0  ;;  %v8646_v40 = vpop.f32.mrb[95].mxu1 }
 0x56b   :  { %v2397_v22 = vpop.f32.mrb[96].mxu1 }
 0x56c   :  { %v2420_v23 = vadd.f32 %v2397_v22, %v2287_v53  ;;  %v8728_v25 = vpop.f32.mrb[97].mxu1 }
 0x56e   :  { %v2431_v51 = vadd.f32 %v7289_v14, %v2420_v23 }
 0x56f   :  { %v2305_v26 = vpop.f32.mrb[110].mxu0  ;;  %v2402_v19 = vpop.f32.mrb[98].mxu1 }
 0x570   :  { %v2306_v29 = vadd.f32 %v2305_v26, %v2216_v20  ;;  %v8693_v30 = vpop.f32.mrb[111].mxu0  ;;  %v2435_v33 = vmax.f32 %v2431_v51, 0.0  ;;  %v2421_v34 = vadd.f32 %v2402_v19, %v2292_v9  ;;  %v8731_v35 = vpop.f32.mrb[99].mxu1 }
 0x572   :  { %2439 = vst [vmem:[#allocation3] sm:$0xff] %v2435_v33  ;;  %v2432_v56 = vadd.f32 %v7289_v14, %v2421_v34 }
 0x573   :  { %v2407_v36 = vpop.f32.mrb[100].mxu1 }
 0x574   :  { %v2436_v41 = vmax.f32 %v2432_v56, 0.0  ;;  %v8734_v42 = vpop.f32.mrb[101].mxu1 }
 0x576   :  { %2440 = vst [vmem:[#allocation3 + $0x8] sm:$0xff] %v2436_v41 }
 0x577   :  { %v2411_v24 = vpop.f32.mrb[102].mxu1 }
 0x578   :  { %v2422_v43 = vadd.f32 %v2411_v24, %v2301_v21  ;;  %v8737_v44 = vpop.f32.mrb[103].mxu1 }
 0x57a   :  { %v2433_v32 = vadd.f32 %v7289_v14, %v2422_v43 }
 0x57b   :  { %v2416_v48 = vpop.f32.mrb[104].mxu1 }
 0x57c   :  { %v2437_v49 = vmax.f32 %v2433_v32, 0.0  ;;  %v2423_v50 = vadd.f32 %v2416_v48, %v2306_v29  ;;  %v8740_v52 = vpop.f32.mrb[105].mxu1 }
 0x57d   :  { %v2443_v59 = vld [vmem:[#allocation3] ss:$2 sm:$0xff]  ;;  %v2445_v0 = vld [vmem:[#allocation3 + $0x1] ss:$2 sm:$0xff] }
 0x57e   :  { %2441 = vst [vmem:[#allocation3 + $0x10] sm:$0xff] %v2437_v49  ;;  %v2434_v27 = vadd.f32 %v7289_v14, %v2423_v50  ;;  %v2447_v37 = vmax.f32 %v2443_v59, %v2445_v0 }
 0x580   :  { %v2438_v60 = vmax.f32 %v2434_v27, 0.0  ;;  %8773 = vmatprep.mubr.f32.mxu0 %v2447_v37 }
 0x582   :  { %2442 = vst [vmem:[#allocation3 + $0x18] sm:$0xff] %v2438_v60 }
 0x589   :  { %v2444_v57 = vld [vmem:[#allocation3 + $0x10] ss:$2 sm:$0xff]  ;;  %v2446_v63 = vld [vmem:[#allocation3 + $0x11] ss:$2 sm:$0xff] }
 0x58a   :  { %v2448_v1 = vmax.f32 %v2444_v57, %v2446_v63 }
 0x58c   :  { %8774 = vmatmul.mubr.f32.vlgmr.msra.gmra.mrb[112].mxu0 %v2448_v1 }
 0x58d   :  { %8792 = vmatprep.mubr.msk.f32.mxu0 %vm13117_vm3, %v11787_v2 }
 0x65f   :  { %v8775_v5 = vpop.f32.mrb[112].mxu0 }
 0x660   :  { %v2538_v6 = vpop.f32.mrb[113].mxu0  ;;  %v11803_v7 = vadd.f32 %v8775_v5, %v7290_v4 }
 0x661   :  { %v11791_v28 = vadd.f32 %v7290_v4, %v2538_v6 }
 0x663   :  { %7300 = vmatmul.mubr.msk.f32.vlgmr.msra.gmra.mrb[106].mxu1 %vm13119_vm4, %v11791_v28 }
 0x664   :  { %9393 = vmatpush1.bf16.msra.mxu1 %v11736_v54  ;;  %2778 = vmatprep.mubr.f32.mxu1 %v11787_v2  ;;  %v2547_v54 = vlaneseq }
 0x665   :  { %9395 = vmatprep.subr.bf16.mxu1 %v11738_v55 }
 0x666   :  { %v11810_v55 = vshrl.u32 %v2547_v54, 7 }
 0x668   :  { %9397 = vmatpush1.bf16.msra.mxu1 %v11753_v61  ;;  %v11812_v61 = vand.u32 127, %v2547_v54  ;;  %v2551_v53 = vadd.s32 24, %v11810_v55  ;;  %v2552_v10 = vadd.s32 32, %v11810_v55  ;;  %v2553_v11 = vadd.s32 40, %v11810_v55 }
 0x669   :  { %9399 = vmatprep.subr.bf16.mxu1 %v11756_v62  ;;  %v2549_v62 = vadd.s32 8, %v11810_v55  ;;  %v2554_v58 = vadd.s32 48, %v11810_v55  ;;  %v2555_v9 = vadd.s32 56, %v11810_v55  ;;  %v11874_v39 = vsub.s32 0, %v11810_v55 }
 0x66a   :  { %v2603_v30 = vadd.s32 1, %v11810_v55  ;;  %v2601_v33 = vmul.u32 16, %v11810_v55 }
 0x66b   :  { %v2630_v18 = vrot.slane %v11879_v17, %v11874_v39 }
 0x66c   :  { %9401 = vmatpush1.bf16.msra.mxu1 %v11771_v3  ;;  %v2558_v3 = vmul.u32 16, %v11812_v61  ;;  %v2604_v34 = vmul.u32 16, %v2603_v30  ;;  %v11971_v30 = vsub.s32 1, %v11810_v55 }
 0x66d   :  { %9403 = vmatprep.subr.bf16.mxu1 %v11774_v31  ;;  %v2567_v31 = vadd.s32 1, %v11812_v61 }
 0x66e   :  { %vm2559_vm5 = vcmp.ge.s32.totalorder %v11810_v55, %v2558_v3  ;;  %vm2560_vm6 = vcmp.ge.s32.totalorder %v2549_v62, %v2558_v3  ;;  %vm2562_vm13 = vcmp.ge.s32.totalorder %v2551_v53, %v2558_v3  ;;  %vm2563_vm1 = vcmp.ge.s32.totalorder %v2552_v10, %v2558_v3 }
 0x66f   :  { %v2568_v8 = vmul.u32 16, %v2567_v31 }
 0x670   :  { %9405 = vmatpush1.bf16.msra.mxu1 %v11783_v46  ;;  %v2550_v46 = vadd.s32 16, %v11810_v55 }
 0x671   :  { %9418 = vmatprep.subr.bf16.mxu1 %v10459_v38  ;;  %vm2569_vm7 = vcmp.lt.s32.totalorder %v11810_v55, %v2568_v8  ;;  %vm2570_vm8 = vcmp.lt.s32.totalorder %v2549_v62, %v2568_v8  ;;  %vm2572_vm14 = vcmp.lt.s32.totalorder %v2551_v53, %v2568_v8  ;;  %vm2573_vm2 = vcmp.lt.s32.totalorder %v2552_v10, %v2568_v8  ;;  %v3418_v10 = vld [vmem:[#allocation13] sm:$0xff] }
 0x672   :  { %vm2577_vm9 = vmand %vm2559_vm5, %vm2569_vm7  ;;  %vm2561_vm10 = vcmp.ge.s32.totalorder %v2550_v46, %v2558_v3  ;;  %vm2571_vm11 = vcmp.lt.s32.totalorder %v2550_v46, %v2568_v8  ;;  %vm2574_vm7 = vcmp.lt.s32.totalorder %v2553_v11, %v2568_v8 }
 0x673   :  { %7301 = vmatmul.mubr.msk.f32.vlgmr.msra.gmra.mrb[108].mxu1 %vm13119_vm4, %v11803_v7  ;;  %vm2578_vm12 = vmand %vm2560_vm6, %vm2570_vm8  ;;  %vm2564_vm6 = vcmp.ge.s32.totalorder %v2553_v11, %v2558_v3  ;;  %vm2576_vm4 = vcmp.lt.s32.totalorder %v2555_v9, %v2568_v8  ;;  %v3419_v11 = vld [vmem:[#allocation13 + $0x8] sm:$0xff] }
 0x674   :  { %8811 = vmatprep.mubr.msk.f32.mxu1 %vm13117_vm3, %v11787_v2  ;;  %vm11823_vm15 = vmpackc.low %vm2578_vm12, %vm2577_vm9  ;;  %vm2566_vm3 = vcmp.ge.s32.totalorder %v2555_v9, %v2558_v3  ;;  %v9455_v9 = vpack.c.bf16 %v3419_v11, %v3418_v10  ;;  %v3631_v10 = vld [vmem:[%s13097_s17 + $0x18] sm:$0xff] }
 0x675   :  { %9408 = vmatpush3.bf16.msk.msra.mxu0 %vm11823_vm15, %v10462_v12  ;;  %vm2579_vm0 = vmand %vm2561_vm10, %vm2571_vm11  ;;  %9420 = vmatpush3.bf16.msk.msra.mxu1 %vm11823_vm15, %v10462_v12  ;;  %vm2565_vm10 = vcmp.ge.s32.totalorder %v2554_v58, %v2558_v3  ;;  %vm2575_vm11 = vcmp.lt.s32.totalorder %v2554_v58, %v2568_v8 }
 0x676   :  { %9409 = vmatprep.subr.bf16.mxu0 %v10459_v38  ;;  %vm2580_vm5 = vmand %vm2562_vm13, %vm2572_vm14  ;;  %9421 = vmatprep.subr.bf16.mxu1 %v10459_v38 }
 0x677   :  { %vm11837_vm8 = vmpackc.low %vm2580_vm5, %vm2579_vm0 }
 0x678   :  { %vm2581_vm9 = vmand %vm2563_vm1, %vm2573_vm2 }
 0x679   :  { %9411 = vmatpush3.bf16.msk.msra.mxu0 %vm11837_vm8, %v10462_v12  ;;  %vm2582_vm12 = vmand %vm2564_vm6, %vm2574_vm7  ;;  %9423 = vmatpush3.bf16.msk.msra.mxu1 %vm11837_vm8, %v10462_v12  ;;  %vm2602_vm7 = vcmp.ge.s32.totalorder %v11812_v61, %v2601_v33  ;;  %v2634_v33 = vrot.slane %v11879_v17, %v11971_v30 }
 0x67a   :  { %9412 = vmatprep.subr.bf16.mxu0 %v10459_v38  ;;  %vm11848_vm13 = vmpackc.low %vm2582_vm12, %vm2581_vm9  ;;  %9424 = vmatprep.subr.bf16.mxu1 %v10459_v38  ;;  %vm2605_vm9 = vcmp.lt.s32.totalorder %v11812_v61, %v2604_v34  ;;  %vm3115_vm12 = vcmask 31744  }
 0x67b   :  { %vm2583_vm14 = vmand %vm2565_vm10, %vm2575_vm11  ;;  %vm3119_vm11 = vcmask 1043456  }
 0x67c   :  { %vm2584_vm0 = vmand %vm2566_vm3, %vm2576_vm4  ;;  %vm13151_vm3 = vcmask 523264   ;;  %vm13152_vm4 = vmmov 0  }
 0x67d   :  { %9414 = vmatpush3.bf16.msk.msra.mxu0 %vm11848_vm13, %v10462_v12  ;;  %9426 = vmatpush3.bf16.msk.msra.mxu1 %vm11848_vm13, %v10462_v12  ;;  %vm11860_vm1 = vmpackc.low %vm2584_vm0, %vm2583_vm14 }
 0x67e   :  { %9415 = vmatprep.subr.bf16.mxu0 %v10459_v38  ;;  %9427 = vmatprep.subr.bf16.mxu1 %v10459_v38  ;;  %vm13153_vm2 = vmmov %vm13151_vm3 }
 0x67f   :  { %vm13154_vm5 = vmmov %vm13153_vm2 }
 0x680   :  { %vm13155_vm6 = vmmov %vm13153_vm2 }
 0x681   :  { %9417 = vmatpush3.bf16.msk.msra.mxu0 %vm11860_vm1, %v10462_v12  ;;  %9429 = vmatpush3.bf16.msk.msra.mxu1 %vm11860_vm1, %v10462_v12  ;;  %vm2606_vm10 = vmand %vm2602_vm7, %vm2605_vm9 }
 0x682   :  { %9430 = vmatprep.subr.bf16.mxu0 %v10459_v38  ;;  %9442 = vmatprep.subr.bf16.mxu1 %v10459_v38  ;;  %v11938_v35 = vsel %vm2606_vm10, 1.0, %v11787_v2  ;;  %vm13156_vm14 = vmmov %vm13153_vm2 }
 0x683   :  { %vm13157_vm0 = vmmov %vm13153_vm2 }
 0x684   :  { %vm13163_vm7 = vmmov %vm13157_vm0 }
 0x685   :  { %vm13164_vm9 = vmmov %vm13157_vm0 }
 0x686   :  { %vm13166_vm10 = vmmov %vm13157_vm0 }
 0x736   :  { %v2706_v20 = vpop.f32.mrb[106].mxu1 }
 0x737   :  { %v2707_v21 = vadd.f32 %v2706_v20, %v2630_v18  ;;  %v11883_v45 = vpop.f32.mrb[107].mxu1 }
 0x738   :  { %v2709_v34 = vadd.f32 %v11883_v45, %v2634_v33 }
 0x739   :  { %2786 = vrot.lane.b32.xlu0 %v2707_v21, %s10463_s9 }
 0x746   :  { %v2780_v40 = vpop.f32.mrb[108].mxu1 }
 0x747   :  { %v2781_v22 = vadd.f32 %v2780_v40, %v2630_v18  ;;  %v11886_v14 = vpop.f32.mrb[109].mxu1  ;;  %v3421_v40 = vld [vmem:[#allocation13 + $0x18] sm:$0xff] }
 0x749   :  { %2865 = vrot.lane.b32.xlu0 %v2781_v22, %s10463_s9 }
 0x7ab   :  { %v2787_v23 = vpop.permute.xlu0 %2786 }
 0x7ac   :  { %v2789_v25 = vmul.f32 %v2787_v23, %v2707_v21  ;;  %v2943_v26 = vmul.f32 %v2787_v23, %v2781_v22  ;;  %v3422_v23 = vld [vmem:[#allocation13 + $0x20] sm:$0xff] }
 0x7ae   :  { %8793 = vmatmul.mubr.msk.f32.vlgmr.msra.gmra.mrb[114].mxu0 %vm13151_vm3, %v2789_v25  ;;  %v3423_v25 = vld [vmem:[#allocation13 + $0x28] sm:$0xff]  ;;  %vm13158_vm3 = vmmov %vm13157_vm0 }
 0x7af   :  { %9432 = vmatpush3.bf16.msk.msra.mxu0 %vm11823_vm15, %v10462_v12  ;;  %8830 = vmatprep.mubr.msk.f32.mxu0 %vm13152_vm4, %v11787_v2 }
 0x7b0   :  { %9433 = vmatprep.subr.bf16.mxu0 %v10459_v38 }
 0x7b3   :  { %9435 = vmatpush3.bf16.msk.msra.mxu0 %vm11837_vm8, %v10462_v12 }
 0x7b4   :  { %9436 = vmatprep.subr.bf16.mxu0 %v10459_v38 }
 0x7b7   :  { %9438 = vmatpush3.bf16.msk.msra.mxu0 %vm11848_vm13, %v10462_v12 }
 0x7b8   :  { %9439 = vmatprep.subr.bf16.mxu0 %v10459_v38 }
 0x7bb   :  { %9441 = vmatpush3.bf16.msk.msra.mxu0 %vm11860_vm1, %v10462_v12  ;;  %v2866_v51 = vpop.permute.xlu0 %2865 }
 0x7bc   :  { %v2868_v19 = vmul.f32 %v2866_v51, %v2707_v21  ;;  %8852 = vmatprep.subr.mxu0 %v11787_v2  ;;  %v3018_v29 = vmul.f32 %v2866_v51, %v2781_v22  ;;  %v3420_v21 = vld [vmem:[#allocation13 + $0x10] sm:$0xff]  ;;  %v9461_v51 = vpack.c.bf16 %v3423_v25, %v3422_v23 }
 0x7bd   :  { %v9458_v22 = vpack.c.bf16 %v3421_v40, %v3420_v21  ;;  %v3635_v21 = vld [vmem:[%s13097_s17 + $0x38] sm:$0xff]  ;;  %v3634_v23 = vld [vmem:[%s13097_s17 + $0x30] sm:$0xff] }
 0x7be   :  { %8812 = vmatmul.mubr.msk.f32.vlgmr.msra.gmra.mrb[110].mxu1 %vm13153_vm2, %v2868_v19  ;;  %8831 = vmatmul.mubr.msk.f32.vlgmr.msra.gmra.mrb[116].mxu0 %vm13154_vm5, %v2943_v26  ;;  %v3424_v26 = vld [vmem:[#allocation13 + $0x30] sm:$0xff]  ;;  %v3425_v19 = vld [vmem:[#allocation13 + $0x38] sm:$0xff]  ;;  %vm13159_vm2 = vmmov %vm13157_vm0 }
 0x7bf   :  { %9444 = vmatpush3.bf16.msk.msra.mxu1 %vm11823_vm15, %v10462_v12  ;;  %8849 = vmatprep.mubr.msk.f32.mxu1 %vm13152_vm4, %v11787_v2  ;;  %vm13160_vm5 = vmmov %vm13157_vm0 }
 0x7c0   :  { %9445 = vmatprep.subr.bf16.mxu1 %v10459_v38  ;;  %8854 = vmatprep.mubr.msk.f32.mxu0 %vm13152_vm4, %v11787_v2 }
 0x7c1   :  { %8853 = vmatpush3.msk.msra.mxu0 %vm3119_vm11, %v11938_v35 }
 0x7c2   :  { %8857 = vmatprep.subr.mxu0 %v11787_v2 }
 0x7c3   :  { %9447 = vmatpush3.bf16.msk.msra.mxu1 %vm11837_vm8, %v10462_v12 }
 0x7c4   :  { %9448 = vmatprep.subr.bf16.mxu1 %v10459_v38 }
 0x7c7   :  { %9450 = vmatpush3.bf16.msk.msra.mxu1 %vm11848_vm13, %v10462_v12 }
 0x7c8   :  { %9451 = vmatprep.subr.bf16.mxu1 %v10459_v38 }
 0x7cb   :  { %9453 = vmatpush3.bf16.msk.msra.mxu1 %vm11860_vm1, %v10462_v12 }
 0x7cc   :  { %8867 = vmatprep.subr.mxu1 %v11787_v2 }
 0x7ce   :  { %8850 = vmatmul.mubr.msk.f32.vlgmr.msra.gmra.mrb[112].mxu1 %vm13155_vm6, %v3018_v29  ;;  %v9464_v29 = vpack.c.bf16 %v3425_v19, %v3424_v26  ;;  %vm13161_vm6 = vmmov %vm13157_vm0  ;;  %v3639_v26 = vld [vmem:[%s13097_s17 + $0x58] sm:$0xff] }
 0x7cf   :  { %8869 = vmatprep.mubr.msk.f32.mxu1 %vm13152_vm4, %v11787_v2  ;;  %8868 = vmatpush3.msk.msra.mxu1 %vm3119_vm11, %v11938_v35 }
 0x7d0   :  { %9466 = vmatprep.subr.bf16.mxu1 %v10459_v38 }
 0x881   :  { %v2859_v56 = vpop.f32.mrb[114].mxu0 }
 0x882   :  { %v8794_v36 = vpop.f32.mrb[115].mxu0  ;;  %v2863_v24 = vmul.f32 0.25, %v2859_v56 }
 0x891   :  { %v2938_v41 = vpop.f32.mrb[110].mxu1  ;;  %v3013_v42 = vpop.f32.mrb[116].mxu0 }
 0x892   :  { %v2942_v43 = vmul.f32 0.25, %v2938_v41  ;;  %v8813_v44 = vpop.f32.mrb[111].mxu1  ;;  %v8832_v32 = vpop.f32.mrb[117].mxu0  ;;  %v3017_v27 = vmul.f32 0.25, %v3013_v42  ;;  %v2783_v42 = vadd.f32 %v11886_v14, %v2634_v33  ;;  %v3638_v33 = vld [vmem:[%s13097_s17 + $0x50] sm:$0xff] }
 0x894   :  { %v3093_v48 = vmax.f32 %v2863_v24, %v2942_v43 }
 0x896   :  { %v3094_v49 = vsub.f32 %v2863_v24, %v3093_v48  ;;  %v3097_v50 = vsub.f32 %v2942_v43, %v3093_v48 }
 0x898   :  { %v3095_v52 = vmul.f32 1.442695, %v3094_v49  ;;  %v3098_v59 = vmul.f32 1.442695, %v3097_v50 }
 0x89a   :  { %10022 = vpow2.f32 %v3095_v52 }
 0x89b   :  { %10024 = vpow2.f32 %v3098_v59 }
 0x8a1   :  { %v3088_v0 = vpop.f32.mrb[112].mxu1 }
 0x8a2   :  { %v3092_v37 = vmul.f32 0.25, %v3088_v0  ;;  %v8851_v60 = vpop.f32.mrb[113].mxu1  ;;  %v7347_v0 = vld [vmem:[#allocation15] ss:$0 sm:$0xff] }
 0x8a4   :  { %v10023_v57 = vpop.eup %10022  ;;  %v3104_v63 = vmax.f32 %v3017_v27, %v3092_v37 }
 0x8a5   :  { %v10025_v1 = vpop.eup %10024 }
 0x8a6   :  { %v3100_v4 = vadd.f32 %v10025_v1, %v10023_v57  ;;  %v3105_v5 = vsub.f32 %v3017_v27, %v3104_v63  ;;  %v3108_v6 = vsub.f32 %v3092_v37, %v3104_v63 }
 0x8a8   :  { %10026 = vrcp.f32 %v3100_v4  ;;  %v3106_v54 = vmul.f32 1.442695, %v3105_v5  ;;  %v3109_v61 = vmul.f32 1.442695, %v3108_v6 }
 0x8aa   :  { %10028 = vpow2.f32 %v3106_v54 }
 0x8ab   :  { %10030 = vpow2.f32 %v3109_v61 }
 0x8b2   :  { %v10027_v62 = vpop.eup %10026 }
 0x8b3   :  { %v3102_v3 = vmul.f32 %v10027_v62, %v10023_v57  ;;  %v3103_v31 = vmul.f32 %v10027_v62, %v10025_v1 }
 0x8b4   :  { %v10029_v46 = vpop.eup %10028 }
 0x8b5   :  { %v10031_v8 = vpop.eup %10030  ;;  %8855 = vmatmul.mubr.msk.f32.vlgmr.msra.gmra.mrb[118].mxu0 %vm3115_vm12, %v3102_v3 }
 0x8b6   :  { %v3111_v53 = vadd.f32 %v10031_v8, %v10029_v46  ;;  %8858 = vmatpush3.msk.msra.mxu0 %vm3119_vm11, %v11938_v35  ;;  %8859 = vmatprep.mubr.msk.f32.mxu0 %vm13152_vm4, %v11787_v2 }
 0x8b7   :  { %8862 = vmatprep.subr.mxu0 %v11787_v2 }
 0x8b8   :  { %10032 = vrcp.f32 %v3111_v53  ;;  %v3629_v53 = vld [vmem:[%s13097_s17 + $0x8] sm:$0xff] }
 0x8b9   :  { %8860 = vmatmul.mubr.msk.f32.vlgmr.msra.gmra.mrb[120].mxu0 %vm3115_vm12, %v3103_v31  ;;  %v9478_v11 = vpack.c.bf16 %v3631_v10, %v3629_v53  ;;  %v3654_v53 = vld [vmem:[%s13162_s10 + $0x48] sm:$0xff]  ;;  %v3671_v10 = vld [vmem:[%s13162_s10 + $0xd0] sm:$0xff] }
 0x8ba   :  { %8863 = vmatpush3.msk.msra.mxu0 %vm3119_vm11, %v11938_v35  ;;  %8864 = vmatprep.mubr.msk.f32.mxu0 %vm13152_vm4, %v11787_v2 }
 0x8bb   :  { %9454 = vmatprep.subr.bf16.mxu0 %v10459_v38 }
 0x8c2   :  { %v10033_v58 = vpop.eup %10032 }
 0x8c3   :  { %v3113_v18 = vmul.f32 %v10033_v58, %v10029_v46  ;;  %v3114_v20 = vmul.f32 %v10033_v58, %v10031_v8  ;;  %v3628_v58 = vld [vmem:[%s13097_s17] sm:$0xff] }
 0x8c5   :  { %8865 = vmatmul.mubr.msk.f32.vlgmr.msra.gmra.mrb[122].mxu0 %vm3115_vm12, %v3113_v18  ;;  %8870 = vmatmul.mubr.msk.f32.vlgmr.msra.gmra.mrb[114].mxu1 %vm3115_vm12, %v3114_v20  ;;  %v3633_v20 = vld [vmem:[%s13097_s17 + $0x28] sm:$0xff] }
 0x8c6   :  { %9456 = vmatpush3.bf16.msra.mxu0 %v9455_v9  ;;  %9468 = vmatpush3.bf16.msra.mxu1 %v9455_v9  ;;  %v3630_v9 = vld [vmem:[%s13097_s17 + $0x10] sm:$0xff]  ;;  %v12015_v40 = vpack.c.bf16 %v3635_v21, %v3633_v20  ;;  %v3656_v21 = vld [vmem:[%s13162_s10 + $0x58] sm:$0xff] }
 0x8c7   :  { %9457 = vmatprep.subr.bf16.mxu0 %v10459_v38  ;;  %8888 = vmatprep.mubr.msk.f32.mxu0 %vm13152_vm4, %v11787_v2  ;;  %v12006_v18 = vpack.c.bf16 %v3630_v9, %v3628_v58  ;;  %v3655_v20 = vld [vmem:[%s13162_s10 + $0x50] sm:$0xff] }
 0x8c8   :  { %9469 = vmatprep.subr.bf16.mxu1 %v10459_v38  ;;  %8907 = vmatprep.mubr.msk.f32.mxu1 %vm13152_vm4, %v11787_v2 }
 0x8ca   :  { %9459 = vmatpush3.bf16.msra.mxu0 %v9458_v22  ;;  %9471 = vmatpush3.bf16.msra.mxu1 %v9458_v22  ;;  %v3632_v22 = vld [vmem:[%s13097_s17 + $0x20] sm:$0xff] }
 0x8cb   :  { %9460 = vmatprep.subr.bf16.mxu0 %v10459_v38  ;;  %9472 = vmatprep.subr.bf16.mxu1 %v10459_v38  ;;  %v12023_v25 = vpack.c.bf16 %v3634_v23, %v3632_v22  ;;  %v3673_v22 = vld [vmem:[%s13162_s10 + $0xe0] sm:$0xff]  ;;  %v3674_v23 = vld [vmem:[%s13162_s10 + $0xe8] sm:$0xff] }
 0x8ce   :  { %9462 = vmatpush3.bf16.msra.mxu0 %v9461_v51  ;;  %9474 = vmatpush3.bf16.msra.mxu1 %v9461_v51  ;;  %v3637_v51 = vld [vmem:[%s13097_s17 + $0x48] sm:$0xff] }
 0x8cf   :  { %9463 = vmatprep.subr.bf16.mxu0 %v10459_v38  ;;  %9475 = vmatprep.subr.bf16.mxu1 %v10459_v38  ;;  %v12033_v19 = vpack.c.bf16 %v3639_v26, %v3637_v51  ;;  %v9516_v51 = vpack.c.bf16 %v3656_v21, %v3655_v20  ;;  %v9518_v26 = vpack.c.bf16 %v3674_v23, %v3673_v22 }
 0x8d2   :  { %9465 = vmatpush3.bf16.msra.mxu0 %v9464_v29  ;;  %9477 = vmatpush3.bf16.msra.mxu1 %v9464_v29  ;;  %v3636_v29 = vld [vmem:[%s13097_s17 + $0x40] sm:$0xff] }
 0x8d3   :  { %9479 = vmatprep.subr.bf16.mxu0 %v9478_v11 }
 0x988   :  { %v3189_v56 = vpop.f32.mrb[118].mxu0 }
 0x989   :  { %v3193_v36 = vmul.f32 %v3189_v56, %v2709_v34  ;;  %v8856_v41 = vpop.f32.mrb[119].mxu0  ;;  %v3641_v56 = vld [vmem:[%s13097_s17 + $0x68] sm:$0xff] }
 0x98c   :  { %v3263_v24 = vpop.f32.mrb[120].mxu0 }
 0x98d   :  { %v3267_v43 = vmul.f32 %v3263_v24, %v2783_v42  ;;  %v8861_v44 = vpop.f32.mrb[121].mxu0  ;;  %v3642_v24 = vld [vmem:[%s13097_s17 + $0x70] sm:$0xff] }
 0x98e   :  { %v3661_v44 = vld [vmem:[%s13162_s10 + $0x80] sm:$0xff] }
 0x98f   :  { %v3268_v32 = vadd.f32 %v3267_v43, %v3193_v36  ;;  %v3643_v36 = vld [vmem:[%s13097_s17 + $0x78] sm:$0xff] }
 0x990   :  { %v12051_v41 = vpack.c.bf16 %v3643_v36, %v3641_v56 }
 0x991   :  { %8889 = vmatmul.mubr.msk.f32.vlgmr.msra.gmra.mrb[124].mxu0 %vm13156_vm14, %v3268_v32  ;;  %v3662_v32 = vld [vmem:[%s13162_s10 + $0x88] sm:$0xff]  ;;  %vm13167_vm14 = vmmov %vm13157_vm0 }
 0x992   :  { %3758 = vmatprep.mubr.f32.mxu0 %v11787_v2  ;;  %9481 = vmatpush1.bf16.msra.mxu0 %v12006_v18 }
 0x993   :  { %9483 = vmatprep.subr.bf16.mxu0 %v12015_v40 }
 0x996   :  { %9485 = vmatpush1.bf16.msra.mxu0 %v12023_v25 }
 0x997   :  { %9487 = vmatprep.subr.bf16.mxu0 %v12033_v19 }
 0x998   :  { %v3338_v55 = vpop.f32.mrb[122].mxu0  ;;  %v3412_v48 = vpop.f32.mrb[114].mxu1 }
 0x999   :  { %v3342_v49 = vmul.f32 %v3338_v55, %v2709_v34  ;;  %v3416_v50 = vmul.f32 %v3412_v48, %v2783_v42  ;;  %v8866_v17 = vpop.f32.mrb[123].mxu0  ;;  %v8871_v52 = vpop.f32.mrb[115].mxu1  ;;  %v12041_v34 = vpack.c.bf16 %v3638_v33, %v3636_v29  ;;  %v3640_v42 = vld [vmem:[%s13097_s17 + $0x60] sm:$0xff]  ;;  %v12072_v48 = vpack.c.bf16 %v3662_v32, %v3661_v44 }
 0x99a   :  { %v12059_v43 = vpack.c.bf16 %v3642_v24, %v3640_v42  ;;  %v3645_v55 = vld [vmem:[%s13162_s10] sm:$0xff]  ;;  %v3664_v17 = vld [vmem:[%s13162_s10 + $0x98] sm:$0xff] }
 0x99b   :  { %v3417_v45 = vadd.f32 %v3416_v50, %v3342_v49  ;;  %9489 = vmatpush1.bf16.msra.mxu0 %v12041_v34  ;;  %v3646_v49 = vld [vmem:[%s13162_s10 + $0x8] sm:$0xff]  ;;  %v3663_v50 = vld [vmem:[%s13162_s10 + $0x90] sm:$0xff]  ;;  %9495 = vmatprep.subr.bf16.mxu1 %v12072_v48  ;;  %v7348_v32 = vld [vmem:[#allocation16] ss:$0 sm:$0xff] }
 0x99c   :  { %9491 = vmatprep.subr.bf16.mxu0 %v12051_v41  ;;  %v12083_v52 = vpack.c.bf16 %v3646_v49, %v3645_v55  ;;  %v7349_v49 = vld [vmem:[#allocation18] ss:$0 sm:$0xff] }
 0x99d   :  { %8908 = vmatmul.mubr.msk.f32.vlgmr.msra.gmra.mrb[116].mxu1 %vm13157_vm0, %v3417_v45  ;;  %v12085_v45 = vpack.c.bf16 %v3664_v17, %v3663_v50 }
 0x99e   :  { %9497 = vmatpush3.bf16.msra.mxu1 %v12083_v52 }
 0x99f   :  { %9493 = vmatpush1.bf16.msra.mxu0 %v12059_v43  ;;  %9499 = vmatprep.subr.bf16.mxu1 %v12085_v45 }
 0x9a0   :  { %9527 = vmatprep.subr.bf16.mxu0 %v9478_v11  ;;  %v3672_v11 = vld [vmem:[%s13162_s10 + $0xd8] sm:$0xff] }
 0x9a1   :  { %v9514_v9 = vpack.c.bf16 %v3672_v11, %v3671_v10 }
 0xa64   :  { %v3498_v59 = vpop.f32.mrb[124].mxu0 }
 0xa65   :  { %v3502_v14 = vadd.f32 %v3498_v59, %v11791_v28  ;;  %v8890_v27 = vpop.f32.mrb[125].mxu0  ;;  %v3647_v59 = vld [vmem:[%s13162_s10 + $0x10] sm:$0xff] }
 0xa66   :  { %v3666_v27 = vld [vmem:[%s13162_s10 + $0xa8] sm:$0xff] }
 0xa67   :  { %v3509_v37 = vadd.f32 %v7347_v0, %v3502_v14  ;;  %v3665_v14 = vld [vmem:[%s13162_s10 + $0xa0] sm:$0xff] }
 0xa69   :  { %v3510_v60 = vsel %vm13158_vm3, %v3509_v37, 0.0  ;;  %vm13168_vm3 = vmmov %vm13157_vm0 }
 0xa6a   :  { %3511 = vadd.xlane.f32.xlu1 %v3510_v60  ;;  %v12104_v60 = vpack.c.bf16 %v3666_v27, %v3665_v14 }
 0xa70   :  { %v3607_v57 = vpop.f32.mrb[116].mxu1 }
 0xa71   :  { %v3611_v63 = vadd.f32 %v3607_v57, %v11803_v7  ;;  %v8909_v1 = vpop.f32.mrb[117].mxu1  ;;  %v3649_v57 = vld [vmem:[%s13162_s10 + $0x20] sm:$0xff] }
 0xa72   :  { %v3667_v1 = vld [vmem:[%s13162_s10 + $0xb0] sm:$0xff] }
 0xa73   :  { %v3612_v4 = vadd.f32 %v7347_v0, %v3611_v63  ;;  %v3648_v0 = vld [vmem:[%s13162_s10 + $0x18] sm:$0xff]  ;;  %v3650_v63 = vld [vmem:[%s13162_s10 + $0x28] sm:$0xff] }
 0xa75   :  { %v3613_v5 = vsel %vm13159_vm2, %v3612_v4, 0.0  ;;  %vm13169_vm2 = vmmov %vm13157_vm0 }
 0xa76   :  { %3614 = vadd.xlane.f32.xlu1 %v3613_v5  ;;  %v9504_v5 = vpack.c.bf16 %v3650_v63, %v3649_v57 }
 0xaf7   :  { %v3512_v6 = vpop.xlane.xlu1 %3511 }
 0xaf8   :  { %v3514_v54 = vmul.f32 0.015625, %v3512_v6 }
 0xafa   :  { %v11984_v61 = vsub.f32 %v3509_v37, %v3514_v54  ;;  %v12101_v37 = vpack.c.bf16 %v3648_v0, %v3647_v59  ;;  %v3651_v54 = vld [vmem:[%s13162_s10 + $0x30] sm:$0xff] }
 0xafc   :  { %v3516_v28 = vmul.f32 %v11984_v61, %v11984_v61  ;;  %9501 = vmatpush3.bf16.msra.mxu1 %v12101_v37 }
 0xafd   :  { %9503 = vmatprep.subr.bf16.mxu1 %v12104_v60 }
 0xafe   :  { %v3517_v62 = vsel %vm13160_vm5, %v3516_v28, 0.0  ;;  %v3652_v28 = vld [vmem:[%s13162_s10 + $0x38] sm:$0xff]  ;;  %vm13170_vm5 = vmmov %vm13157_vm0 }
 0xaff   :  { %3518 = vadd.xlane.f32.xlu0 %v3517_v62  ;;  %v3669_v62 = vld [vmem:[%s13162_s10 + $0xc0] sm:$0xff] }
 0xb00   :  { %9505 = vmatpush3.bf16.msra.mxu1 %v9504_v5 }
 0xb03   :  { %v3615_v3 = vpop.xlane.xlu1 %3614 }
 0xb04   :  { %v3616_v31 = vmul.f32 0.015625, %v3615_v3  ;;  %v3670_v3 = vld [vmem:[%s13162_s10 + $0xc8] sm:$0xff] }
 0xb06   :  { %v11989_v46 = vsub.f32 %v3612_v4, %v3616_v31  ;;  %v3668_v4 = vld [vmem:[%s13162_s10 + $0xb8] sm:$0xff]  ;;  %v9508_v31 = vpack.c.bf16 %v3652_v28, %v3651_v54 }
 0xb07   :  { %v9506_v6 = vpack.c.bf16 %v3668_v4, %v3667_v1 }
 0xb08   :  { %v3618_v7 = vmul.f32 %v11989_v46, %v11989_v46 }
 0xb09   :  { %9507 = vmatprep.subr.bf16.mxu1 %v9506_v6 }
 0xb0a   :  { %v3619_v8 = vsel %vm13161_vm6, %v3618_v7, 0.0  ;;  %v9510_v7 = vpack.c.bf16 %v3670_v3, %v3669_v62  ;;  %9509 = vmatpush3.bf16.msra.mxu1 %v9508_v31  ;;  %vm13171_vm6 = vmmov %vm13157_vm0 }
 0xb0b   :  { %3620 = vadd.xlane.f32.xlu1 %v3619_v8  ;;  %v3653_v8 = vld [vmem:[%s13162_s10 + $0x40] sm:$0xff] }
 0xb0c   :  { %v9512_v58 = vpack.c.bf16 %v3654_v53, %v3653_v8  ;;  %9511 = vmatprep.subr.bf16.mxu1 %v9510_v7 }
 0xb0e   :  { %9513 = vmatpush3.bf16.msra.mxu1 %v9512_v58 }
 0xb0f   :  { %9515 = vmatprep.subr.bf16.mxu1 %v9514_v9 }
 0xb12   :  { %9517 = vmatpush3.bf16.msra.mxu1 %v9516_v51 }
 0xb13   :  { %9519 = vmatprep.subr.bf16.mxu1 %v9518_v26 }
 0xb8c   :  { %v3519_v29 = vpop.xlane.xlu0 %3518 }
 0xb8d   :  { %v3520_v33 = vmul.f32 0.015625, %v3519_v29 }
 0xb8f   :  { %v3521_v56 = vadd.f32 1e-05, %v3520_v33 }
 0xb91   :  { %10034 = vrsqrt.f32 %v3521_v56 }
 0xb98   :  { %v3621_v36 = vpop.xlane.xlu1 %3620 }
 0xb99   :  { %v3622_v42 = vmul.f32 0.015625, %v3621_v36 }
 0xb9b   :  { %v10035_v24 = vpop.eup %10034  ;;  %v3623_v44 = vadd.f32 1e-05, %v3622_v42 }
 0xb9c   :  { %v3523_v55 = vmul.f32 %v10035_v24, %v11984_v61 }
 0xb9d   :  { %10036 = vrsqrt.f32 %v3623_v44 }
 0xb9e   :  { %v3530_v50 = vmul.f32 %v7348_v32, %v3523_v55 }
 0xba0   :  { %v12157_v17 = vadd.f32 %v7349_v49, %v3530_v50  ;;  %v7359_v50 = vld [vmem:[%s13091_s11 + $0x98] sm:$0xff] }
 0xba2   :  { %7351 = vmatmul.mubr.msk.f32.vlgmr.msra.gmra.mrb[126].mxu0 %vm13163_vm7, %v12157_v17  ;;  %vm13172_vm7 = vmmov %vm13157_vm0 }
 0xba3   :  { %9529 = vmatpush1.bf16.msra.mxu0 %v12006_v18  ;;  %3938 = vmatprep.mubr.f32.mxu0 %v11787_v2  ;;  %v3658_v18 = vld [vmem:[%s13162_s10 + $0x68] sm:$0xff] }
 0xba4   :  { %9531 = vmatprep.subr.bf16.mxu0 %v12015_v40 }
 0xba7   :  { %v10037_v59 = vpop.eup %10036  ;;  %9533 = vmatpush1.bf16.msra.mxu0 %v12023_v25  ;;  %v3675_v25 = vld [vmem:[%s13162_s10 + $0xf0] sm:$0xff] }
 0xba8   :  { %v3625_v0 = vmul.f32 %v10037_v59, %v11989_v46  ;;  %9535 = vmatprep.subr.bf16.mxu0 %v12033_v19  ;;  %v3657_v46 = vld [vmem:[%s13162_s10 + $0x60] sm:$0xff]  ;;  %v3676_v19 = vld [vmem:[%s13162_s10 + $0xf8] sm:$0xff] }
 0xba9   :  { %v9520_v40 = vpack.c.bf16 %v3658_v18, %v3657_v46  ;;  %v7356_v59 = vld [vmem:[%s13091_s11 + $0x80] sm:$0xff]  ;;  %v7363_v46 = vld [vmem:[%s13091_s11 + $0xb8] sm:$0xff] }
 0xbaa   :  { %v3626_v61 = vmul.f32 %v7348_v32, %v3625_v0  ;;  %v7358_v0 = vld [vmem:[%s13091_s11 + $0x90] sm:$0xff] }
 0xbab   :  { %9537 = vmatpush1.bf16.msra.mxu0 %v12041_v34  ;;  %9521 = vmatpush3.bf16.msra.mxu1 %v9520_v40  ;;  %v9522_v34 = vpack.c.bf16 %v3676_v19, %v3675_v25  ;;  %v7362_v25 = vld [vmem:[%s13091_s11 + $0xb0] sm:$0xff] }
 0xbac   :  { %9539 = vmatprep.subr.bf16.mxu0 %v12051_v41  ;;  %v12170_v14 = vadd.f32 %v7349_v49, %v3626_v61  ;;  %v3659_v41 = vld [vmem:[%s13162_s10 + $0x70] sm:$0xff]  ;;  %v7357_v49 = vld [vmem:[%s13091_s11 + $0x88] sm:$0xff]  ;;  %v9576_v61 = vpack.c.bf16 %v7358_v0, %v7356_v59 }
 0xbad   :  { %9523 = vmatprep.subr.bf16.mxu1 %v9522_v34 }
 0xbaf   :  { %9541 = vmatpush1.bf16.msra.mxu0 %v12059_v43  ;;  %v3660_v43 = vld [vmem:[%s13162_s10 + $0x78] sm:$0xff] }
 0xbb0   :  { %9543 = vmatprep.subr.bf16.mxu0 %v12072_v48  ;;  %v9524_v48 = vpack.c.bf16 %v3660_v43, %v3659_v41  ;;  %v7367_v41 = vld [vmem:[%s13091_s11 + $0xd8] sm:$0xff] }
 0xbb2   :  { %7355 = vmatmul.mubr.msk.f32.vlgmr.msra.gmra.mrb[128].mxu0 %vm13164_vm9, %v12170_v14  ;;  %9525 = vmatpush3.bf16.msra.mxu1 %v9524_v48  ;;  %vm13173_vm9 = vmmov %vm13157_vm0 }
 0xbb3   :  { %9545 = vmatpush3.bf16.msra.mxu0 %v12083_v52  ;;  %v3644_v52 = vld [vmem:[%s13165_s15] sm:$0x3] }
 0xbb4   :  { %9547 = vmatprep.subr.bf16.mxu0 %v12085_v45  ;;  %v3684_v45 = vrot.slane %v3644_v52, %v11874_v39  ;;  %v3688_v27 = vrot.slane %v3644_v52, %v11971_v30  ;;  %v7366_v52 = vld [vmem:[%s13091_s11 + $0xd0] sm:$0xff] }
 0xbb7   :  { %9549 = vmatpush3.bf16.msra.mxu0 %v12101_v37 }
 0xbb8   :  { %9551 = vmatprep.subr.bf16.mxu0 %v12104_v60 }
 0xbbb   :  { %9553 = vmatpush3.bf16.msra.mxu0 %v9504_v5 }
 0xbbc   :  { %9555 = vmatprep.subr.bf16.mxu0 %v9506_v6 }
 0xbbf   :  { %9557 = vmatpush3.bf16.msra.mxu0 %v9508_v31 }
 0xbc0   :  { %9559 = vmatprep.subr.bf16.mxu0 %v9510_v7  ;;  %v7352_v7 = vld [vmem:[#allocation19] ss:$0 sm:$0xff] }
 0xbc3   :  { %9561 = vmatpush3.bf16.msra.mxu0 %v9512_v58 }
 0xbc4   :  { %9563 = vmatprep.subr.bf16.mxu0 %v9514_v9 }
 0xbc7   :  { %9565 = vmatpush3.bf16.msra.mxu0 %v9516_v51 }
 0xbc8   :  { %9567 = vmatprep.subr.bf16.mxu0 %v9518_v26 }
 0xbcb   :  { %9569 = vmatpush3.bf16.msra.mxu0 %v9520_v40  ;;  %v7360_v40 = vld [vmem:[%s13091_s11 + $0xa0] sm:$0xff] }
 0xbcc   :  { %9571 = vmatprep.subr.bf16.mxu0 %v9522_v34  ;;  %v9580_v19 = vpack.c.bf16 %v7362_v25, %v7360_v40  ;;  %v7365_v34 = vld [vmem:[%s13091_s11 + $0xc8] sm:$0xff] }
 0xbcd   :  { %v9582_v43 = vpack.c.bf16 %v7367_v41, %v7365_v34 }
 0xbcf   :  { %9573 = vmatpush3.bf16.msra.mxu0 %v9524_v48  ;;  %v7364_v48 = vld [vmem:[%s13091_s11 + $0xc0] sm:$0xff] }
 0xbd0   :  { %9606 = vmatprep.subr.bf16.mxu0 %v10459_v38 }
 0xc75   :  { %v3760_v37 = vpop.f32.mrb[126].mxu0 }
 0xc76   :  { %v3761_v60 = vadd.f32 %v3760_v37, %v3684_v45  ;;  %v3762_v57 = vpop.f32.mrb[127].mxu0  ;;  %v7371_v37 = vld [vmem:[%s13091_s11 + $0xf8] sm:$0xff] }
 0xc77   :  { %v3763_v63 = vadd.f32 %v3762_v57, %v3688_v27  ;;  %v7368_v57 = vld [vmem:[%s13091_s11 + $0xe0] sm:$0xff] }
 0xc78   :  { %v3765_v4 = vmax.f32 %v3761_v60, 0.0 }
 0xc79   :  { %v3766_v1 = vmax.f32 %v3763_v63, 0.0  ;;  %v7370_v63 = vld [vmem:[%s13091_s11 + $0xf0] sm:$0xff] }
 0xc7b   :  { %3837 = vmatprep.mubr.f32.mxu1 %v3766_v1  ;;  %v9588_v1 = vpack.c.bf16 %v7370_v63, %v7368_v57 }
 0xc7c   :  { %3838 = vmatmul.mubr.f32.vlgmr.msra.gmra.mrb[118].mxu1 %v3765_v4 }
 0xc7d   :  { %4130 = vmatprep.mubr.f32.mxu1 %v11787_v2 }
 0xc85   :  { %v3940_v5 = vpop.f32.mrb[128].mxu0 }
 0xc86   :  { %v3941_v6 = vadd.f32 %v3940_v5, %v3684_v45  ;;  %v3942_v54 = vpop.f32.mrb[129].mxu0  ;;  %v9584_v45 = vpack.c.bf16 %v7366_v52, %v7364_v48 }
 0xc87   :  { %v3943_v28 = vadd.f32 %v3942_v54, %v3688_v27  ;;  %v7369_v27 = vld [vmem:[%s13091_s11 + $0xe8] sm:$0xff] }
 0xc88   :  { %v3945_v3 = vmax.f32 %v3941_v6, 0.0  ;;  %v9586_v60 = vpack.c.bf16 %v7371_v37, %v7369_v27 }
 0xc89   :  { %v3946_v62 = vmax.f32 %v3943_v28, 0.0  ;;  %v7353_v28 = vld [vmem:[#allocation21] ss:$0 sm:$0xff] }
 0xc8b   :  { %4011 = vmatprep.mubr.f32.mxu0 %v3946_v62 }
 0xc8c   :  { %4012 = vmatmul.mubr.f32.vlgmr.msra.gmra.mrb[130].mxu0 %v3945_v3 }
 0xc8d   :  { %9608 = vmatpush3.bf16.msk.msra.mxu0 %vm11823_vm15, %v10462_v12  ;;  %8926 = vmatprep.mubr.msk.f32.mxu0 %vm13152_vm4, %v11787_v2 }
 0xc8e   :  { %9609 = vmatprep.subr.bf16.mxu0 %v10459_v38 }
 0xc91   :  { %9611 = vmatpush3.bf16.msk.msra.mxu0 %vm11837_vm8, %v10462_v12 }
 0xc92   :  { %9612 = vmatprep.subr.bf16.mxu0 %v10459_v38 }
 0xc95   :  { %9614 = vmatpush3.bf16.msk.msra.mxu0 %vm11848_vm13, %v10462_v12 }
 0xc96   :  { %9615 = vmatprep.subr.bf16.mxu0 %v10459_v38 }
 0xc99   :  { %9617 = vmatpush3.bf16.msk.msra.mxu0 %vm11860_vm1, %v10462_v12 }
 0xc9a   :  { %9630 = vmatprep.subr.bf16.mxu0 %v10459_v38 }
 0xd4f   :  { %v7924_v31 = vpop.f32.mrb[118].mxu1 }
 0xd50   :  { %v7925_v8 = vpop.f32.mrb[119].mxu1 }
 0xd51   :  { %v7926_v53 = vadd.f32 %v7925_v8, %v7924_v31 }
 0xd53   :  { %v3840_v10 = vadd.f32 %v7926_v53, %v7352_v7 }
 0xd55   :  { %v3843_v11 = vadd.f32 %v3840_v10, %v12157_v17  ;;  %v9574_v17 = vpack.c.bf16 %v7359_v50, %v7357_v49 }
 0xd57   :  { %v3844_v58 = vsel %vm13166_vm10, %v3843_v11, 0.0  ;;  %9575 = vmatprep.subr.bf16.mxu1 %v9574_v17  ;;  %vm13174_vm10 = vmmov %vm13157_vm0 }
 0xd58   :  { %3845 = vadd.xlane.f32.xlu1 %v3844_v58  ;;  %9577 = vmatpush1.bf16.msra.mxu1 %v9576_v61 }
 0xd5f   :  { %v7959_v9 = vpop.f32.mrb[130].mxu0 }
 0xd60   :  { %v7960_v20 = vpop.f32.mrb[131].mxu0 }
 0xd61   :  { %v7961_v21 = vadd.f32 %v7960_v20, %v7959_v9 }
 0xd63   :  { %v4014_v22 = vadd.f32 %v7961_v21, %v7352_v7  ;;  %v7354_v7 = vld [vmem:[#allocation22] ss:$0 sm:$0xff]  ;;  %v12309_v21 = vld [vmem:[%s13092_s12 + $0x2] sm:$0x3] }
 0xd65   :  { %v4017_v23 = vadd.f32 %v4014_v22, %v12170_v14  ;;  %v7361_v14 = vld [vmem:[%s13091_s11 + $0xa8] sm:$0xff]  ;;  %v4056_v22 = vrot.slane %v12309_v21, %v11874_v39 }
 0xd66   :  { %v9578_v18 = vpack.c.bf16 %v7363_v46, %v7361_v14 }
 0xd67   :  { %v4018_v51 = vsel %vm13167_vm14, %v4017_v23, 0.0  ;;  %vm13175_vm14 = vmmov %vm13157_vm0 }
 0xd68   :  { %4019 = vadd.xlane.f32.xlu1 %v4018_v51  ;;  %9579 = vmatprep.subr.bf16.mxu1 %v9578_v18 }
 0xd69   :  { %9581 = vmatpush1.bf16.msra.mxu1 %v9580_v19 }
 0xd6a   :  { %9583 = vmatprep.subr.bf16.mxu1 %v9582_v43 }
 0xd6d   :  { %9585 = vmatpush1.bf16.msra.mxu1 %v9584_v45 }
 0xd6e   :  { %9587 = vmatprep.subr.bf16.mxu1 %v9586_v60 }
 0xd71   :  { %9589 = vmatpush1.bf16.msra.mxu1 %v9588_v1 }
 0xd72   :  { %9591 = vmatprep.subr.bf16.mxu1 %v9574_v17 }
 0xde5   :  { %v3846_v26 = vpop.xlane.xlu1 %3845 }
 0xde6   :  { %v3847_v29 = vmul.f32 0.015625, %v3846_v26 }
 0xde8   :  { %v3848_v33 = vsub.f32 %v3843_v11, %v3847_v29 }
 0xdea   :  { %v3849_v56 = vmul.f32 %v3848_v33, %v3848_v33 }
 0xdec   :  { %v3850_v36 = vsel %vm13157_vm0, %v3849_v56, 0.0 }
 0xded   :  { %3851 = vadd.xlane.f32.xlu1 %v3850_v36 }
 0xdf5   :  { %v4020_v42 = vpop.xlane.xlu1 %4019 }
 0xdf6   :  { %v4021_v24 = vmul.f32 0.015625, %v4020_v42 }
 0xdf8   :  { %v4022_v44 = vsub.f32 %v4017_v23, %v4021_v24 }
 0xdfa   :  { %v4023_v32 = vmul.f32 %v4022_v44, %v4022_v44 }
 0xdfc   :  { %v4024_v55 = vsel %vm13168_vm3, %v4023_v32, 0.0  ;;  %vm13176_vm3 = vmmov %vm13157_vm0 }
 0xdfd   :  { %4025 = vadd.xlane.f32.xlu1 %v4024_v55 }
 0xe7a   :  { %v3852_v4 = vpop.xlane.xlu1 %3851 }
 0xe7b   :  { %v3853_v5 = vmul.f32 0.015625, %v3852_v4 }
 0xe7d   :  { %v3854_v6 = vadd.f32 1e-05, %v3853_v5 }
 0xe7f   :  { %10038 = vrsqrt.f32 %v3854_v6 }
 0xe89   :  { %v10039_v54 = vpop.eup %10038 }
 0xe8a   :  { %v3856_v62 = vmul.f32 %v10039_v54, %v3848_v33  ;;  %v4026_v3 = vpop.xlane.xlu1 %4025 }
 0xe8b   :  { %v4027_v31 = vmul.f32 0.015625, %v4026_v3 }
 0xe8c   :  { %v3863_v8 = vmul.f32 %v7353_v28, %v3856_v62 }
 0xe8d   :  { %v4028_v53 = vadd.f32 1e-05, %v4027_v31  ;;  %v4840_v31 = vld [vmem:[#allocation13 + $0x40] sm:$0xff] }
 0xe8e   :  { %v12276_v10 = vadd.f32 %v7354_v7, %v3863_v8 }
 0xe8f   :  { %10040 = vrsqrt.f32 %v4028_v53 }
 0xe90   :  { %7373 = vmatmul.mubr.msk.f32.vlgmr.msra.gmra.mrb[120].mxu1 %vm13169_vm2, %v12276_v10  ;;  %vm13177_vm2 = vmmov %vm13157_vm0 }
 0xe91   :  { %9593 = vmatpush1.bf16.msra.mxu1 %v9576_v61  ;;  %4204 = vmatprep.mubr.f32.mxu1 %v11787_v2  ;;  %v12289_v2 = vld [vmem:[#allocation2] sm:$0xff] }
 0xe92   :  { %9595 = vmatprep.subr.bf16.mxu1 %v9578_v18 }
 0xe95   :  { %9597 = vmatpush1.bf16.msra.mxu1 %v9580_v19 }
 0xe96   :  { %9599 = vmatprep.subr.bf16.mxu1 %v9582_v43 }
 0xe99   :  { %v10041_v11 = vpop.eup %10040  ;;  %9601 = vmatpush1.bf16.msra.mxu1 %v9584_v45 }
 0xe9a   :  { %v4030_v58 = vmul.f32 %v10041_v11, %v4022_v44  ;;  %9603 = vmatprep.subr.bf16.mxu1 %v9586_v60 }
 0xe9c   :  { %v4031_v9 = vmul.f32 %v7353_v28, %v4030_v58 }
 0xe9d   :  { %9605 = vmatpush1.bf16.msra.mxu1 %v9588_v1 }
 0xe9e   :  { %v12281_v20 = vadd.f32 %v7354_v7, %v4031_v9  ;;  %9618 = vmatprep.subr.bf16.mxu1 %v10459_v38  ;;  %v4841_v7 = vld [vmem:[#allocation13 + $0x48] sm:$0xff]  ;;  %v4842_v9 = vld [vmem:[#allocation13 + $0x50] sm:$0xff] }
 0xe9f   :  { %v9655_v53 = vpack.c.bf16 %v4841_v7, %v4840_v31  ;;  %v7427_v31 = vld [vmem:[%s13097_s17 + $0x98] sm:$0xff] }
 0xea0   :  { %7374 = vmatmul.mubr.msk.f32.vlgmr.msra.gmra.mrb[122].mxu1 %vm13170_vm5, %v12281_v20  ;;  %vm13178_vm5 = vmmov %vm13157_vm0 }
 0xea1   :  { %9620 = vmatpush3.bf16.msk.msra.mxu1 %vm11823_vm15, %v10462_v12  ;;  %8945 = vmatprep.mubr.msk.f32.mxu1 %vm13152_vm4, %v12289_v2 }
 0xea2   :  { %9621 = vmatprep.subr.bf16.mxu1 %v10459_v38 }
 0xea5   :  { %9623 = vmatpush3.bf16.msk.msra.mxu1 %vm11837_vm8, %v10462_v12 }
 0xea6   :  { %9624 = vmatprep.subr.bf16.mxu1 %v10459_v38 }
 0xea9   :  { %9626 = vmatpush3.bf16.msk.msra.mxu1 %vm11848_vm13, %v10462_v12 }
 0xeaa   :  { %9627 = vmatprep.subr.bf16.mxu1 %v10459_v38 }
 0xead   :  { %9629 = vmatpush3.bf16.msk.msra.mxu1 %vm11860_vm1, %v10462_v12 }
 0xeae   :  { %9642 = vmatprep.subr.bf16.mxu1 %v10459_v38 }
 0xf63   :  { %v4132_v23 = vpop.f32.mrb[120].mxu1 }
 0xf64   :  { %v4133_v51 = vadd.f32 %v4132_v23, %v4056_v22  ;;  %v12313_v26 = vpop.f32.mrb[121].mxu1 }
 0xf66   :  { %4212 = vrot.lane.b32.xlu1 %v4133_v51, %s10463_s9 }
 0xf73   :  { %v4206_v29 = vpop.f32.mrb[122].mxu1 }
 0xf74   :  { %v4207_v33 = vadd.f32 %v4206_v29, %v4056_v22  ;;  %v12316_v56 = vpop.f32.mrb[123].mxu1  ;;  %v4843_v22 = vld [vmem:[#allocation13 + $0x58] sm:$0xff]  ;;  %v4845_v29 = vld [vmem:[#allocation13 + $0x68] sm:$0xff] }
 0xf75   :  { %v9658_v23 = vpack.c.bf16 %v4843_v22, %v4842_v9  ;;  %v7431_v9 = vld [vmem:[%s13097_s17 + $0xb8] sm:$0xff] }
 0xf76   :  { %4291 = vrot.lane.b32.xlu0 %v4207_v33, %s10463_s9 }
 0xfd8   :  { %v4213_v36 = vpop.permute.xlu1 %4212 }
 0xfd9   :  { %v4215_v42 = vmul.f32 %v4213_v36, %v4133_v51  ;;  %v4369_v44 = vmul.f32 %v4213_v36, %v4207_v33  ;;  %v4846_v36 = vld [vmem:[#allocation13 + $0x70] sm:$0xff] }
 0xfdb   :  { %8927 = vmatmul.mubr.msk.f32.vlgmr.msra.gmra.mrb[132].mxu0 %vm13171_vm6, %v4215_v42  ;;  %v4847_v42 = vld [vmem:[#allocation13 + $0x78] sm:$0xff]  ;;  %vm13179_vm6 = vmmov %vm13157_vm0 }
 0xfdc   :  { %9632 = vmatpush3.bf16.msk.msra.mxu0 %vm11823_vm15, %v10462_v12  ;;  %8964 = vmatprep.mubr.msk.f32.mxu0 %vm13152_vm4, %v12289_v2 }
 0xfdd   :  { %9633 = vmatprep.subr.bf16.mxu0 %v10459_v38 }
 0xfe0   :  { %9635 = vmatpush3.bf16.msk.msra.mxu0 %vm11837_vm8, %v10462_v12 }
 0xfe1   :  { %9636 = vmatprep.subr.bf16.mxu0 %v10459_v38 }
 0xfe4   :  { %9638 = vmatpush3.bf16.msk.msra.mxu0 %vm11848_vm13, %v10462_v12 }
 0xfe5   :  { %9639 = vmatprep.subr.bf16.mxu0 %v10459_v38 }
 0xfe8   :  { %v4292_v24 = vpop.permute.xlu0 %4291  ;;  %9641 = vmatpush3.bf16.msk.msra.mxu0 %vm11860_vm1, %v10462_v12 }
 0xfe9   :  { %v4294_v32 = vmul.f32 %v4292_v24, %v4133_v51  ;;  %8986 = vmatprep.subr.mxu0 %v12289_v2  ;;  %v4444_v55 = vmul.f32 %v4292_v24, %v4207_v33  ;;  %v4844_v51 = vld [vmem:[#allocation13 + $0x60] sm:$0xff]  ;;  %v9664_v24 = vpack.c.bf16 %v4847_v42, %v4846_v36  ;;  %v7435_v36 = vld [vmem:[%s13097_s17 + $0xd8] sm:$0xff] }
 0xfea   :  { %v9661_v33 = vpack.c.bf16 %v4845_v29, %v4844_v51  ;;  %v7430_v51 = vld [vmem:[%s13097_s17 + $0xb0] sm:$0xff] }
 0xfeb   :  { %8946 = vmatmul.mubr.msk.f32.vlgmr.msra.gmra.mrb[124].mxu1 %vm13172_vm7, %v4294_v32  ;;  %8965 = vmatmul.mubr.msk.f32.vlgmr.msra.gmra.mrb[134].mxu0 %vm13173_vm9, %v4369_v44  ;;  %v4060_v44 = vrot.slane %v12309_v21, %v11971_v30  ;;  %vm13180_vm7 = vmmov %vm13157_vm0 }
 0xfec   :  { %9644 = vmatpush3.bf16.msk.msra.mxu1 %vm11823_vm15, %v10462_v12  ;;  %8983 = vmatprep.mubr.msk.f32.mxu1 %vm13152_vm4, %v12289_v2  ;;  %vm13181_vm9 = vmmov %vm13157_vm0 }
 0xfed   :  { %9645 = vmatprep.subr.bf16.mxu1 %v10459_v38  ;;  %8987 = vmatpush3.msk.msra.mxu0 %vm3119_vm11, %v11938_v35  ;;  %v4135_v32 = vadd.f32 %v12313_v26, %v4060_v44 }
 0xfee   :  { %8988 = vmatprep.mubr.msk.f32.mxu0 %vm13152_vm4, %v12289_v2  ;;  %8996 = vmatprep.subr.mxu0 %v12289_v2 }
 0xff0   :  { %9647 = vmatpush3.bf16.msk.msra.mxu1 %vm11837_vm8, %v10462_v12 }
 0xff1   :  { %9648 = vmatprep.subr.bf16.mxu1 %v10459_v38 }
 0xff4   :  { %9650 = vmatpush3.bf16.msk.msra.mxu1 %vm11848_vm13, %v10462_v12 }
 0xff5   :  { %9651 = vmatprep.subr.bf16.mxu1 %v10459_v38 }
 0xff8   :  { %9653 = vmatpush3.bf16.msk.msra.mxu1 %vm11860_vm1, %v10462_v12 }
 0xff9   :  { %8991 = vmatprep.subr.mxu1 %v12289_v2 }
 0xffb   :  { %8984 = vmatmul.mubr.msk.f32.vlgmr.msra.gmra.mrb[126].mxu1 %vm13174_vm10, %v4444_v55  ;;  %v4209_v55 = vadd.f32 %v12316_v56, %v4060_v44  ;;  %v7434_v44 = vld [vmem:[%s13097_s17 + $0xd0] sm:$0xff]  ;;  %vm13182_vm10 = vmmov %vm13157_vm0 }
 0xffc   :  { %8992 = vmatpush3.msk.msra.mxu1 %vm3119_vm11, %v11938_v35  ;;  %8993 = vmatprep.mubr.msk.f32.mxu1 %vm13152_vm4, %v12289_v2 }
 0xffd   :  { %9001 = vmatprep.subr.mxu1 %v12289_v2 }
0x10ae   :  { %v4285_v49 = vpop.f32.mrb[132].mxu0 }
0x10af   :  { %v8928_v50 = vpop.f32.mrb[133].mxu0  ;;  %v4289_v0 = vmul.f32 0.25, %v4285_v49 }
0x10be   :  { %v4364_v17 = vpop.f32.mrb[124].mxu1  ;;  %v4439_v59 = vpop.f32.mrb[134].mxu0 }
0x10bf   :  { %v4368_v61 = vmul.f32 0.25, %v4364_v17  ;;  %v8947_v14 = vpop.f32.mrb[125].mxu1  ;;  %v8966_v46 = vpop.f32.mrb[135].mxu0  ;;  %v4443_v43 = vmul.f32 0.25, %v4439_v59 }
0x10c1   :  { %v4519_v18 = vmax.f32 %v4289_v0, %v4368_v61 }
0x10c3   :  { %v4520_v40 = vsub.f32 %v4289_v0, %v4519_v18  ;;  %v4523_v25 = vsub.f32 %v4368_v61, %v4519_v18 }
0x10c5   :  { %v4521_v19 = vmul.f32 1.442695, %v4520_v40  ;;  %v4524_v34 = vmul.f32 1.442695, %v4523_v25 }
0x10c7   :  { %10042 = vpow2.f32 %v4521_v19 }
0x10c8   :  { %10044 = vpow2.f32 %v4524_v34  ;;  %v7420_v34 = vld [vmem:[#allocation15 + $0x1] ss:$0 sm:$0xff] }
0x10ce   :  { %v4514_v41 = vpop.f32.mrb[126].mxu1 }
0x10cf   :  { %v4518_v48 = vmul.f32 0.25, %v4514_v41  ;;  %v8985_v52 = vpop.f32.mrb[127].mxu1 }
0x10d1   :  { %v10043_v45 = vpop.eup %10042  ;;  %v4530_v27 = vmax.f32 %v4443_v43, %v4518_v48 }
0x10d2   :  { %v10045_v37 = vpop.eup %10044 }
0x10d3   :  { %v4526_v60 = vadd.f32 %v10045_v37, %v10043_v45  ;;  %v4531_v57 = vsub.f32 %v4443_v43, %v4530_v27  ;;  %v4534_v63 = vsub.f32 %v4518_v48, %v4530_v27 }
0x10d5   :  { %10046 = vrcp.f32 %v4526_v60  ;;  %v4532_v1 = vmul.f32 1.442695, %v4531_v57  ;;  %v4535_v4 = vmul.f32 1.442695, %v4534_v63 }
0x10d7   :  { %10048 = vpow2.f32 %v4532_v1 }
0x10d8   :  { %10050 = vpow2.f32 %v4535_v4 }
0x10df   :  { %v10047_v5 = vpop.eup %10046 }
0x10e0   :  { %v4528_v6 = vmul.f32 %v10047_v5, %v10043_v45  ;;  %v4529_v54 = vmul.f32 %v10047_v5, %v10045_v37 }
0x10e1   :  { %v10049_v28 = vpop.eup %10048 }
0x10e2   :  { %v10051_v62 = vpop.eup %10050  ;;  %8989 = vmatmul.mubr.msk.f32.vlgmr.msra.gmra.mrb[136].mxu0 %vm3115_vm12, %v4528_v6  ;;  %8994 = vmatmul.mubr.msk.f32.vlgmr.msra.gmra.mrb[128].mxu1 %vm3115_vm12, %v4529_v54 }
0x10e3   :  { %v4537_v3 = vadd.f32 %v10051_v62, %v10049_v28  ;;  %8997 = vmatpush3.msk.msra.mxu0 %vm3119_vm11, %v11938_v35  ;;  %9002 = vmatpush3.msk.msra.mxu1 %vm3119_vm11, %v11938_v35 }
0x10e4   :  { %8998 = vmatprep.mubr.msk.f32.mxu0 %vm13152_vm4, %v12289_v2  ;;  %9003 = vmatprep.mubr.msk.f32.mxu1 %vm13152_vm4, %v12289_v2 }
0x10e5   :  { %10052 = vrcp.f32 %v4537_v3  ;;  %9654 = vmatprep.subr.bf16.mxu0 %v10459_v38  ;;  %9666 = vmatprep.subr.bf16.mxu1 %v10459_v38  ;;  %v7425_v3 = vld [vmem:[%s13097_s17 + $0x88] sm:$0xff] }
0x10e6   :  { %v9678_v7 = vpack.c.bf16 %v7427_v31, %v7425_v3  ;;  %v7450_v3 = vld [vmem:[%s13162_s10 + $0x148] sm:$0xff]  ;;  %v7467_v31 = vld [vmem:[%s13162_s10 + $0x1d0] sm:$0xff] }
0x10ef   :  { %v10053_v8 = vpop.eup %10052 }
0x10f0   :  { %v4539_v11 = vmul.f32 %v10053_v8, %v10049_v28  ;;  %v4540_v58 = vmul.f32 %v10053_v8, %v10051_v62  ;;  %v7424_v8 = vld [vmem:[%s13097_s17 + $0x80] sm:$0xff] }
0x10f2   :  { %8999 = vmatmul.mubr.msk.f32.vlgmr.msra.gmra.mrb[138].mxu0 %vm3115_vm12, %v4539_v11  ;;  %9004 = vmatmul.mubr.msk.f32.vlgmr.msra.gmra.mrb[130].mxu1 %vm3115_vm12, %v4540_v58  ;;  %v7429_v58 = vld [vmem:[%s13097_s17 + $0xa8] sm:$0xff] }
0x10f3   :  { %9656 = vmatpush3.bf16.msra.mxu0 %v9655_v53  ;;  %9022 = vmatprep.mubr.msk.f32.mxu0 %vm13152_vm4, %v12289_v2  ;;  %v12435_v22 = vpack.c.bf16 %v7431_v9, %v7429_v58  ;;  %v7451_v58 = vld [vmem:[%s13162_s10 + $0x150] sm:$0xff]  ;;  %v7452_v9 = vld [vmem:[%s13162_s10 + $0x158] sm:$0xff] }
0x10f4   :  { %9657 = vmatprep.subr.bf16.mxu0 %v10459_v38  ;;  %9668 = vmatpush3.bf16.msra.mxu1 %v9655_v53  ;;  %v7426_v53 = vld [vmem:[%s13097_s17 + $0x90] sm:$0xff] }
0x10f5   :  { %9669 = vmatprep.subr.bf16.mxu1 %v10459_v38  ;;  %9041 = vmatprep.mubr.msk.f32.mxu1 %vm13152_vm4, %v12289_v2  ;;  %v12426_v11 = vpack.c.bf16 %v7426_v53, %v7424_v8 }
0x10f7   :  { %9659 = vmatpush3.bf16.msra.mxu0 %v9658_v23 }
0x10f8   :  { %9660 = vmatprep.subr.bf16.mxu0 %v10459_v38  ;;  %9671 = vmatpush3.bf16.msra.mxu1 %v9658_v23  ;;  %v7428_v23 = vld [vmem:[%s13097_s17 + $0xa0] sm:$0xff] }
0x10f9   :  { %9672 = vmatprep.subr.bf16.mxu1 %v10459_v38  ;;  %v12443_v29 = vpack.c.bf16 %v7430_v51, %v7428_v23  ;;  %v7469_v23 = vld [vmem:[%s13162_s10 + $0x1e0] sm:$0xff]  ;;  %v7470_v51 = vld [vmem:[%s13162_s10 + $0x1e8] sm:$0xff] }
0x10fb   :  { %9662 = vmatpush3.bf16.msra.mxu0 %v9661_v33 }
0x10fc   :  { %9663 = vmatprep.subr.bf16.mxu0 %v10459_v38  ;;  %9674 = vmatpush3.bf16.msra.mxu1 %v9661_v33  ;;  %v7433_v33 = vld [vmem:[%s13097_s17 + $0xc8] sm:$0xff] }
0x10fd   :  { %9675 = vmatprep.subr.bf16.mxu1 %v10459_v38  ;;  %v12453_v42 = vpack.c.bf16 %v7435_v36, %v7433_v33  ;;  %v9716_v33 = vpack.c.bf16 %v7452_v9, %v7451_v58  ;;  %v9718_v36 = vpack.c.bf16 %v7470_v51, %v7469_v23 }
0x10ff   :  { %9665 = vmatpush3.bf16.msra.mxu0 %v9664_v24 }
0x1100   :  { %9677 = vmatpush3.bf16.msra.mxu1 %v9664_v24  ;;  %9679 = vmatprep.subr.bf16.mxu0 %v9678_v7  ;;  %v7432_v24 = vld [vmem:[%s13097_s17 + $0xc0] sm:$0xff] }
0x11b5   :  { %v4610_v49 = vpop.f32.mrb[136].mxu0  ;;  %v4684_v50 = vpop.f32.mrb[128].mxu1 }
0x11b6   :  { %v4614_v17 = vmul.f32 %v4610_v49, %v4135_v32  ;;  %v4688_v59 = vmul.f32 %v4684_v50, %v4209_v55  ;;  %v8990_v0 = vpop.f32.mrb[137].mxu0  ;;  %v8995_v61 = vpop.f32.mrb[129].mxu1  ;;  %v7439_v49 = vld [vmem:[%s13097_s17 + $0xf8] sm:$0xff] }
0x11b7   :  { %v7457_v61 = vld [vmem:[%s13162_s10 + $0x180] sm:$0xff] }
0x11b8   :  { %v4689_v14 = vadd.f32 %v4688_v59, %v4614_v17  ;;  %v7436_v17 = vld [vmem:[%s13097_s17 + $0xe0] sm:$0xff]  ;;  %v7438_v59 = vld [vmem:[%s13097_s17 + $0xf0] sm:$0xff] }
0x11b9   :  { %v12479_v0 = vpack.c.bf16 %v7438_v59, %v7436_v17  ;;  %v7421_v17 = vld [vmem:[#allocation16 + $0x1] ss:$0 sm:$0xff] }
0x11ba   :  { %9023 = vmatmul.mubr.msk.f32.vlgmr.msra.gmra.mrb[140].mxu0 %vm13175_vm14, %v4689_v14  ;;  %v7458_v14 = vld [vmem:[%s13162_s10 + $0x188] sm:$0xff]  ;;  %vm13183_vm14 = vmmov %vm13157_vm0 }
0x11bb   :  { %5188 = vmatprep.mubr.f32.mxu0 %v12289_v2  ;;  %9681 = vmatpush1.bf16.msra.mxu0 %v12426_v11 }
0x11bc   :  { %9683 = vmatprep.subr.bf16.mxu0 %v12435_v22 }
0x11bf   :  { %9685 = vmatpush1.bf16.msra.mxu0 %v12443_v29 }
0x11c0   :  { %9687 = vmatprep.subr.bf16.mxu0 %v12453_v42 }
0x11c5   :  { %v4759_v46 = vpop.f32.mrb[138].mxu0  ;;  %v4833_v18 = vpop.f32.mrb[130].mxu1 }
0x11c6   :  { %v4763_v40 = vmul.f32 %v4759_v46, %v4135_v32  ;;  %v4837_v25 = vmul.f32 %v4833_v18, %v4209_v55  ;;  %v9000_v21 = vpop.f32.mrb[139].mxu0  ;;  %v9005_v19 = vpop.f32.mrb[131].mxu1  ;;  %v12461_v32 = vpack.c.bf16 %v7434_v44, %v7432_v24  ;;  %v7437_v55 = vld [vmem:[%s13097_s17 + $0xe8] sm:$0xff]  ;;  %v7441_v46 = vld [vmem:[%s13162_s10 + $0x100] sm:$0xff]  ;;  %v12492_v18 = vpack.c.bf16 %v7458_v14, %v7457_v61 }
0x11c7   :  { %v12471_v50 = vpack.c.bf16 %v7439_v49, %v7437_v55  ;;  %v7460_v21 = vld [vmem:[%s13162_s10 + $0x198] sm:$0xff] }
0x11c8   :  { %v4838_v26 = vadd.f32 %v4837_v25, %v4763_v40  ;;  %9689 = vmatpush1.bf16.msra.mxu0 %v12461_v32  ;;  %v7442_v40 = vld [vmem:[%s13162_s10 + $0x108] sm:$0xff]  ;;  %v7459_v25 = vld [vmem:[%s13162_s10 + $0x190] sm:$0xff]  ;;  %9695 = vmatprep.subr.bf16.mxu1 %v12492_v18 }
0x11c9   :  { %9691 = vmatprep.subr.bf16.mxu0 %v12471_v50  ;;  %v12503_v19 = vpack.c.bf16 %v7442_v40, %v7441_v46  ;;  %v7422_v46 = vld [vmem:[#allocation18 + $0x1] ss:$0 sm:$0xff] }
0x11ca   :  { %9042 = vmatmul.mubr.msk.f32.vlgmr.msra.gmra.mrb[132].mxu1 %vm13157_vm0, %v4838_v26  ;;  %v12505_v26 = vpack.c.bf16 %v7460_v21, %v7459_v25 }
0x11cb   :  { %9697 = vmatpush3.bf16.msra.mxu1 %v12503_v19 }
0x11cc   :  { %9693 = vmatpush1.bf16.msra.mxu0 %v12479_v0  ;;  %9699 = vmatprep.subr.bf16.mxu1 %v12505_v26 }
0x11cd   :  { %9727 = vmatprep.subr.bf16.mxu0 %v9678_v7  ;;  %v7468_v7 = vld [vmem:[%s13162_s10 + $0x1d8] sm:$0xff] }
0x11ce   :  { %v9714_v53 = vpack.c.bf16 %v7468_v7, %v7467_v31 }
0x128d   :  { %v4923_v56 = vpop.f32.mrb[140].mxu0 }
0x128e   :  { %v4927_v41 = vadd.f32 %v4923_v56, %v12276_v10  ;;  %v9024_v43 = vpop.f32.mrb[141].mxu0  ;;  %v7443_v56 = vld [vmem:[%s13162_s10 + $0x110] sm:$0xff] }
0x128f   :  { %v7462_v43 = vld [vmem:[%s13162_s10 + $0x1a8] sm:$0xff] }
0x1290   :  { %v4934_v48 = vadd.f32 %v7420_v34, %v4927_v41  ;;  %v7461_v41 = vld [vmem:[%s13162_s10 + $0x1a0] sm:$0xff] }
0x1292   :  { %v4935_v52 = vsel %vm13176_vm3, %v4934_v48, 0.0  ;;  %vm13184_vm3 = vmmov %vm13157_vm0 }
0x1293   :  { %4936 = vadd.xlane.f32.xlu1 %v4935_v52  ;;  %v12524_v52 = vpack.c.bf16 %v7462_v43, %v7461_v41 }
0x129d   :  { %v5031_v45 = vpop.f32.mrb[132].mxu1 }
0x129e   :  { %v5035_v27 = vadd.f32 %v5031_v45, %v12281_v20  ;;  %v9043_v37 = vpop.f32.mrb[133].mxu1  ;;  %v7445_v45 = vld [vmem:[%s13162_s10 + $0x120] sm:$0xff] }
0x129f   :  { %v7463_v37 = vld [vmem:[%s13162_s10 + $0x1b0] sm:$0xff] }
0x12a0   :  { %v5036_v60 = vadd.f32 %v7420_v34, %v5035_v27  ;;  %v7444_v34 = vld [vmem:[%s13162_s10 + $0x118] sm:$0xff]  ;;  %v7446_v27 = vld [vmem:[%s13162_s10 + $0x128] sm:$0xff] }
0x12a2   :  { %v5037_v57 = vsel %vm13177_vm2, %v5036_v60, 0.0  ;;  %vm13185_vm2 = vmmov %vm13157_vm0 }
0x12a3   :  { %5038 = vadd.xlane.f32.xlu0 %v5037_v57  ;;  %v9704_v57 = vpack.c.bf16 %v7446_v27, %v7445_v45 }
0x1320   :  { %v4937_v63 = vpop.xlane.xlu1 %4936 }
0x1321   :  { %v4938_v1 = vmul.f32 0.015625, %v4937_v63 }
0x1323   :  { %v12404_v4 = vsub.f32 %v4934_v48, %v4938_v1  ;;  %v12521_v48 = vpack.c.bf16 %v7444_v34, %v7443_v56  ;;  %v7447_v1 = vld [vmem:[%s13162_s10 + $0x130] sm:$0xff] }
0x1325   :  { %v4940_v10 = vmul.f32 %v12404_v4, %v12404_v4  ;;  %9701 = vmatpush3.bf16.msra.mxu1 %v12521_v48 }
0x1326   :  { %9703 = vmatprep.subr.bf16.mxu1 %v12524_v52 }
0x1327   :  { %v4941_v5 = vsel %vm13178_vm5, %v4940_v10, 0.0  ;;  %v7448_v10 = vld [vmem:[%s13162_s10 + $0x138] sm:$0xff]  ;;  %vm13186_vm5 = vmmov %vm13157_vm0 }
0x1328   :  { %4942 = vadd.xlane.f32.xlu1 %v4941_v5  ;;  %v7465_v5 = vld [vmem:[%s13162_s10 + $0x1c0] sm:$0xff] }
0x1329   :  { %9705 = vmatpush3.bf16.msra.mxu1 %v9704_v57 }
0x1330   :  { %v5039_v6 = vpop.xlane.xlu0 %5038 }
0x1331   :  { %v5040_v54 = vmul.f32 0.015625, %v5039_v6  ;;  %v7466_v6 = vld [vmem:[%s13162_s10 + $0x1c8] sm:$0xff] }
0x1333   :  { %v12409_v28 = vsub.f32 %v5036_v60, %v5040_v54  ;;  %v7464_v60 = vld [vmem:[%s13162_s10 + $0x1b8] sm:$0xff]  ;;  %v9708_v54 = vpack.c.bf16 %v7448_v10, %v7447_v1 }
0x1334   :  { %v9706_v63 = vpack.c.bf16 %v7464_v60, %v7463_v37 }
0x1335   :  { %v5042_v20 = vmul.f32 %v12409_v28, %v12409_v28 }
0x1336   :  { %9707 = vmatprep.subr.bf16.mxu1 %v9706_v63 }
0x1337   :  { %v5043_v62 = vsel %vm13179_vm6, %v5042_v20, 0.0  ;;  %v9710_v20 = vpack.c.bf16 %v7466_v6, %v7465_v5  ;;  %9709 = vmatpush3.bf16.msra.mxu1 %v9708_v54  ;;  %vm13187_vm6 = vmmov %vm13157_vm0 }
0x1338   :  { %5044 = vadd.xlane.f32.xlu1 %v5043_v62  ;;  %v7449_v62 = vld [vmem:[%s13162_s10 + $0x140] sm:$0xff] }
0x1339   :  { %v9712_v8 = vpack.c.bf16 %v7450_v3, %v7449_v62  ;;  %9711 = vmatprep.subr.bf16.mxu1 %v9710_v20 }
0x133b   :  { %9713 = vmatpush3.bf16.msra.mxu1 %v9712_v8 }
0x133c   :  { %9715 = vmatprep.subr.bf16.mxu1 %v9714_v53 }
0x133f   :  { %9717 = vmatpush3.bf16.msra.mxu1 %v9716_v33 }
0x1340   :  { %9719 = vmatprep.subr.bf16.mxu1 %v9718_v36 }
0x13b5   :  { %v4943_v24 = vpop.xlane.xlu1 %4942 }
0x13b6   :  { %v4944_v44 = vmul.f32 0.015625, %v4943_v24 }
0x13b8   :  { %v4945_v55 = vadd.f32 1e-05, %v4944_v44 }
0x13ba   :  { %10054 = vrsqrt.f32 %v4945_v55 }
0x13c4   :  { %v10055_v49 = vpop.eup %10054 }
0x13c5   :  { %v4947_v59 = vmul.f32 %v10055_v49, %v12404_v4  ;;  %v5045_v61 = vpop.xlane.xlu1 %5044 }
0x13c6   :  { %v5046_v14 = vmul.f32 0.015625, %v5045_v61 }
0x13c7   :  { %v4954_v40 = vmul.f32 %v7421_v17, %v4947_v59 }
0x13c8   :  { %v5047_v25 = vadd.f32 1e-05, %v5046_v14 }
0x13c9   :  { %v12577_v21 = vadd.f32 %v7422_v46, %v4954_v40  ;;  %v7479_v40 = vld [vmem:[%s13091_s11 + $0x108] sm:$0xff] }
0x13ca   :  { %10056 = vrsqrt.f32 %v5047_v25  ;;  %v7481_v25 = vld [vmem:[%s13091_s11 + $0x118] sm:$0xff] }
0x13cb   :  { %7473 = vmatmul.mubr.msk.f32.vlgmr.msra.gmra.mrb[142].mxu0 %vm13180_vm7, %v12577_v21  ;;  %vm13188_vm7 = vmmov %vm13157_vm0 }
0x13cc   :  { %9729 = vmatpush1.bf16.msra.mxu0 %v12426_v11  ;;  %5368 = vmatprep.mubr.f32.mxu0 %v12289_v2  ;;  %v7454_v11 = vld [vmem:[%s13162_s10 + $0x168] sm:$0xff] }
0x13cd   :  { %9731 = vmatprep.subr.bf16.mxu0 %v12435_v22 }
0x13d0   :  { %9733 = vmatpush1.bf16.msra.mxu0 %v12443_v29  ;;  %v7471_v29 = vld [vmem:[%s13162_s10 + $0x1f0] sm:$0xff] }
0x13d1   :  { %9735 = vmatprep.subr.bf16.mxu0 %v12453_v42  ;;  %v7472_v42 = vld [vmem:[%s13162_s10 + $0x1f8] sm:$0xff] }
0x13d4   :  { %v10057_v4 = vpop.eup %10056  ;;  %9737 = vmatpush1.bf16.msra.mxu0 %v12461_v32  ;;  %v9722_v32 = vpack.c.bf16 %v7472_v42, %v7471_v29  ;;  %v7484_v29 = vld [vmem:[%s13091_s11 + $0x130] sm:$0xff] }
0x13d5   :  { %v5049_v56 = vmul.f32 %v10057_v4, %v12409_v28  ;;  %9739 = vmatprep.subr.bf16.mxu0 %v12471_v50  ;;  %v7453_v28 = vld [vmem:[%s13162_s10 + $0x160] sm:$0xff]  ;;  %v7455_v50 = vld [vmem:[%s13162_s10 + $0x170] sm:$0xff] }
0x13d6   :  { %v9720_v22 = vpack.c.bf16 %v7454_v11, %v7453_v28  ;;  %v7478_v4 = vld [vmem:[%s13091_s11 + $0x100] sm:$0xff]  ;;  %v7485_v28 = vld [vmem:[%s13091_s11 + $0x138] sm:$0xff] }
0x13d7   :  { %v5050_v34 = vmul.f32 %v7421_v17, %v5049_v56  ;;  %v7480_v56 = vld [vmem:[%s13091_s11 + $0x110] sm:$0xff] }
0x13d8   :  { %9741 = vmatpush1.bf16.msra.mxu0 %v12479_v0  ;;  %9721 = vmatpush3.bf16.msra.mxu1 %v9720_v22  ;;  %v7456_v0 = vld [vmem:[%s13162_s10 + $0x178] sm:$0xff] }
0x13d9   :  { %v12590_v41 = vadd.f32 %v7422_v46, %v5050_v34  ;;  %9743 = vmatprep.subr.bf16.mxu0 %v12492_v18  ;;  %v9724_v18 = vpack.c.bf16 %v7456_v0, %v7455_v50  ;;  %9723 = vmatprep.subr.bf16.mxu1 %v9722_v32  ;;  %v9776_v34 = vpack.c.bf16 %v7480_v56, %v7478_v4  ;;  %v7489_v50 = vld [vmem:[%s13091_s11 + $0x158] sm:$0xff] }
0x13db   :  { %7477 = vmatmul.mubr.msk.f32.vlgmr.msra.gmra.mrb[144].mxu0 %vm13181_vm9, %v12590_v41  ;;  %vm13189_vm9 = vmmov %vm13157_vm0 }
0x13dc   :  { %9745 = vmatpush3.bf16.msra.mxu0 %v12503_v19  ;;  %9725 = vmatpush3.bf16.msra.mxu1 %v9724_v18  ;;  %v7440_v19 = vld [vmem:[%s13165_s15 + $0x2] sm:$0x3] }
0x13dd   :  { %9747 = vmatprep.subr.bf16.mxu0 %v12505_v26  ;;  %v5114_v26 = vrot.slane %v7440_v19, %v11874_v39  ;;  %v5118_v43 = vrot.slane %v7440_v19, %v11971_v30  ;;  %v7488_v19 = vld [vmem:[%s13091_s11 + $0x150] sm:$0xff] }
0x13e0   :  { %9749 = vmatpush3.bf16.msra.mxu0 %v12521_v48 }
0x13e1   :  { %9751 = vmatprep.subr.bf16.mxu0 %v12524_v52 }
0x13e4   :  { %9753 = vmatpush3.bf16.msra.mxu0 %v9704_v57 }
0x13e5   :  { %9755 = vmatprep.subr.bf16.mxu0 %v9706_v63 }
0x13e8   :  { %9757 = vmatpush3.bf16.msra.mxu0 %v9708_v54 }
0x13e9   :  { %9759 = vmatprep.subr.bf16.mxu0 %v9710_v20  ;;  %v7474_v20 = vld [vmem:[#allocation19 + $0x1] ss:$0 sm:$0xff] }
0x13ec   :  { %9761 = vmatpush3.bf16.msra.mxu0 %v9712_v8 }
0x13ed   :  { %9763 = vmatprep.subr.bf16.mxu0 %v9714_v53 }
0x13f0   :  { %9765 = vmatpush3.bf16.msra.mxu0 %v9716_v33 }
0x13f1   :  { %9767 = vmatprep.subr.bf16.mxu0 %v9718_v36 }
0x13f4   :  { %9769 = vmatpush3.bf16.msra.mxu0 %v9720_v22  ;;  %v7482_v22 = vld [vmem:[%s13091_s11 + $0x120] sm:$0xff] }
0x13f5   :  { %9771 = vmatprep.subr.bf16.mxu0 %v9722_v32  ;;  %v9780_v42 = vpack.c.bf16 %v7484_v29, %v7482_v22  ;;  %v7487_v32 = vld [vmem:[%s13091_s11 + $0x148] sm:$0xff] }
0x13f6   :  { %v9782_v0 = vpack.c.bf16 %v7489_v50, %v7487_v32 }
0x13f8   :  { %9773 = vmatpush3.bf16.msra.mxu0 %v9724_v18  ;;  %v7486_v18 = vld [vmem:[%s13091_s11 + $0x140] sm:$0xff] }
0x13f9   :  { %9806 = vmatprep.subr.bf16.mxu0 %v10459_v38 }
0x149e   :  { %v5190_v48 = vpop.f32.mrb[142].mxu0 }
0x149f   :  { %v5191_v52 = vadd.f32 %v5190_v48, %v5114_v26  ;;  %v5192_v45 = vpop.f32.mrb[143].mxu0  ;;  %v7493_v48 = vld [vmem:[%s13091_s11 + $0x178] sm:$0xff] }
0x14a0   :  { %v5193_v27 = vadd.f32 %v5192_v45, %v5118_v43  ;;  %v7490_v45 = vld [vmem:[%s13091_s11 + $0x160] sm:$0xff] }
0x14a1   :  { %v5195_v60 = vmax.f32 %v5191_v52, 0.0 }
0x14a2   :  { %v5196_v37 = vmax.f32 %v5193_v27, 0.0  ;;  %v7492_v27 = vld [vmem:[%s13091_s11 + $0x170] sm:$0xff] }
0x14a4   :  { %5267 = vmatprep.mubr.f32.mxu1 %v5196_v37  ;;  %v9788_v37 = vpack.c.bf16 %v7492_v27, %v7490_v45 }
0x14a5   :  { %5268 = vmatmul.mubr.f32.vlgmr.msra.gmra.mrb[134].mxu1 %v5195_v60 }
0x14a6   :  { %5560 = vmatprep.mubr.f32.mxu1 %v12289_v2 }
0x14ae   :  { %v5370_v57 = vpop.f32.mrb[144].mxu0 }
0x14af   :  { %v5371_v63 = vadd.f32 %v5370_v57, %v5114_v26  ;;  %v5372_v1 = vpop.f32.mrb[145].mxu0  ;;  %v9784_v26 = vpack.c.bf16 %v7488_v19, %v7486_v18 }
0x14b0   :  { %v5373_v10 = vadd.f32 %v5372_v1, %v5118_v43  ;;  %v7491_v43 = vld [vmem:[%s13091_s11 + $0x168] sm:$0xff] }
0x14b1   :  { %v5375_v6 = vmax.f32 %v5371_v63, 0.0  ;;  %v9786_v52 = vpack.c.bf16 %v7493_v48, %v7491_v43 }
0x14b2   :  { %v5376_v5 = vmax.f32 %v5373_v10, 0.0  ;;  %v7475_v10 = vld [vmem:[#allocation21 + $0x1] ss:$0 sm:$0xff] }
0x14b4   :  { %5441 = vmatprep.mubr.f32.mxu0 %v5376_v5 }
0x14b5   :  { %5442 = vmatmul.mubr.f32.vlgmr.msra.gmra.mrb[146].mxu0 %v5375_v6 }
0x14b6   :  { %9808 = vmatpush3.bf16.msk.msra.mxu0 %vm11823_vm15, %v10462_v12  ;;  %9060 = vmatprep.mubr.msk.f32.mxu0 %vm13152_vm4, %v12289_v2 }
0x14b7   :  { %9809 = vmatprep.subr.bf16.mxu0 %v10459_v38 }
0x14ba   :  { %9811 = vmatpush3.bf16.msk.msra.mxu0 %vm11837_vm8, %v10462_v12 }
0x14bb   :  { %9812 = vmatprep.subr.bf16.mxu0 %v10459_v38 }
0x14be   :  { %9814 = vmatpush3.bf16.msk.msra.mxu0 %vm11848_vm13, %v10462_v12 }
0x14bf   :  { %9815 = vmatprep.subr.bf16.mxu0 %v10459_v38 }
0x14c2   :  { %9817 = vmatpush3.bf16.msk.msra.mxu0 %vm11860_vm1, %v10462_v12 }
0x14c3   :  { %9830 = vmatprep.subr.bf16.mxu0 %v10459_v38 }
0x1578   :  { %v8056_v54 = vpop.f32.mrb[134].mxu1 }
0x1579   :  { %v8057_v62 = vpop.f32.mrb[135].mxu1 }
0x157a   :  { %v8058_v3 = vadd.f32 %v8057_v62, %v8056_v54 }
0x157c   :  { %v5270_v31 = vadd.f32 %v8058_v3, %v7474_v20 }
0x157e   :  { %v5273_v7 = vadd.f32 %v5270_v31, %v12577_v21  ;;  %v9774_v21 = vpack.c.bf16 %v7481_v25, %v7479_v40 }
0x1580   :  { %v5274_v8 = vsel %vm13182_vm10, %v5273_v7, 0.0  ;;  %9775 = vmatprep.subr.bf16.mxu1 %v9774_v21  ;;  %vm13196_vm10 = vmmov %vm13157_vm0 }
0x1581   :  { %5275 = vadd.xlane.f32.xlu1 %v5274_v8  ;;  %9777 = vmatpush1.bf16.msra.mxu1 %v9776_v34 }
0x1588   :  { %v8091_v53 = vpop.f32.mrb[146].mxu0 }
0x1589   :  { %v8092_v58 = vpop.f32.mrb[147].mxu0 }
0x158a   :  { %v8093_v9 = vadd.f32 %v8092_v58, %v8091_v53 }
0x158c   :  { %v5444_v23 = vadd.f32 %v8093_v9, %v7474_v20  ;;  %v7476_v20 = vld [vmem:[#allocation22 + $0x1] ss:$0 sm:$0xff]  ;;  %v12727_v9 = vld [vmem:[%s13092_s12 + $0x4] sm:$0x3] }
0x158e   :  { %v5447_v51 = vadd.f32 %v5444_v23, %v12590_v41  ;;  %v7483_v41 = vld [vmem:[%s13091_s11 + $0x128] sm:$0xff]  ;;  %v5486_v23 = vrot.slane %v12727_v9, %v11874_v39 }
0x158f   :  { %v9778_v11 = vpack.c.bf16 %v7485_v28, %v7483_v41 }
0x1590   :  { %v5448_v33 = vsel %vm13183_vm14, %v5447_v51, 0.0  ;;  %vm13197_vm14 = vmmov %vm13157_vm0 }
0x1591   :  { %5449 = vadd.xlane.f32.xlu0 %v5448_v33  ;;  %9779 = vmatprep.subr.bf16.mxu1 %v9778_v11 }
0x1592   :  { %9781 = vmatpush1.bf16.msra.mxu1 %v9780_v42 }
0x1593   :  { %9783 = vmatprep.subr.bf16.mxu1 %v9782_v0 }
0x1596   :  { %9785 = vmatpush1.bf16.msra.mxu1 %v9784_v26 }
0x1597   :  { %9787 = vmatprep.subr.bf16.mxu1 %v9786_v52 }
0x159a   :  { %9789 = vmatpush1.bf16.msra.mxu1 %v9788_v37 }
0x159b   :  { %9791 = vmatprep.subr.bf16.mxu1 %v9774_v21 }
0x160e   :  { %v5276_v36 = vpop.xlane.xlu1 %5275 }
0x160f   :  { %v5277_v24 = vmul.f32 0.015625, %v5276_v36 }
0x1611   :  { %v5278_v44 = vsub.f32 %v5273_v7, %v5277_v24 }
0x1613   :  { %v5279_v55 = vmul.f32 %v5278_v44, %v5278_v44 }
0x1615   :  { %v5280_v49 = vsel %vm13157_vm0, %v5279_v55, 0.0 }
0x1616   :  { %5281 = vadd.xlane.f32.xlu1 %v5280_v49 }
0x161e   :  { %v5450_v17 = vpop.xlane.xlu0 %5449 }
0x161f   :  { %v5451_v59 = vmul.f32 0.015625, %v5450_v17 }
0x1621   :  { %v5452_v61 = vsub.f32 %v5447_v51, %v5451_v59 }
0x1623   :  { %v5453_v14 = vmul.f32 %v5452_v61, %v5452_v61 }
0x1625   :  { %v5454_v46 = vsel %vm13184_vm3, %v5453_v14, 0.0  ;;  %vm13198_vm3 = vmmov %vm13157_vm0 }
0x1626   :  { %5455 = vadd.xlane.f32.xlu0 %v5454_v46 }
0x16a3   :  { %v5282_v60 = vpop.xlane.xlu1 %5281 }
0x16a4   :  { %v5283_v57 = vmul.f32 0.015625, %v5282_v60 }
0x16a6   :  { %v5284_v63 = vadd.f32 1e-05, %v5283_v57  ;;  %v12793_v57 = vld [vmem:[#allocation2] sm:$0xff] }
0x16a8   :  { %10058 = vrsqrt.f32 %v5284_v63  ;;  %v6270_v63 = vld [vmem:[#allocation13 + $0x80] sm:$0xff] }
0x16b2   :  { %v10059_v1 = vpop.eup %10058 }
0x16b3   :  { %v5286_v5 = vmul.f32 %v10059_v1, %v5278_v44  ;;  %v5456_v6 = vpop.xlane.xlu0 %5455  ;;  %v6271_v1 = vld [vmem:[#allocation13 + $0x88] sm:$0xff] }
0x16b4   :  { %v5457_v54 = vmul.f32 0.015625, %v5456_v6 }
0x16b5   :  { %v5293_v62 = vmul.f32 %v7475_v10, %v5286_v5  ;;  %v9855_v5 = vpack.c.bf16 %v6271_v1, %v6270_v63  ;;  %v7553_v63 = vld [vmem:[%s13097_s17 + $0x138] sm:$0xff] }
0x16b6   :  { %v5458_v3 = vadd.f32 1e-05, %v5457_v54 }
0x16b7   :  { %v12696_v31 = vadd.f32 %v7476_v20, %v5293_v62 }
0x16b8   :  { %10060 = vrsqrt.f32 %v5458_v3  ;;  %v6274_v3 = vld [vmem:[#allocation13 + $0xa0] sm:$0xff] }
0x16b9   :  { %7495 = vmatmul.mubr.msk.f32.vlgmr.msra.gmra.mrb[136].mxu1 %vm13185_vm2, %v12696_v31  ;;  %vm13199_vm2 = vmmov %vm13157_vm0 }
0x16ba   :  { %9793 = vmatpush1.bf16.msra.mxu1 %v9776_v34  ;;  %5634 = vmatprep.mubr.f32.mxu1 %v12289_v2 }
0x16bb   :  { %9795 = vmatprep.subr.bf16.mxu1 %v9778_v11 }
0x16be   :  { %9797 = vmatpush1.bf16.msra.mxu1 %v9780_v42 }
0x16bf   :  { %9799 = vmatprep.subr.bf16.mxu1 %v9782_v0 }
0x16c2   :  { %v10061_v7 = vpop.eup %10060  ;;  %9801 = vmatpush1.bf16.msra.mxu1 %v9784_v26 }
0x16c3   :  { %v5460_v8 = vmul.f32 %v10061_v7, %v5452_v61  ;;  %9803 = vmatprep.subr.bf16.mxu1 %v9786_v52  ;;  %v6275_v7 = vld [vmem:[#allocation13 + $0xa8] sm:$0xff] }
0x16c5   :  { %v5461_v53 = vmul.f32 %v7475_v10, %v5460_v8  ;;  %v9861_v8 = vpack.c.bf16 %v6275_v7, %v6274_v3  ;;  %v7556_v3 = vld [vmem:[%s13097_s17 + $0x150] sm:$0xff] }
0x16c6   :  { %9805 = vmatpush1.bf16.msra.mxu1 %v9788_v37 }
0x16c7   :  { %v12701_v58 = vadd.f32 %v7476_v20, %v5461_v53  ;;  %9818 = vmatprep.subr.bf16.mxu1 %v10459_v38  ;;  %v6273_v20 = vld [vmem:[#allocation13 + $0x98] sm:$0xff]  ;;  %v6276_v53 = vld [vmem:[#allocation13 + $0xb0] sm:$0xff] }
0x16c9   :  { %7496 = vmatmul.mubr.msk.f32.vlgmr.msra.gmra.mrb[138].mxu1 %vm13186_vm5, %v12701_v58  ;;  %vm13200_vm5 = vmmov %vm13157_vm0 }
0x16ca   :  { %9820 = vmatpush3.bf16.msk.msra.mxu1 %vm11823_vm15, %v10462_v12  ;;  %9079 = vmatprep.mubr.msk.f32.mxu1 %vm13152_vm4, %v12289_v2 }
0x16cb   :  { %9821 = vmatprep.subr.bf16.mxu1 %v10459_v38 }
0x16ce   :  { %9823 = vmatpush3.bf16.msk.msra.mxu1 %vm11837_vm8, %v10462_v12 }
0x16cf   :  { %9824 = vmatprep.subr.bf16.mxu1 %v10459_v38 }
0x16d2   :  { %9826 = vmatpush3.bf16.msk.msra.mxu1 %vm11848_vm13, %v10462_v12 }
0x16d3   :  { %9827 = vmatprep.subr.bf16.mxu1 %v10459_v38 }
0x16d6   :  { %9829 = vmatpush3.bf16.msk.msra.mxu1 %vm11860_vm1, %v10462_v12 }
0x16d7   :  { %9842 = vmatprep.subr.bf16.mxu1 %v10459_v38 }
0x178c   :  { %v5562_v51 = vpop.f32.mrb[136].mxu1 }
0x178d   :  { %v5563_v33 = vadd.f32 %v5562_v51, %v5486_v23  ;;  %v12731_v36 = vpop.f32.mrb[137].mxu1 }
0x178f   :  { %5642 = vrot.lane.b32.xlu1 %v5563_v33, %s10463_s9 }
0x179c   :  { %v5636_v24 = vpop.f32.mrb[138].mxu1 }
0x179d   :  { %v5637_v44 = vadd.f32 %v5636_v24, %v5486_v23  ;;  %v12734_v55 = vpop.f32.mrb[139].mxu1  ;;  %v6277_v23 = vld [vmem:[#allocation13 + $0xb8] sm:$0xff] }
0x179e   :  { %v9864_v51 = vpack.c.bf16 %v6277_v23, %v6276_v53  ;;  %v7561_v53 = vld [vmem:[%s13097_s17 + $0x178] sm:$0xff] }
0x179f   :  { %5721 = vrot.lane.b32.xlu0 %v5637_v44, %s10463_s9 }
0x1801   :  { %v5643_v49 = vpop.permute.xlu1 %5642 }
0x1802   :  { %v5645_v17 = vmul.f32 %v5643_v49, %v5563_v33  ;;  %v5799_v61 = vmul.f32 %v5643_v49, %v5637_v44 }
0x1804   :  { %9061 = vmatmul.mubr.msk.f32.vlgmr.msra.gmra.mrb[148].mxu0 %vm13187_vm6, %v5645_v17  ;;  %vm13201_vm6 = vmmov %vm13157_vm0 }
0x1805   :  { %9832 = vmatpush3.bf16.msk.msra.mxu0 %vm11823_vm15, %v10462_v12  ;;  %9098 = vmatprep.mubr.msk.f32.mxu0 %vm13152_vm4, %v12289_v2 }
0x1806   :  { %9833 = vmatprep.subr.bf16.mxu0 %v10459_v38 }
0x1809   :  { %9835 = vmatpush3.bf16.msk.msra.mxu0 %vm11837_vm8, %v10462_v12 }
0x180a   :  { %9836 = vmatprep.subr.bf16.mxu0 %v10459_v38 }
0x180d   :  { %9838 = vmatpush3.bf16.msk.msra.mxu0 %vm11848_vm13, %v10462_v12 }
0x180e   :  { %9839 = vmatprep.subr.bf16.mxu0 %v10459_v38 }
0x1811   :  { %v5722_v59 = vpop.permute.xlu0 %5721  ;;  %9841 = vmatpush3.bf16.msk.msra.mxu0 %vm11860_vm1, %v10462_v12 }
0x1812   :  { %v5724_v14 = vmul.f32 %v5722_v59, %v5563_v33  ;;  %9120 = vmatprep.subr.mxu0 %v12289_v2  ;;  %v5874_v47 = vmul.f32 %v5722_v59, %v5637_v44  ;;  %v5490_v33 = vrot.slane %v12727_v9, %v11971_v30 }
0x1814   :  { %9080 = vmatmul.mubr.msk.f32.vlgmr.msra.gmra.mrb[140].mxu1 %vm13188_vm7, %v5724_v14  ;;  %9099 = vmatmul.mubr.msk.f32.vlgmr.msra.gmra.mrb[150].mxu0 %vm13189_vm9, %v5799_v61  ;;  %v5565_v24 = vadd.f32 %v12731_v36, %v5490_v33  ;;  %v5639_v44 = vadd.f32 %v12734_v55, %v5490_v33  ;;  %v7560_v33 = vld [vmem:[%s13097_s17 + $0x170] sm:$0xff]  ;;  %vm13202_vm7 = vmmov %vm13157_vm0 }
0x1815   :  { %9844 = vmatpush3.bf16.msk.msra.mxu1 %vm11823_vm15, %v10462_v12  ;;  %9117 = vmatprep.mubr.msk.f32.mxu1 %vm13152_vm4, %v12289_v2  ;;  %vm13190_vm15 = vmmov %vm13157_vm0 }
0x1816   :  { %9845 = vmatprep.subr.bf16.mxu1 %v10459_v38  ;;  %9121 = vmatpush3.msk.msra.mxu0 %vm3119_vm11, %v11938_v35  ;;  %vm13203_vm9 = vmmov %vm13157_vm0 }
0x1817   :  { %9122 = vmatprep.mubr.msk.f32.mxu0 %vm13152_vm4, %v12289_v2  ;;  %9130 = vmatprep.subr.mxu0 %v12289_v2 }
0x1819   :  { %9847 = vmatpush3.bf16.msk.msra.mxu1 %vm11837_vm8, %v10462_v12  ;;  %vm13191_vm8 = vmmov %vm13157_vm0 }
0x181a   :  { %9848 = vmatprep.subr.bf16.mxu1 %v10459_v38 }
0x181d   :  { %9850 = vmatpush3.bf16.msk.msra.mxu1 %vm11848_vm13, %v10462_v12  ;;  %vm13192_vm13 = vmmov %vm13157_vm0 }
0x181e   :  { %9851 = vmatprep.subr.bf16.mxu1 %v10459_v38 }
0x1821   :  { %9853 = vmatpush3.bf16.msk.msra.mxu1 %vm11860_vm1, %v10462_v12  ;;  %vm13193_vm1 = vmmov %vm13157_vm0 }
0x1822   :  { %9125 = vmatprep.subr.mxu1 %v12289_v2 }
0x1824   :  { %9118 = vmatmul.mubr.msk.f32.vlgmr.msra.gmra.mrb[142].mxu1 %vm13190_vm15, %v5874_v47  ;;  %vm13204_vm15 = vmmov %vm13157_vm0 }
0x1825   :  { %9126 = vmatpush3.msk.msra.mxu1 %vm3119_vm11, %v11938_v35  ;;  %9127 = vmatprep.mubr.msk.f32.mxu1 %vm13152_vm4, %v12289_v2 }
0x1826   :  { %9135 = vmatprep.subr.mxu1 %v12289_v2 }
0x18d7   :  { %v5715_v13 = vpop.f32.mrb[148].mxu0 }
0x18d8   :  { %v9062_v15 = vpop.f32.mrb[149].mxu0  ;;  %v5719_v25 = vmul.f32 0.25, %v5715_v13 }
0x18e7   :  { %v5794_v46 = vpop.f32.mrb[140].mxu1  ;;  %v5869_v40 = vpop.f32.mrb[150].mxu0 }
0x18e8   :  { %v5798_v16 = vmul.f32 0.25, %v5794_v46  ;;  %v9081_v12 = vpop.f32.mrb[141].mxu1  ;;  %v9100_v21 = vpop.f32.mrb[151].mxu0  ;;  %v5873_v22 = vmul.f32 0.25, %v5869_v40 }
0x18e9   :  { %v7542_v12 = vld [vmem:[#allocation15 + $0x2] ss:$0 sm:$0xff] }
0x18ea   :  { %v5949_v4 = vmax.f32 %v5719_v25, %v5798_v16 }
0x18ec   :  { %v5950_v56 = vsub.f32 %v5719_v25, %v5949_v4  ;;  %v5953_v34 = vsub.f32 %v5798_v16, %v5949_v4 }
0x18ee   :  { %v5951_v41 = vmul.f32 1.442695, %v5950_v56  ;;  %v5954_v28 = vmul.f32 1.442695, %v5953_v34 }
0x18f0   :  { %10062 = vpow2.f32 %v5951_v41 }
0x18f1   :  { %10064 = vpow2.f32 %v5954_v28 }
0x18f7   :  { %v5944_v11 = vpop.f32.mrb[142].mxu1 }
0x18f8   :  { %v5948_v29 = vmul.f32 0.25, %v5944_v11  ;;  %v9119_v42 = vpop.f32.mrb[143].mxu1 }
0x18fa   :  { %v10063_v2 = vpop.eup %10062  ;;  %v5960_v32 = vmax.f32 %v5873_v22, %v5948_v29 }
0x18fb   :  { %v10065_v50 = vpop.eup %10064 }
0x18fc   :  { %v5956_v0 = vadd.f32 %v10065_v50, %v10063_v2  ;;  %v5961_v18 = vsub.f32 %v5873_v22, %v5960_v32  ;;  %v5964_v19 = vsub.f32 %v5948_v29, %v5960_v32 }
0x18fe   :  { %10066 = vrcp.f32 %v5956_v0  ;;  %v5962_v26 = vmul.f32 1.442695, %v5961_v18  ;;  %v5965_v43 = vmul.f32 1.442695, %v5964_v19 }
0x1900   :  { %10068 = vpow2.f32 %v5962_v26 }
0x1901   :  { %10070 = vpow2.f32 %v5965_v43  ;;  %v7547_v43 = vld [vmem:[%s13097_s17 + $0x108] sm:$0xff] }
0x1908   :  { %v10067_v48 = vpop.eup %10066 }
0x1909   :  { %v5958_v52 = vmul.f32 %v10067_v48, %v10063_v2  ;;  %v5959_v45 = vmul.f32 %v10067_v48, %v10065_v50  ;;  %v7549_v48 = vld [vmem:[%s13097_s17 + $0x118] sm:$0xff] }
0x190a   :  { %v10069_v27 = vpop.eup %10068 }
0x190b   :  { %v10071_v37 = vpop.eup %10070  ;;  %9123 = vmatmul.mubr.msk.f32.vlgmr.msra.gmra.mrb[152].mxu0 %vm3115_vm12, %v5958_v52  ;;  %9128 = vmatmul.mubr.msk.f32.vlgmr.msra.gmra.mrb[144].mxu1 %vm3115_vm12, %v5959_v45  ;;  %v9878_v52 = vpack.c.bf16 %v7549_v48, %v7547_v43  ;;  %v7546_v45 = vld [vmem:[%s13097_s17 + $0x100] sm:$0xff]  ;;  %v7574_v43 = vld [vmem:[%s13162_s10 + $0x258] sm:$0xff] }
0x190c   :  { %v5967_v60 = vadd.f32 %v10071_v37, %v10069_v27  ;;  %9131 = vmatpush3.msk.msra.mxu0 %vm3119_vm11, %v11938_v35  ;;  %9136 = vmatpush3.msk.msra.mxu1 %vm3119_vm11, %v11938_v35  ;;  %v6272_v35 = vld [vmem:[#allocation13 + $0x90] sm:$0xff]  ;;  %vm13194_vm11 = vmmov %vm13157_vm0  ;;  %v7591_v48 = vld [vmem:[%s13162_s10 + $0x2e0] sm:$0xff] }
0x190d   :  { %9132 = vmatprep.mubr.msk.f32.mxu0 %vm13152_vm4, %v12793_v57  ;;  %9137 = vmatprep.mubr.msk.f32.mxu1 %vm13152_vm4, %v12793_v57  ;;  %v9858_v62 = vpack.c.bf16 %v6273_v20, %v6272_v35  ;;  %v7557_v35 = vld [vmem:[%s13097_s17 + $0x158] sm:$0xff] }
0x190e   :  { %10072 = vrcp.f32 %v5967_v60  ;;  %9854 = vmatprep.subr.bf16.mxu0 %v10459_v38  ;;  %9866 = vmatprep.subr.bf16.mxu1 %v10459_v38  ;;  %v7551_v60 = vld [vmem:[%s13097_s17 + $0x128] sm:$0xff] }
0x190f   :  { %v12855_v1 = vpack.c.bf16 %v7553_v63, %v7551_v60 }
0x1918   :  { %v10073_v10 = vpop.eup %10072 }
0x1919   :  { %v5969_v6 = vmul.f32 %v10073_v10, %v10069_v27  ;;  %v5970_v54 = vmul.f32 %v10073_v10, %v10071_v37  ;;  %v7548_v27 = vld [vmem:[%s13097_s17 + $0x110] sm:$0xff]  ;;  %v7550_v10 = vld [vmem:[%s13097_s17 + $0x120] sm:$0xff] }
0x191a   :  { %v12846_v37 = vpack.c.bf16 %v7548_v27, %v7546_v45 }
0x191b   :  { %9133 = vmatmul.mubr.msk.f32.vlgmr.msra.gmra.mrb[154].mxu0 %vm3115_vm12, %v5969_v6  ;;  %9138 = vmatmul.mubr.msk.f32.vlgmr.msra.gmra.mrb[146].mxu1 %vm3115_vm12, %v5970_v54  ;;  %vm13195_vm12 = vmmov %vm13157_vm0  ;;  %v7555_v54 = vld [vmem:[%s13097_s17 + $0x148] sm:$0xff] }
0x191c   :  { %9856 = vmatpush3.bf16.msra.mxu0 %v9855_v5  ;;  %9156 = vmatprep.mubr.msk.f32.mxu0 %vm13152_vm4, %v12793_v57  ;;  %v12873_v20 = vpack.c.bf16 %v7557_v35, %v7555_v54  ;;  %v7543_v54 = vld [vmem:[#allocation16 + $0x2] ss:$0 sm:$0xff] }
0x191d   :  { %9857 = vmatprep.subr.bf16.mxu0 %v10459_v38  ;;  %9868 = vmatpush3.bf16.msra.mxu1 %v9855_v5  ;;  %v7552_v5 = vld [vmem:[%s13097_s17 + $0x130] sm:$0xff] }
0x191e   :  { %9869 = vmatprep.subr.bf16.mxu1 %v10459_v38  ;;  %9175 = vmatprep.mubr.msk.f32.mxu1 %vm13152_vm4, %v12793_v57  ;;  %v12863_v6 = vpack.c.bf16 %v7552_v5, %v7550_v10 }
0x1920   :  { %9859 = vmatpush3.bf16.msra.mxu0 %v9858_v62 }
0x1921   :  { %9860 = vmatprep.subr.bf16.mxu0 %v10459_v38  ;;  %9871 = vmatpush3.bf16.msra.mxu1 %v9858_v62  ;;  %v7554_v62 = vld [vmem:[%s13097_s17 + $0x140] sm:$0xff] }
0x1922   :  { %9872 = vmatprep.subr.bf16.mxu1 %v10459_v38  ;;  %v12881_v7 = vpack.c.bf16 %v7556_v3, %v7554_v62 }
0x1924   :  { %9862 = vmatpush3.bf16.msra.mxu0 %v9861_v8 }
0x1925   :  { %9863 = vmatprep.subr.bf16.mxu0 %v10459_v38  ;;  %9874 = vmatpush3.bf16.msra.mxu1 %v9861_v8  ;;  %v7559_v8 = vld [vmem:[%s13097_s17 + $0x168] sm:$0xff] }
0x1926   :  { %9875 = vmatprep.subr.bf16.mxu1 %v10459_v38  ;;  %v12891_v23 = vpack.c.bf16 %v7561_v53, %v7559_v8  ;;  %v7544_v8 = vld [vmem:[#allocation18 + $0x2] ss:$0 sm:$0xff] }
0x1928   :  { %9865 = vmatpush3.bf16.msra.mxu0 %v9864_v51 }
0x1929   :  { %9877 = vmatpush3.bf16.msra.mxu1 %v9864_v51  ;;  %9879 = vmatprep.subr.bf16.mxu0 %v9878_v52  ;;  %v7558_v51 = vld [vmem:[%s13097_s17 + $0x160] sm:$0xff] }
0x19de   :  { %v6040_v49 = vpop.f32.mrb[152].mxu0  ;;  %v6114_v17 = vpop.f32.mrb[144].mxu1 }
0x19df   :  { %v6044_v59 = vmul.f32 %v6040_v49, %v5565_v24  ;;  %v6118_v61 = vmul.f32 %v6114_v17, %v5639_v44  ;;  %v9124_v14 = vpop.f32.mrb[153].mxu0  ;;  %v9129_v47 = vpop.f32.mrb[145].mxu1  ;;  %v7580_v49 = vld [vmem:[%s13162_s10 + $0x288] sm:$0xff]  ;;  %v7563_v17 = vld [vmem:[%s13162_s10 + $0x200] sm:$0xff] }
0x19e0   :  { %v7581_v14 = vld [vmem:[%s13162_s10 + $0x290] sm:$0xff]  ;;  %v7582_v47 = vld [vmem:[%s13162_s10 + $0x298] sm:$0xff] }
0x19e1   :  { %v6119_v13 = vadd.f32 %v6118_v61, %v6044_v59  ;;  %v7564_v61 = vld [vmem:[%s13162_s10 + $0x208] sm:$0xff] }
0x19e3   :  { %9157 = vmatmul.mubr.msk.f32.vlgmr.msra.gmra.mrb[156].mxu0 %vm13191_vm8, %v6119_v13  ;;  %v12923_v13 = vpack.c.bf16 %v7564_v61, %v7563_v17  ;;  %v7562_v61 = vld [vmem:[%s13165_s15 + $0x4] sm:$0x3]  ;;  %vm13205_vm8 = vmmov %vm13157_vm0 }
0x19e4   :  { %6618 = vmatprep.mubr.f32.mxu0 %v12793_v57  ;;  %9881 = vmatpush1.bf16.msra.mxu0 %v12846_v37 }
0x19e5   :  { %9883 = vmatprep.subr.bf16.mxu0 %v12855_v1 }
0x19e8   :  { %9885 = vmatpush1.bf16.msra.mxu0 %v12863_v6 }
0x19e9   :  { %9887 = vmatprep.subr.bf16.mxu0 %v12873_v20 }
0x19ec   :  { %9889 = vmatpush1.bf16.msra.mxu0 %v12881_v7 }
0x19ed   :  { %9891 = vmatprep.subr.bf16.mxu0 %v12891_v23 }
0x19ee   :  { %v6189_v15 = vpop.f32.mrb[154].mxu0  ;;  %v6263_v46 = vpop.f32.mrb[146].mxu1 }
0x19ef   :  { %v6193_v40 = vmul.f32 %v6189_v15, %v5565_v24  ;;  %v6267_v25 = vmul.f32 %v6263_v46, %v5639_v44  ;;  %v9134_v9 = vpop.f32.mrb[155].mxu0  ;;  %v9139_v16 = vpop.f32.mrb[147].mxu1  ;;  %v12899_v24 = vpack.c.bf16 %v7560_v33, %v7558_v51  ;;  %v7579_v44 = vld [vmem:[%s13162_s10 + $0x280] sm:$0xff]  ;;  %v12925_v15 = vpack.c.bf16 %v7582_v47, %v7581_v14  ;;  %v7565_v46 = vld [vmem:[%s13162_s10 + $0x210] sm:$0xff] }
0x19f0   :  { %v12912_v59 = vpack.c.bf16 %v7580_v49, %v7579_v44  ;;  %v7584_v9 = vld [vmem:[%s13162_s10 + $0x2a8] sm:$0xff]  ;;  %v6544_v14 = vrot.slane %v7562_v61, %v11874_v39  ;;  %v6548_v47 = vrot.slane %v7562_v61, %v11971_v30  ;;  %v7596_v30 = vld [vmem:[#allocation19 + $0x2] ss:$0 sm:$0xff] }
0x19f1   :  { %v6268_v36 = vadd.f32 %v6267_v25, %v6193_v40  ;;  %9893 = vmatpush1.bf16.msra.mxu0 %v12899_v24  ;;  %v7566_v40 = vld [vmem:[%s13162_s10 + $0x218] sm:$0xff]  ;;  %v7583_v25 = vld [vmem:[%s13162_s10 + $0x2a0] sm:$0xff] }
0x19f2   :  { %9927 = vmatprep.subr.bf16.mxu0 %v9878_v52  ;;  %9895 = vmatprep.subr.bf16.mxu1 %v12912_v59  ;;  %v12941_v16 = vpack.c.bf16 %v7566_v40, %v7565_v46  ;;  %v7592_v52 = vld [vmem:[%s13162_s10 + $0x2e8] sm:$0xff] }
0x19f3   :  { %9176 = vmatmul.mubr.msk.f32.vlgmr.msra.gmra.mrb[148].mxu1 %vm13192_vm13, %v6268_v36  ;;  %v12944_v36 = vpack.c.bf16 %v7584_v9, %v7583_v25  ;;  %v9918_v27 = vpack.c.bf16 %v7592_v52, %v7591_v48 }
0x19f4   :  { %9897 = vmatpush3.bf16.msra.mxu1 %v12923_v13 }
0x19f5   :  { %9899 = vmatprep.subr.bf16.mxu1 %v12925_v15 }
0x19f8   :  { %9901 = vmatpush3.bf16.msra.mxu1 %v12941_v16 }
0x19f9   :  { %9903 = vmatprep.subr.bf16.mxu1 %v12944_v36 }
0x1ab6   :  { %v6353_v55 = vpop.f32.mrb[156].mxu0 }
0x1ab7   :  { %v6357_v21 = vadd.f32 %v6353_v55, %v12696_v31  ;;  %v9158_v4 = vpop.f32.mrb[157].mxu0  ;;  %v7567_v55 = vld [vmem:[%s13162_s10 + $0x220] sm:$0xff] }
0x1ab8   :  { %v7586_v4 = vld [vmem:[%s13162_s10 + $0x2b8] sm:$0xff] }
0x1ab9   :  { %v6364_v56 = vadd.f32 %v7542_v12, %v6357_v21  ;;  %v7585_v21 = vld [vmem:[%s13162_s10 + $0x2b0] sm:$0xff] }
0x1abb   :  { %v6365_v34 = vsel %vm13193_vm1, %v6364_v56, 0.0 }
0x1abc   :  { %6366 = vadd.xlane.f32.xlu1 %v6365_v34  ;;  %v9906_v34 = vpack.c.bf16 %v7586_v4, %v7585_v21 }
0x1ac6   :  { %v6461_v41 = vpop.f32.mrb[148].mxu1 }
0x1ac7   :  { %v6465_v28 = vadd.f32 %v6461_v41, %v12701_v58  ;;  %v9177_v11 = vpop.f32.mrb[149].mxu1  ;;  %v7569_v41 = vld [vmem:[%s13162_s10 + $0x230] sm:$0xff] }
0x1ac8   :  { %v7587_v11 = vld [vmem:[%s13162_s10 + $0x2c0] sm:$0xff] }
0x1ac9   :  { %v6466_v22 = vadd.f32 %v7542_v12, %v6465_v28  ;;  %v7568_v12 = vld [vmem:[%s13162_s10 + $0x228] sm:$0xff]  ;;  %v7570_v28 = vld [vmem:[%s13162_s10 + $0x238] sm:$0xff] }
0x1acb   :  { %v6467_v29 = vsel %vm13194_vm11, %v6466_v22, 0.0 }
0x1acc   :  { %6468 = vadd.xlane.f32.xlu0 %v6467_v29  ;;  %v9908_v29 = vpack.c.bf16 %v7570_v28, %v7569_v41 }
0x1b49   :  { %v6367_v42 = vpop.xlane.xlu1 %6366 }
0x1b4a   :  { %v6368_v2 = vmul.f32 0.015625, %v6367_v42 }
0x1b4c   :  { %v12824_v32 = vsub.f32 %v6364_v56, %v6368_v2  ;;  %v9904_v56 = vpack.c.bf16 %v7568_v12, %v7567_v55  ;;  %v7571_v2 = vld [vmem:[%s13162_s10 + $0x240] sm:$0xff] }
0x1b4e   :  { %v6370_v31 = vmul.f32 %v12824_v32, %v12824_v32  ;;  %9905 = vmatpush3.bf16.msra.mxu1 %v9904_v56 }
0x1b4f   :  { %9907 = vmatprep.subr.bf16.mxu1 %v9906_v34 }
0x1b50   :  { %v6371_v50 = vsel %vm13195_vm12, %v6370_v31, 0.0  ;;  %v7572_v31 = vld [vmem:[%s13162_s10 + $0x248] sm:$0xff] }
0x1b51   :  { %6372 = vadd.xlane.f32.xlu1 %v6371_v50  ;;  %v7589_v50 = vld [vmem:[%s13162_s10 + $0x2d0] sm:$0xff] }
0x1b52   :  { %9909 = vmatpush3.bf16.msra.mxu1 %v9908_v29 }
0x1b59   :  { %v6469_v0 = vpop.xlane.xlu0 %6468 }
0x1b5a   :  { %v6470_v18 = vmul.f32 0.015625, %v6469_v0  ;;  %v7590_v0 = vld [vmem:[%s13162_s10 + $0x2d8] sm:$0xff] }
0x1b5c   :  { %v12829_v19 = vsub.f32 %v6466_v22, %v6470_v18  ;;  %v7588_v22 = vld [vmem:[%s13162_s10 + $0x2c8] sm:$0xff]  ;;  %v9912_v18 = vpack.c.bf16 %v7572_v31, %v7571_v2 }
0x1b5d   :  { %v9910_v42 = vpack.c.bf16 %v7588_v22, %v7587_v11 }
0x1b5e   :  { %v6472_v58 = vmul.f32 %v12829_v19, %v12829_v19 }
0x1b5f   :  { %9911 = vmatprep.subr.bf16.mxu1 %v9910_v42 }
0x1b60   :  { %v6473_v26 = vsel %vm13196_vm10, %v6472_v58, 0.0  ;;  %v9914_v58 = vpack.c.bf16 %v7590_v0, %v7589_v50  ;;  %9913 = vmatpush3.bf16.msra.mxu1 %v9912_v18 }
0x1b61   :  { %6474 = vadd.xlane.f32.xlu0 %v6473_v26  ;;  %v7573_v26 = vld [vmem:[%s13162_s10 + $0x250] sm:$0xff] }
0x1b62   :  { %v9916_v45 = vpack.c.bf16 %v7574_v43, %v7573_v26  ;;  %9915 = vmatprep.subr.bf16.mxu1 %v9914_v58 }
0x1b64   :  { %9917 = vmatpush3.bf16.msra.mxu1 %v9916_v45 }
0x1b65   :  { %9919 = vmatprep.subr.bf16.mxu1 %v9918_v27 }
0x1bde   :  { %v6373_v60 = vpop.xlane.xlu1 %6372 }
0x1bdf   :  { %v6374_v63 = vmul.f32 0.015625, %v6373_v60 }
0x1be1   :  { %v6375_v10 = vadd.f32 1e-05, %v6374_v63  ;;  %v6902_v63 = vld [vmem:[#allocation24] sm:$0xff] }
0x1be3   :  { %10074 = vrsqrt.f32 %v6375_v10  ;;  %v6903_v10 = vld [vmem:[#allocation24 + $0x8] sm:$0xff] }
0x1bed   :  { %v10075_v5 = vpop.eup %10074 }
0x1bee   :  { %v6377_v35 = vmul.f32 %v10075_v5, %v12824_v32  ;;  %v6475_v62 = vpop.xlane.xlu0 %6474  ;;  %v9975_v5 = vpack.c.bf16 %v6903_v10, %v6902_v63 }
0x1bef   :  { %v6476_v3 = vmul.f32 0.015625, %v6475_v62 }
0x1bf0   :  { %v6384_v53 = vmul.f32 %v7543_v54, %v6377_v35  ;;  %v6905_v35 = vld [vmem:[#allocation24 + $0x18] sm:$0xff] }
0x1bf1   :  { %v6477_v51 = vadd.f32 1e-05, %v6476_v3  ;;  %v6906_v3 = vld [vmem:[#allocation24 + $0x20] sm:$0xff] }
0x1bf2   :  { %v12997_v33 = vadd.f32 %v7544_v8, %v6384_v53 }
0x1bf3   :  { %10076 = vrsqrt.f32 %v6477_v51  ;;  %v6908_v51 = vld [vmem:[#allocation24 + $0x30] sm:$0xff] }
0x1bf4   :  { %7595 = vmatmul.mubr.msk.f32.vlgmr.msra.gmra.mrb[158].mxu0 %vm13197_vm14, %v12997_v33 }
0x1bf5   :  { %9929 = vmatpush1.bf16.msra.mxu0 %v12846_v37  ;;  %6798 = vmatprep.mubr.f32.mxu0 %v12793_v57  ;;  %v7576_v37 = vld [vmem:[%s13162_s10 + $0x268] sm:$0xff] }
0x1bf6   :  { %9931 = vmatprep.subr.bf16.mxu0 %v12855_v1 }
0x1bf9   :  { %9933 = vmatpush1.bf16.msra.mxu0 %v12863_v6  ;;  %v7593_v6 = vld [vmem:[%s13162_s10 + $0x2f0] sm:$0xff] }
0x1bfa   :  { %9935 = vmatprep.subr.bf16.mxu0 %v12873_v20  ;;  %v7594_v20 = vld [vmem:[%s13162_s10 + $0x2f8] sm:$0xff] }
0x1bfd   :  { %v10077_v32 = vpop.eup %10076  ;;  %9937 = vmatpush1.bf16.msra.mxu0 %v12881_v7  ;;  %v9922_v7 = vpack.c.bf16 %v7594_v20, %v7593_v6  ;;  %v7598_v20 = vld [vmem:[#allocation22 + $0x2] ss:$0 sm:$0xff] }
0x1bfe   :  { %v6479_v44 = vmul.f32 %v10077_v32, %v12829_v19  ;;  %9939 = vmatprep.subr.bf16.mxu0 %v12891_v23  ;;  %v7575_v19 = vld [vmem:[%s13162_s10 + $0x260] sm:$0xff]  ;;  %v7577_v23 = vld [vmem:[%s13162_s10 + $0x270] sm:$0xff] }
0x1bff   :  { %v9920_v1 = vpack.c.bf16 %v7576_v37, %v7575_v19  ;;  %v7597_v37 = vld [vmem:[#allocation21 + $0x2] ss:$0 sm:$0xff] }
0x1c00   :  { %v6480_v49 = vmul.f32 %v7543_v54, %v6479_v44  ;;  %v6904_v54 = vld [vmem:[#allocation24 + $0x10] sm:$0xff] }
0x1c01   :  { %9941 = vmatpush1.bf16.msra.mxu0 %v12899_v24  ;;  %9921 = vmatpush3.bf16.msra.mxu1 %v9920_v1  ;;  %v7578_v24 = vld [vmem:[%s13162_s10 + $0x278] sm:$0xff]  ;;  %v9978_v62 = vpack.c.bf16 %v6905_v35, %v6904_v54  ;;  %s10464_s10 = smov [#allocation27]  }
0x1c02   :  { %v13010_v17 = vadd.f32 %v7544_v8, %v6480_v49  ;;  %9943 = vmatprep.subr.bf16.mxu0 %v12912_v59  ;;  %v9924_v59 = vpack.c.bf16 %v7578_v24, %v7577_v23  ;;  %9923 = vmatprep.subr.bf16.mxu1 %v9922_v7  ;;  %v6907_v8 = vld [vmem:[#allocation24 + $0x28] sm:$0xff]  ;;  %s7111_s15 = sshll.u32 %s10464_s10, 4  ;;  %s7112_s15 = int_to_ptr.vmem [resolvable:$true] %s7111_s15 }
0x1c03   :  { %v9981_v53 = vpack.c.bf16 %v6907_v8, %v6906_v3  ;;  %s10401_s30 = scalar_lea.vmem %s7112_s15, 32  ;;  %p10406_p1 = scmp.lt.s32.totalorder %s7112_s15, %s7112_s15 }
0x1c04   :  { %7599 = vmatmul.mubr.msk.f32.vlgmr.msra.gmra.mrb[160].mxu0 %vm13157_vm0, %v13010_v17  ;;  %p10402_p0 = scmp.ne.s32.totalorder %s7112_s15, %s10401_s30  ;;  %p10407_p2 = scmp.lt.s32.totalorder %s10401_s30, %s10401_s30 }
0x1c05   :  { %9945 = vmatpush3.bf16.msra.mxu0 %v12923_v13  ;;  %9925 = vmatpush3.bf16.msra.mxu1 %v9924_v59 }
0x1c06   :  { %9947 = vmatprep.subr.bf16.mxu0 %v12925_v15  ;;  %9974 = vmatprep.subr.bf16.mxu1 %v10459_v38  ;;  %p10408_p3 = por %p10407_p2, %p10406_p1 }
0x1c08   :  { %p10409_p4 = pnand %p10408_p3, %p10402_p0 }
0x1c09   :  { %9949 = vmatpush3.bf16.msra.mxu0 %v12941_v16 }
0x1c0a   :  { %9951 = vmatprep.subr.bf16.mxu0 %v12944_v36 }
0x1c0d   :  { %9953 = vmatpush3.bf16.msra.mxu0 %v9904_v56 }
0x1c0e   :  { %9955 = vmatprep.subr.bf16.mxu0 %v9906_v34 }
0x1c11   :  { %9957 = vmatpush3.bf16.msra.mxu0 %v9908_v29 }
0x1c12   :  { %9959 = vmatprep.subr.bf16.mxu0 %v9910_v42 }
0x1c15   :  { %9961 = vmatpush3.bf16.msra.mxu0 %v9912_v18 }
0x1c16   :  { %9963 = vmatprep.subr.bf16.mxu0 %v9914_v58 }
0x1c19   :  { %9965 = vmatpush3.bf16.msra.mxu0 %v9916_v45 }
0x1c1a   :  { %9967 = vmatprep.subr.bf16.mxu0 %v9918_v27 }
0x1c1d   :  { %9969 = vmatpush3.bf16.msra.mxu0 %v9920_v1 }
0x1c1e   :  { %9971 = vmatprep.subr.bf16.mxu0 %v9922_v7 }
0x1c21   :  { %9973 = vmatpush3.bf16.msra.mxu0 %v9924_v59 }
0x1cc7   :  { %v6620_v13 = vpop.f32.mrb[158].mxu0 }
0x1cc8   :  { %v6621_v15 = vadd.f32 %v6620_v13, %v6544_v14  ;;  %v6622_v46 = vpop.f32.mrb[159].mxu0 }
0x1cc9   :  { %v6623_v40 = vadd.f32 %v6622_v46, %v6548_v47 }
0x1cca   :  { %v6625_v9 = vmax.f32 %v6621_v15, 0.0 }
0x1ccb   :  { %v6626_v25 = vmax.f32 %v6623_v40, 0.0 }
0x1ccd   :  { %6697 = vmatprep.mubr.f32.mxu1 %v6626_v25 }
0x1cce   :  { %6698 = vmatmul.mubr.f32.vlgmr.msra.gmra.mrb[150].mxu1 %v6625_v9 }
0x1ccf   :  { %9194 = vmatprep.mubr.msk.f32.mxu1 %vm13152_vm4, %v12793_v57  ;;  %9976 = vmatpush3.bf16.msra.mxu1 %v9975_v5 }
0x1cd0   :  { %9977 = vmatprep.subr.bf16.mxu1 %v10459_v38 }
0x1cd3   :  { %9979 = vmatpush3.bf16.msra.mxu1 %v9978_v62 }
0x1cd4   :  { %9980 = vmatprep.subr.bf16.mxu1 %v10459_v38 }
0x1cd7   :  { %v6800_v16 = vpop.f32.mrb[160].mxu0  ;;  %9982 = vmatpush3.bf16.msra.mxu1 %v9981_v53 }
0x1cd8   :  { %v6801_v36 = vadd.f32 %v6800_v16, %v6544_v14  ;;  %v6802_v55 = vpop.f32.mrb[161].mxu0  ;;  %9983 = vmatprep.subr.bf16.mxu1 %v10459_v38 }
0x1cd9   :  { %v6803_v12 = vadd.f32 %v6802_v55, %v6548_v47 }
0x1cda   :  { %v6805_v4 = vmax.f32 %v6801_v36, 0.0 }
0x1cdb   :  { %v6806_v21 = vmax.f32 %v6803_v12, 0.0 }
0x1cdd   :  { %6871 = vmatprep.mubr.f32.mxu0 %v6806_v21 }
0x1cde   :  { %6872 = vmatmul.mubr.f32.vlgmr.msra.gmra.mrb[162].mxu0 %v6805_v4 }
0x1da1   :  { %v8188_v39 = vpop.f32.mrb[150].mxu1 }
0x1da2   :  { %v8189_v56 = vpop.f32.mrb[151].mxu1 }
0x1da3   :  { %v8190_v34 = vadd.f32 %v8189_v56, %v8188_v39 }
0x1da5   :  { %v6700_v41 = vadd.f32 %v8190_v34, %v7596_v30 }
0x1da7   :  { %v6703_v28 = vadd.f32 %v6700_v41, %v12997_v33  ;;  %v6909_v33 = vld [vmem:[#allocation24 + $0x38] sm:$0xff] }
0x1da8   :  { %v9984_v32 = vpack.c.bf16 %v6909_v33, %v6908_v51 }
0x1da9   :  { %v6704_v11 = vsel %vm13198_vm3, %v6703_v28, 0.0 }
0x1daa   :  { %6705 = vadd.xlane.f32.xlu1 %v6704_v11  ;;  %9985 = vmatpush3.bf16.msra.mxu1 %v9984_v32 }
0x1dab   :  { %9986 = vmatprep.subr.bf16.mxu1 %v10459_v38 }
0x1db1   :  { %v8223_v22 = vpop.f32.mrb[162].mxu0 }
0x1db2   :  { %v8224_v29 = vpop.f32.mrb[163].mxu0 }
0x1db3   :  { %v8225_v42 = vadd.f32 %v8224_v29, %v8223_v22 }
0x1db5   :  { %v6874_v2 = vadd.f32 %v8225_v42, %v7596_v30 }
0x1db7   :  { %v6877_v31 = vadd.f32 %v6874_v2, %v13010_v17  ;;  %v7016_v2 = vld [vmem:[#allocation25] sm:$0x1] }
0x1db9   :  { %v6878_v50 = vsel %vm13199_vm2, %v6877_v31, 0.0 }
0x1dba   :  { %6879 = vadd.xlane.f32.xlu0 %v6878_v50 }
0x1e37   :  { %v6706_v0 = vpop.xlane.xlu1 %6705 }
0x1e38   :  { %v6707_v18 = vmul.f32 0.015625, %v6706_v0 }
0x1e3a   :  { %v6708_v58 = vsub.f32 %v6703_v28, %v6707_v18 }
0x1e3c   :  { %v6709_v26 = vmul.f32 %v6708_v58, %v6708_v58 }
0x1e3e   :  { %v6710_v43 = vsel %vm13200_vm5, %v6709_v26, 0.0 }
0x1e3f   :  { %6711 = vadd.xlane.f32.xlu1 %v6710_v43 }
0x1e47   :  { %v6880_v48 = vpop.xlane.xlu0 %6879 }
0x1e48   :  { %v6881_v52 = vmul.f32 0.015625, %v6880_v48 }
0x1e4a   :  { %v6882_v45 = vsub.f32 %v6877_v31, %v6881_v52 }
0x1e4c   :  { %v6883_v27 = vmul.f32 %v6882_v45, %v6882_v45 }
0x1e4e   :  { %v6884_v60 = vsel %vm13201_vm6, %v6883_v27, 0.0 }
0x1e4f   :  { %6885 = vadd.xlane.f32.xlu0 %v6884_v60 }
0x1ecc   :  { %v6712_v44 = vpop.xlane.xlu1 %6711 }
0x1ecd   :  { %v6713_v49 = vmul.f32 0.015625, %v6712_v44 }
0x1ecf   :  { %v6714_v17 = vadd.f32 1e-05, %v6713_v49 }
0x1ed1   :  { %10078 = vrsqrt.f32 %v6714_v17 }
0x1edb   :  { %v10079_v19 = vpop.eup %10078 }
0x1edc   :  { %v6716_v1 = vmul.f32 %v10079_v19, %v6708_v58  ;;  %v6886_v6 = vpop.xlane.xlu0 %6885 }
0x1edd   :  { %v6887_v7 = vmul.f32 0.015625, %v6886_v6 }
0x1ede   :  { %v6723_v23 = vmul.f32 %v7597_v37, %v6716_v1 }
0x1edf   :  { %v6888_v24 = vadd.f32 1e-05, %v6887_v7 }
0x1ee0   :  { %v6730_v59 = vadd.f32 %v7598_v20, %v6723_v23 }
0x1ee1   :  { %10080 = vrsqrt.f32 %v6888_v24 }
0x1ee2   :  { %v6893_v61 = vsel %vm13202_vm7, %v6730_v59, 0.0 }
0x1ee3   :  { %v6894_v14 = vrot.slane %v6893_v61, 4 }
0x1ee5   :  { %v6895_v47 = vadd.f32 %v6894_v14, %v6893_v61 }
0x1ee7   :  { %v6896_v13 = vrot.slane %v6895_v47, 2 }
0x1ee9   :  { %v6897_v15 = vadd.f32 %v6896_v13, %v6895_v47 }
0x1eeb   :  { %v10081_v46 = vpop.eup %10080  ;;  %v6898_v40 = vrot.slane %v6897_v15, 1 }
0x1eec   :  { %v6890_v25 = vmul.f32 %v10081_v46, %v6882_v45 }
0x1eed   :  { %v6899_v9 = vadd.f32 %v6898_v40, %v6897_v15 }
0x1eee   :  { %v6891_v16 = vmul.f32 %v7597_v37, %v6890_v25 }
0x1eef   :  { %v6901_v36 = vmul.f32 0.125, %v6899_v9 }
0x1ef0   :  { %v6892_v55 = vadd.f32 %v7598_v20, %v6891_v16 }
0x1ef1   :  { %9195 = vmatmul.mubr.msk.f32.vlgmr.msra.gmra.mrb[152].mxu1 %vm13203_vm9, %v6901_v36 }
0x1ef2   :  { %9988 = vmatpush3.bf16.msra.mxu1 %v9975_v5  ;;  %9213 = vmatprep.mubr.msk.f32.mxu1 %vm13152_vm4, %v12793_v57  ;;  %v7000_v12 = vsel %vm13204_vm15, %v6892_v55, 0.0  ;;  %v6910_v57 = vld [vmem:[#allocation25] sm:$0x1]  ;;  %vm6985_vm4 = vcmask 516096  }
0x1ef3   :  { %9989 = vmatprep.subr.bf16.mxu1 %v10459_v38  ;;  %v7001_v21 = vrot.slane %v7000_v12, 4 }
0x1ef5   :  { %v7002_v4 = vadd.f32 %v7001_v21, %v7000_v12 }
0x1ef6   :  { %9991 = vmatpush3.bf16.msra.mxu1 %v9978_v62 }
0x1ef7   :  { %9992 = vmatprep.subr.bf16.mxu1 %v10459_v38  ;;  %v7003_v39 = vrot.slane %v7002_v4, 2 }
0x1ef9   :  { %v7004_v30 = vadd.f32 %v7003_v39, %v7002_v4 }
0x1efa   :  { %9994 = vmatpush3.bf16.msra.mxu1 %v9981_v53 }
0x1efb   :  { %9995 = vmatprep.subr.bf16.mxu1 %v10459_v38  ;;  %v7005_v56 = vrot.slane %v7004_v30, 1 }
0x1efd   :  { %v7006_v34 = vadd.f32 %v7005_v56, %v7004_v30 }
0x1efe   :  { %9997 = vmatpush3.bf16.msra.mxu1 %v9984_v32 }
0x1eff   :  { %v7007_v41 = vmul.f32 0.125, %v7006_v34 }
0x1f01   :  { %9214 = vmatmul.mubr.msk.f32.vlgmr.msra.gmra.mrb[154].mxu1 %vm13205_vm8, %v7007_v41 }
0x1fc4   :  { %v6980_v28 = vpop.f32.mrb[152].mxu1 }
0x1fc5   :  { %v6981_v11 = vadd.f32 %v6980_v28, %v6910_v57  ;;  %v9196_v22 = vpop.f32.mrb[153].mxu1 }
0x1fc7   :  { %v6984_v29 = vmul.f32 %v6981_v11, %v6981_v11 }
0x1fc9   :  { %v6986_v42 = vsel %vm6985_vm4, %v6984_v29, 0.0 }
0x1fca   :  { %6987 = vadd.xlane.f32.xlu1 %v6986_v42 }
0x1fd4   :  { %v7086_v31 = vpop.f32.mrb[154].mxu1 }
0x1fd5   :  { %v7087_v50 = vadd.f32 %v7086_v31, %v7016_v2  ;;  %v9215_v0 = vpop.f32.mrb[155].mxu1 }
0x1fd7   :  { %v7090_v38 = vmul.f32 %v7087_v50, %v7087_v50 }
0x1fd9   :  { %v7091_v18 = vsel %vm6985_vm4, %v7090_v38, 0.0 }
0x1fda   :  { %7092 = vadd.xlane.f32.xlu0 %v7091_v18 }
0x2057   :  { %v6988_v58 = vpop.xlane.xlu1 %6987 }
0x2058   :  { %10082 = vrsqrt.f32 %v6988_v58  ;;  %vm6991_vm13 = vcmp.eq.f32.partialorder %v6988_v58, inf  ;;  %v6994_v48 = vand.u32 2147483648, %v6988_v58  ;;  %vm6993_vm1 = vcmp.eq.f32.partialorder %v6988_v58, 0.0 }
0x2062   :  { %v10083_v26 = vpop.eup %10082 }
0x2063   :  { %v6990_v43 = vmul.f32 %v10083_v26, %v6988_v58 }
0x2065   :  { %v6992_v52 = vsel %vm6991_vm13, %v6988_v58, %v6990_v43 }
0x2066   :  { %v6995_v45 = vsel %vm6993_vm1, %v6994_v48, %v6992_v52 }
0x2067   :  { %v6996_v27 = vmax.f32 %v6995_v45, 1e-12  ;;  %v7093_v60 = vpop.xlane.xlu0 %7092 }
0x2068   :  { %10084 = vrsqrt.f32 %v7093_v60  ;;  %vm7096_vm11 = vcmp.eq.f32.partialorder %v7093_v60, inf  ;;  %v7099_v54 = vand.u32 2147483648, %v7093_v60  ;;  %vm7098_vm12 = vcmp.eq.f32.partialorder %v7093_v60, 0.0 }
0x2069   :  { %10086 = vrcp.f32 %v6996_v27 }
0x2072   :  { %v10085_v63 = vpop.eup %10084 }
0x2073   :  { %v10087_v10 = vpop.eup %10086  ;;  %v7095_v5 = vmul.f32 %v10085_v63, %v7093_v60 }
0x2074   :  { %v6998_v35 = vmul.f32 %v10087_v10, %v6981_v11 }
0x2075   :  { %v7097_v62 = vsel %vm7096_vm11, %v7093_v60, %v7095_v5 }
0x2076   :  { %v7100_v3 = vsel %vm7098_vm12, %v7099_v54, %v7097_v62  ;;  %6999 = vst.msk [vmem:[#allocation27] sm:$0x1] %vm6985_vm4, %v6998_v35 }
0x2077   :  { %v7101_v8 = vmax.f32 %v7100_v3, 1e-12 }
0x2079   :  { %10088 = vrcp.f32 %v7101_v8 }
0x2083   :  { %v10089_v53 = vpop.eup %10088 }
0x2084   :  { %v7103_v51 = vmul.f32 %v10089_v53, %v7087_v50 }
0x2086   :  { %7104 = vst.msk [vmem:[#allocation27 + $0x1] sm:$0x1] %vm6985_vm4, %v7103_v51 }
0x2087   :  { %10412 = shalt.err (!%p10409_p4)
}
0x2088   :  { %s13206_s25 = sld [smem:[#allocation49_spill]] }
0x208e   :  { %s10413_s29 = scalar_lea.hbm %s13206_s25, 32 }
0x208f   :  { %p10414_p5 = scmp.ne.s32.totalorder %s13206_s25, %s10413_s29  ;;  %p10417_p6 = scmp.lt.u32.totalorder %s10413_s29, %s13206_s25 }
0x2091   :  { %p10419_p7 = pnand %p10417_p6, %p10414_p5 }
0x2093   :  { %10422 = shalt.err (!%p10419_p7)
}
0x2094   :  { %7114 = dma.vmem_to_hbm [thread:$0]  %s7112_s15, 32, %s13206_s25, [#allocation6]  }
0x2095   :  { %10439 = dma.done.wait [#allocation6], 32  }
0x2096   :  { %10440 = vsyncadd [#allocation6], 4294967264 }
0x2097   :  { %7118 = vsyncpa [#allocation5], 1 }
0x2098   :  { %7119 = vsyncpa [#allocation8], 1 }
0x2099   :  { %7120 = vsyncpa [#allocation11], 1 }
0x209a   :  { %7121 = vsyncpa [#allocation14], 1 }
0x209b   :  { %7122 = vsyncpa [#allocation17], 1 }
0x209c   :  { %7123 = vsyncpa [#allocation20], 1 }
0x209d   :  { %7124 = vsyncpa [#allocation23], 1 }
0x209e   :  { %7125 = vsyncpa [#allocation26], 1 }
0x209f   :  { %7126 = vsyncpa [#allocation6], 1 }

</bundles_post_ra>
